<compile_context>
chip_gen: v7x
topology: tpu7x:2x2x1
jax: 0.10.0
libtpu: 0.0.40
codegen_flags: <defaults>
</compile_context>

<pallas_src>
import math
from functools import partial

import jax
import jax.numpy as jnp
from jax.experimental import pallas as pl
from jax.experimental.pallas import tpu as pltpu

LEAKY_SLOPE = 0.1
BN_EPS = 1e-5


def _leaky(x):
    # slope < 1 => leaky_relu(x) == max(x, slope*x)
    return jnp.maximum(x, LEAKY_SLOPE * x)


# ------------------------- in-kernel building blocks -------------------------

def _edge_masks(R, L):
    """Per-row conv-padding masks, hoisted once per stage length L.

    Returns (m_not_first, m_not_last): f32 (R, 1) with 0.0 at sequence
    boundaries (pos==0 / pos==L-1), 1.0 elsewhere.
    """
    pos = jax.lax.broadcasted_iota(jnp.int32, (R, 1), 0) % L
    return (pos != 0).astype(jnp.float32), (pos != L - 1).astype(jnp.float32)


def _conv3_fused(x, w_ref, b_ref, m_not_first, m_not_last):
    """Conv1d(k=3, pad=1) + folded BN + LeakyReLU as ONE MXU matmul.

    x: (R, Cin) f32 flattened (cutout, position) rows.
    w_ref: (3*Cin, Cout) bf16 -- rows [0:Cin]=tap t-1, [Cin:2Cin]=t, [2Cin:]=t+1.
    b_ref: (1, Cout) f32.  Masks zero out the out-of-range tap at boundaries.
    """
    R = x.shape[0]
    xp = pltpu.roll(x, shift=1, axis=0) * m_not_first        # x[t-1]
    xn = pltpu.roll(x, shift=R - 1, axis=0) * m_not_last     # x[t+1]
    lhs = jnp.concatenate([xp, x, xn], axis=1).astype(jnp.bfloat16)  # (R, 3*Cin)
    y = jnp.dot(lhs, w_ref[...], preferred_element_type=jnp.float32) + b_ref[...]
    return _leaky(y)


def _maxpool2(y):
    """F.max_pool1d(kernel_size=2) on flattened rows (even L => pairs stay
    inside one cutout)."""
    R, C = y.shape
    return jnp.max(y.reshape(R // 2, 2, C), axis=1)


# ------------------------- fused kernels -------------------------

def backbone_u12_kernel(x_ref, xp_ref, xn_ref,
                        w0, b0, w1, b1, w2, b2, w3, b3, w4, b4, w5, b5,
                        o_ref):
    """conv_u1 (1->64->64->128) + pool + conv_u2 (128->128->128->256) + pool
    for a block of cutouts (all scans share this kernel via the grid)."""
    blk, n_pc = x_ref.shape
    # ---- layer 0 (Cin=1): VPU broadcast multiply in the lane-dense input
    # layout; the t-1 / t+1 taps were pre-shifted (zero-filled) in the wrapper.
    w = w0[...]                                               # (3, 64) f32
    y = (xp_ref[...][..., None] * w[0:1, :]
         + x_ref[...][..., None] * w[1:2, :]
         + xn_ref[...][..., None] * w[2:3, :]
         + b0[...])                                           # (blk, n_pc, 64)
    x = _leaky(y).reshape(blk * n_pc, w.shape[1])             # (R, 64) f32

    R, L = blk * n_pc, n_pc
    mf, ml = _edge_masks(R, L)
    x = _conv3_fused(x, w1, b1, mf, ml)                       # 64 -> 64
    x = _conv3_fused(x, w2, b2, mf, ml)                       # 64 -> 128
    x = _maxpool2(x)
    R, L = R // 2, L // 2
    # dropout (eval mode) = identity.
    mf, ml = _edge_masks(R, L)
    x = _conv3_fused(x, w3, b3, mf, ml)                       # 128 -> 128
    x = _conv3_fused(x, w4, b4, mf, ml)                       # 128 -> 128
    x = _conv3_fused(x, w5, b5, mf, ml)                       # 128 -> 256
    x = _maxpool2(x)                                          # (R//2, 256)
    o_ref[...] = x


def attention_kernel(sig_ref, mem0_ref, we_ref, be_ref, mask_ref,
                     mem_ref, sim_ref, *, alpha, n_bs, n_cutout):
    """One spatial-attention memory update per grid step (grid=(n_scan-1,)).

    The memory lives in the (constant-index) output block `mem_ref`, so it is
    VMEM-resident across all scans; only the final state is written to HBM.
    """
    @pl.when(pl.program_id(0) == 0)
    def _():
        mem_ref[...] = mem0_ref[...]          # first scan seeds the memory

    sig = sig_ref[...]                        # (N, CP) f32
    mem = mem_ref[...]                        # (N, CP) f32
    N, CP = sig.shape
    we = we_ref[...]
    be = be_ref[...]
    emb_x = _leaky(jnp.dot(sig.astype(jnp.bfloat16), we,
                           preferred_element_type=jnp.float32) + be)
    emb_t = _leaky(jnp.dot(mem.astype(jnp.bfloat16), we,
                           preferred_element_type=jnp.float32) + be)
    E = emb_x.shape[1]
    ex = emb_x.reshape(n_bs, n_cutout, E)
    et = emb_t.reshape(n_bs, n_cutout, E)
    # tiny batched matmuls -> leave in f32 (not MXU-bound)
    s = jnp.einsum("bqe,bke->bqk", ex, et, preferred_element_type=jnp.float32)
    mask = mask_ref[...][None, :, :]          # (1, nc, nc)
    # masked softmax in f32 (the *mask makes the -1e10 bias of the reference
    # redundant, result is identical)
    m = jnp.max(s, axis=-1, keepdims=True)
    e = jnp.exp(s - m) * mask
    sim = e / jnp.sum(e, axis=-1, keepdims=True)

    mem3 = mem.reshape(n_bs, n_cutout, CP)
    mem_w = jnp.einsum("bqk,bkd->bqd", sim, mem3,
                       preferred_element_type=jnp.float32)
    mem_ref[...] = alpha * sig + (1.0 - alpha) * mem_w.reshape(N, CP)
    sim_ref[...] = sim.reshape(n_bs * n_cutout, n_cutout)


def tail_kernel(x_ref, w0, b0, w1, b1, w2, b2, w3, b3, w4, b4, wh, bh,
                o_ref, *, L0):
    """conv_u3 (256->256->256->512) + pool + conv_u4 (512->256->128)
       + avg-pool over length + fused (lane-dense) cls/reg heads."""
    R = x_ref.shape[0]
    blk_n = R // L0
    x = x_ref[...]                                            # (blk_n*L0, 256)
    L = L0
    mf, ml = _edge_masks(R, L)
    x = _conv3_fused(x, w0, b0, mf, ml)                       # 256 -> 256
    x = _conv3_fused(x, w1, b1, mf, ml)                       # 256 -> 256
    x = _conv3_fused(x, w2, b2, mf, ml)                       # 256 -> 512
    x = _maxpool2(x)
    R, L = R // 2, L // 2
    mf, ml = _edge_masks(R, L)
    x = _conv3_fused(x, w3, b3, mf, ml)                       # 512 -> 256
    x = _conv3_fused(x, w4, b4, mf, ml)                       # 256 -> 128
    C = x.shape[1]
    xm = jnp.mean(x.reshape(blk_n, L, C), axis=1)             # avg_pool1d(kernel=L)
    y = jnp.dot(xm.astype(jnp.bfloat16), wh[...],
                preferred_element_type=jnp.float32) + bh[...]
    o_ref[...] = y                                            # (blk_n, 128) lane-dense


# ------------------------- pallas_call wrappers -------------------------

def _cparams(semantics):
    # 48 MiB: fits v7x's 64 MiB/TC; v5e/v6e have 128 MiB physical.
    return pltpu.CompilerParams(dimension_semantics=semantics,
                                vmem_limit_bytes=48 * 1024 * 1024)


def _const_specs(arrays):
    """Full-array blocks with constant index_maps -> resident across grid steps."""
    return [pl.BlockSpec(a.shape, (lambda i, _n=a.ndim: (0,) * _n)) for a in arrays]


def _choose_block(total, target):
    """Block size over cutouts: multiple of 8 (or full extent) + padded total."""
    if total <= target or total <= 8:
        return total, total
    blk = max(8, (min(target, total) // 8) * 8)
    padded = -(-total // blk) * blk
    return blk, padded


def backbone_u12(x, xp, xn, params, *, blk):
    T_pad, n_pc = x.shape
    Lq = n_pc // 4
    wb = []
    for w, b in params["u12"]:
        wb += [w, b]
    data_spec = pl.BlockSpec((blk, n_pc), lambda i: (i, 0))
    return pl.pallas_call(
        backbone_u12_kernel,
        out_shape=jax.ShapeDtypeStruct((T_pad * Lq, 256), jnp.float32),
        grid=(T_pad // blk,),
        in_specs=[data_spec, data_spec, data_spec] + _const_specs(wb),
        out_specs=pl.BlockSpec((blk * Lq, 256), lambda i: (i, 0)),
        compiler_params=_cparams(("parallel",)),
    )(x, xp, xn, *wb)


def attention_all(feats, params, mask, *, alpha, n_bs, n_cutout):
    n_scan, N, CP = feats.shape
    w_e, b_e = params["embed"]
    sigs, mem0 = feats[1:], feats[0]
    consts = [mem0, w_e, b_e, mask]
    new_mem, sim_flat = pl.pallas_call(
        partial(attention_kernel, alpha=alpha, n_bs=n_bs, n_cutout=n_cutout),
        out_shape=(jax.ShapeDtypeStruct((N, CP), jnp.float32),
                   jax.ShapeDtypeStruct((n_bs * n_cutout, n_cutout), jnp.float32)),
        grid=(n_scan - 1,),
        in_specs=[pl.BlockSpec((None, N, CP), lambda i: (i, 0, 0))]
                 + _const_specs(consts),
        out_specs=(pl.BlockSpec((N, CP), lambda i: (0, 0)),
                   pl.BlockSpec((n_bs * n_cutout, n_cutout), lambda i: (0, 0))),
        compiler_params=_cparams(("arbitrary",)),
    )(sigs, *consts)
    return new_mem, sim_flat


def tail_head(flow, params, *, L0, blk_n):
    N_pad = flow.shape[0] // L0
    wb = []
    for w, b in params["u34"]:
        wb += [w, b]
    wb += list(params["head"])
    return pl.pallas_call(
        partial(tail_kernel, L0=L0),
        out_shape=jax.ShapeDtypeStruct((N_pad, 128), jnp.float32),
        grid=(N_pad // blk_n,),
        in_specs=[pl.BlockSpec((blk_n * L0, 256), lambda i: (i, 0))]
                 + _const_specs(wb),
        out_specs=pl.BlockSpec((blk_n, 128), lambda i: (i, 0)),
        compiler_params=_cparams(("parallel",)),
    )(flow, *wb)


# ------------------------- parameters (deterministic) -------------------------

def make_conv_params(key, cin, cout, k):
    kw, kb = jax.random.split(key)
    fan_in = cin * k
    gain = math.sqrt(2.0 / (1.0 + LEAKY_SLOPE ** 2))    # kaiming_normal_, a=0.1
    std = gain / math.sqrt(fan_in)
    w = jax.random.normal(kw, (cout, cin, k), jnp.float32) * std
    bound = 1.0 / math.sqrt(fan_in)                      # torch conv default bias
    b = jax.random.uniform(kb, (cout,), jnp.float32, -bound, bound)
    return w, b


def build_params(key, num_pts, embed_len):
    keys = iter(jax.random.split(key, 16))
    bn_scale = 1.0 / math.sqrt(1.0 + BN_EPS)   # eval BN: gamma=1 beta=0 mean=0 var=1

    def conv3(cin, cout, first=False):
        w, b = make_conv_params(next(keys), cin, cout, 3)
        w = jnp.transpose(w * bn_scale, (2, 1, 0))       # (3, Cin, Cout)
        b = (b * bn_scale)[None, :]
        if first:                                        # Cin == 1: VPU path, f32
            return w[:, 0, :], b                         # (3, Cout)
        return w.reshape(3 * cin, cout).astype(jnp.bfloat16), b   # fused-tap layout

    u12 = [conv3(1, 64, first=True), conv3(64, 64), conv3(64, 128),
           conv3(128, 128), conv3(128, 128), conv3(128, 256)]
    u34 = [conv3(256, 256), conv3(256, 256), conv3(256, 512),
           conv3(512, 256), conv3(256, 128)]

    # heads: Conv1d(128->1,k=1) + Conv1d(128->2,k=1); fused + zero-padded to 128
    # output lanes so the head store is lane-dense (sliced back in the wrapper).
    w_cls, b_cls = make_conv_params(next(keys), 128, 1, 1)
    w_reg, b_reg = make_conv_params(next(keys), 128, 2, 1)
    w_head = jnp.concatenate([w_cls[:, :, 0], w_reg[:, :, 0]], axis=0).T   # (128, 3)
    w_head_pad = jnp.zeros((128, 128), jnp.float32).at[:, :3].set(w_head)
    b_head_pad = jnp.zeros((1, 128), jnp.float32).at[0, :3].set(
        jnp.concatenate([b_cls, b_reg]))

    # attention embedding: Conv1d(256, embed_len, kernel=n_att_pts) + BN + LReLU,
    # flattened in (t, c) order to match the (cutout, position, channel) layout.
    n_att_pts = int(math.ceil(num_pts / 4))
    w_e, b_e = make_conv_params(next(keys), 256, embed_len, n_att_pts)     # (E,256,T)
    w_e = jnp.transpose(w_e * bn_scale, (2, 1, 0)).reshape(n_att_pts * 256, embed_len)
    b_e = (b_e * bn_scale)[None, :]

    return {"u12": u12, "u34": u34,
            "head": (w_head_pad.astype(jnp.bfloat16), b_head_pad),
            "embed": (w_e.astype(jnp.bfloat16), b_e)}


# ------------------------- forward glue -------------------------

def neighbour_mask(n_cutout, win_size):
    # pano_scan=False / eval: column indices clamp to [0, n-1] => |i-j| <= half
    half = int(win_size / 2)
    idx = jnp.arange(n_cutout)
    return (jnp.abs(idx[:, None] - idx[None, :]) <= half).astype(jnp.float32)


@partial(jax.jit, static_argnames=("alpha", "win_size", "block_cutouts"))
def dr_spaam_forward(signal, params, *, alpha, win_size, block_cutouts=64):
    # signal: (n_bs, n_cutout, n_scan, n_pc)   (same as the PyTorch module)
    n_bs, n_cutout, n_scan, n_pc = signal.shape
    assert n_pc % 8 == 0, "n_pc must be divisible by 8 (three pool halvings)"
    N = n_bs * n_cutout
    Lq = n_pc // 4
    CP = Lq * 256
    T = n_scan * N

    # --- backbone for ALL scans in one pallas_call (grid over cutout tiles) ---
    sig_all = jnp.transpose(signal, (2, 0, 1, 3)).reshape(T, n_pc)
    blk, T_pad = _choose_block(T, block_cutouts)
    if T_pad != T:
        sig_all = jnp.pad(sig_all, ((0, T_pad - T), (0, 0)))
    # pre-shifted taps for the Cin=1 first layer (== conv padding=1)
    xp_all = jnp.pad(sig_all, ((0, 0), (1, 0)))[:, :-1]
    xn_all = jnp.pad(sig_all, ((0, 0), (0, 1)))[:, 1:]
    feats_rows = backbone_u12(sig_all, xp_all, xn_all, params, blk=blk)
    feats = feats_rows[: T * Lq].reshape(n_scan, N, CP)

    # --- attention memory recursion for all scans in one pallas_call ---
    if n_scan > 1:
        mask = neighbour_mask(n_cutout, win_size)
        mem, sim_flat = attention_all(feats, params, mask,
                                      alpha=alpha, n_bs=n_bs, n_cutout=n_cutout)
        sim = sim_flat.reshape(n_bs, n_cutout, n_cutout)
    else:
        mem, sim = feats[0], None

    # --- tail + heads, tiled over cutouts ---
    blk_t, N_pad = _choose_block(N, block_cutouts)
    mem_p = jnp.pad(mem, ((0, N_pad - N), (0, 0))) if N_pad != N else mem
    flow = mem_p.reshape(N_pad * Lq, 256)
    heads = tail_head(flow, params, L0=Lq, blk_n=blk_t)       # (N_pad, 128)
    heads = heads[:N, :3]
    pred_cls = heads[:, 0:1].reshape(n_bs, n_cutout, 1)
    pred_reg = heads[:, 1:3].reshape(n_bs, n_cutout, 2)
    return pred_cls, pred_reg, sim


# ------------------------- pure-JAX reference (correctness guard) ------------

def _ref_conv3(x, w_fused, b):
    # x: (B, L, Cin) f32; w_fused: (3*Cin, Cout); b: (1, Cout)
    cin = x.shape[-1]
    w = jnp.asarray(w_fused, jnp.float32).reshape(3, cin, -1)
    xp = jnp.pad(x, ((0, 0), (1, 0), (0, 0)))[:, :-1]
    xn = jnp.pad(x, ((0, 0), (0, 1), (0, 0)))[:, 1:]
    y = (jnp.einsum("blc,cd->bld", xp, w[0])
         + jnp.einsum("blc,cd->bld", x, w[1])
         + jnp.einsum("blc,cd->bld", xn, w[2])
         + jnp.asarray(b, jnp.float32))
    return _leaky(y)


def _ref_pool(x):
    B, L, C = x.shape
    return jnp.max(x.reshape(B, L // 2, 2, C), axis=2)


def _ref_forward(signal, params, *, alpha, win_size):
    n_bs, n_cutout, n_scan, n_pc = signal.shape
    N, Lq = n_bs * n_cutout, n_pc // 4
    CP = Lq * 256
    u12, u34 = params["u12"], params["u34"]
    w_head, b_head = params["head"]
    w_e, b_e = params["embed"]
    mask = neighbour_mask(n_cutout, win_size)

    def backbone(x2d):                         # (N, n_pc) -> (N, Lq, 256)
        h = x2d[..., None]
        for w, b in u12[:3]:
            h = _ref_conv3(h, w, b)
        h = _ref_pool(h)
        for w, b in u12[3:]:
            h = _ref_conv3(h, w, b)
        return _ref_pool(h)

    we = jnp.asarray(w_e, jnp.float32)
    mem, sim = None, None
    for i in range(n_scan):
        sig = backbone(signal[:, :, i, :].reshape(N, n_pc)).reshape(N, CP)
        if mem is None:
            mem = sig
            continue
        ex = _leaky(sig @ we + b_e).reshape(n_bs, n_cutout, -1)
        et = _leaky(mem @ we + b_e).reshape(n_bs, n_cutout, -1)
        s = jnp.einsum("bqe,bke->bqk", ex, et)
        e = jnp.exp(s - jnp.max(s, axis=-1, keepdims=True)) * mask[None]
        sim = e / jnp.sum(e, axis=-1, keepdims=True)
        mem_w = jnp.einsum("bqk,bkd->bqd", sim, mem.reshape(n_bs, n_cutout, CP))
        mem = alpha * sig + (1.0 - alpha) * mem_w.reshape(N, CP)

    h = mem.reshape(N, Lq, 256)
    for w, b in u34[:3]:
        h = _ref_conv3(h, w, b)
    h = _ref_pool(h)
    for w, b in u34[3:]:
        h = _ref_conv3(h, w, b)
    xm = jnp.mean(h, axis=1)                   # (N, 128)
    y = xm @ jnp.asarray(w_head, jnp.float32) + b_head
    pred_cls = y[:, 0:1].reshape(n_bs, n_cutout, 1)
    pred_reg = y[:, 1:3].reshape(n_bs, n_cutout, 2)
    return pred_cls, pred_reg, sim


# ------------------------- demo -------------------------

if __name__ == "__main__":
    key = jax.random.PRNGKey(0)
    n_bs, n_cutout, n_scan, n_pc = 2, 8, 3, 16     # small shapes; num_pts = n_pc
    embed_len, alpha, win_size = 32, 0.5, 7

    k_par, k_sig = jax.random.split(key)
    params = build_params(k_par, num_pts=n_pc, embed_len=embed_len)
    signal = jax.random.normal(k_sig, (n_bs, n_cutout, n_scan, n_pc), jnp.float32)

    # small block size so the demo actually exercises multi-step grids
    pred_cls, pred_reg, sim = dr_spaam_forward(signal, params, alpha=alpha,
                                               win_size=win_size, block_cutouts=8)
    jax.block_until_ready((pred_cls, pred_reg, sim))

    assert pred_cls.shape == (n_bs, n_cutout, 1)
    assert pred_reg.shape == (n_bs, n_cutout, 2)
    assert sim.shape == (n_bs, n_cutout, n_cutout)
    assert bool(jnp.all(jnp.isfinite(pred_cls))) and bool(jnp.all(jnp.isfinite(pred_reg)))
    assert bool(jnp.allclose(jnp.sum(sim, axis=-1), 1.0, atol=1e-5))

    # guard the fused-tap weight layout / tiling against a pure-JAX f32 reference
    ref_cls, ref_reg, ref_sim = _ref_forward(signal, params,
                                             alpha=alpha, win_size=win_size)
    err = lambda a, b: float(jnp.max(jnp.abs(a - b)))
    assert err(pred_cls, ref_cls) < 0.2, ("cls", err(pred_cls, ref_cls))
    assert err(pred_reg, ref_reg) < 0.2, ("reg", err(pred_reg, ref_reg))
    assert err(sim, ref_sim) < 0.2, ("sim", err(sim, ref_sim))
    print("KERNEL_OK")
</pallas_src>

<mosaic_0001>
module attributes {stable_mosaic.version = 11 : i64} {
  func.func @backbone_u12_kernel(%arg0: i32, %arg1: memref<8x16xf32, #tpu.memory_space<vmem>>, %arg2: memref<8x16xf32, #tpu.memory_space<vmem>>, %arg3: memref<8x16xf32, #tpu.memory_space<vmem>>, %arg4: memref<3x64xf32, #tpu.memory_space<vmem>>, %arg5: memref<1x64xf32, #tpu.memory_space<vmem>>, %arg6: memref<192x64xbf16, #tpu.memory_space<vmem>>, %arg7: memref<1x64xf32, #tpu.memory_space<vmem>>, %arg8: memref<192x128xbf16, #tpu.memory_space<vmem>>, %arg9: memref<1x128xf32, #tpu.memory_space<vmem>>, %arg10: memref<384x128xbf16, #tpu.memory_space<vmem>>, %arg11: memref<1x128xf32, #tpu.memory_space<vmem>>, %arg12: memref<384x128xbf16, #tpu.memory_space<vmem>>, %arg13: memref<1x128xf32, #tpu.memory_space<vmem>>, %arg14: memref<384x256xbf16, #tpu.memory_space<vmem>>, %arg15: memref<1x256xf32, #tpu.memory_space<vmem>>, %arg16: memref<32x256xf32, #tpu.memory_space<vmem>>) attributes {dimension_semantics = [#tpu.dimension_semantics<parallel>], iteration_bounds = array<i64: 6>, scalar_prefetch = 0 : i64, scratch_operands = 0 : i64, tpu.core_type = #tpu.core_type<tc>, window_params = [{transform_indices = @transform_0, window_bounds = array<i64: 8, 16>}, {transform_indices = @transform_1, window_bounds = array<i64: 8, 16>}, {transform_indices = @transform_2, window_bounds = array<i64: 8, 16>}, {pipeline_mode = #tpu.pipeline_mode<synchronous>, transform_indices = @transform_3, window_bounds = array<i64: 3, 64>}, {pipeline_mode = #tpu.pipeline_mode<synchronous>, transform_indices = @transform_4, window_bounds = array<i64: 1, 64>}, {pipeline_mode = #tpu.pipeline_mode<synchronous>, transform_indices = @transform_5, window_bounds = array<i64: 192, 64>}, {pipeline_mode = #tpu.pipeline_mode<synchronous>, transform_indices = @transform_6, window_bounds = array<i64: 1, 64>}, {pipeline_mode = #tpu.pipeline_mode<synchronous>, transform_indices = @transform_7, window_bounds = array<i64: 192, 128>}, {pipeline_mode = #tpu.pipeline_mode<synchronous>, transform_indices = @transform_8, window_bounds = array<i64: 1, 128>}, {pipeline_mode = #tpu.pipeline_mode<synchronous>, transform_indices = @transform_9, window_bounds = array<i64: 384, 128>}, {pipeline_mode = #tpu.pipeline_mode<synchronous>, transform_indices = @transform_10, window_bounds = array<i64: 1, 128>}, {pipeline_mode = #tpu.pipeline_mode<synchronous>, transform_indices = @transform_11, window_bounds = array<i64: 384, 128>}, {pipeline_mode = #tpu.pipeline_mode<synchronous>, transform_indices = @transform_12, window_bounds = array<i64: 1, 128>}, {pipeline_mode = #tpu.pipeline_mode<synchronous>, transform_indices = @transform_13, window_bounds = array<i64: 384, 256>}, {pipeline_mode = #tpu.pipeline_mode<synchronous>, transform_indices = @transform_14, window_bounds = array<i64: 1, 256>}, {transform_indices = @transform_15, window_bounds = array<i64: 32, 256>}]} {
    %c0 = arith.constant 0 : index
    %c0_0 = arith.constant 0 : index
    %0 = vector.load %arg4[%c0, %c0_0] : memref<3x64xf32, #tpu.memory_space<vmem>>, vector<3x64xf32>
    %c0_1 = arith.constant 0 : index
    %c0_2 = arith.constant 0 : index
    %1 = vector.load %arg2[%c0_1, %c0_2] : memref<8x16xf32, #tpu.memory_space<vmem>>, vector<8x16xf32>
    %2 = vector.shape_cast %1 : vector<8x16xf32> to vector<8x16x1xf32>
    %3 = vector.extract_strided_slice %0 {offsets = [0, 0], sizes = [1, 64], strides = [1, 1]} : vector<3x64xf32> to vector<1x64xf32>
    %4 = vector.shape_cast %3 : vector<1x64xf32> to vector<1x1x64xf32>
    %5 = vector.broadcast %2 : vector<8x16x1xf32> to vector<8x16x64xf32>
    %6 = vector.broadcast %4 : vector<1x1x64xf32> to vector<8x16x64xf32>
    %7 = arith.mulf %5, %6 : vector<8x16x64xf32>
    %c0_3 = arith.constant 0 : index
    %c0_4 = arith.constant 0 : index
    %8 = vector.load %arg1[%c0_3, %c0_4] : memref<8x16xf32, #tpu.memory_space<vmem>>, vector<8x16xf32>
    %9 = vector.shape_cast %8 : vector<8x16xf32> to vector<8x16x1xf32>
    %10 = vector.extract_strided_slice %0 {offsets = [1, 0], sizes = [1, 64], strides = [1, 1]} : vector<3x64xf32> to vector<1x64xf32>
    %11 = vector.shape_cast %10 : vector<1x64xf32> to vector<1x1x64xf32>
    %12 = vector.broadcast %9 : vector<8x16x1xf32> to vector<8x16x64xf32>
    %13 = vector.broadcast %11 : vector<1x1x64xf32> to vector<8x16x64xf32>
    %14 = arith.mulf %12, %13 : vector<8x16x64xf32>
    %15 = arith.addf %7, %14 : vector<8x16x64xf32>
    %c0_5 = arith.constant 0 : index
    %c0_6 = arith.constant 0 : index
    %16 = vector.load %arg3[%c0_5, %c0_6] : memref<8x16xf32, #tpu.memory_space<vmem>>, vector<8x16xf32>
    %17 = vector.shape_cast %16 : vector<8x16xf32> to vector<8x16x1xf32>
    %18 = vector.extract_strided_slice %0 {offsets = [2, 0], sizes = [1, 64], strides = [1, 1]} : vector<3x64xf32> to vector<1x64xf32>
    %19 = vector.shape_cast %18 : vector<1x64xf32> to vector<1x1x64xf32>
    %20 = vector.broadcast %17 : vector<8x16x1xf32> to vector<8x16x64xf32>
    %21 = vector.broadcast %19 : vector<1x1x64xf32> to vector<8x16x64xf32>
    %22 = arith.mulf %20, %21 : vector<8x16x64xf32>
    %23 = arith.addf %15, %22 : vector<8x16x64xf32>
    %c0_7 = arith.constant 0 : index
    %c0_8 = arith.constant 0 : index
    %24 = vector.load %arg5[%c0_7, %c0_8] : memref<1x64xf32, #tpu.memory_space<vmem>>, vector<1x64xf32>
    %25 = vector.shape_cast %24 : vector<1x64xf32> to vector<1x1x64xf32>
    %26 = vector.broadcast %25 : vector<1x1x64xf32> to vector<8x16x64xf32>
    %27 = arith.addf %23, %26 : vector<8x16x64xf32>
    %cst = arith.constant 1.000000e-01 : f32
    %28 = vector.broadcast %cst : f32 to vector<8x16x64xf32>
    %29 = arith.mulf %28, %27 : vector<8x16x64xf32>
    %30 = arith.maximumf %27, %29 : vector<8x16x64xf32>
    %31 = vector.shape_cast %30 : vector<8x16x64xf32> to vector<128x64xf32>
    %32 = tpu.iota {dimensions = array<i32: 0>} : vector<128x1xi32>
    %c16_i32 = arith.constant 16 : i32
    %c0_i32 = arith.constant 0 : i32
    %33 = arith.cmpi eq, %c16_i32, %c0_i32 : i32
    %c1_i32 = arith.constant 1 : i32
    %34 = arith.select %33, %c1_i32, %c16_i32 : i32
    %35 = vector.broadcast %34 : i32 to vector<128x1xi32>
    %36 = arith.remsi %32, %35 : vector<128x1xi32>
    %c0_i32_9 = arith.constant 0 : i32
    %37 = vector.broadcast %c0_i32_9 : i32 to vector<128x1xi32>
    %38 = arith.cmpi ne, %36, %37 : vector<128x1xi32>
    %c0_i32_10 = arith.constant 0 : i32
    %39 = vector.broadcast %c0_i32_10 : i32 to vector<128x1xi32>
    %40 = arith.cmpi slt, %36, %39 : vector<128x1xi32>
    %c0_i32_11 = arith.constant 0 : i32
    %41 = arith.cmpi slt, %34, %c0_i32_11 : i32
    %42 = vector.broadcast %41 : i1 to vector<128x1xi1>
    %43 = vector.broadcast %42 : vector<128x1xi1> to vector<128x1xi1>
    %44 = arith.xori %40, %43 : vector<128x1xi1>
    %45 = arith.andi %44, %38 : vector<128x1xi1>
    %46 = vector.broadcast %34 : i32 to vector<128x1xi32>
    %47 = arith.addi %36, %46 : vector<128x1xi32>
    %48 = arith.select %45, %47, %36 : vector<128x1xi1>, vector<128x1xi32>
    %c0_i32_12 = arith.constant 0 : i32
    %49 = vector.broadcast %c0_i32_12 : i32 to vector<128x1xi32>
    %50 = arith.cmpi ne, %48, %49 : vector<128x1xi32>
    %51 = arith.extui %50 : vector<128x1xi1> to vector<128x1xi32>
    %52 = arith.sitofp %51 : vector<128x1xi32> to vector<128x1xf32>
    %c15_i32 = arith.constant 15 : i32
    %53 = vector.broadcast %c15_i32 : i32 to vector<128x1xi32>
    %54 = arith.cmpi ne, %48, %53 : vector<128x1xi32>
    %55 = arith.extui %54 : vector<128x1xi1> to vector<128x1xi32>
    %56 = arith.sitofp %55 : vector<128x1xi32> to vector<128x1xf32>
    %c1_i32_13 = arith.constant 1 : i32
    %57 = tpu.dynamic_rotate %31 by %c1_i32_13 dim 0 : vector<128x64xf32>, i32 -> vector<128x64xf32>
    %58 = vector.broadcast %52 : vector<128x1xf32> to vector<128x64xf32>
    %59 = arith.mulf %57, %58 : vector<128x64xf32>
    %c127_i32 = arith.constant 127 : i32
    %60 = tpu.dynamic_rotate %31 by %c127_i32 dim 0 : vector<128x64xf32>, i32 -> vector<128x64xf32>
    %61 = vector.broadcast %56 : vector<128x1xf32> to vector<128x64xf32>
    %62 = arith.mulf %60, %61 : vector<128x64xf32>
    %63 = tpu.concatenate %59, %31, %62 in 1 : vector<128x64xf32>, vector<128x64xf32>, vector<128x64xf32> -> vector<128x192xf32>
    %64 = arith.truncf %63 : vector<128x192xf32> to vector<128x192xbf16>
    %c0_14 = arith.constant 0 : index
    %c0_15 = arith.constant 0 : index
    %65 = vector.load %arg6[%c0_14, %c0_15] : memref<192x64xbf16, #tpu.memory_space<vmem>>, vector<192x64xbf16>
    %cst_16 = arith.constant dense<0.000000e+00> : vector<128x64xf32>
    %66 = tpu.matmul %64, %65, %cst_16 {dimension_numbers = #tpu.dot_dimension_numbers<[1], [0], [0], [1], [0, 0, 1, 1], [], []>} : vector<128x192xbf16>, vector<192x64xbf16>, vector<128x64xf32> -> vector<128x64xf32>
    %c0_17 = arith.constant 0 : index
    %c0_18 = arith.constant 0 : index
    %67 = vector.load %arg7[%c0_17, %c0_18] : memref<1x64xf32, #tpu.memory_space<vmem>>, vector<1x64xf32>
    %68 = vector.broadcast %67 : vector<1x64xf32> to vector<128x64xf32>
    %69 = arith.addf %66, %68 : vector<128x64xf32>
    %cst_19 = arith.constant 1.000000e-01 : f32
    %70 = vector.broadcast %cst_19 : f32 to vector<128x64xf32>
    %71 = arith.mulf %70, %69 : vector<128x64xf32>
    %72 = arith.maximumf %69, %71 : vector<128x64xf32>
    %c1_i32_20 = arith.constant 1 : i32
    %73 = tpu.dynamic_rotate %72 by %c1_i32_20 dim 0 : vector<128x64xf32>, i32 -> vector<128x64xf32>
    %74 = vector.broadcast %52 : vector<128x1xf32> to vector<128x64xf32>
    %75 = arith.mulf %73, %74 : vector<128x64xf32>
    %c127_i32_21 = arith.constant 127 : i32
    %76 = tpu.dynamic_rotate %72 by %c127_i32_21 dim 0 : vector<128x64xf32>, i32 -> vector<128x64xf32>
    %77 = vector.broadcast %56 : vector<128x1xf32> to vector<128x64xf32>
    %78 = arith.mulf %76, %77 : vector<128x64xf32>
    %79 = tpu.concatenate %75, %72, %78 in 1 : vector<128x64xf32>, vector<128x64xf32>, vector<128x64xf32> -> vector<128x192xf32>
    %80 = arith.truncf %79 : vector<128x192xf32> to vector<128x192xbf16>
    %c0_22 = arith.constant 0 : index
    %c0_23 = arith.constant 0 : index
    %81 = vector.load %arg8[%c0_22, %c0_23] : memref<192x128xbf16, #tpu.memory_space<vmem>>, vector<192x128xbf16>
    %cst_24 = arith.constant dense<0.000000e+00> : vector<128x128xf32>
    %82 = tpu.matmul %80, %81, %cst_24 {dimension_numbers = #tpu.dot_dimension_numbers<[1], [0], [0], [1], [0, 0, 1, 1], [], []>} : vector<128x192xbf16>, vector<192x128xbf16>, vector<128x128xf32> -> vector<128x128xf32>
    %c0_25 = arith.constant 0 : index
    %c0_26 = arith.constant 0 : index
    %83 = vector.load %arg9[%c0_25, %c0_26] : memref<1x128xf32, #tpu.memory_space<vmem>>, vector<1x128xf32>
    %84 = vector.broadcast %83 : vector<1x128xf32> to vector<128x128xf32>
    %85 = arith.addf %82, %84 : vector<128x128xf32>
    %cst_27 = arith.constant 1.000000e-01 : f32
    %86 = vector.broadcast %cst_27 : f32 to vector<128x128xf32>
    %87 = arith.mulf %86, %85 : vector<128x128xf32>
    %88 = arith.maximumf %85, %87 : vector<128x128xf32>
    %89 = vector.shape_cast %88 : vector<128x128xf32> to vector<64x2x128xf32>
    %cst_28 = arith.constant dense<0xFF800000> : vector<64x128xf32>
    %90 = vector.multi_reduction <maximumf>, %89, %cst_28 [1] : vector<64x2x128xf32> to vector<64x128xf32>
    %91 = tpu.iota {dimensions = array<i32: 0>} : vector<64x1xi32>
    %c8_i32 = arith.constant 8 : i32
    %c0_i32_29 = arith.constant 0 : i32
    %92 = arith.cmpi eq, %c8_i32, %c0_i32_29 : i32
    %c1_i32_30 = arith.constant 1 : i32
    %93 = arith.select %92, %c1_i32_30, %c8_i32 : i32
    %94 = vector.broadcast %93 : i32 to vector<64x1xi32>
    %95 = arith.remsi %91, %94 : vector<64x1xi32>
    %c0_i32_31 = arith.constant 0 : i32
    %96 = vector.broadcast %c0_i32_31 : i32 to vector<64x1xi32>
    %97 = arith.cmpi ne, %95, %96 : vector<64x1xi32>
    %c0_i32_32 = arith.constant 0 : i32
    %98 = vector.broadcast %c0_i32_32 : i32 to vector<64x1xi32>
    %99 = arith.cmpi slt, %95, %98 : vector<64x1xi32>
    %c0_i32_33 = arith.constant 0 : i32
    %100 = arith.cmpi slt, %93, %c0_i32_33 : i32
    %101 = vector.broadcast %100 : i1 to vector<64x1xi1>
    %102 = vector.broadcast %101 : vector<64x1xi1> to vector<64x1xi1>
    %103 = arith.xori %99, %102 : vector<64x1xi1>
    %104 = arith.andi %103, %97 : vector<64x1xi1>
    %105 = vector.broadcast %93 : i32 to vector<64x1xi32>
    %106 = arith.addi %95, %105 : vector<64x1xi32>
    %107 = arith.select %104, %106, %95 : vector<64x1xi1>, vector<64x1xi32>
    %c0_i32_34 = arith.constant 0 : i32
    %108 = vector.broadcast %c0_i32_34 : i32 to vector<64x1xi32>
    %109 = arith.cmpi ne, %107, %108 : vector<64x1xi32>
    %110 = arith.extui %109 : vector<64x1xi1> to vector<64x1xi32>
    %111 = arith.sitofp %110 : vector<64x1xi32> to vector<64x1xf32>
    %c7_i32 = arith.constant 7 : i32
    %112 = vector.broadcast %c7_i32 : i32 to vector<64x1xi32>
    %113 = arith.cmpi ne, %107, %112 : vector<64x1xi32>
    %114 = arith.extui %113 : vector<64x1xi1> to vector<64x1xi32>
    %115 = arith.sitofp %114 : vector<64x1xi32> to vector<64x1xf32>
    %c1_i32_35 = arith.constant 1 : i32
    %116 = tpu.dynamic_rotate %90 by %c1_i32_35 dim 0 : vector<64x128xf32>, i32 -> vector<64x128xf32>
    %117 = vector.broadcast %111 : vector<64x1xf32> to vector<64x128xf32>
    %118 = arith.mulf %116, %117 : vector<64x128xf32>
    %c63_i32 = arith.constant 63 : i32
    %119 = tpu.dynamic_rotate %90 by %c63_i32 dim 0 : vector<64x128xf32>, i32 -> vector<64x128xf32>
    %120 = vector.broadcast %115 : vector<64x1xf32> to vector<64x128xf32>
    %121 = arith.mulf %119, %120 : vector<64x128xf32>
    %122 = tpu.concatenate %118, %90, %121 in 1 : vector<64x128xf32>, vector<64x128xf32>, vector<64x128xf32> -> vector<64x384xf32>
    %123 = arith.truncf %122 : vector<64x384xf32> to vector<64x384xbf16>
    %c0_36 = arith.constant 0 : index
    %c0_37 = arith.constant 0 : index
    %124 = vector.load %arg10[%c0_36, %c0_37] : memref<384x128xbf16, #tpu.memory_space<vmem>>, vector<384x128xbf16>
    %cst_38 = arith.constant dense<0.000000e+00> : vector<64x128xf32>
    %125 = tpu.matmul %123, %124, %cst_38 {dimension_numbers = #tpu.dot_dimension_numbers<[1], [0], [0], [1], [0, 0, 1, 1], [], []>} : vector<64x384xbf16>, vector<384x128xbf16>, vector<64x128xf32> -> vector<64x128xf32>
    %c0_39 = arith.constant 0 : index
    %c0_40 = arith.constant 0 : index
    %126 = vector.load %arg11[%c0_39, %c0_40] : memref<1x128xf32, #tpu.memory_space<vmem>>, vector<1x128xf32>
    %127 = vector.broadcast %126 : vector<1x128xf32> to vector<64x128xf32>
    %128 = arith.addf %125, %127 : vector<64x128xf32>
    %cst_41 = arith.constant 1.000000e-01 : f32
    %129 = vector.broadcast %cst_41 : f32 to vector<64x128xf32>
    %130 = arith.mulf %129, %128 : vector<64x128xf32>
    %131 = arith.maximumf %128, %130 : vector<64x128xf32>
    %c1_i32_42 = arith.constant 1 : i32
    %132 = tpu.dynamic_rotate %131 by %c1_i32_42 dim 0 : vector<64x128xf32>, i32 -> vector<64x128xf32>
    %133 = vector.broadcast %111 : vector<64x1xf32> to vector<64x128xf32>
    %134 = arith.mulf %132, %133 : vector<64x128xf32>
    %c63_i32_43 = arith.constant 63 : i32
    %135 = tpu.dynamic_rotate %131 by %c63_i32_43 dim 0 : vector<64x128xf32>, i32 -> vector<64x128xf32>
    %136 = vector.broadcast %115 : vector<64x1xf32> to vector<64x128xf32>
    %137 = arith.mulf %135, %136 : vector<64x128xf32>
    %138 = tpu.concatenate %134, %131, %137 in 1 : vector<64x128xf32>, vector<64x128xf32>, vector<64x128xf32> -> vector<64x384xf32>
    %139 = arith.truncf %138 : vector<64x384xf32> to vector<64x384xbf16>
    %c0_44 = arith.constant 0 : index
    %c0_45 = arith.constant 0 : index
    %140 = vector.load %arg12[%c0_44, %c0_45] : memref<384x128xbf16, #tpu.memory_space<vmem>>, vector<384x128xbf16>
    %cst_46 = arith.constant dense<0.000000e+00> : vector<64x128xf32>
    %141 = tpu.matmul %139, %140, %cst_46 {dimension_numbers = #tpu.dot_dimension_numbers<[1], [0], [0], [1], [0, 0, 1, 1], [], []>} : vector<64x384xbf16>, vector<384x128xbf16>, vector<64x128xf32> -> vector<64x128xf32>
    %c0_47 = arith.constant 0 : index
    %c0_48 = arith.constant 0 : index
    %142 = vector.load %arg13[%c0_47, %c0_48] : memref<1x128xf32, #tpu.memory_space<vmem>>, vector<1x128xf32>
    %143 = vector.broadcast %142 : vector<1x128xf32> to vector<64x128xf32>
    %144 = arith.addf %141, %143 : vector<64x128xf32>
    %cst_49 = arith.constant 1.000000e-01 : f32
    %145 = vector.broadcast %cst_49 : f32 to vector<64x128xf32>
    %146 = arith.mulf %145, %144 : vector<64x128xf32>
    %147 = arith.maximumf %144, %146 : vector<64x128xf32>
    %c1_i32_50 = arith.constant 1 : i32
    %148 = tpu.dynamic_rotate %147 by %c1_i32_50 dim 0 : vector<64x128xf32>, i32 -> vector<64x128xf32>
    %149 = vector.broadcast %111 : vector<64x1xf32> to vector<64x128xf32>
    %150 = arith.mulf %148, %149 : vector<64x128xf32>
    %c63_i32_51 = arith.constant 63 : i32
    %151 = tpu.dynamic_rotate %147 by %c63_i32_51 dim 0 : vector<64x128xf32>, i32 -> vector<64x128xf32>
    %152 = vector.broadcast %115 : vector<64x1xf32> to vector<64x128xf32>
    %153 = arith.mulf %151, %152 : vector<64x128xf32>
    %154 = tpu.concatenate %150, %147, %153 in 1 : vector<64x128xf32>, vector<64x128xf32>, vector<64x128xf32> -> vector<64x384xf32>
    %155 = arith.truncf %154 : vector<64x384xf32> to vector<64x384xbf16>
    %c0_52 = arith.constant 0 : index
    %c0_53 = arith.constant 0 : index
    %156 = vector.load %arg14[%c0_52, %c0_53] : memref<384x256xbf16, #tpu.memory_space<vmem>>, vector<384x256xbf16>
    %cst_54 = arith.constant dense<0.000000e+00> : vector<64x256xf32>
    %157 = tpu.matmul %155, %156, %cst_54 {dimension_numbers = #tpu.dot_dimension_numbers<[1], [0], [0], [1], [0, 0, 1, 1], [], []>} : vector<64x384xbf16>, vector<384x256xbf16>, vector<64x256xf32> -> vector<64x256xf32>
    %c0_55 = arith.constant 0 : index
    %c0_56 = arith.constant 0 : index
    %158 = vector.load %arg15[%c0_55, %c0_56] : memref<1x256xf32, #tpu.memory_space<vmem>>, vector<1x256xf32>
    %159 = vector.broadcast %158 : vector<1x256xf32> to vector<64x256xf32>
    %160 = arith.addf %157, %159 : vector<64x256xf32>
    %cst_57 = arith.constant 1.000000e-01 : f32
    %161 = vector.broadcast %cst_57 : f32 to vector<64x256xf32>
    %162 = arith.mulf %161, %160 : vector<64x256xf32>
    %163 = arith.maximumf %160, %162 : vector<64x256xf32>
    %164 = vector.shape_cast %163 : vector<64x256xf32> to vector<32x2x256xf32>
    %cst_58 = arith.constant dense<0xFF800000> : vector<32x256xf32>
    %165 = vector.multi_reduction <maximumf>, %164, %cst_58 [1] : vector<32x2x256xf32> to vector<32x256xf32>
    %c0_59 = arith.constant 0 : index
    %c0_60 = arith.constant 0 : index
    %166 = vector.load %arg16[%c0_59, %c0_60] : memref<32x256xf32, #tpu.memory_space<vmem>>, vector<32x256xf32>
    tpu.vector_store %arg16[%c0_59, %c0_60], %165 {strides = array<i32>} : memref<32x256xf32, #tpu.memory_space<vmem>>, vector<32x256xf32>,
    return
  }
  func.func @transform_0(%arg0: i32) -> (i32, i32) {
    %c0_i32 = arith.constant 0 : i32
    %c0_i32_0 = arith.constant 0 : i32
    return %arg0, %c0_i32 : i32, i32
  }
  func.func @transform_1(%arg0: i32) -> (i32, i32) {
    %c0_i32 = arith.constant 0 : i32
    %c0_i32_0 = arith.constant 0 : i32
    return %arg0, %c0_i32 : i32, i32
  }
  func.func @transform_2(%arg0: i32) -> (i32, i32) {
    %c0_i32 = arith.constant 0 : i32
    %c0_i32_0 = arith.constant 0 : i32
    return %arg0, %c0_i32 : i32, i32
  }
  func.func @transform_3(%arg0: i32) -> (i32, i32) {
    %c0_i32 = arith.constant 0 : i32
    %c0_i32_0 = arith.constant 0 : i32
    %c0_i32_1 = arith.constant 0 : i32
    return %c0_i32, %c0_i32_0 : i32, i32
  }
  func.func @transform_4(%arg0: i32) -> (i32, i32) {
    %c0_i32 = arith.constant 0 : i32
    %c0_i32_0 = arith.constant 0 : i32
    %c0_i32_1 = arith.constant 0 : i32
    return %c0_i32, %c0_i32_0 : i32, i32
  }
  func.func @transform_5(%arg0: i32) -> (i32, i32) {
    %c0_i32 = arith.constant 0 : i32
    %c0_i32_0 = arith.constant 0 : i32
    %c0_i32_1 = arith.constant 0 : i32
    return %c0_i32, %c0_i32_0 : i32, i32
  }
  func.func @transform_6(%arg0: i32) -> (i32, i32) {
    %c0_i32 = arith.constant 0 : i32
    %c0_i32_0 = arith.constant 0 : i32
    %c0_i32_1 = arith.constant 0 : i32
    return %c0_i32, %c0_i32_0 : i32, i32
  }
  func.func @transform_7(%arg0: i32) -> (i32, i32) {
    %c0_i32 = arith.constant 0 : i32
    %c0_i32_0 = arith.constant 0 : i32
    %c0_i32_1 = arith.constant 0 : i32
    return %c0_i32, %c0_i32_0 : i32, i32
  }
  func.func @transform_8(%arg0: i32) -> (i32, i32) {
    %c0_i32 = arith.constant 0 : i32
    %c0_i32_0 = arith.constant 0 : i32
    %c0_i32_1 = arith.constant 0 : i32
    return %c0_i32, %c0_i32_0 : i32, i32
  }
  func.func @transform_9(%arg0: i32) -> (i32, i32) {
    %c0_i32 = arith.constant 0 : i32
    %c0_i32_0 = arith.constant 0 : i32
    %c0_i32_1 = arith.constant 0 : i32
    return %c0_i32, %c0_i32_0 : i32, i32
  }
  func.func @transform_10(%arg0: i32) -> (i32, i32) {
    %c0_i32 = arith.constant 0 : i32
    %c0_i32_0 = arith.constant 0 : i32
    %c0_i32_1 = arith.constant 0 : i32
    return %c0_i32, %c0_i32_0 : i32, i32
  }
  func.func @transform_11(%arg0: i32) -> (i32, i32) {
    %c0_i32 = arith.constant 0 : i32
    %c0_i32_0 = arith.constant 0 : i32
    %c0_i32_1 = arith.constant 0 : i32
    return %c0_i32, %c0_i32_0 : i32, i32
  }
  func.func @transform_12(%arg0: i32) -> (i32, i32) {
    %c0_i32 = arith.constant 0 : i32
    %c0_i32_0 = arith.constant 0 : i32
    %c0_i32_1 = arith.constant 0 : i32
    return %c0_i32, %c0_i32_0 : i32, i32
  }
  func.func @transform_13(%arg0: i32) -> (i32, i32) {
    %c0_i32 = arith.constant 0 : i32
    %c0_i32_0 = arith.constant 0 : i32
    %c0_i32_1 = arith.constant 0 : i32
    return %c0_i32, %c0_i32_0 : i32, i32
  }
  func.func @transform_14(%arg0: i32) -> (i32, i32) {
    %c0_i32 = arith.constant 0 : i32
    %c0_i32_0 = arith.constant 0 : i32
    %c0_i32_1 = arith.constant 0 : i32
    return %c0_i32, %c0_i32_0 : i32, i32
  }
  func.func @transform_15(%arg0: i32) -> (i32, i32) {
    %c0_i32 = arith.constant 0 : i32
    %c0_i32_0 = arith.constant 0 : i32
    return %arg0, %c0_i32 : i32, i32
  }
}

module attributes {stable_mosaic.version = 11 : i64} {
  func.func @attention_kernel(%arg0: i32, %arg1: memref<1x16x1024xf32, #tpu.memory_space<vmem>>, %arg2: memref<16x1024xf32, #tpu.memory_space<vmem>>, %arg3: memref<1024x32xbf16, #tpu.memory_space<vmem>>, %arg4: memref<1x32xf32, #tpu.memory_space<vmem>>, %arg5: memref<8x8xf32, #tpu.memory_space<vmem>>, %arg6: memref<16x1024xf32, #tpu.memory_space<vmem>>, %arg7: memref<16x8xf32, #tpu.memory_space<vmem>>) attributes {dimension_semantics = [#tpu.dimension_semantics<arbitrary>], iteration_bounds = array<i64: 2>, scalar_prefetch = 0 : i64, scratch_operands = 0 : i64, tpu.core_type = #tpu.core_type<tc>, window_params = [{transform_indices = @transform_0, window_bounds = array<i64: 1, 16, 1024>}, {pipeline_mode = #tpu.pipeline_mode<synchronous>, transform_indices = @transform_1, window_bounds = array<i64: 16, 1024>}, {pipeline_mode = #tpu.pipeline_mode<synchronous>, transform_indices = @transform_2, window_bounds = array<i64: 1024, 32>}, {pipeline_mode = #tpu.pipeline_mode<synchronous>, transform_indices = @transform_3, window_bounds = array<i64: 1, 32>}, {pipeline_mode = #tpu.pipeline_mode<synchronous>, transform_indices = @transform_4, window_bounds = array<i64: 8, 8>}, {pipeline_mode = #tpu.pipeline_mode<synchronous>, transform_indices = @transform_5, window_bounds = array<i64: 16, 1024>}, {pipeline_mode = #tpu.pipeline_mode<synchronous>, transform_indices = @transform_6, window_bounds = array<i64: 16, 8>}]} {
    %c0_i32 = arith.constant 0 : i32
    %0 = arith.cmpi eq, %arg0, %c0_i32 : i32
    %1 = arith.extui %0 : i1 to i32
    %c0_i32_0 = arith.constant 0 : i32
    %2 = arith.cmpi ne, %1, %c0_i32_0 : i32
    scf.if %2 {
      %c0_24 = arith.constant 0 : index
      %c0_25 = arith.constant 0 : index
      %49 = vector.load %arg2[%c0_24, %c0_25] : memref<16x1024xf32, #tpu.memory_space<vmem>>, vector<16x1024xf32>
      %c0_26 = arith.constant 0 : index
      %c0_27 = arith.constant 0 : index
      %50 = vector.load %arg6[%c0_26, %c0_27] : memref<16x1024xf32, #tpu.memory_space<vmem>>, vector<16x1024xf32>
      tpu.vector_store %arg6[%c0_26, %c0_27], %49 {strides = array<i32>} : memref<16x1024xf32, #tpu.memory_space<vmem>>, vector<16x1024xf32>,
    } else {
    }
    %c0 = arith.constant 0 : index
    %c0_1 = arith.constant 0 : index
    %c0_2 = arith.constant 0 : index
    %3 = vector.load %arg1[%c0, %c0_1, %c0_2] : memref<1x16x1024xf32, #tpu.memory_space<vmem>>, vector<1x16x1024xf32>
    %4 = vector.shape_cast %3 : vector<1x16x1024xf32> to vector<16x1024xf32>
    %c0_3 = arith.constant 0 : index
    %c0_4 = arith.constant 0 : index
    %5 = vector.load %arg6[%c0_3, %c0_4] : memref<16x1024xf32, #tpu.memory_space<vmem>>, vector<16x1024xf32>
    %c0_5 = arith.constant 0 : index
    %c0_6 = arith.constant 0 : index
    %6 = vector.load %arg3[%c0_5, %c0_6] : memref<1024x32xbf16, #tpu.memory_space<vmem>>, vector<1024x32xbf16>
    %c0_7 = arith.constant 0 : index
    %c0_8 = arith.constant 0 : index
    %7 = vector.load %arg4[%c0_7, %c0_8] : memref<1x32xf32, #tpu.memory_space<vmem>>, vector<1x32xf32>
    %8 = arith.truncf %4 : vector<16x1024xf32> to vector<16x1024xbf16>
    %cst = arith.constant dense<0.000000e+00> : vector<16x32xf32>
    %9 = tpu.matmul %8, %6, %cst {dimension_numbers = #tpu.dot_dimension_numbers<[1], [0], [0], [1], [0, 0, 1, 1], [], []>} : vector<16x1024xbf16>, vector<1024x32xbf16>, vector<16x32xf32> -> vector<16x32xf32>
    %10 = vector.broadcast %7 : vector<1x32xf32> to vector<16x32xf32>
    %11 = arith.addf %9, %10 : vector<16x32xf32>
    %cst_9 = arith.constant 1.000000e-01 : f32
    %12 = vector.broadcast %cst_9 : f32 to vector<16x32xf32>
    %13 = arith.mulf %12, %11 : vector<16x32xf32>
    %14 = arith.maximumf %11, %13 : vector<16x32xf32>
    %15 = arith.truncf %5 : vector<16x1024xf32> to vector<16x1024xbf16>
    %cst_10 = arith.constant dense<0.000000e+00> : vector<16x32xf32>
    %16 = tpu.matmul %15, %6, %cst_10 {dimension_numbers = #tpu.dot_dimension_numbers<[1], [0], [0], [1], [0, 0, 1, 1], [], []>} : vector<16x1024xbf16>, vector<1024x32xbf16>, vector<16x32xf32> -> vector<16x32xf32>
    %17 = vector.broadcast %7 : vector<1x32xf32> to vector<16x32xf32>
    %18 = arith.addf %16, %17 : vector<16x32xf32>
    %cst_11 = arith.constant 1.000000e-01 : f32
    %19 = vector.broadcast %cst_11 : f32 to vector<16x32xf32>
    %20 = arith.mulf %19, %18 : vector<16x32xf32>
    %21 = arith.maximumf %18, %20 : vector<16x32xf32>
    %22 = vector.shape_cast %14 : vector<16x32xf32> to vector<2x8x32xf32>
    %23 = vector.shape_cast %21 : vector<16x32xf32> to vector<2x8x32xf32>
    "tpu.trace_start"() <{level = 10 : i32, message = "bqe,bke->bqk"}> : () -> ()
    %cst_12 = arith.constant dense<0.000000e+00> : vector<2x8x8xf32>
    %24 = tpu.matmul %22, %23, %cst_12 {dimension_numbers = #tpu.dot_dimension_numbers<[2], [2], [1], [1], [0, 0, 0, 1, 1, 1], [0], [0]>} : vector<2x8x32xf32>, vector<2x8x32xf32>, vector<2x8x8xf32> -> vector<2x8x8xf32>
    "tpu.trace_stop"() : () -> ()
    %c0_13 = arith.constant 0 : index
    %c0_14 = arith.constant 0 : index
    %25 = vector.load %arg5[%c0_13, %c0_14] : memref<8x8xf32, #tpu.memory_space<vmem>>, vector<8x8xf32>
    %26 = vector.shape_cast %25 : vector<8x8xf32> to vector<1x8x8xf32>
    %cst_15 = arith.constant dense<0xFF800000> : vector<2x8xf32>
    %27 = vector.multi_reduction <maximumf>, %24, %cst_15 [2] : vector<2x8x8xf32> to vector<2x8xf32>
    %28 = vector.shape_cast %27 : vector<2x8xf32> to vector<2x8x1xf32>
    %29 = vector.broadcast %28 : vector<2x8x1xf32> to vector<2x8x8xf32>
    %30 = arith.subf %24, %29 : vector<2x8x8xf32>
    %31 = math.exp %30 : vector<2x8x8xf32>
    %32 = vector.broadcast %26 : vector<1x8x8xf32> to vector<2x8x8xf32>
    %33 = arith.mulf %31, %32 : vector<2x8x8xf32>
    %cst_16 = arith.constant dense<0.000000e+00> : vector<2x8xf32>
    %34 = vector.multi_reduction <add>, %33, %cst_16 [2] : vector<2x8x8xf32> to vector<2x8xf32>
    %35 = vector.shape_cast %34 : vector<2x8xf32> to vector<2x8x1xf32>
    %36 = vector.broadcast %35 : vector<2x8x1xf32> to vector<2x8x8xf32>
    %37 = arith.divf %33, %36 : vector<2x8x8xf32>
    %38 = vector.shape_cast %5 : vector<16x1024xf32> to vector<2x8x1024xf32>
    "tpu.trace_start"() <{level = 10 : i32, message = "bqk,bkd->bqd"}> : () -> ()
    %cst_17 = arith.constant dense<0.000000e+00> : vector<2x8x1024xf32>
    %39 = tpu.matmul %37, %38, %cst_17 {dimension_numbers = #tpu.dot_dimension_numbers<[2], [1], [1], [2], [0, 0, 0, 1, 1, 2], [0], [0]>} : vector<2x8x8xf32>, vector<2x8x1024xf32>, vector<2x8x1024xf32> -> vector<2x8x1024xf32>
    "tpu.trace_stop"() : () -> ()
    %cst_18 = arith.constant 5.000000e-01 : f32
    %40 = vector.broadcast %cst_18 : f32 to vector<16x1024xf32>
    %41 = arith.mulf %40, %4 : vector<16x1024xf32>
    %42 = vector.shape_cast %39 : vector<2x8x1024xf32> to vector<16x1024xf32>
    %cst_19 = arith.constant 5.000000e-01 : f32
    %43 = vector.broadcast %cst_19 : f32 to vector<16x1024xf32>
    %44 = arith.mulf %43, %42 : vector<16x1024xf32>
    %45 = arith.addf %41, %44 : vector<16x1024xf32>
    %c0_20 = arith.constant 0 : index
    %c0_21 = arith.constant 0 : index
    %46 = vector.load %arg6[%c0_20, %c0_21] : memref<16x1024xf32, #tpu.memory_space<vmem>>, vector<16x1024xf32>
    tpu.vector_store %arg6[%c0_20, %c0_21], %45 {strides = array<i32>} : memref<16x1024xf32, #tpu.memory_space<vmem>>, vector<16x1024xf32>,
    %47 = vector.shape_cast %37 : vector<2x8x8xf32> to vector<16x8xf32>
    %c0_22 = arith.constant 0 : index
    %c0_23 = arith.constant 0 : index
    %48 = vector.load %arg7[%c0_22, %c0_23] : memref<16x8xf32, #tpu.memory_space<vmem>>, vector<16x8xf32>
    tpu.vector_store %arg7[%c0_22, %c0_23], %47 {strides = array<i32>} : memref<16x8xf32, #tpu.memory_space<vmem>>, vector<16x8xf32>,
    return
  }
  func.func @transform_0(%arg0: i32) -> (i32, i32, i32) {
    %c0_i32 = arith.constant 0 : i32
    %c0_i32_0 = arith.constant 0 : i32
    %c0_i32_1 = arith.constant 0 : i32
    return %arg0, %c0_i32, %c0_i32_0 : i32, i32, i32
  }
  func.func @transform_1(%arg0: i32) -> (i32, i32) {
    %c0_i32 = arith.constant 0 : i32
    %c0_i32_0 = arith.constant 0 : i32
    %c0_i32_1 = arith.constant 0 : i32
    return %c0_i32, %c0_i32_0 : i32, i32
  }
  func.func @transform_2(%arg0: i32) -> (i32, i32) {
    %c0_i32 = arith.constant 0 : i32
    %c0_i32_0 = arith.constant 0 : i32
    %c0_i32_1 = arith.constant 0 : i32
    return %c0_i32, %c0_i32_0 : i32, i32
  }
  func.func @transform_3(%arg0: i32) -> (i32, i32) {
    %c0_i32 = arith.constant 0 : i32
    %c0_i32_0 = arith.constant 0 : i32
    %c0_i32_1 = arith.constant 0 : i32
    return %c0_i32, %c0_i32_0 : i32, i32
  }
  func.func @transform_4(%arg0: i32) -> (i32, i32) {
    %c0_i32 = arith.constant 0 : i32
    %c0_i32_0 = arith.constant 0 : i32
    %c0_i32_1 = arith.constant 0 : i32
    return %c0_i32, %c0_i32_0 : i32, i32
  }
  func.func @transform_5(%arg0: i32) -> (i32, i32) {
    %c0_i32 = arith.constant 0 : i32
    %c0_i32_0 = arith.constant 0 : i32
    %c0_i32_1 = arith.constant 0 : i32
    return %c0_i32, %c0_i32_0 : i32, i32
  }
  func.func @transform_6(%arg0: i32) -> (i32, i32) {
    %c0_i32 = arith.constant 0 : i32
    %c0_i32_0 = arith.constant 0 : i32
    %c0_i32_1 = arith.constant 0 : i32
    return %c0_i32, %c0_i32_0 : i32, i32
  }
}

module attributes {stable_mosaic.version = 11 : i64} {
  func.func @tail_kernel(%arg0: i32, %arg1: memref<32x256xf32, #tpu.memory_space<vmem>>, %arg2: memref<768x256xbf16, #tpu.memory_space<vmem>>, %arg3: memref<1x256xf32, #tpu.memory_space<vmem>>, %arg4: memref<768x256xbf16, #tpu.memory_space<vmem>>, %arg5: memref<1x256xf32, #tpu.memory_space<vmem>>, %arg6: memref<768x512xbf16, #tpu.memory_space<vmem>>, %arg7: memref<1x512xf32, #tpu.memory_space<vmem>>, %arg8: memref<1536x256xbf16, #tpu.memory_space<vmem>>, %arg9: memref<1x256xf32, #tpu.memory_space<vmem>>, %arg10: memref<768x128xbf16, #tpu.memory_space<vmem>>, %arg11: memref<1x128xf32, #tpu.memory_space<vmem>>, %arg12: memref<128x128xbf16, #tpu.memory_space<vmem>>, %arg13: memref<1x128xf32, #tpu.memory_space<vmem>>, %arg14: memref<8x128xf32, #tpu.memory_space<vmem>>) attributes {dimension_semantics = [#tpu.dimension_semantics<parallel>], iteration_bounds = array<i64: 2>, scalar_prefetch = 0 : i64, scratch_operands = 0 : i64, tpu.core_type = #tpu.core_type<tc>, window_params = [{transform_indices = @transform_0, window_bounds = array<i64: 32, 256>}, {pipeline_mode = #tpu.pipeline_mode<synchronous>, transform_indices = @transform_1, window_bounds = array<i64: 768, 256>}, {pipeline_mode = #tpu.pipeline_mode<synchronous>, transform_indices = @transform_2, window_bounds = array<i64: 1, 256>}, {pipeline_mode = #tpu.pipeline_mode<synchronous>, transform_indices = @transform_3, window_bounds = array<i64: 768, 256>}, {pipeline_mode = #tpu.pipeline_mode<synchronous>, transform_indices = @transform_4, window_bounds = array<i64: 1, 256>}, {pipeline_mode = #tpu.pipeline_mode<synchronous>, transform_indices = @transform_5, window_bounds = array<i64: 768, 512>}, {pipeline_mode = #tpu.pipeline_mode<synchronous>, transform_indices = @transform_6, window_bounds = array<i64: 1, 512>}, {pipeline_mode = #tpu.pipeline_mode<synchronous>, transform_indices = @transform_7, window_bounds = array<i64: 1536, 256>}, {pipeline_mode = #tpu.pipeline_mode<synchronous>, transform_indices = @transform_8, window_bounds = array<i64: 1, 256>}, {pipeline_mode = #tpu.pipeline_mode<synchronous>, transform_indices = @transform_9, window_bounds = array<i64: 768, 128>}, {pipeline_mode = #tpu.pipeline_mode<synchronous>, transform_indices = @transform_10, window_bounds = array<i64: 1, 128>}, {pipeline_mode = #tpu.pipeline_mode<synchronous>, transform_indices = @transform_11, window_bounds = array<i64: 128, 128>}, {pipeline_mode = #tpu.pipeline_mode<synchronous>, transform_indices = @transform_12, window_bounds = array<i64: 1, 128>}, {transform_indices = @transform_13, window_bounds = array<i64: 8, 128>}]} {
    %c0 = arith.constant 0 : index
    %c0_0 = arith.constant 0 : index
    %0 = vector.load %arg1[%c0, %c0_0] : memref<32x256xf32, #tpu.memory_space<vmem>>, vector<32x256xf32>
    %1 = tpu.iota {dimensions = array<i32: 0>} : vector<32x1xi32>
    %c4_i32 = arith.constant 4 : i32
    %c0_i32 = arith.constant 0 : i32
    %2 = arith.cmpi eq, %c4_i32, %c0_i32 : i32
    %c1_i32 = arith.constant 1 : i32
    %3 = arith.select %2, %c1_i32, %c4_i32 : i32
    %4 = vector.broadcast %3 : i32 to vector<32x1xi32>
    %5 = arith.remsi %1, %4 : vector<32x1xi32>
    %c0_i32_1 = arith.constant 0 : i32
    %6 = vector.broadcast %c0_i32_1 : i32 to vector<32x1xi32>
    %7 = arith.cmpi ne, %5, %6 : vector<32x1xi32>
    %c0_i32_2 = arith.constant 0 : i32
    %8 = vector.broadcast %c0_i32_2 : i32 to vector<32x1xi32>
    %9 = arith.cmpi slt, %5, %8 : vector<32x1xi32>
    %c0_i32_3 = arith.constant 0 : i32
    %10 = arith.cmpi slt, %3, %c0_i32_3 : i32
    %11 = vector.broadcast %10 : i1 to vector<32x1xi1>
    %12 = vector.broadcast %11 : vector<32x1xi1> to vector<32x1xi1>
    %13 = arith.xori %9, %12 : vector<32x1xi1>
    %14 = arith.andi %13, %7 : vector<32x1xi1>
    %15 = vector.broadcast %3 : i32 to vector<32x1xi32>
    %16 = arith.addi %5, %15 : vector<32x1xi32>
    %17 = arith.select %14, %16, %5 : vector<32x1xi1>, vector<32x1xi32>
    %c0_i32_4 = arith.constant 0 : i32
    %18 = vector.broadcast %c0_i32_4 : i32 to vector<32x1xi32>
    %19 = arith.cmpi ne, %17, %18 : vector<32x1xi32>
    %20 = arith.extui %19 : vector<32x1xi1> to vector<32x1xi32>
    %21 = arith.sitofp %20 : vector<32x1xi32> to vector<32x1xf32>
    %c3_i32 = arith.constant 3 : i32
    %22 = vector.broadcast %c3_i32 : i32 to vector<32x1xi32>
    %23 = arith.cmpi ne, %17, %22 : vector<32x1xi32>
    %24 = arith.extui %23 : vector<32x1xi1> to vector<32x1xi32>
    %25 = arith.sitofp %24 : vector<32x1xi32> to vector<32x1xf32>
    %c1_i32_5 = arith.constant 1 : i32
    %26 = tpu.dynamic_rotate %0 by %c1_i32_5 dim 0 : vector<32x256xf32>, i32 -> vector<32x256xf32>
    %27 = vector.broadcast %21 : vector<32x1xf32> to vector<32x256xf32>
    %28 = arith.mulf %26, %27 : vector<32x256xf32>
    %c31_i32 = arith.constant 31 : i32
    %29 = tpu.dynamic_rotate %0 by %c31_i32 dim 0 : vector<32x256xf32>, i32 -> vector<32x256xf32>
    %30 = vector.broadcast %25 : vector<32x1xf32> to vector<32x256xf32>
    %31 = arith.mulf %29, %30 : vector<32x256xf32>
    %32 = tpu.concatenate %28, %0, %31 in 1 : vector<32x256xf32>, vector<32x256xf32>, vector<32x256xf32> -> vector<32x768xf32>
    %33 = arith.truncf %32 : vector<32x768xf32> to vector<32x768xbf16>
    %c0_6 = arith.constant 0 : index
    %c0_7 = arith.constant 0 : index
    %34 = vector.load %arg2[%c0_6, %c0_7] : memref<768x256xbf16, #tpu.memory_space<vmem>>, vector<768x256xbf16>
    %cst = arith.constant dense<0.000000e+00> : vector<32x256xf32>
    %35 = tpu.matmul %33, %34, %cst {dimension_numbers = #tpu.dot_dimension_numbers<[1], [0], [0], [1], [0, 0, 1, 1], [], []>} : vector<32x768xbf16>, vector<768x256xbf16>, vector<32x256xf32> -> vector<32x256xf32>
    %c0_8 = arith.constant 0 : index
    %c0_9 = arith.constant 0 : index
    %36 = vector.load %arg3[%c0_8, %c0_9] : memref<1x256xf32, #tpu.memory_space<vmem>>, vector<1x256xf32>
    %37 = vector.broadcast %36 : vector<1x256xf32> to vector<32x256xf32>
    %38 = arith.addf %35, %37 : vector<32x256xf32>
    %cst_10 = arith.constant 1.000000e-01 : f32
    %39 = vector.broadcast %cst_10 : f32 to vector<32x256xf32>
    %40 = arith.mulf %39, %38 : vector<32x256xf32>
    %41 = arith.maximumf %38, %40 : vector<32x256xf32>
    %c1_i32_11 = arith.constant 1 : i32
    %42 = tpu.dynamic_rotate %41 by %c1_i32_11 dim 0 : vector<32x256xf32>, i32 -> vector<32x256xf32>
    %43 = vector.broadcast %21 : vector<32x1xf32> to vector<32x256xf32>
    %44 = arith.mulf %42, %43 : vector<32x256xf32>
    %c31_i32_12 = arith.constant 31 : i32
    %45 = tpu.dynamic_rotate %41 by %c31_i32_12 dim 0 : vector<32x256xf32>, i32 -> vector<32x256xf32>
    %46 = vector.broadcast %25 : vector<32x1xf32> to vector<32x256xf32>
    %47 = arith.mulf %45, %46 : vector<32x256xf32>
    %48 = tpu.concatenate %44, %41, %47 in 1 : vector<32x256xf32>, vector<32x256xf32>, vector<32x256xf32> -> vector<32x768xf32>
    %49 = arith.truncf %48 : vector<32x768xf32> to vector<32x768xbf16>
    %c0_13 = arith.constant 0 : index
    %c0_14 = arith.constant 0 : index
    %50 = vector.load %arg4[%c0_13, %c0_14] : memref<768x256xbf16, #tpu.memory_space<vmem>>, vector<768x256xbf16>
    %cst_15 = arith.constant dense<0.000000e+00> : vector<32x256xf32>
    %51 = tpu.matmul %49, %50, %cst_15 {dimension_numbers = #tpu.dot_dimension_numbers<[1], [0], [0], [1], [0, 0, 1, 1], [], []>} : vector<32x768xbf16>, vector<768x256xbf16>, vector<32x256xf32> -> vector<32x256xf32>
    %c0_16 = arith.constant 0 : index
    %c0_17 = arith.constant 0 : index
    %52 = vector.load %arg5[%c0_16, %c0_17] : memref<1x256xf32, #tpu.memory_space<vmem>>, vector<1x256xf32>
    %53 = vector.broadcast %52 : vector<1x256xf32> to vector<32x256xf32>
    %54 = arith.addf %51, %53 : vector<32x256xf32>
    %cst_18 = arith.constant 1.000000e-01 : f32
    %55 = vector.broadcast %cst_18 : f32 to vector<32x256xf32>
    %56 = arith.mulf %55, %54 : vector<32x256xf32>
    %57 = arith.maximumf %54, %56 : vector<32x256xf32>
    %c1_i32_19 = arith.constant 1 : i32
    %58 = tpu.dynamic_rotate %57 by %c1_i32_19 dim 0 : vector<32x256xf32>, i32 -> vector<32x256xf32>
    %59 = vector.broadcast %21 : vector<32x1xf32> to vector<32x256xf32>
    %60 = arith.mulf %58, %59 : vector<32x256xf32>
    %c31_i32_20 = arith.constant 31 : i32
    %61 = tpu.dynamic_rotate %57 by %c31_i32_20 dim 0 : vector<32x256xf32>, i32 -> vector<32x256xf32>
    %62 = vector.broadcast %25 : vector<32x1xf32> to vector<32x256xf32>
    %63 = arith.mulf %61, %62 : vector<32x256xf32>
    %64 = tpu.concatenate %60, %57, %63 in 1 : vector<32x256xf32>, vector<32x256xf32>, vector<32x256xf32> -> vector<32x768xf32>
    %65 = arith.truncf %64 : vector<32x768xf32> to vector<32x768xbf16>
    %c0_21 = arith.constant 0 : index
    %c0_22 = arith.constant 0 : index
    %66 = vector.load %arg6[%c0_21, %c0_22] : memref<768x512xbf16, #tpu.memory_space<vmem>>, vector<768x512xbf16>
    %cst_23 = arith.constant dense<0.000000e+00> : vector<32x512xf32>
    %67 = tpu.matmul %65, %66, %cst_23 {dimension_numbers = #tpu.dot_dimension_numbers<[1], [0], [0], [1], [0, 0, 1, 1], [], []>} : vector<32x768xbf16>, vector<768x512xbf16>, vector<32x512xf32> -> vector<32x512xf32>
    %c0_24 = arith.constant 0 : index
    %c0_25 = arith.constant 0 : index
    %68 = vector.load %arg7[%c0_24, %c0_25] : memref<1x512xf32, #tpu.memory_space<vmem>>, vector<1x512xf32>
    %69 = vector.broadcast %68 : vector<1x512xf32> to vector<32x512xf32>
    %70 = arith.addf %67, %69 : vector<32x512xf32>
    %cst_26 = arith.constant 1.000000e-01 : f32
    %71 = vector.broadcast %cst_26 : f32 to vector<32x512xf32>
    %72 = arith.mulf %71, %70 : vector<32x512xf32>
    %73 = arith.maximumf %70, %72 : vector<32x512xf32>
    %74 = vector.shape_cast %73 : vector<32x512xf32> to vector<16x2x512xf32>
    %cst_27 = arith.constant dense<0xFF800000> : vector<16x512xf32>
    %75 = vector.multi_reduction <maximumf>, %74, %cst_27 [1] : vector<16x2x512xf32> to vector<16x512xf32>
    %76 = tpu.iota {dimensions = array<i32: 0>} : vector<16x1xi32>
    %c2_i32 = arith.constant 2 : i32
    %c0_i32_28 = arith.constant 0 : i32
    %77 = arith.cmpi eq, %c2_i32, %c0_i32_28 : i32
    %c1_i32_29 = arith.constant 1 : i32
    %78 = arith.select %77, %c1_i32_29, %c2_i32 : i32
    %79 = vector.broadcast %78 : i32 to vector<16x1xi32>
    %80 = arith.remsi %76, %79 : vector<16x1xi32>
    %c0_i32_30 = arith.constant 0 : i32
    %81 = vector.broadcast %c0_i32_30 : i32 to vector<16x1xi32>
    %82 = arith.cmpi ne, %80, %81 : vector<16x1xi32>
    %c0_i32_31 = arith.constant 0 : i32
    %83 = vector.broadcast %c0_i32_31 : i32 to vector<16x1xi32>
    %84 = arith.cmpi slt, %80, %83 : vector<16x1xi32>
    %c0_i32_32 = arith.constant 0 : i32
    %85 = arith.cmpi slt, %78, %c0_i32_32 : i32
    %86 = vector.broadcast %85 : i1 to vector<16x1xi1>
    %87 = vector.broadcast %86 : vector<16x1xi1> to vector<16x1xi1>
    %88 = arith.xori %84, %87 : vector<16x1xi1>
    %89 = arith.andi %88, %82 : vector<16x1xi1>
    %90 = vector.broadcast %78 : i32 to vector<16x1xi32>
    %91 = arith.addi %80, %90 : vector<16x1xi32>
    %92 = arith.select %89, %91, %80 : vector<16x1xi1>, vector<16x1xi32>
    %c0_i32_33 = arith.constant 0 : i32
    %93 = vector.broadcast %c0_i32_33 : i32 to vector<16x1xi32>
    %94 = arith.cmpi ne, %92, %93 : vector<16x1xi32>
    %95 = arith.extui %94 : vector<16x1xi1> to vector<16x1xi32>
    %96 = arith.sitofp %95 : vector<16x1xi32> to vector<16x1xf32>
    %c1_i32_34 = arith.constant 1 : i32
    %97 = vector.broadcast %c1_i32_34 : i32 to vector<16x1xi32>
    %98 = arith.cmpi ne, %92, %97 : vector<16x1xi32>
    %99 = arith.extui %98 : vector<16x1xi1> to vector<16x1xi32>
    %100 = arith.sitofp %99 : vector<16x1xi32> to vector<16x1xf32>
    %c1_i32_35 = arith.constant 1 : i32
    %101 = tpu.dynamic_rotate %75 by %c1_i32_35 dim 0 : vector<16x512xf32>, i32 -> vector<16x512xf32>
    %102 = vector.broadcast %96 : vector<16x1xf32> to vector<16x512xf32>
    %103 = arith.mulf %101, %102 : vector<16x512xf32>
    %c15_i32 = arith.constant 15 : i32
    %104 = tpu.dynamic_rotate %75 by %c15_i32 dim 0 : vector<16x512xf32>, i32 -> vector<16x512xf32>
    %105 = vector.broadcast %100 : vector<16x1xf32> to vector<16x512xf32>
    %106 = arith.mulf %104, %105 : vector<16x512xf32>
    %107 = tpu.concatenate %103, %75, %106 in 1 : vector<16x512xf32>, vector<16x512xf32>, vector<16x512xf32> -> vector<16x1536xf32>
    %108 = arith.truncf %107 : vector<16x1536xf32> to vector<16x1536xbf16>
    %c0_36 = arith.constant 0 : index
    %c0_37 = arith.constant 0 : index
    %109 = vector.load %arg8[%c0_36, %c0_37] : memref<1536x256xbf16, #tpu.memory_space<vmem>>, vector<1536x256xbf16>
    %cst_38 = arith.constant dense<0.000000e+00> : vector<16x256xf32>
    %110 = tpu.matmul %108, %109, %cst_38 {dimension_numbers = #tpu.dot_dimension_numbers<[1], [0], [0], [1], [0, 0, 1, 1], [], []>} : vector<16x1536xbf16>, vector<1536x256xbf16>, vector<16x256xf32> -> vector<16x256xf32>
    %c0_39 = arith.constant 0 : index
    %c0_40 = arith.constant 0 : index
    %111 = vector.load %arg9[%c0_39, %c0_40] : memref<1x256xf32, #tpu.memory_space<vmem>>, vector<1x256xf32>
    %112 = vector.broadcast %111 : vector<1x256xf32> to vector<16x256xf32>
    %113 = arith.addf %110, %112 : vector<16x256xf32>
    %cst_41 = arith.constant 1.000000e-01 : f32
    %114 = vector.broadcast %cst_41 : f32 to vector<16x256xf32>
    %115 = arith.mulf %114, %113 : vector<16x256xf32>
    %116 = arith.maximumf %113, %115 : vector<16x256xf32>
    %c1_i32_42 = arith.constant 1 : i32
    %117 = tpu.dynamic_rotate %116 by %c1_i32_42 dim 0 : vector<16x256xf32>, i32 -> vector<16x256xf32>
    %118 = vector.broadcast %96 : vector<16x1xf32> to vector<16x256xf32>
    %119 = arith.mulf %117, %118 : vector<16x256xf32>
    %c15_i32_43 = arith.constant 15 : i32
    %120 = tpu.dynamic_rotate %116 by %c15_i32_43 dim 0 : vector<16x256xf32>, i32 -> vector<16x256xf32>
    %121 = vector.broadcast %100 : vector<16x1xf32> to vector<16x256xf32>
    %122 = arith.mulf %120, %121 : vector<16x256xf32>
    %123 = tpu.concatenate %119, %116, %122 in 1 : vector<16x256xf32>, vector<16x256xf32>, vector<16x256xf32> -> vector<16x768xf32>
    %124 = arith.truncf %123 : vector<16x768xf32> to vector<16x768xbf16>
    %c0_44 = arith.constant 0 : index
    %c0_45 = arith.constant 0 : index
    %125 = vector.load %arg10[%c0_44, %c0_45] : memref<768x128xbf16, #tpu.memory_space<vmem>>, vector<768x128xbf16>
    %cst_46 = arith.constant dense<0.000000e+00> : vector<16x128xf32>
    %126 = tpu.matmul %124, %125, %cst_46 {dimension_numbers = #tpu.dot_dimension_numbers<[1], [0], [0], [1], [0, 0, 1, 1], [], []>} : vector<16x768xbf16>, vector<768x128xbf16>, vector<16x128xf32> -> vector<16x128xf32>
    %c0_47 = arith.constant 0 : index
    %c0_48 = arith.constant 0 : index
    %127 = vector.load %arg11[%c0_47, %c0_48] : memref<1x128xf32, #tpu.memory_space<vmem>>, vector<1x128xf32>
    %128 = vector.broadcast %127 : vector<1x128xf32> to vector<16x128xf32>
    %129 = arith.addf %126, %128 : vector<16x128xf32>
    %cst_49 = arith.constant 1.000000e-01 : f32
    %130 = vector.broadcast %cst_49 : f32 to vector<16x128xf32>
    %131 = arith.mulf %130, %129 : vector<16x128xf32>
    %132 = arith.maximumf %129, %131 : vector<16x128xf32>
    %133 = vector.shape_cast %132 : vector<16x128xf32> to vector<8x2x128xf32>
    %cst_50 = arith.constant dense<0.000000e+00> : vector<8x128xf32>
    %134 = vector.multi_reduction <add>, %133, %cst_50 [1] : vector<8x2x128xf32> to vector<8x128xf32>
    %cst_51 = arith.constant 2.000000e+00 : f32
    %135 = vector.broadcast %cst_51 : f32 to vector<8x128xf32>
    %136 = arith.divf %134, %135 : vector<8x128xf32>
    %137 = arith.truncf %136 : vector<8x128xf32> to vector<8x128xbf16>
    %c0_52 = arith.constant 0 : index
    %c0_53 = arith.constant 0 : index
    %138 = vector.load %arg12[%c0_52, %c0_53] : memref<128x128xbf16, #tpu.memory_space<vmem>>, vector<128x128xbf16>
    %cst_54 = arith.constant dense<0.000000e+00> : vector<8x128xf32>
    %139 = tpu.matmul %137, %138, %cst_54 {dimension_numbers = #tpu.dot_dimension_numbers<[1], [0], [0], [1], [0, 0, 1, 1], [], []>} : vector<8x128xbf16>, vector<128x128xbf16>, vector<8x128xf32> -> vector<8x128xf32>
    %c0_55 = arith.constant 0 : index
    %c0_56 = arith.constant 0 : index
    %140 = vector.load %arg13[%c0_55, %c0_56] : memref<1x128xf32, #tpu.memory_space<vmem>>, vector<1x128xf32>
    %141 = vector.broadcast %140 : vector<1x128xf32> to vector<8x128xf32>
    %142 = arith.addf %139, %141 : vector<8x128xf32>
    %c0_57 = arith.constant 0 : index
    %c0_58 = arith.constant 0 : index
    %143 = vector.load %arg14[%c0_57, %c0_58] : memref<8x128xf32, #tpu.memory_space<vmem>>, vector<8x128xf32>
    tpu.vector_store %arg14[%c0_57, %c0_58], %142 {strides = array<i32>} : memref<8x128xf32, #tpu.memory_space<vmem>>, vector<8x128xf32>,
    return
  }
  func.func @transform_0(%arg0: i32) -> (i32, i32) {
    %c0_i32 = arith.constant 0 : i32
    %c0_i32_0 = arith.constant 0 : i32
    return %arg0, %c0_i32 : i32, i32
  }
  func.func @transform_1(%arg0: i32) -> (i32, i32) {
    %c0_i32 = arith.constant 0 : i32
    %c0_i32_0 = arith.constant 0 : i32
    %c0_i32_1 = arith.constant 0 : i32
    return %c0_i32, %c0_i32_0 : i32, i32
  }
  func.func @transform_2(%arg0: i32) -> (i32, i32) {
    %c0_i32 = arith.constant 0 : i32
    %c0_i32_0 = arith.constant 0 : i32
    %c0_i32_1 = arith.constant 0 : i32
    return %c0_i32, %c0_i32_0 : i32, i32
  }
  func.func @transform_3(%arg0: i32) -> (i32, i32) {
    %c0_i32 = arith.constant 0 : i32
    %c0_i32_0 = arith.constant 0 : i32
    %c0_i32_1 = arith.constant 0 : i32
    return %c0_i32, %c0_i32_0 : i32, i32
  }
  func.func @transform_4(%arg0: i32) -> (i32, i32) {
    %c0_i32 = arith.constant 0 : i32
    %c0_i32_0 = arith.constant 0 : i32
    %c0_i32_1 = arith.constant 0 : i32
    return %c0_i32, %c0_i32_0 : i32, i32
  }
  func.func @transform_5(%arg0: i32) -> (i32, i32) {
    %c0_i32 = arith.constant 0 : i32
    %c0_i32_0 = arith.constant 0 : i32
    %c0_i32_1 = arith.constant 0 : i32
    return %c0_i32, %c0_i32_0 : i32, i32
  }
  func.func @transform_6(%arg0: i32) -> (i32, i32) {
    %c0_i32 = arith.constant 0 : i32
    %c0_i32_0 = arith.constant 0 : i32
    %c0_i32_1 = arith.constant 0 : i32
    return %c0_i32, %c0_i32_0 : i32, i32
  }
  func.func @transform_7(%arg0: i32) -> (i32, i32) {
    %c0_i32 = arith.constant 0 : i32
    %c0_i32_0 = arith.constant 0 : i32
    %c0_i32_1 = arith.constant 0 : i32
    return %c0_i32, %c0_i32_0 : i32, i32
  }
  func.func @transform_8(%arg0: i32) -> (i32, i32) {
    %c0_i32 = arith.constant 0 : i32
    %c0_i32_0 = arith.constant 0 : i32
    %c0_i32_1 = arith.constant 0 : i32
    return %c0_i32, %c0_i32_0 : i32, i32
  }
  func.func @transform_9(%arg0: i32) -> (i32, i32) {
    %c0_i32 = arith.constant 0 : i32
    %c0_i32_0 = arith.constant 0 : i32
    %c0_i32_1 = arith.constant 0 : i32
    return %c0_i32, %c0_i32_0 : i32, i32
  }
  func.func @transform_10(%arg0: i32) -> (i32, i32) {
    %c0_i32 = arith.constant 0 : i32
    %c0_i32_0 = arith.constant 0 : i32
    %c0_i32_1 = arith.constant 0 : i32
    return %c0_i32, %c0_i32_0 : i32, i32
  }
  func.func @transform_11(%arg0: i32) -> (i32, i32) {
    %c0_i32 = arith.constant 0 : i32
    %c0_i32_0 = arith.constant 0 : i32
    %c0_i32_1 = arith.constant 0 : i32
    return %c0_i32, %c0_i32_0 : i32, i32
  }
  func.func @transform_12(%arg0: i32) -> (i32, i32) {
    %c0_i32 = arith.constant 0 : i32
    %c0_i32_0 = arith.constant 0 : i32
    %c0_i32_1 = arith.constant 0 : i32
    return %c0_i32, %c0_i32_0 : i32, i32
  }
  func.func @transform_13(%arg0: i32) -> (i32, i32) {
    %c0_i32 = arith.constant 0 : i32
    %c0_i32_0 = arith.constant 0 : i32
    return %arg0, %c0_i32 : i32, i32
  }
}

</mosaic_0001>

<bundles_post_ra>
// kernel: squeeze.1
= control target key start
LH: loop header
LB: loop body
LE: loop exit
PB: predicated region body
PF: predicated region fallthrough
CT: control target
= control target key end

     0   :  { %s486_s0 = inlined_call_operand.vmem [shape: f32[64,256], index: 0, kind: input, shape index: {}]   ;;  %s487_s1 = inlined_call_operand.vmem [shape: f32[16,1024], index: 1, kind: output, shape index: {}]  }
   0x1   :  { %v2_v0 = vld [vmem:[%s486_s0] sm:$0xff]   ;;  %v161_v1 = vld [vmem:[%s486_s0 + $0x8] sm:$0xff]   ;;  %v166_v2 = vld [vmem:[%s486_s0 + $0x10] sm:$0xff]  }
   0x2   :  { %3 = vst [vmem:[%s487_s1] ss:$16 sm:$0x3] %v2_v0   ;;  %4 = vst [vmem:[%s487_s1] ss:$16 sm:$0xc] %v2_v0   ;;  %v171_v3 = vld [vmem:[%s486_s0 + $0x18] sm:$0xff]   ;;  %v176_v4 = vld [vmem:[%s486_s0 + $0x20] sm:$0xff]  }
   0x3   :  { %159 = vst [vmem:[%s487_s1 - $0x3f] ss:$16 sm:$0x30] %v2_v0   ;;  %160 = vst [vmem:[%s487_s1 - $0x3f] ss:$16 sm:$0xc0] %v2_v0  }
   0x4   :  { %162 = vst [vmem:[%s487_s1 + $0x8] ss:$16 sm:$0x3] %v161_v1   ;;  %163 = vst [vmem:[%s487_s1 + $0x8] ss:$16 sm:$0xc] %v161_v1  }
   0x5   :  { %164 = vst [vmem:[%s487_s1 - $0x37] ss:$16 sm:$0x30] %v161_v1   ;;  %165 = vst [vmem:[%s487_s1 - $0x37] ss:$16 sm:$0xc0] %v161_v1  }
   0x6   :  { %167 = vst [vmem:[%s487_s1 + $0x2] ss:$16 sm:$0x3] %v166_v2   ;;  %168 = vst [vmem:[%s487_s1 + $0x2] ss:$16 sm:$0xc] %v166_v2  }
   0x7   :  { %169 = vst [vmem:[%s487_s1 - $0x3d] ss:$16 sm:$0x30] %v166_v2   ;;  %170 = vst [vmem:[%s487_s1 - $0x3d] ss:$16 sm:$0xc0] %v166_v2  }
   0x8   :  { %v181_v5 = vld [vmem:[%s486_s0 + $0x28] sm:$0xff]   ;;  %172 = vst [vmem:[%s487_s1 + $0xa] ss:$16 sm:$0x3] %v171_v3   ;;  %v186_v6 = vld [vmem:[%s486_s0 + $0x30] sm:$0xff]   ;;  %v191_v7 = vld [vmem:[%s486_s0 + $0x38] sm:$0xff]  }
   0x9   :  { %173 = vst [vmem:[%s487_s1 + $0xa] ss:$16 sm:$0xc] %v171_v3   ;;  %174 = vst [vmem:[%s487_s1 - $0x35] ss:$16 sm:$0x30] %v171_v3  }
   0xa   :  { %175 = vst [vmem:[%s487_s1 - $0x35] ss:$16 sm:$0xc0] %v171_v3   ;;  %177 = vst [vmem:[%s487_s1 + $0x4] ss:$16 sm:$0x3] %v176_v4  }
   0xb   :  { %178 = vst [vmem:[%s487_s1 + $0x4] ss:$16 sm:$0xc] %v176_v4   ;;  %179 = vst [vmem:[%s487_s1 - $0x3b] ss:$16 sm:$0x30] %v176_v4  }
   0xc   :  { %180 = vst [vmem:[%s487_s1 - $0x3b] ss:$16 sm:$0xc0] %v176_v4   ;;  %182 = vst [vmem:[%s487_s1 + $0xc] ss:$16 sm:$0x3] %v181_v5  }
   0xd   :  { %183 = vst [vmem:[%s487_s1 + $0xc] ss:$16 sm:$0xc] %v181_v5   ;;  %184 = vst [vmem:[%s487_s1 - $0x33] ss:$16 sm:$0x30] %v181_v5  }
   0xe   :  { %185 = vst [vmem:[%s487_s1 - $0x33] ss:$16 sm:$0xc0] %v181_v5   ;;  %v196_v8 = vld [vmem:[%s486_s0 + $0x40] sm:$0xff]   ;;  %v201_v9 = vld [vmem:[%s486_s0 + $0x48] sm:$0xff]   ;;  %v206_v10 = vld [vmem:[%s486_s0 + $0x50] sm:$0xff]  }
   0xf   :  { %187 = vst [vmem:[%s487_s1 + $0x6] ss:$16 sm:$0x3] %v186_v6   ;;  %188 = vst [vmem:[%s487_s1 + $0x6] ss:$16 sm:$0xc] %v186_v6  }
  0x10   :  { %189 = vst [vmem:[%s487_s1 - $0x39] ss:$16 sm:$0x30] %v186_v6   ;;  %190 = vst [vmem:[%s487_s1 - $0x39] ss:$16 sm:$0xc0] %v186_v6  }
  0x11   :  { %192 = vst [vmem:[%s487_s1 + $0xe] ss:$16 sm:$0x3] %v191_v7   ;;  %193 = vst [vmem:[%s487_s1 + $0xe] ss:$16 sm:$0xc] %v191_v7  }
  0x12   :  { %194 = vst [vmem:[%s487_s1 - $0x31] ss:$16 sm:$0x30] %v191_v7   ;;  %195 = vst [vmem:[%s487_s1 - $0x31] ss:$16 sm:$0xc0] %v191_v7  }
  0x13   :  { %197 = vst [vmem:[%s487_s1 + $0x40] ss:$16 sm:$0x3] %v196_v8   ;;  %198 = vst [vmem:[%s487_s1 + $0x40] ss:$16 sm:$0xc] %v196_v8  }
  0x14   :  { %199 = vst [vmem:[%s487_s1 + $0x1] ss:$16 sm:$0x30] %v196_v8   ;;  %200 = vst [vmem:[%s487_s1 + $0x1] ss:$16 sm:$0xc0] %v196_v8  }
  0x15   :  { %v211_v11 = vld [vmem:[%s486_s0 + $0x58] sm:$0xff]   ;;  %202 = vst [vmem:[%s487_s1 + $0x48] ss:$16 sm:$0x3] %v201_v9   ;;  %v216_v12 = vld [vmem:[%s486_s0 + $0x60] sm:$0xff]   ;;  %v221_v13 = vld [vmem:[%s486_s0 + $0x68] sm:$0xff]  }
  0x16   :  { %203 = vst [vmem:[%s487_s1 + $0x48] ss:$16 sm:$0xc] %v201_v9   ;;  %204 = vst [vmem:[%s487_s1 + $0x9] ss:$16 sm:$0x30] %v201_v9  }
  0x17   :  { %205 = vst [vmem:[%s487_s1 + $0x9] ss:$16 sm:$0xc0] %v201_v9   ;;  %207 = vst [vmem:[%s487_s1 + $0x42] ss:$16 sm:$0x3] %v206_v10  }
  0x18   :  { %208 = vst [vmem:[%s487_s1 + $0x42] ss:$16 sm:$0xc] %v206_v10   ;;  %209 = vst [vmem:[%s487_s1 + $0x3] ss:$16 sm:$0x30] %v206_v10  }
  0x19   :  { %210 = vst [vmem:[%s487_s1 + $0x3] ss:$16 sm:$0xc0] %v206_v10   ;;  %212 = vst [vmem:[%s487_s1 + $0x4a] ss:$16 sm:$0x3] %v211_v11  }
  0x1a   :  { %213 = vst [vmem:[%s487_s1 + $0x4a] ss:$16 sm:$0xc] %v211_v11   ;;  %214 = vst [vmem:[%s487_s1 + $0xb] ss:$16 sm:$0x30] %v211_v11  }
  0x1b   :  { %215 = vst [vmem:[%s487_s1 + $0xb] ss:$16 sm:$0xc0] %v211_v11   ;;  %v226_v14 = vld [vmem:[%s486_s0 + $0x70] sm:$0xff]   ;;  %v231_v15 = vld [vmem:[%s486_s0 + $0x78] sm:$0xff]  }
  0x1c   :  { %217 = vst [vmem:[%s487_s1 + $0x44] ss:$16 sm:$0x3] %v216_v12   ;;  %218 = vst [vmem:[%s487_s1 + $0x44] ss:$16 sm:$0xc] %v216_v12  }
  0x1d   :  { %219 = vst [vmem:[%s487_s1 + $0x5] ss:$16 sm:$0x30] %v216_v12   ;;  %220 = vst [vmem:[%s487_s1 + $0x5] ss:$16 sm:$0xc0] %v216_v12  }
  0x1e   :  { %222 = vst [vmem:[%s487_s1 + $0x4c] ss:$16 sm:$0x3] %v221_v13   ;;  %223 = vst [vmem:[%s487_s1 + $0x4c] ss:$16 sm:$0xc] %v221_v13  }
  0x1f   :  { %224 = vst [vmem:[%s487_s1 + $0xd] ss:$16 sm:$0x30] %v221_v13   ;;  %225 = vst [vmem:[%s487_s1 + $0xd] ss:$16 sm:$0xc0] %v221_v13  }
  0x20   :  { %227 = vst [vmem:[%s487_s1 + $0x46] ss:$16 sm:$0x3] %v226_v14   ;;  %228 = vst [vmem:[%s487_s1 + $0x46] ss:$16 sm:$0xc] %v226_v14  }
  0x21   :  { %229 = vst [vmem:[%s487_s1 + $0x7] ss:$16 sm:$0x30] %v226_v14   ;;  %230 = vst [vmem:[%s487_s1 + $0x7] ss:$16 sm:$0xc0] %v226_v14  }
  0x22   :  { %232 = vst [vmem:[%s487_s1 + $0x4e] ss:$16 sm:$0x3] %v231_v15   ;;  %233 = vst [vmem:[%s487_s1 + $0x4e] ss:$16 sm:$0xc] %v231_v15  }
  0x23   :  { %234 = vst [vmem:[%s487_s1 + $0xf] ss:$16 sm:$0x30] %v231_v15   ;;  %235 = vst [vmem:[%s487_s1 + $0xf] ss:$16 sm:$0xc0] %v231_v15  }

// kernel: dr_spaam_forward.4
= control target key start
LH: loop header
LB: loop body
LE: loop exit
PB: predicated region body
PF: predicated region fallthrough
CT: control target
= control target key end

     0   :  { %12 = vsyncpa [#allocation3], 0  ;;  %s3462_s0 = inlined_call_operand.vmem [shape: f32[2,16,1024], index: 0, kind: input, shape index: {}]   ;;  %s3463_s1 = inlined_call_operand.vmem [shape: f32[16,1024], index: 1, kind: input, shape index: {}]   ;;  %s3464_s2 = inlined_call_operand.vmem [shape: bf16[1024,32], index: 2, kind: input, shape index: {}]   ;;  %s3465_s3 = inlined_call_operand.hbm [shape: f32[1,32], index: 3, kind: input, shape index: {}]   ;;  %s3466_s4 = inlined_call_operand.vmem [shape: f32[8,8], index: 4, kind: input, shape index: {}]   ;;  %s3467_s5 = inlined_call_operand.vmem [shape: f32[16,1024], index: 5, kind: output, shape index: {0}]   ;;  %s3468_s6 = inlined_call_operand.hbm [shape: f32[16,8], index: 6, kind: output, shape index: {1}]  }
   0x1   :  { %13 = vsyncpa [#allocation4], 0  ;;  %s2568_s21 = smov 0  }
   0x2 LB: > { %s2574_s22 = sadd.s32 4294967295, %s2525_s21   ;;  %p2075_p0 = scmp.ge.s32.totalorder %s2525_s21, 1  ;;  %s2525_s21 = sphi %s2568_s21, %s19_s21  }
   0x3   : > { %p176_p1 = scmp.lt.s32.totalorder %s2525_s21, 3  ;;  %p3469_p4 = scmp.eq.s32.totalorder %s2574_s22, 0 }
   0x4   : > { %s2527_s24 = smov [#allocation2]   ;;  %s2457_s29 = scalar_lea.hbm %s3465_s3, 16 }
   0x5   : > { %p2579_p3 = pnand %p2075_p0, %p176_p1  ;;  %s195_s25 = sshll.u32 %s2527_s24, 4  ;;  %s196_s25 = int_to_ptr.vmem [resolvable:$true] %s195_s25 }
   0x6   : > { %p2458_p7 = scmp.ne.s32.totalorder %s3465_s3, %s2457_s29  ;;  %p2464_p11 = scmp.lt.u32.totalorder %s2457_s29, %s3465_s3 }
   0x7   : > { %s3494_s23 = scalar_select %p2579_p3, 1, 0 }
   0x8   : > { %p2363_p5 = pneg %p2579_p3 }
   0xa   : > { %p2588_p6 = pnand %p3469_p4, %p2363_p5 }
   0xc   : > { %p2459_p8 = pneg %p2588_p6 }
   0xe   : > { %p2460_p9 = pnand %p2459_p8, %p2458_p7 }
  0x10   : > { %p2461_p10 = pneg %p2460_p9 }
  0x12   : > { %p2466_p12 = pnand %p2464_p11, %p2461_p10 }
  0x14   : > { %2469 = shalt.err (!%p2466_p12)
}
  0x15   : > { %s2470_s10 = scalar_lea.vmem %s196_s25, 16  ;;  %s2477_s11 = scalar_lea.vmem %s196_s25, 32 }
  0x16   : > { %p2471_p13 = scmp.ne.s32.totalorder %s196_s25, %s2470_s10  ;;  %p2478_p5 = scmp.lt.s32.totalorder %s196_s25, %s196_s25 }
  0x17   : > { %p2479_p2 = scmp.lt.s32.totalorder %s2477_s11, %s2470_s10 }
  0x18   : > { %p2473_p0 = pnand %p2471_p13, %p2459_p8 }
  0x19   : > { %p2480_p4 = por %p2479_p2, %p2478_p5 }
  0x1a   : > { %p2474_p1 = pneg %p2473_p0 }
  0x1c   : > { %p2481_p3 = pnand %p2480_p4, %p2474_p1 }
  0x1e   : > { %2484 = shalt.err (!%p2481_p3)
}
  0x1f   : > { %2366 = dma.hbm_to_vmem [thread:$0]  (!%p2588_p6), %s3465_s3, 16, %s196_s25, [#allocation3]  }
  0x20   : > { %p3496_p7 = scmp.ne.s32.totalorder %s3494_s23, 0 }
  0x22   : > { %219 = sbr.rel (%p3496_p7) target bundleno = 1171 (0x493), region = 40 }
  0x29   : > { %p3497_p9 = scmp.eq.s32.totalorder %s2574_s22, 0 }
  0x2b   : > { %2516 = dma.done.wait (%p3497_p9), [#allocation3], 16   ;;  %p3498_p8 = pmov %p3497_p9 }
  0x2c   : > { %p244_p2 = scmp.lt.s32.totalorder %s2574_s22, 1  ;;  %p3499_p3 = scmp.ne.s32.totalorder %s2574_s22, 0 }
  0x2d   : > { %2518 = vsyncadd (%p3498_p8), [#allocation3], 4294967280  ;;  %v254_v0 = vld [vmem:[%s3463_s1] sm:$0xff] (!%p3499_p3)  ;;  %v255_v1 = vld [vmem:[%s3463_s1 + $0x8] sm:$0xff] (!%p3499_p3) }
  0x2e   : > { %s245_s14 = scalar_select %p244_p2, %s2574_s22, 1 }
  0x2f   : > { %253 = sbr.rel (%p3499_p3) target bundleno = 55 (0x37), region = 48  ;;  %v256_v2 = vld [vmem:[%s3463_s1 + $0x10] sm:$0xff] (!%p3499_p3)  ;;  %270 = vst [vmem:[%s3467_s5] sm:$0xff] (!%p3499_p3), %v254_v0  ;;  %271 = vst [vmem:[%s3467_s5 + $0x8] sm:$0xff] (!%p3499_p3), %v255_v1  ;;  %v257_v3 = vld [vmem:[%s3463_s1 + $0x18] sm:$0xff] (!%p3499_p3) }
  0x30   : > { %s2164_s15 = sshll.u32 %s245_s14, 7  ;;  %272 = vst [vmem:[%s3467_s5 + $0x10] sm:$0xff] (!%p3499_p3), %v256_v2  ;;  %v258_v4 = vld [vmem:[%s3463_s1 + $0x20] sm:$0xff] (!%p3499_p3)  ;;  %v259_v5 = vld [vmem:[%s3463_s1 + $0x28] sm:$0xff] (!%p3499_p3)  ;;  %273 = vst [vmem:[%s3467_s5 + $0x18] sm:$0xff] (!%p3499_p3), %v257_v3 }
  0x31   : > { %s2619_s18 = scalar_lea.vmem %s3462_s0, %s2164_s15  ;;  %274 = vst [vmem:[%s3467_s5 + $0x20] sm:$0xff] (!%p3499_p3), %v258_v4  ;;  %275 = vst [vmem:[%s3467_s5 + $0x28] sm:$0xff] (!%p3499_p3), %v259_v5  ;;  %v260_v6 = vld [vmem:[%s3463_s1 + $0x30] sm:$0xff] (!%p3499_p3)  ;;  %v261_v7 = vld [vmem:[%s3463_s1 + $0x38] sm:$0xff] (!%p3499_p3) }
  0x32   : > { %v262_v8 = vld [vmem:[%s3463_s1 + $0x40] sm:$0xff] (!%p3499_p3)  ;;  %276 = vst [vmem:[%s3467_s5 + $0x30] sm:$0xff] (!%p3499_p3), %v260_v6  ;;  %277 = vst [vmem:[%s3467_s5 + $0x38] sm:$0xff] (!%p3499_p3), %v261_v7  ;;  %v263_v9 = vld [vmem:[%s3463_s1 + $0x48] sm:$0xff] (!%p3499_p3) }
  0x33   : > { %278 = vst [vmem:[%s3467_s5 + $0x40] sm:$0xff] (!%p3499_p3), %v262_v8  ;;  %v264_v10 = vld [vmem:[%s3463_s1 + $0x50] sm:$0xff] (!%p3499_p3)  ;;  %v265_v11 = vld [vmem:[%s3463_s1 + $0x58] sm:$0xff] (!%p3499_p3)  ;;  %279 = vst [vmem:[%s3467_s5 + $0x48] sm:$0xff] (!%p3499_p3), %v263_v9 }
  0x34   : > { %280 = vst [vmem:[%s3467_s5 + $0x50] sm:$0xff] (!%p3499_p3), %v264_v10  ;;  %281 = vst [vmem:[%s3467_s5 + $0x58] sm:$0xff] (!%p3499_p3), %v265_v11  ;;  %v266_v12 = vld [vmem:[%s3463_s1 + $0x60] sm:$0xff] (!%p3499_p3)  ;;  %v267_v13 = vld [vmem:[%s3463_s1 + $0x68] sm:$0xff] (!%p3499_p3) }
  0x35   : > { %v268_v14 = vld [vmem:[%s3463_s1 + $0x70] sm:$0xff] (!%p3499_p3)  ;;  %282 = vst [vmem:[%s3467_s5 + $0x60] sm:$0xff] (!%p3499_p3), %v266_v12  ;;  %283 = vst [vmem:[%s3467_s5 + $0x68] sm:$0xff] (!%p3499_p3), %v267_v13  ;;  %v269_v15 = vld [vmem:[%s3463_s1 + $0x78] sm:$0xff] (!%p3499_p3) }
  0x36   : > { %284 = vst [vmem:[%s3467_s5 + $0x70] sm:$0xff] %v268_v14  ;;  %285 = vst [vmem:[%s3467_s5 + $0x78] sm:$0xff] %v269_v15 }
  0x37 PF: > { %v2722_v16 = vld [vmem:[%s3464_s2 + $0x40] sm:$0xff]   ;;  %v2745_v20 = vld [vmem:[%s3464_s2 + $0x48] sm:$0xff]   ;;  %v2769_v24 = vld [vmem:[%s3464_s2 + $0x50] sm:$0xff]   ;;  %vm2529_vm0 = vmmov 0   ;;  %vm1189_vm1 = vcmask 261120   ;;  %vm1343_vm2 = vcmask 64512  }
  0x38   : > { %v2727_v17 = vld [vmem:[%s3464_s2 + $0xc0] sm:$0xff]   ;;  %2165 = vmatprep.subr.bf16.mxu0 %v2722_v16  ;;  %v2751_v21 = vld [vmem:[%s3464_s2 + $0xc8] sm:$0xff]   ;;  %v2775_v25 = vld [vmem:[%s3464_s2 + $0xd0] sm:$0xff]   ;;  %p2369_p4 = scmp.eq.s32.totalorder %s2574_s22, 1  ;;  %s2530_s11 = smov [#allocation5]  }
  0x39   : > { %v2733_v18 = vld [vmem:[%s3464_s2] sm:$0xff]   ;;  %2187 = vmatprep.subr.bf16.mxu1 %v2727_v17  ;;  %v2757_v22 = vld [vmem:[%s3464_s2 + $0x8] sm:$0xff]   ;;  %v2781_v26 = vld [vmem:[%s3464_s2 + $0x10] sm:$0xff]   ;;  %s2017_s12 = sshll.u32 %s2530_s11, 4  ;;  %s2018_s12 = int_to_ptr.vmem [resolvable:$true] %s2017_s12 }
  0x3a   : > { %v2739_v19 = vld [vmem:[%s3464_s2 + $0x80] sm:$0xff]   ;;  %2166 = vmatpush3.bf16.msra.mxu0 %v2733_v18  ;;  %v2763_v23 = vld [vmem:[%s3464_s2 + $0x88] sm:$0xff]   ;;  %v2787_v27 = vld [vmem:[%s3464_s2 + $0x90] sm:$0xff]   ;;  %s2485_s13 = scalar_lea.vmem %s2018_s12, 256  ;;  %p2492_p12 = scmp.lt.s32.totalorder %s2018_s12, %s2018_s12 }
  0x3b   : > { %2188 = vmatpush3.bf16.msra.mxu1 %v2739_v19  ;;  %2167 = vmatprep.subr.bf16.mxu0 %v2745_v20  ;;  %v2793_v28 = vld [vmem:[%s3464_s2 + $0x58] sm:$0xff]   ;;  %v2817_v32 = vld [vmem:[%s3464_s2 + $0x60] sm:$0xff]   ;;  %v2841_v36 = vld [vmem:[%s3464_s2 + $0x68] sm:$0xff]   ;;  %p2486_p6 = scmp.ne.s32.totalorder %s2018_s12, %s2485_s13  ;;  %p2493_p13 = scmp.lt.s32.totalorder %s2485_s13, %s2485_s13 }
  0x3c   : > { %2189 = vmatprep.subr.bf16.mxu1 %v2751_v21  ;;  %v2799_v29 = vld [vmem:[%s3464_s2 + $0xd8] sm:$0xff]   ;;  %v2823_v33 = vld [vmem:[%s3464_s2 + $0xe0] sm:$0xff]   ;;  %v2847_v37 = vld [vmem:[%s3464_s2 + $0xe8] sm:$0xff]  }
  0x3d   : > { %v2805_v30 = vld [vmem:[%s3464_s2 + $0x18] sm:$0xff]   ;;  %v2829_v34 = vld [vmem:[%s3464_s2 + $0x20] sm:$0xff]   ;;  %v2853_v38 = vld [vmem:[%s3464_s2 + $0x28] sm:$0xff]   ;;  %p2487_p10 = pnand %p2486_p6, %p2369_p4  ;;  %p2494_p0 = por %p2493_p13, %p2492_p12 }
  0x3e   : > { %2168 = vmatpush3.bf16.msra.mxu0 %v2757_v22  ;;  %v2811_v31 = vld [vmem:[%s3464_s2 + $0x98] sm:$0xff]   ;;  %v2835_v35 = vld [vmem:[%s3464_s2 + $0xa0] sm:$0xff]   ;;  %v2859_v39 = vld [vmem:[%s3464_s2 + $0xa8] sm:$0xff]  }
  0x3f   : > { %2190 = vmatpush3.bf16.msra.mxu1 %v2763_v23  ;;  %2169 = vmatprep.subr.bf16.mxu0 %v2769_v24  ;;  %v2865_v40 = vld [vmem:[%s3464_s2 + $0x70] sm:$0xff]   ;;  %v2889_v44 = vld [vmem:[%s3464_s2 + $0x78] sm:$0xff]   ;;  %v2911_v48 = vld [vmem:[%s2619_s18 + $0x8] sm:$0xff]  ;;  %p2488_p11 = pneg %p2487_p10 }
  0x40   : > { %2191 = vmatprep.subr.bf16.mxu1 %v2775_v25  ;;  %v2871_v41 = vld [vmem:[%s3464_s2 + $0xf0] sm:$0xff]   ;;  %v2895_v45 = vld [vmem:[%s3464_s2 + $0xf8] sm:$0xff]   ;;  %3500 = vst [vmem:[#allocation8_spill] sm:$0xff] %v2911_v48  ;;  %v2914_v49 = vld [vmem:[%s2619_s18 + $0x48] sm:$0xff] }
  0x41   : > { %v2877_v42 = vld [vmem:[%s3464_s2 + $0x30] sm:$0xff]   ;;  %v2901_v46 = vld [vmem:[%s3464_s2 + $0x38] sm:$0xff]   ;;  %3501 = vst [vmem:[#allocation9_spill] sm:$0xff] %v2914_v49  ;;  %v448_v51 = vpack.c.bf16 %v2914_v49, %v2911_v48  ;;  %v2926_v53 = vld [vmem:[%s2619_s18] sm:$0xff]  ;;  %p2495_p1 = pnand %p2494_p0, %p2488_p11 }
  0x42   : > { %2170 = vmatpush3.bf16.msra.mxu0 %v2781_v26  ;;  %v2883_v43 = vld [vmem:[%s3464_s2 + $0xb0] sm:$0xff]   ;;  %v2907_v47 = vld [vmem:[%s3464_s2 + $0xb8] sm:$0xff]   ;;  %3504 = vst [vmem:[#allocation12_spill] sm:$0xff] %v2926_v53  ;;  %v2929_v54 = vld [vmem:[%s2619_s18 + $0x40] sm:$0xff] }
  0x43   : > { %2192 = vmatpush3.bf16.msra.mxu1 %v2787_v27  ;;  %2171 = vmatprep.subr.bf16.mxu0 %v2793_v28  ;;  %v2917_v50 = vld [vmem:[%s2619_s18 + $0x18] sm:$0xff]  ;;  %3505 = vst [vmem:[#allocation13_spill] sm:$0xff] %v2929_v54  ;;  %v447_v56 = vpack.c.bf16 %v2929_v54, %v2926_v53  ;;  %v2936_v57 = vld [vmem:[%s2619_s18 + $0x10] sm:$0xff]  ;;  %v2946_v60 = vld [vmem:[%s3464_s2 + $0x140] sm:$0xff]  }
  0x44   : > { %2193 = vmatprep.subr.bf16.mxu1 %v2799_v29  ;;  %3502 = vst [vmem:[#allocation10_spill] sm:$0xff] %v2917_v50  ;;  %v2923_v52 = vld [vmem:[%s2619_s18 + $0x58] sm:$0xff]  ;;  %3506 = vst [vmem:[#allocation14_spill] sm:$0xff] %v2936_v57  ;;  %v2939_v58 = vld [vmem:[%s2619_s18 + $0x50] sm:$0xff]  ;;  %877 = vmatprep.mubr.bf16.mxu0 %v448_v51 }
  0x45   : > { %3503 = vst [vmem:[#allocation11_spill] sm:$0xff] %v2923_v52  ;;  %v450_v55 = vpack.c.bf16 %v2923_v52, %v2917_v50  ;;  %3507 = vst [vmem:[#allocation15_spill] sm:$0xff] %v2939_v58  ;;  %v449_v59 = vpack.c.bf16 %v2939_v58, %v2936_v57  ;;  %v2951_v61 = vld [vmem:[%s3464_s2 + $0x1c0] sm:$0xff]   ;;  %v2969_v0 = vld [vmem:[%s3464_s2 + $0x148] sm:$0xff]  }
  0x46   : > { %2172 = vmatpush3.bf16.msra.mxu0 %v2805_v30  ;;  %v2957_v62 = vld [vmem:[%s3464_s2 + $0x100] sm:$0xff]   ;;  %v2975_v1 = vld [vmem:[%s3464_s2 + $0x1c8] sm:$0xff]   ;;  %v2993_v4 = vld [vmem:[%s3464_s2 + $0x150] sm:$0xff]  }
  0x47   : > { %2194 = vmatpush3.bf16.msra.mxu1 %v2811_v31  ;;  %2173 = vmatprep.subr.bf16.mxu0 %v2817_v32  ;;  %v2963_v63 = vld [vmem:[%s3464_s2 + $0x180] sm:$0xff]   ;;  %v2981_v2 = vld [vmem:[%s3464_s2 + $0x108] sm:$0xff]   ;;  %v2999_v5 = vld [vmem:[%s3464_s2 + $0x1d0] sm:$0xff]  }
  0x48   : > { %2195 = vmatprep.subr.bf16.mxu1 %v2823_v33  ;;  %918 = vmatprep.mubr.bf16.mxu1 %v450_v55  ;;  %v2987_v3 = vld [vmem:[%s3464_s2 + $0x188] sm:$0xff]   ;;  %v3005_v6 = vld [vmem:[%s3464_s2 + $0x110] sm:$0xff]   ;;  %v3017_v8 = vld [vmem:[%s3464_s2 + $0x158] sm:$0xff]  }
  0x49   : > { %v3011_v7 = vld [vmem:[%s3464_s2 + $0x190] sm:$0xff]   ;;  %v3023_v9 = vld [vmem:[%s3464_s2 + $0x1d8] sm:$0xff]   ;;  %v3041_v12 = vld [vmem:[%s3464_s2 + $0x160] sm:$0xff]  }
  0x4a   : > { %2174 = vmatpush3.bf16.msra.mxu0 %v2829_v34  ;;  %v3029_v10 = vld [vmem:[%s3464_s2 + $0x118] sm:$0xff]   ;;  %v3047_v13 = vld [vmem:[%s3464_s2 + $0x1e0] sm:$0xff]   ;;  %v3065_v51 = vld [vmem:[%s3464_s2 + $0x168] sm:$0xff]  }
  0x4b   : > { %2196 = vmatpush3.bf16.msra.mxu1 %v2835_v35  ;;  %2175 = vmatprep.subr.bf16.mxu0 %v2841_v36  ;;  %v3035_v11 = vld [vmem:[%s3464_s2 + $0x198] sm:$0xff]   ;;  %v3053_v14 = vld [vmem:[%s3464_s2 + $0x120] sm:$0xff]   ;;  %3508 = vst [vmem:[#allocation16_spill] sm:$0xff] %v3065_v51  ;;  %v3071_v55 = vld [vmem:[%s3464_s2 + $0x1e8] sm:$0xff]  }
  0x4c   : > { %2197 = vmatprep.subr.bf16.mxu1 %v2847_v37  ;;  %v3059_v15 = vld [vmem:[%s3464_s2 + $0x1a0] sm:$0xff]   ;;  %3509 = vst [vmem:[#allocation17_spill] sm:$0xff] %v3071_v55  ;;  %v3089_v52 = vld [vmem:[%s3464_s2 + $0x170] sm:$0xff]   ;;  %v3113_v50 = vld [vmem:[%s3464_s2 + $0x178] sm:$0xff]  }
  0x4d   : > { %3512 = vst [vmem:[#allocation20_spill] sm:$0xff] %v3089_v52  ;;  %v3095_v49 = vld [vmem:[%s3464_s2 + $0x1f0] sm:$0xff]   ;;  %3516 = vst [vmem:[#allocation24_spill] sm:$0xff] %v3113_v50  ;;  %v3119_v48 = vld [vmem:[%s3464_s2 + $0x1f8] sm:$0xff]  }
  0x4e   : > { %2176 = vmatpush3.bf16.msra.mxu0 %v2853_v38  ;;  %3513 = vst [vmem:[#allocation21_spill] sm:$0xff] %v3095_v49  ;;  %v3101_v58 = vld [vmem:[%s3464_s2 + $0x130] sm:$0xff]   ;;  %3517 = vst [vmem:[#allocation25_spill] sm:$0xff] %v3119_v48  ;;  %v3125_v57 = vld [vmem:[%s3464_s2 + $0x138] sm:$0xff]  }
  0x4f   : > { %2198 = vmatpush3.bf16.msra.mxu1 %v2859_v39  ;;  %2177 = vmatprep.subr.bf16.mxu0 %v2865_v40  ;;  %3514 = vst [vmem:[#allocation22_spill] sm:$0xff] %v3101_v58  ;;  %v3107_v54 = vld [vmem:[%s3464_s2 + $0x1b0] sm:$0xff]   ;;  %3518 = vst [vmem:[#allocation26_spill] sm:$0xff] %v3125_v57  ;;  %v3131_v53 = vld [vmem:[%s3464_s2 + $0x1b8] sm:$0xff]  }
  0x50   : > { %2199 = vmatprep.subr.bf16.mxu1 %v2871_v41  ;;  %3515 = vst [vmem:[#allocation23_spill] sm:$0xff] %v3107_v54 }
  0x52   : > { %2178 = vmatpush3.bf16.msra.mxu0 %v2877_v42 }
  0x53   : > { %2200 = vmatpush3.bf16.msra.mxu1 %v2883_v43  ;;  %2179 = vmatprep.subr.bf16.mxu0 %v2889_v44 }
  0x54   : > { %2201 = vmatprep.subr.bf16.mxu1 %v2895_v45 }
  0x56   : > { %2180 = vmatpush3.bf16.msra.mxu0 %v2901_v46 }
  0x57   : > { %2202 = vmatpush3.bf16.msra.mxu1 %v2907_v47  ;;  %2209 = vmatprep.subr.bf16.mxu0 %v2946_v60 }
  0x58   : > { %2231 = vmatprep.subr.bf16.mxu1 %v2951_v61 }
  0x59   : > { %878 = vmatmul.mubr.bf16.vlgmr.msra.gmra.mrb[0].mxu0 %v447_v56  ;;  %v3077_v56 = vld [vmem:[%s3464_s2 + $0x128] sm:$0xff]  }
  0x5a   : > { %919 = vmatmul.mubr.bf16.vlgmr.msra.gmra.mrb[0].mxu1 %v449_v59  ;;  %2210 = vmatpush3.bf16.msra.mxu0 %v2957_v62  ;;  %3510 = vst [vmem:[#allocation18_spill] sm:$0xff] %v3077_v56  ;;  %v3083_v59 = vld [vmem:[%s3464_s2 + $0x1a8] sm:$0xff]  }
  0x5b   : > { %2232 = vmatpush3.bf16.msra.mxu1 %v2963_v63  ;;  %2211 = vmatprep.subr.bf16.mxu0 %v2969_v0  ;;  %3511 = vst [vmem:[#allocation19_spill] sm:$0xff] %v3083_v59 }
  0x5c   : > { %2233 = vmatprep.subr.bf16.mxu1 %v2975_v1 }
  0x5e   : > { %2212 = vmatpush3.bf16.msra.mxu0 %v2981_v2 }
  0x5f   : > { %2234 = vmatpush3.bf16.msra.mxu1 %v2987_v3  ;;  %2213 = vmatprep.subr.bf16.mxu0 %v2993_v4 }
  0x60   : > { %2235 = vmatprep.subr.bf16.mxu1 %v2999_v5 }
  0x62   : > { %2214 = vmatpush3.bf16.msra.mxu0 %v3005_v6 }
  0x63   : > { %2236 = vmatpush3.bf16.msra.mxu1 %v3011_v7  ;;  %2215 = vmatprep.subr.bf16.mxu0 %v3017_v8 }
  0x64   : > { %2237 = vmatprep.subr.bf16.mxu1 %v3023_v9 }
  0x66   : > { %2216 = vmatpush3.bf16.msra.mxu0 %v3029_v10 }
  0x67   : > { %2238 = vmatpush3.bf16.msra.mxu1 %v3035_v11  ;;  %2217 = vmatprep.subr.bf16.mxu0 %v3041_v12 }
  0x68   : > { %2239 = vmatprep.subr.bf16.mxu1 %v3047_v13 }
  0x6a   : > { %2218 = vmatpush3.bf16.msra.mxu0 %v3053_v14 }
  0x6b   : > { %2240 = vmatpush3.bf16.msra.mxu1 %v3059_v15  ;;  %2219 = vmatprep.subr.bf16.mxu0 %v3065_v51  ;;  %v3164_v51 = vld [vmem:[%s2619_s18 + $0x70] sm:$0xff] }
  0x6c   : > { %2241 = vmatprep.subr.bf16.mxu1 %v3071_v55  ;;  %v3158_v55 = vld [vmem:[%s2619_s18 + $0x30] sm:$0xff] }
  0x6e   : > { %2220 = vmatpush3.bf16.msra.mxu0 %v3077_v56  ;;  %v3155_v56 = vld [vmem:[%s2619_s18 + $0x60] sm:$0xff] }
  0x6f   : > { %2242 = vmatpush3.bf16.msra.mxu1 %v3083_v59  ;;  %2221 = vmatprep.subr.bf16.mxu0 %v3089_v52  ;;  %v3152_v59 = vld [vmem:[%s2619_s18 + $0x20] sm:$0xff]  ;;  %3522 = vst [vmem:[#allocation30_spill] sm:$0xff] %v3155_v56 }
  0x70   : > { %2243 = vmatprep.subr.bf16.mxu1 %v3095_v49  ;;  %v3144_v49 = vld [vmem:[%s2619_s18 + $0x78] sm:$0xff] }
  0x71   : > { %3521 = vst [vmem:[#allocation29_spill] sm:$0xff] %v3144_v49 }
  0x72   : > { %2222 = vmatpush3.bf16.msra.mxu0 %v3101_v58  ;;  %v3138_v58 = vld [vmem:[%s2619_s18 + $0x68] sm:$0xff] }
  0x73   : > { %2244 = vmatpush3.bf16.msra.mxu1 %v3107_v54  ;;  %2223 = vmatprep.subr.bf16.mxu0 %v3113_v50  ;;  %v3134_v54 = vld [vmem:[%s2619_s18 + $0x28] sm:$0xff]  ;;  %3519 = vst [vmem:[#allocation27_spill] sm:$0xff] %v3138_v58  ;;  %v3141_v50 = vld [vmem:[%s2619_s18 + $0x38] sm:$0xff] }
  0x74   : > { %2245 = vmatprep.subr.bf16.mxu1 %v3119_v48  ;;  %3520 = vst [vmem:[#allocation28_spill] sm:$0xff] %v3141_v50  ;;  %v452_v48 = vpack.c.bf16 %v3138_v58, %v3134_v54  ;;  %v454_v52 = vpack.c.bf16 %v3144_v49, %v3141_v50  ;;  %v3170_v58 = vld [vmem:[%s3467_s5 + $0x8] sm:$0xff]  ;;  %v3189_v50 = vld [vmem:[%s3467_s5 + $0x58] sm:$0xff] }
  0x75   : > { %v3175_v49 = vld [vmem:[%s3467_s5 + $0x48] sm:$0xff] }
  0x76   : > { %2224 = vmatpush3.bf16.msra.mxu0 %v3125_v57  ;;  %v451_v57 = vpack.c.bf16 %v3155_v56, %v3152_v59  ;;  %959 = vmatprep.mubr.bf16.mxu0 %v452_v48  ;;  %v1014_v56 = vpack.c.bf16 %v3175_v49, %v3170_v58 }
  0x77   : > { %2246 = vmatpush3.bf16.msra.mxu1 %v3131_v53  ;;  %2253 = vmatprep.subr.bf16.mxu0 %v2722_v16  ;;  %v453_v16 = vpack.c.bf16 %v3164_v51, %v3158_v55 }
  0x78   : > { %2275 = vmatprep.subr.bf16.mxu1 %v2727_v17  ;;  %1000 = vmatprep.mubr.bf16.mxu1 %v454_v52  ;;  %v3184_v17 = vld [vmem:[%s3467_s5 + $0x18] sm:$0xff] }
  0x79   : > { %960 = vmatmul.mubr.bf16.vlgmr.msra.gmra.mrb[4].mxu0 %v451_v57  ;;  %v1016_v48 = vpack.c.bf16 %v3189_v50, %v3184_v17 }
  0x7a   : > { %1001 = vmatmul.mubr.bf16.vlgmr.msra.gmra.mrb[4].mxu1 %v453_v16  ;;  %2254 = vmatpush3.bf16.msra.mxu0 %v2733_v18  ;;  %v3221_v18 = vld [vmem:[%s3467_s5] sm:$0xff] }
  0x7b   : > { %2276 = vmatpush3.bf16.msra.mxu1 %v2739_v19  ;;  %2255 = vmatprep.subr.bf16.mxu0 %v2745_v20  ;;  %v3226_v19 = vld [vmem:[%s3467_s5 + $0x40] sm:$0xff]  ;;  %v3233_v20 = vld [vmem:[%s3467_s5 + $0x10] sm:$0xff] }
  0x7c   : > { %2277 = vmatprep.subr.bf16.mxu1 %v2751_v21  ;;  %1053 = vmatprep.mubr.bf16.mxu0 %v1014_v56  ;;  %v3238_v21 = vld [vmem:[%s3467_s5 + $0x50] sm:$0xff] }
  0x7d   : > { %1094 = vmatprep.mubr.bf16.mxu1 %v1016_v48 }
  0x7e   : > { %2256 = vmatpush3.bf16.msra.mxu0 %v2757_v22  ;;  %v1013_v22 = vpack.c.bf16 %v3226_v19, %v3221_v18 }
  0x7f   : > { %2278 = vmatpush3.bf16.msra.mxu1 %v2763_v23  ;;  %2257 = vmatprep.subr.bf16.mxu0 %v2769_v24  ;;  %v3246_v23 = vld [vmem:[%s3467_s5 + $0x28] sm:$0xff] }
  0x80   : > { %2279 = vmatprep.subr.bf16.mxu1 %v2775_v25  ;;  %v3251_v24 = vld [vmem:[%s3467_s5 + $0x68] sm:$0xff]  ;;  %v1015_v25 = vpack.c.bf16 %v3238_v21, %v3233_v20 }
  0x82   : > { %2258 = vmatpush3.bf16.msra.mxu0 %v2781_v26  ;;  %v3259_v26 = vld [vmem:[%s3467_s5 + $0x38] sm:$0xff] }
  0x83   : > { %2280 = vmatpush3.bf16.msra.mxu1 %v2787_v27  ;;  %2259 = vmatprep.subr.bf16.mxu0 %v2793_v28  ;;  %v3264_v27 = vld [vmem:[%s3467_s5 + $0x78] sm:$0xff]  ;;  %v1018_v28 = vpack.c.bf16 %v3251_v24, %v3246_v23 }
  0x84   : > { %2281 = vmatprep.subr.bf16.mxu1 %v2799_v29  ;;  %v1020_v29 = vpack.c.bf16 %v3264_v27, %v3259_v26 }
  0x86   : > { %2260 = vmatpush3.bf16.msra.mxu0 %v2805_v30  ;;  %v3523_v30 = vld [vmem:[#allocation16_spill] sm:$0xff] }
  0x87   : > { %2282 = vmatpush3.bf16.msra.mxu1 %v2811_v31  ;;  %2261 = vmatprep.subr.bf16.mxu0 %v2817_v32  ;;  %v3524_v31 = vld [vmem:[#allocation17_spill] sm:$0xff]  ;;  %v3525_v32 = vld [vmem:[#allocation18_spill] sm:$0xff] }
  0x88   : > { %2283 = vmatprep.subr.bf16.mxu1 %v2823_v33  ;;  %v3526_v33 = vld [vmem:[#allocation19_spill] sm:$0xff] }
  0x8a   : > { %2262 = vmatpush3.bf16.msra.mxu0 %v2829_v34  ;;  %v3527_v34 = vld [vmem:[#allocation20_spill] sm:$0xff] }
  0x8b   : > { %2284 = vmatpush3.bf16.msra.mxu1 %v2835_v35  ;;  %2263 = vmatprep.subr.bf16.mxu0 %v2841_v36  ;;  %v3528_v35 = vld [vmem:[#allocation21_spill] sm:$0xff]  ;;  %v3529_v36 = vld [vmem:[#allocation22_spill] sm:$0xff] }
  0x8c   : > { %2285 = vmatprep.subr.bf16.mxu1 %v2847_v37  ;;  %v3301_v37 = vld [vmem:[%s3467_s5 + $0x20] sm:$0xff] }
  0x8e   : > { %2264 = vmatpush3.bf16.msra.mxu0 %v2853_v38  ;;  %v3306_v38 = vld [vmem:[%s3467_s5 + $0x60] sm:$0xff] }
  0x8f   : > { %2286 = vmatpush3.bf16.msra.mxu1 %v2859_v39  ;;  %2265 = vmatprep.subr.bf16.mxu0 %v2865_v40  ;;  %v3530_v39 = vld [vmem:[#allocation23_spill] sm:$0xff]  ;;  %v3531_v40 = vld [vmem:[#allocation24_spill] sm:$0xff] }
  0x90   : > { %2287 = vmatprep.subr.bf16.mxu1 %v2871_v41  ;;  %v3313_v41 = vld [vmem:[%s3467_s5 + $0x30] sm:$0xff] }
  0x92   : > { %2266 = vmatpush3.bf16.msra.mxu0 %v2877_v42  ;;  %v3318_v42 = vld [vmem:[%s3467_s5 + $0x70] sm:$0xff] }
  0x93   : > { %2288 = vmatpush3.bf16.msra.mxu1 %v2883_v43  ;;  %2267 = vmatprep.subr.bf16.mxu0 %v2889_v44  ;;  %v3532_v43 = vld [vmem:[#allocation25_spill] sm:$0xff]  ;;  %v1017_v44 = vpack.c.bf16 %v3306_v38, %v3301_v37 }
  0x94   : > { %2289 = vmatprep.subr.bf16.mxu1 %v2895_v45  ;;  %v3533_v45 = vld [vmem:[#allocation26_spill] sm:$0xff] }
  0x96   : > { %2268 = vmatpush3.bf16.msra.mxu0 %v2901_v46  ;;  %v1019_v46 = vpack.c.bf16 %v3318_v42, %v3313_v41 }
  0x97   : > { %2290 = vmatpush3.bf16.msra.mxu1 %v2907_v47  ;;  %2297 = vmatprep.subr.bf16.mxu0 %v2946_v60  ;;  %v2528_v47 = vmov 0.0   ;;  %v2083_v60 = vld [vmem:[#allocation2] ss:$0 sm:$0xff] }
  0x98   : > { %2319 = vmatprep.subr.bf16.mxu1 %v2951_v61 }
  0x99   : > { %1054 = vmatmul.mubr.bf16.vlgmr.msra.gmra.mrb[8].mxu0 %v1013_v22 }
  0x9a   : > { %1095 = vmatmul.mubr.bf16.vlgmr.msra.gmra.mrb[8].mxu1 %v1015_v25  ;;  %2298 = vmatpush3.bf16.msra.mxu0 %v2957_v62 }
  0x9b   : > { %2320 = vmatpush3.bf16.msra.mxu1 %v2963_v63  ;;  %2299 = vmatprep.subr.bf16.mxu0 %v2969_v0 }
  0x9c   : > { %2321 = vmatprep.subr.bf16.mxu1 %v2975_v1  ;;  %1135 = vmatprep.mubr.bf16.mxu0 %v1018_v28 }
  0x9d   : > { %1176 = vmatprep.mubr.bf16.mxu1 %v1020_v29 }
  0x9e   : > { %2300 = vmatpush3.bf16.msra.mxu0 %v2981_v2 }
  0x9f   : > { %2322 = vmatpush3.bf16.msra.mxu1 %v2987_v3  ;;  %2301 = vmatprep.subr.bf16.mxu0 %v2993_v4 }
  0xa0   : > { %2323 = vmatprep.subr.bf16.mxu1 %v2999_v5 }
  0xa2   : > { %2302 = vmatpush3.bf16.msra.mxu0 %v3005_v6 }
  0xa3   : > { %2324 = vmatpush3.bf16.msra.mxu1 %v3011_v7  ;;  %2303 = vmatprep.subr.bf16.mxu0 %v3017_v8 }
  0xa4   : > { %2325 = vmatprep.subr.bf16.mxu1 %v3023_v9 }
  0xa6   : > { %2304 = vmatpush3.bf16.msra.mxu0 %v3029_v10 }
  0xa7   : > { %2326 = vmatpush3.bf16.msra.mxu1 %v3035_v11  ;;  %2305 = vmatprep.subr.bf16.mxu0 %v3041_v12 }
  0xa8   : > { %2327 = vmatprep.subr.bf16.mxu1 %v3047_v13 }
  0xaa   : > { %2306 = vmatpush3.bf16.msra.mxu0 %v3053_v14 }
  0xab   : > { %2328 = vmatpush3.bf16.msra.mxu1 %v3059_v15  ;;  %2307 = vmatprep.subr.bf16.mxu0 %v3523_v30 }
  0xac   : > { %2329 = vmatprep.subr.bf16.mxu1 %v3524_v31 }
  0xae   : > { %2308 = vmatpush3.bf16.msra.mxu0 %v3525_v32 }
  0xaf   : > { %2330 = vmatpush3.bf16.msra.mxu1 %v3526_v33  ;;  %2309 = vmatprep.subr.bf16.mxu0 %v3527_v34 }
  0xb0   : > { %2331 = vmatprep.subr.bf16.mxu1 %v3528_v35 }
  0xb2   : > { %2310 = vmatpush3.bf16.msra.mxu0 %v3529_v36 }
  0xb3   : > { %2332 = vmatpush3.bf16.msra.mxu1 %v3530_v39  ;;  %2311 = vmatprep.subr.bf16.mxu0 %v3531_v40 }
  0xb4   : > { %2333 = vmatprep.subr.bf16.mxu1 %v3532_v43 }
  0xb6   : > { %2312 = vmatpush3.bf16.msra.mxu0 %v3533_v45 }
  0xb7   : > { %2334 = vmatpush3.bf16.msra.mxu1 %v3131_v53  ;;  %2345 = vmatprep.subr.mxu0 %v2528_v47 }
  0xb8   : > { %2350 = vmatprep.subr.mxu1 %v2528_v47 }
  0xb9   : > { %1136 = vmatmul.mubr.bf16.vlgmr.msra.gmra.mrb[12].mxu0 %v1017_v44 }
  0xba   : > { %1177 = vmatmul.mubr.bf16.vlgmr.msra.gmra.mrb[12].mxu1 %v1019_v46  ;;  %2347 = vmatprep.mubr.msk.f32.mxu0 %vm2529_vm0, %v2528_v47 }
  0xbb   : > { %2352 = vmatprep.mubr.msk.f32.mxu1 %vm2529_vm0, %v2528_v47 }
 0x12c   : > { %v2181_v52 = vpop.f32.mrb[0].mxu0 }
 0x12d   : > { %v2203_v57 = vpop.f32.mrb[0].mxu1  ;;  %v2182_v61 = vpop.f32.mrb[1].mxu0 }
 0x12e   : > { %v2183_v62 = vadd.f32 %v2182_v61, %v2181_v52  ;;  %v2204_v63 = vpop.f32.mrb[1].mxu1  ;;  %v2184_v0 = vpop.f32.mrb[2].mxu0 }
 0x12f   : > { %v2205_v53 = vadd.f32 %v2204_v63, %v2203_v57  ;;  %v2206_v1 = vpop.f32.mrb[2].mxu1  ;;  %v2185_v2 = vpop.f32.mrb[3].mxu0 }
 0x130   : > { %v880_v3 = vadd.f32 %v2183_v62, %v2083_v60  ;;  %v2186_v4 = vadd.f32 %v2185_v2, %v2184_v0  ;;  %v2207_v5 = vpop.f32.mrb[3].mxu1 }
 0x131   : > { %v2208_v6 = vadd.f32 %v2207_v5, %v2206_v1 }
 0x132   : > { %v921_v7 = vadd.f32 %v2205_v53, %v880_v3  ;;  %v883_v8 = vadd.f32 %v2186_v4, %v2083_v60 }
 0x134   : > { %v924_v9 = vadd.f32 %v2208_v6, %v883_v8 }
 0x14c   : > { %v2225_v10 = vpop.f32.mrb[4].mxu0 }
 0x14d   : > { %v2247_v11 = vpop.f32.mrb[4].mxu1  ;;  %v2226_v12 = vpop.f32.mrb[5].mxu0 }
 0x14e   : > { %v2227_v13 = vadd.f32 %v2226_v12, %v2225_v10  ;;  %v2248_v14 = vpop.f32.mrb[5].mxu1  ;;  %v2228_v15 = vpop.f32.mrb[6].mxu0 }
 0x14f   : > { %v2249_v56 = vadd.f32 %v2248_v14, %v2247_v11  ;;  %v2250_v16 = vpop.f32.mrb[6].mxu1  ;;  %v2229_v48 = vpop.f32.mrb[7].mxu0 }
 0x150   : > { %v962_v22 = vadd.f32 %v2227_v13, %v921_v7  ;;  %v2230_v25 = vadd.f32 %v2229_v48, %v2228_v15  ;;  %v2251_v28 = vpop.f32.mrb[7].mxu1 }
 0x151   : > { %v2252_v29 = vadd.f32 %v2251_v28, %v2250_v16 }
 0x152   : > { %v1003_v30 = vadd.f32 %v2249_v56, %v962_v22  ;;  %v965_v31 = vadd.f32 %v2230_v25, %v924_v9 }
 0x154   : > { %v1006_v32 = vadd.f32 %v2252_v29, %v965_v31  ;;  %v1009_v16 = vmul.f32 0.1, %v1003_v30 }
 0x156   : > { %v1010_v22 = vmul.f32 0.1, %v1006_v32  ;;  %v1011_v28 = vmax.f32 %v1003_v30, %v1009_v16 }
 0x158   : > { %v1012_v29 = vmax.f32 %v1006_v32, %v1010_v22 }
 0x16c   : > { %v2269_v33 = vpop.f32.mrb[8].mxu0 }
 0x16d   : > { %v2291_v34 = vpop.f32.mrb[8].mxu1  ;;  %v2270_v35 = vpop.f32.mrb[9].mxu0 }
 0x16e   : > { %v2271_v36 = vadd.f32 %v2270_v35, %v2269_v33  ;;  %v2292_v39 = vpop.f32.mrb[9].mxu1  ;;  %v2272_v40 = vpop.f32.mrb[10].mxu0 }
 0x16f   : > { %v2293_v43 = vadd.f32 %v2292_v39, %v2291_v34  ;;  %v2294_v44 = vpop.f32.mrb[10].mxu1  ;;  %v2273_v45 = vpop.f32.mrb[11].mxu0 }
 0x170   : > { %v1056_v46 = vadd.f32 %v2271_v36, %v2083_v60  ;;  %v2274_v52 = vadd.f32 %v2273_v45, %v2272_v40  ;;  %v2295_v57 = vpop.f32.mrb[11].mxu1 }
 0x171   : > { %v2296_v61 = vadd.f32 %v2295_v57, %v2294_v44 }
 0x172   : > { %v1097_v62 = vadd.f32 %v2293_v43, %v1056_v46  ;;  %v1059_v63 = vadd.f32 %v2274_v52, %v2083_v60 }
 0x174   : > { %v1100_v0 = vadd.f32 %v2296_v61, %v1059_v63 }
 0x18c   : > { %v2313_v53 = vpop.f32.mrb[12].mxu0 }
 0x18d   : > { %v2335_v1 = vpop.f32.mrb[12].mxu1  ;;  %v2314_v2 = vpop.f32.mrb[13].mxu0 }
 0x18e   : > { %v2315_v3 = vadd.f32 %v2314_v2, %v2313_v53  ;;  %v2336_v4 = vpop.f32.mrb[13].mxu1  ;;  %v2316_v5 = vpop.f32.mrb[14].mxu0 }
 0x18f   : > { %v2337_v6 = vadd.f32 %v2336_v4, %v2335_v1  ;;  %v2338_v7 = vpop.f32.mrb[14].mxu1  ;;  %v2317_v8 = vpop.f32.mrb[15].mxu0 }
 0x190   : > { %v1138_v9 = vadd.f32 %v2315_v3, %v1097_v62  ;;  %v2318_v10 = vadd.f32 %v2317_v8, %v2316_v5  ;;  %v2339_v11 = vpop.f32.mrb[15].mxu1 }
 0x191   : > { %v2340_v12 = vadd.f32 %v2339_v11, %v2338_v7 }
 0x192   : > { %v1179_v13 = vadd.f32 %v2337_v6, %v1138_v9  ;;  %v1141_v14 = vadd.f32 %v2318_v10, %v1100_v0 }
 0x194   : > { %v1185_v15 = vmul.f32 0.1, %v1179_v13  ;;  %v1182_v56 = vadd.f32 %v2340_v12, %v1141_v14 }
 0x196   : > { %v1187_v60 = vmax.f32 %v1179_v13, %v1185_v15  ;;  %v1186_v48 = vmul.f32 0.1, %v1182_v56 }
 0x198   : > { %v1188_v25 = vmax.f32 %v1182_v56, %v1186_v48  ;;  %2346 = vmatpush3.xpose.msk.msra.mxu0 %vm1189_vm1, %v1187_v60 }
 0x199   : > { %1371 = vmatprep.subr.mxu0 %v3170_v58 }
 0x19a   : > { %2351 = vmatpush3.xpose.msk.msra.mxu1 %vm1189_vm1, %v1188_v25 }
 0x19b   : > { %2348 = vmatmul.mubr.msk.f32.vlgmr.msra.gmra.mrb[16].mxu0 %vm1189_vm1, %v1011_v28  ;;  %1442 = vmatprep.subr.mxu1 %v3184_v17 }
 0x19c   : > { %1372 = vmatpush1.msra.mxu0 %v3221_v18  ;;  %1435 = vmatprep.mubr.f32.mxu0 %v2528_v47 }
 0x19d   : > { %2353 = vmatmul.mubr.msk.f32.vlgmr.msra.gmra.mrb[16].mxu1 %vm1189_vm1, %v1012_v29  ;;  %1513 = vmatprep.subr.mxu0 %v3246_v23 }
 0x19e   : > { %1443 = vmatpush1.msra.mxu1 %v3233_v20  ;;  %1506 = vmatprep.mubr.f32.mxu1 %v2528_v47 }
 0x19f   : > { %1584 = vmatprep.subr.mxu1 %v3259_v26  ;;  %v1342_v26 = vld [vmem:[%s3466_s4] sm:$0xff] }
 0x26e   : > { %v1262_v58 = vpop.f32.mrb[16].mxu0 }
 0x26f   : > { %v2349_v30 = vpop.f32.mrb[17].mxu0  ;;  %v1344_v31 = vsel %vm1343_vm2, %v1262_v58, -inf }
 0x270   : > { %v1338_v32 = vpop.f32.mrb[16].mxu1  ;;  %1345 = vmax.xlane.f32.xlu0 %v1344_v31 }
 0x271   : > { %v2354_v17 = vpop.f32.mrb[17].mxu1  ;;  %v1347_v18 = vsel %vm1343_vm2, %v1338_v32, -inf }
 0x274   : > { %1348 = vmax.xlane.f32.xlu0 %v1347_v18 }
 0x2fd   : > { %v1346_v33 = vpop.xlane.xlu0 %1345 }
 0x2fe   : > { %v1350_v34 = vsub.f32 %v1262_v58, %v1346_v33 }
 0x300   : > { %v1352_v23 = vmul.f32 1.442695, %v1350_v34 }
 0x301   : > { %v1349_v35 = vpop.xlane.xlu0 %1348 }
 0x302   : > { %2449 = vpow2.f32 %v1352_v23  ;;  %v1351_v20 = vsub.f32 %v1338_v32, %v1349_v35 }
 0x304   : > { %v1354_v36 = vmul.f32 1.442695, %v1351_v20 }
 0x306   : > { %2451 = vpow2.f32 %v1354_v36 }
 0x30c   : > { %v2450_v39 = vpop.eup %2449 }
 0x30d   : > { %v1356_v40 = vmul.f32 %v2450_v39, %v1342_v26 }
 0x30f   : > { %v1358_v43 = vsel %vm1343_vm2, %v1356_v40, 0.0 }
 0x310   : > { %v2452_v44 = vpop.eup %2451  ;;  %1359 = vadd.xlane.f32.xlu1 %v1358_v43 }
 0x311   : > { %v1357_v45 = vmul.f32 %v2452_v44, %v1342_v26 }
 0x313   : > { %v1361_v46 = vsel %vm1343_vm2, %v1357_v45, 0.0 }
 0x314   : > { %1362 = vadd.xlane.f32.xlu1 %v1361_v46 }
 0x39d   : > { %v1360_v52 = vpop.xlane.xlu1 %1359 }
 0x39e   : > { %2453 = vrcp.f32 %v1360_v52 }
 0x3a1   : > { %v1363_v57 = vpop.xlane.xlu1 %1362 }
 0x3a2   : > { %2455 = vrcp.f32 %v1363_v57 }
 0x3a8   : > { %v2454_v61 = vpop.eup %2453 }
 0x3a9   : > { %v1365_v62 = vmul.f32 %v2454_v61, %v1356_v40 }
 0x3ab   : > { %2006 = vst.msk [vmem:[#allocation5] sm:$0xff] %vm1343_vm2, %v1365_v62  ;;  %2152 = vmatmul.mubr.msk.f32.vlgmr.msra.gmra.mrb[18].mxu0 %vm1343_vm2, %v1365_v62  ;;  %2153 = vmatmul.mubr.msk.f32.vlgmr.msra.gmra.mrb[18].mxu1 %vm1343_vm2, %v1365_v62 }
 0x3ac   : > { %v2456_v63 = vpop.eup %2455  ;;  %1514 = vmatpush1.msra.mxu0 %v3301_v37  ;;  %1577 = vmatprep.mubr.f32.mxu0 %v2528_v47 }
 0x3ad   : > { %v1367_v0 = vmul.f32 %v2456_v63, %v1357_v45  ;;  %1585 = vmatpush1.msra.mxu1 %v3313_v41  ;;  %1648 = vmatprep.mubr.f32.mxu1 %v2528_v47 }
 0x3ae   : > { %1658 = vmatprep.subr.mxu0 %v3175_v49  ;;  %1729 = vmatprep.subr.mxu1 %v3189_v50 }
 0x3af   : > { %2007 = vst.msk [vmem:[#allocation5 + $0x8] sm:$0xff] %vm1343_vm2, %v1367_v0  ;;  %2154 = vmatmul.mubr.msk.f32.vlgmr.msra.gmra.mrb[20].mxu0 %vm1343_vm2, %v1365_v62  ;;  %2155 = vmatmul.mubr.msk.f32.vlgmr.msra.gmra.mrb[20].mxu1 %vm1343_vm2, %v1365_v62 }
 0x3b0   : > { %1659 = vmatpush1.msra.mxu0 %v3226_v19  ;;  %1722 = vmatprep.mubr.f32.mxu0 %v2528_v47 }
 0x3b1   : > { %1730 = vmatpush1.msra.mxu1 %v3238_v21  ;;  %1793 = vmatprep.mubr.f32.mxu1 %v2528_v47 }
 0x3b2   : > { %1800 = vmatprep.subr.mxu0 %v3251_v24  ;;  %1871 = vmatprep.subr.mxu1 %v3264_v27 }
 0x3b3   : > { %2156 = vmatmul.mubr.msk.f32.vlgmr.msra.gmra.mrb[22].mxu0 %vm1343_vm2, %v1367_v0  ;;  %2157 = vmatmul.mubr.msk.f32.vlgmr.msra.gmra.mrb[22].mxu1 %vm1343_vm2, %v1367_v0 }
 0x3b4   : > { %1801 = vmatpush1.msra.mxu0 %v3306_v38  ;;  %1864 = vmatprep.mubr.f32.mxu0 %v2528_v47 }
 0x3b5   : > { %1872 = vmatpush1.msra.mxu1 %v3318_v42  ;;  %1935 = vmatprep.mubr.f32.mxu1 %v2528_v47 }
 0x3b7   : > { %2158 = vmatmul.mubr.msk.f32.vlgmr.msra.gmra.mrb[24].mxu0 %vm1343_vm2, %v1367_v0  ;;  %2159 = vmatmul.mubr.msk.f32.vlgmr.msra.gmra.mrb[24].mxu1 %vm1343_vm2, %v1367_v0 }
 0x3b8   : > { %2498 = shalt.err (!%p2495_p1)
}
 0x3b9   : > { %s2499_s16 = scalar_lea.hbm %s3468_s6, 256 }
 0x3ba   : > { %p2500_p5 = scmp.ne.s32.totalorder %s3468_s6, %s2499_s16  ;;  %p2505_p8 = scmp.lt.u32.totalorder %s2499_s16, %s3468_s6 }
 0x3bc   : > { %p2501_p7 = pnand %p2500_p5, %p2369_p4 }
 0x3be   : > { %p2502_p9 = pneg %p2501_p7 }
 0x3c0   : > { %p2507_p2 = pnand %p2505_p8, %p2502_p9 }
 0x3c2   : > { %2510 = shalt.err (!%p2507_p2)
}
 0x3c3   : > { %s2531_s24 = smov 128   ;;  %s2532_s25 = smov 8   ;;  %v3534_v49 = vld [vmem:[#allocation12_spill] sm:$0xff]  ;;  %v3535_v19 = vld [vmem:[#allocation14_spill] sm:$0xff]  ;;  %v1946_v7 = vmul.f32 0.5, %v3152_v59  ;;  %v1948_v8 = vmul.f32 0.5, %v3158_v55 }
 0x3c4   : > { %2360 = dma.vmem_to_hbm [thread:$0]  (%p2369_p4), %s2018_s12, 256, %s3468_s6, [#allocation4], %s2531_s24, %s2531_s24, %s2532_s25   ;;  %v1942_v50 = vmul.f32 0.5, %v3534_v49  ;;  %v1944_v21 = vmul.f32 0.5, %v3535_v19  ;;  %v3536_v24 = vld [vmem:[#allocation8_spill] sm:$0xff]  ;;  %v3537_v37 = vld [vmem:[#allocation10_spill] sm:$0xff] }
 0x3c5   : > { %v1943_v27 = vmul.f32 0.5, %v3536_v24  ;;  %v1945_v38 = vmul.f32 0.5, %v3537_v37  ;;  %v1947_v13 = vmul.f32 0.5, %v3134_v54  ;;  %v3538_v14 = vld [vmem:[#allocation28_spill] sm:$0xff]  ;;  %v3539_v25 = vld [vmem:[#allocation13_spill] sm:$0xff]  ;;  %v3540_v29 = vld [vmem:[#allocation15_spill] sm:$0xff] }
 0x3c6   : > { %v1949_v15 = vmul.f32 0.5, %v3538_v14  ;;  %v1950_v28 = vmul.f32 0.5, %v3539_v25  ;;  %v1952_v58 = vmul.f32 0.5, %v3540_v29  ;;  %v3541_v30 = vld [vmem:[#allocation9_spill] sm:$0xff]  ;;  %v3542_v32 = vld [vmem:[#allocation11_spill] sm:$0xff]  ;;  %v3543_v45 = vld [vmem:[#allocation30_spill] sm:$0xff] }
 0x3c7   : > { %v1951_v31 = vmul.f32 0.5, %v3541_v30  ;;  %v1953_v17 = vmul.f32 0.5, %v3542_v32  ;;  %v1954_v46 = vmul.f32 0.5, %v3543_v45  ;;  %v1956_v52 = vmul.f32 0.5, %v3164_v51  ;;  %v3544_v0 = vld [vmem:[#allocation27_spill] sm:$0xff] }
 0x3c8   : > { %v1955_v49 = vmul.f32 0.5, %v3544_v0 }
 0x47e   : > { %v1437_v41 = vpop.f32.mrb[18].mxu0  ;;  %v1508_v42 = vpop.f32.mrb[18].mxu1 }
 0x47f   : > { %v1958_v47 = vmul.f32 0.5, %v1437_v41  ;;  %v1960_v53 = vmul.f32 0.5, %v1508_v42  ;;  %v1439_v1 = vpop.f32.mrb[19].mxu0  ;;  %v1510_v2 = vpop.f32.mrb[19].mxu1 }
 0x480   : > { %v1959_v3 = vmul.f32 0.5, %v1439_v1  ;;  %v1961_v4 = vmul.f32 0.5, %v1510_v2 }
 0x481   : > { %v1974_v5 = vadd.f32 %v1958_v47, %v1942_v50  ;;  %v1976_v6 = vadd.f32 %v1960_v53, %v1944_v21  ;;  %v3545_v50 = vld [vmem:[#allocation29_spill] sm:$0xff] }
 0x482   : > { %v1975_v9 = vadd.f32 %v1959_v3, %v1943_v27  ;;  %v1977_v10 = vadd.f32 %v1961_v4, %v1945_v38  ;;  %v1579_v11 = vpop.f32.mrb[20].mxu0  ;;  %v1650_v12 = vpop.f32.mrb[20].mxu1  ;;  %v1957_v19 = vmul.f32 0.5, %v3545_v50 }
 0x483   : > { %1990 = vst [vmem:[%s3467_s5] sm:$0xff] %v1974_v5  ;;  %1992 = vst [vmem:[%s3467_s5 + $0x10] sm:$0xff] %v1976_v6  ;;  %v1962_v56 = vmul.f32 0.5, %v1579_v11  ;;  %v1964_v59 = vmul.f32 0.5, %v1650_v12  ;;  %v1581_v16 = vpop.f32.mrb[21].mxu0  ;;  %v1652_v55 = vpop.f32.mrb[21].mxu1 }
 0x484   : > { %1991 = vst [vmem:[%s3467_s5 + $0x8] sm:$0xff] %v1975_v9  ;;  %1993 = vst [vmem:[%s3467_s5 + $0x18] sm:$0xff] %v1977_v10  ;;  %v1963_v54 = vmul.f32 0.5, %v1581_v16  ;;  %v1965_v60 = vmul.f32 0.5, %v1652_v55 }
 0x485   : > { %v1978_v48 = vadd.f32 %v1962_v56, %v1946_v7  ;;  %v1980_v22 = vadd.f32 %v1964_v59, %v1948_v8 }
 0x486   : > { %v1979_v18 = vadd.f32 %v1963_v54, %v1947_v13  ;;  %v1981_v33 = vadd.f32 %v1965_v60, %v1949_v15  ;;  %v1724_v34 = vpop.f32.mrb[22].mxu0  ;;  %v1795_v23 = vpop.f32.mrb[22].mxu1 }
 0x487   : > { %1994 = vst [vmem:[%s3467_s5 + $0x20] sm:$0xff] %v1978_v48  ;;  %1996 = vst [vmem:[%s3467_s5 + $0x30] sm:$0xff] %v1980_v22  ;;  %v1966_v35 = vmul.f32 0.5, %v1724_v34  ;;  %v1968_v20 = vmul.f32 0.5, %v1795_v23  ;;  %v1726_v36 = vpop.f32.mrb[23].mxu0  ;;  %v1797_v26 = vpop.f32.mrb[23].mxu1 }
 0x488   : > { %1995 = vst [vmem:[%s3467_s5 + $0x28] sm:$0xff] %v1979_v18  ;;  %1997 = vst [vmem:[%s3467_s5 + $0x38] sm:$0xff] %v1981_v33  ;;  %v1967_v39 = vmul.f32 0.5, %v1726_v36  ;;  %v1969_v40 = vmul.f32 0.5, %v1797_v26 }
 0x489   : > { %v1982_v43 = vadd.f32 %v1966_v35, %v1950_v28  ;;  %v1984_v44 = vadd.f32 %v1968_v20, %v1952_v58 }
 0x48a   : > { %v1983_v57 = vadd.f32 %v1967_v39, %v1951_v31  ;;  %v1985_v61 = vadd.f32 %v1969_v40, %v1953_v17  ;;  %v1866_v62 = vpop.f32.mrb[24].mxu0  ;;  %v1937_v63 = vpop.f32.mrb[24].mxu1 }
 0x48b   : > { %1998 = vst [vmem:[%s3467_s5 + $0x40] sm:$0xff] %v1982_v43  ;;  %2000 = vst [vmem:[%s3467_s5 + $0x50] sm:$0xff] %v1984_v44  ;;  %v1970_v21 = vmul.f32 0.5, %v1866_v62  ;;  %v1972_v24 = vmul.f32 0.5, %v1937_v63  ;;  %v1868_v51 = vpop.f32.mrb[25].mxu0  ;;  %v1939_v27 = vpop.f32.mrb[25].mxu1 }
 0x48c   : > { %1999 = vst [vmem:[%s3467_s5 + $0x48] sm:$0xff] %v1983_v57  ;;  %2001 = vst [vmem:[%s3467_s5 + $0x58] sm:$0xff] %v1985_v61  ;;  %v1971_v37 = vmul.f32 0.5, %v1868_v51  ;;  %v1973_v38 = vmul.f32 0.5, %v1939_v27 }
 0x48d   : > { %v1986_v41 = vadd.f32 %v1970_v21, %v1954_v46  ;;  %v1988_v42 = vadd.f32 %v1972_v24, %v1956_v52 }
 0x48e   : > { %v1987_v47 = vadd.f32 %v1971_v37, %v1955_v49  ;;  %v1989_v53 = vadd.f32 %v1973_v38, %v1957_v19 }
 0x48f   : > { %2002 = vst [vmem:[%s3467_s5 + $0x60] sm:$0xff] %v1986_v41  ;;  %2004 = vst [vmem:[%s3467_s5 + $0x70] sm:$0xff] %v1988_v42 }
 0x490   : > { %2003 = vst [vmem:[%s3467_s5 + $0x68] sm:$0xff] %v1987_v47  ;;  %2005 = vst [vmem:[%s3467_s5 + $0x78] sm:$0xff] %v1989_v53 }
 0x491   : > { %2520 = dma.done.wait (%p2369_p4), [#allocation4], 256  }
 0x492   : > { %2522 = vsyncadd (%p2369_p4), [#allocation4], 4294967040 }
 0x493 PF: > { %s19_s21 = sadd.s32 1, %s2525_s21  }
 0x494   : > { %p16_p3 = scmp.ge.s32.totalorder %s19_s21, 4  }
 0x496   :  { %18 = sbr.rel (!%p16_p3) target bundleno = 2 (0x2), region = 84 }
 0x49d   :  { %2036 = vsyncpa [#allocation3], 1 }
 0x49e   :  { %2038 = vsyncpa [#allocation3 + $0x1], 1 }
 0x49f   :  { %2039 = vsyncpa [#allocation4], 1 }
 0x4a0   :  { %2041 = vsyncpa [#allocation4 + $0x1], 1 }

// kernel: dr_spaam_forward.3
= control target key start
LH: loop header
LB: loop body
LE: loop exit
PB: predicated region body
PF: predicated region fallthrough
CT: control target
= control target key end

     0   :  { %s9288_s0 = inlined_call_operand.vmem [shape: f32[48,16], index: 0, kind: input, shape index: {}]   ;;  %s9289_s1 = inlined_call_operand.vmem [shape: f32[48,16], index: 1, kind: input, shape index: {}]   ;;  %s9290_s2 = inlined_call_operand.vmem [shape: f32[48,16], index: 2, kind: input, shape index: {}]   ;;  %s9291_s3 = inlined_call_operand.vmem [shape: f32[3,64], index: 3, kind: input, shape index: {}]   ;;  %s9292_s4 = inlined_call_operand.hbm [shape: f32[1,64], index: 4, kind: input, shape index: {}]   ;;  %s9293_s5 = inlined_call_operand.vmem [shape: bf16[192,64], index: 5, kind: input, shape index: {}]   ;;  %s9294_s6 = inlined_call_operand.hbm [shape: f32[1,64], index: 6, kind: input, shape index: {}]   ;;  %s9295_s7 = inlined_call_operand.hbm [shape: bf16[192,128], index: 7, kind: input, shape index: {}]   ;;  %s9296_s8 = inlined_call_operand.hbm [shape: f32[1,128], index: 8, kind: input, shape index: {}]   ;;  %s9297_s9 = inlined_call_operand.hbm [shape: bf16[384,128], index: 9, kind: input, shape index: {}]   ;;  %s9298_s10 = inlined_call_operand.hbm [shape: f32[1,128], index: 10, kind: input, shape index: {}]   ;;  %s9299_s11 = inlined_call_operand.hbm [shape: bf16[384,128], index: 11, kind: input, shape index: {}]   ;;  %s9300_s12 = inlined_call_operand.hbm [shape: f32[1,128], index: 12, kind: input, shape index: {}]   ;;  %s9301_s13 = inlined_call_operand.vmem [shape: bf16[384,256], index: 13, kind: input, shape index: {}]   ;;  %s9302_s14 = inlined_call_operand.vmem [shape: f32[1,256], index: 14, kind: input, shape index: {}]   ;;  %s9303_s15 = inlined_call_operand.vmem [shape: f32[192,256], index: 15, kind: output, shape index: {}]  }
   0x1   :  { %9320 = sst [smem:[#allocation24_spill]] %s9292_s4 }
   0x2   :  { %9321 = sst [smem:[#allocation25_spill]] %s9302_s14 }
   0x3   :  { %9322 = sst [smem:[#allocation26_spill]] %s9303_s15 }
   0x4   :  { %20 = vsyncpa [#allocation3], 0 }
   0x5   :  { %21 = vsyncpa [#allocation5], 0 }
   0x6   :  { %22 = vsyncpa [#allocation8], 0 }
   0x7   :  { %23 = vsyncpa [#allocation11], 0 }
   0x8   :  { %24 = vsyncpa [#allocation14], 0  ;;  %s6962_s18 = smov 0  }
   0x9 LB: > { %9323 = sst [smem:[#allocation20_spill]] %s6866_s18  ;;  %s6868_s19 = smov [#allocation4]   ;;  %s6866_s18 = sphi %s6962_s18, %s30_s18  }
   0xa   : > { %s421_s20 = sshll.u32 %s6868_s19, 4  ;;  %s6968_s21 = sadd.s32 4294967295, %s6866_s18   ;;  %s6973_s20 = int_to_ptr.vmem [resolvable:$true] %s421_s20 }
   0xb   : > { %p5911_p0 = scmp.ge.s32.totalorder %s6866_s18, 1  ;;  %p391_p1 = scmp.lt.s32.totalorder %s6866_s18, 7 }
   0xc   : > { %p9305_p2 = scmp.eq.s32.totalorder %s6968_s21, 0  ;;  %s6869_s23 = smov [#allocation7]  }
   0xd   : > { %p6975_p3 = pnand %p5911_p0, %p391_p1  ;;  %s445_s24 = sshll.u32 %s6869_s23, 4  ;;  %s6981_s24 = int_to_ptr.vmem [resolvable:$true] %s445_s24 }
   0xe   : > { %s6870_s25 = smov [#allocation10]   ;;  %s6871_s28 = smov [#allocation2]  }
   0xf   : > { %s9324_s22 = scalar_select %p6975_p3, 1, 0 }
  0x10   : > { %p6328_p4 = pneg %p6975_p3  ;;  %s469_s26 = sshll.u32 %s6870_s25, 4  ;;  %s6989_s26 = int_to_ptr.vmem [resolvable:$true] %s469_s26 }
  0x11   : > { %s407_s29 = sshll.u32 %s6871_s28, 4  ;;  %s6616_s17 = scalar_lea.hbm %s9294_s6, 16  ;;  %s6991_s29 = int_to_ptr.vmem [resolvable:$true] %s407_s29 }
  0x12   : > { %p6985_p5 = pnand %p9305_p2, %p6328_p4  ;;  %p6617_p6 = scmp.ne.s32.totalorder %s9294_s6, %s6616_s17 }
  0x13   : > { %p6623_p10 = scmp.lt.u32.totalorder %s6616_s17, %s9294_s6 }
  0x14   : > { %p7001_p7 = pneg %p6985_p5 }
  0x16   : > { %p6619_p8 = pnand %p7001_p7, %p6617_p6 }
  0x18   : > { %p6620_p9 = pneg %p6619_p8 }
  0x1a   : > { %p6625_p11 = pnand %p6623_p10, %p6620_p9 }
  0x1c   : > { %6628 = shalt.err (!%p6625_p11)
}
  0x1d   : > { %s6629_s30 = scalar_lea.vmem %s6973_s20, 16  ;;  %s6636_s16 = scalar_lea.vmem %s6973_s20, 32 }
  0x1e   : > { %p6630_p12 = scmp.ne.s32.totalorder %s6973_s20, %s6629_s30  ;;  %p6637_p1 = scmp.lt.s32.totalorder %s6973_s20, %s6973_s20 }
  0x1f   : > { %p6638_p4 = scmp.lt.s32.totalorder %s6636_s16, %s6629_s30 }
  0x20   : > { %p6632_p13 = pnand %p6630_p12, %p7001_p7 }
  0x21   : > { %p6639_p6 = por %p6638_p4, %p6637_p1 }
  0x22   : > { %p6633_p0 = pneg %p6632_p13 }
  0x24   : > { %p6640_p8 = pnand %p6639_p6, %p6633_p0 }
  0x26   : > { %6643 = shalt.err (!%p6640_p8)
}
  0x27   : > { %6334 = dma.hbm_to_vmem [thread:$0]  (!%p6985_p5), %s9294_s6, 16, %s6973_s20, [#allocation5]  }
  0x28   : > { %s6644_s28 = scalar_lea.hbm %s9296_s8, 16 }
  0x29   : > { %p6645_p9 = scmp.ne.s32.totalorder %s9296_s8, %s6644_s28  ;;  %p6651_p12 = scmp.lt.u32.totalorder %s6644_s28, %s9296_s8 }
  0x2b   : > { %p6647_p10 = pnand %p6645_p9, %p7001_p7 }
  0x2d   : > { %p6648_p11 = pneg %p6647_p10 }
  0x2f   : > { %p6653_p13 = pnand %p6651_p12, %p6648_p11 }
  0x31   : > { %6656 = shalt.err (!%p6653_p13)
}
  0x32   : > { %s6657_s20 = scalar_lea.vmem %s6981_s24, 16  ;;  %s6664_s14 = scalar_lea.vmem %s6981_s24, 32 }
  0x33   : > { %p6658_p0 = scmp.ne.s32.totalorder %s6981_s24, %s6657_s20  ;;  %p6665_p6 = scmp.lt.s32.totalorder %s6981_s24, %s6981_s24 }
  0x34   : > { %p6666_p8 = scmp.lt.s32.totalorder %s6664_s14, %s6657_s20 }
  0x35   : > { %p6660_p1 = pnand %p6658_p0, %p7001_p7 }
  0x36   : > { %p6667_p9 = por %p6666_p8, %p6665_p6 }
  0x37   : > { %p6661_p4 = pneg %p6660_p1 }
  0x39   : > { %p6668_p10 = pnand %p6667_p9, %p6661_p4 }
  0x3b   : > { %6671 = shalt.err (!%p6668_p10)
}
  0x3c   : > { %6340 = dma.hbm_to_vmem [thread:$0]  (!%p6985_p5), %s9296_s8, 16, %s6981_s24, [#allocation8]  }
  0x3d   : > { %s6672_s23 = scalar_lea.hbm %s9298_s10, 16 }
  0x3e   : > { %p6673_p11 = scmp.ne.s32.totalorder %s9298_s10, %s6672_s23  ;;  %p6679_p0 = scmp.lt.u32.totalorder %s6672_s23, %s9298_s10 }
  0x40   : > { %p6675_p12 = pnand %p6673_p11, %p7001_p7 }
  0x42   : > { %p6676_p13 = pneg %p6675_p12 }
  0x44   : > { %p6681_p1 = pnand %p6679_p0, %p6676_p13 }
  0x46   : > { %6684 = shalt.err (!%p6681_p1)
}
  0x47   : > { %s6685_s24 = scalar_lea.vmem %s6989_s26, 16  ;;  %s6692_s14 = scalar_lea.vmem %s6989_s26, 32 }
  0x48   : > { %p6686_p4 = scmp.ne.s32.totalorder %s6989_s26, %s6685_s24  ;;  %p6693_p9 = scmp.lt.s32.totalorder %s6989_s26, %s6989_s26 }
  0x49   : > { %p6694_p10 = scmp.lt.s32.totalorder %s6692_s14, %s6685_s24 }
  0x4a   : > { %p6688_p6 = pnand %p6686_p4, %p7001_p7 }
  0x4b   : > { %p6695_p11 = por %p6694_p10, %p6693_p9 }
  0x4c   : > { %p6689_p8 = pneg %p6688_p6 }
  0x4e   : > { %p6696_p12 = pnand %p6695_p11, %p6689_p8 }
  0x50   : > { %6699 = shalt.err (!%p6696_p12)
}
  0x51   : > { %6346 = dma.hbm_to_vmem [thread:$0]  (!%p6985_p5), %s9298_s10, 16, %s6989_s26, [#allocation11]  }
  0x52   : > { %s9327_s4 = sld [smem:[#allocation24_spill]] }
  0x58   : > { %s6700_s23 = scalar_lea.hbm %s9327_s4, 16 }
  0x59   : > { %p6701_p13 = scmp.ne.s32.totalorder %s9327_s4, %s6700_s23  ;;  %p6707_p4 = scmp.lt.u32.totalorder %s6700_s23, %s9327_s4 }
  0x5b   : > { %p6703_p0 = pnand %p6701_p13, %p7001_p7 }
  0x5d   : > { %p6704_p1 = pneg %p6703_p0 }
  0x5f   : > { %p6709_p6 = pnand %p6707_p4, %p6704_p1 }
  0x61   : > { %6712 = shalt.err (!%p6709_p6)
}
  0x62   : > { %s6713_s26 = scalar_lea.vmem %s6991_s29, 16  ;;  %s6720_s24 = scalar_lea.vmem %s6991_s29, 32 }
  0x63   : > { %p6714_p8 = scmp.ne.s32.totalorder %s6991_s29, %s6713_s26  ;;  %p6721_p11 = scmp.lt.s32.totalorder %s6991_s29, %s6991_s29 }
  0x64   : > { %p6722_p12 = scmp.lt.s32.totalorder %s6720_s24, %s6713_s26 }
  0x65   : > { %p6716_p9 = pnand %p6714_p8, %p7001_p7 }
  0x66   : > { %p6723_p13 = por %p6722_p12, %p6721_p11 }
  0x67   : > { %p6717_p10 = pneg %p6716_p9 }
  0x69   : > { %p6724_p0 = pnand %p6723_p13, %p6717_p10 }
  0x6b   : > { %6727 = shalt.err (!%p6724_p0)
}
  0x6c   : > { %6331 = dma.hbm_to_vmem [thread:$0]  (!%p6985_p5), %s9327_s4, 16, %s6991_s29, [#allocation3]  }
  0x6d   : > { %s6872_s18 = smov [#allocation6]   ;;  %s6728_s28 = scalar_lea.hbm %s9295_s7, 1536 }
  0x6e   : > { %s431_s17 = sshll.u32 %s6872_s18, 4  ;;  %p6729_p1 = scmp.ne.s32.totalorder %s9295_s7, %s6728_s28  ;;  %s432_s17 = int_to_ptr.vmem [resolvable:$true] %s431_s17 }
  0x6f   : > { %p6735_p8 = scmp.lt.u32.totalorder %s6728_s28, %s9295_s7 }
  0x70   : > { %p6731_p4 = pnand %p6729_p1, %p7001_p7 }
  0x72   : > { %p6732_p6 = pneg %p6731_p4 }
  0x74   : > { %p6737_p9 = pnand %p6735_p8, %p6732_p6 }
  0x76   : > { %6740 = shalt.err (!%p6737_p9)
}
  0x77   : > { %s6741_s29 = scalar_lea.vmem %s432_s17, 1536  ;;  %p6749_p13 = scmp.lt.s32.totalorder %s432_s17, %s432_s17 }
  0x78   : > { %p6742_p10 = scmp.ne.s32.totalorder %s432_s17, %s6741_s29  ;;  %p6750_p0 = scmp.lt.s32.totalorder %s6741_s29, %s6741_s29 }
  0x7a   : > { %p6744_p11 = pnand %p6742_p10, %p7001_p7  ;;  %p6751_p2 = por %p6750_p0, %p6749_p13 }
  0x7c   : > { %p6745_p12 = pneg %p6744_p11 }
  0x7e   : > { %p6752_p3 = pnand %p6751_p2, %p6745_p12 }
  0x80   : > { %6755 = shalt.err (!%p6752_p3)
}
  0x81   : > { %s6873_s24 = smov 64   ;;  %s6874_s14 = smov 4  }
  0x82   : > { %6337 = dma.hbm_to_vmem [thread:$0]  (!%p6985_p5), %s9295_s7, 1536, %s432_s17, [#allocation5], %s6873_s24, %s6873_s24, %s6874_s14  }
  0x83   : > { %s6875_s19 = smov [#allocation9]   ;;  %s6876_s28 = smov [#allocation12]  }
  0x84   : > { %s455_s23 = sshll.u32 %s6875_s19, 4  ;;  %s479_s30 = sshll.u32 %s6876_s28, 4  ;;  %s456_s23 = int_to_ptr.vmem [resolvable:$true] %s455_s23  ;;  %s7116_s30 = int_to_ptr.vmem [resolvable:$true] %s479_s30 }
  0x85   : > { %s6756_s26 = scalar_lea.hbm %s9297_s9, 3072 }
  0x86   : > { %p6757_p2 = scmp.ne.s32.totalorder %s9297_s9, %s6756_s26  ;;  %p6763_p4 = scmp.lt.u32.totalorder %s6756_s26, %s9297_s9 }
  0x88   : > { %p6759_p3 = pnand %p6757_p2, %p7001_p7 }
  0x8a   : > { %p6760_p1 = pneg %p6759_p3 }
  0x8c   : > { %p6765_p6 = pnand %p6763_p4, %p6760_p1 }
  0x8e   : > { %6768 = shalt.err (!%p6765_p6)
}
  0x8f   : > { %s6769_s18 = scalar_lea.vmem %s456_s23, 3072  ;;  %p6777_p11 = scmp.lt.s32.totalorder %s456_s23, %s456_s23 }
  0x90   : > { %p6770_p8 = scmp.ne.s32.totalorder %s456_s23, %s6769_s18  ;;  %p6778_p12 = scmp.lt.s32.totalorder %s6769_s18, %s6769_s18 }
  0x92   : > { %p6772_p9 = pnand %p6770_p8, %p7001_p7  ;;  %p6779_p13 = por %p6778_p12, %p6777_p11 }
  0x94   : > { %p6773_p10 = pneg %p6772_p9 }
  0x96   : > { %p6780_p0 = pnand %p6779_p13, %p6773_p10 }
  0x98   : > { %6783 = shalt.err (!%p6780_p0)
}
  0x99   : > { %6343 = dma.hbm_to_vmem [thread:$0]  (!%p6985_p5), %s9297_s9, 3072, %s456_s23, [#allocation8], %s6873_s24, %s6873_s24, %s6874_s14  }
  0x9a   : > { %s6784_s20 = scalar_lea.hbm %s9299_s11, 3072 }
  0x9b   : > { %p6785_p2 = scmp.ne.s32.totalorder %s9299_s11, %s6784_s20  ;;  %p6791_p4 = scmp.lt.u32.totalorder %s6784_s20, %s9299_s11 }
  0x9d   : > { %p6787_p3 = pnand %p6785_p2, %p7001_p7 }
  0x9f   : > { %p6788_p1 = pneg %p6787_p3 }
  0xa1   : > { %p6793_p6 = pnand %p6791_p4, %p6788_p1 }
  0xa3   : > { %6796 = shalt.err (!%p6793_p6)
}
  0xa4   : > { %s6797_s23 = scalar_lea.vmem %s7116_s30, 3072  ;;  %p6805_p11 = scmp.lt.s32.totalorder %s7116_s30, %s7116_s30 }
  0xa5   : > { %p6798_p8 = scmp.ne.s32.totalorder %s7116_s30, %s6797_s23  ;;  %p6806_p12 = scmp.lt.s32.totalorder %s6797_s23, %s6797_s23 }
  0xa7   : > { %p6800_p9 = pnand %p6798_p8, %p7001_p7  ;;  %p6807_p13 = por %p6806_p12, %p6805_p11 }
  0xa9   : > { %p6801_p10 = pneg %p6800_p9 }
  0xab   : > { %p6808_p0 = pnand %p6807_p13, %p6801_p10 }
  0xad   : > { %6811 = shalt.err (!%p6808_p0)
}
  0xae   : > { %6349 = dma.hbm_to_vmem [thread:$0]  (!%p6985_p5), %s9299_s11, 3072, %s7116_s30, [#allocation11], %s6873_s24, %s6873_s24, %s6874_s14  }
  0xaf   : > { %s6877_s19 = smov [#allocation13]   ;;  %s6812_s26 = scalar_lea.hbm %s9300_s12, 16 }
  0xb0   : > { %s493_s28 = sshll.u32 %s6877_s19, 4  ;;  %p6813_p2 = scmp.ne.s32.totalorder %s9300_s12, %s6812_s26  ;;  %s494_s28 = int_to_ptr.vmem [resolvable:$true] %s493_s28 }
  0xb1   : > { %p6819_p4 = scmp.lt.u32.totalorder %s6812_s26, %s9300_s12 }
  0xb2   : > { %p6815_p3 = pnand %p6813_p2, %p7001_p7 }
  0xb4   : > { %p6816_p1 = pneg %p6815_p3 }
  0xb6   : > { %p6821_p6 = pnand %p6819_p4, %p6816_p1 }
  0xb8   : > { %6824 = shalt.err (!%p6821_p6)
}
  0xb9   : > { %s6825_s24 = scalar_lea.vmem %s494_s28, 16  ;;  %s6832_s14 = scalar_lea.vmem %s494_s28, 32 }
  0xba   : > { %p6826_p8 = scmp.ne.s32.totalorder %s494_s28, %s6825_s24  ;;  %p6833_p11 = scmp.lt.s32.totalorder %s494_s28, %s494_s28 }
  0xbb   : > { %p6834_p12 = scmp.lt.s32.totalorder %s6832_s14, %s6825_s24 }
  0xbc   : > { %p6828_p9 = pnand %p6826_p8, %p7001_p7 }
  0xbd   : > { %p6835_p13 = por %p6834_p12, %p6833_p11 }
  0xbe   : > { %p6829_p10 = pneg %p6828_p9 }
  0xc0   : > { %p6836_p0 = pnand %p6835_p13, %p6829_p10 }
  0xc2   : > { %6839 = shalt.err (!%p6836_p0)
}
  0xc3   : > { %6352 = dma.hbm_to_vmem [thread:$0]  (!%p6985_p5), %s9300_s12, 16, %s494_s28, [#allocation14]  }
  0xc4   : > { %p9328_p2 = scmp.ne.s32.totalorder %s9324_s22, 0 }
  0xc6   : > { %533 = sbr.rel (%p9328_p2) target bundleno = 2166 (0x876), region = 80 }
  0xcd   : > { %p9329_p3 = scmp.eq.s32.totalorder %s6968_s21, 0 }
  0xcf   : > { %6845 = dma.done.wait (%p9329_p3), [#allocation3], 16   ;;  %p9330_p7 = pmov %p9329_p3 }
  0xd0   : > { %p9331_p1 = pmov %p9329_p3 }
  0xd1   : > { %6847 = vsyncadd (%p9330_p7), [#allocation3], 4294967280 }
  0xd2   : > { %6849 = dma.done.wait (%p9331_p1), [#allocation5], 1552   ;;  %p9332_p4 = pmov %p9331_p1 }
  0xd3   : > { %p9333_p6 = pmov %p9331_p1 }
  0xd4   : > { %6851 = vsyncadd (%p9332_p4), [#allocation5], 4294965744 }
  0xd5   : > { %6853 = dma.done.wait (%p9333_p6), [#allocation8], 3088   ;;  %p9334_p5 = pmov %p9331_p1 }
  0xd6   : > { %p9335_p8 = pmov %p9331_p1 }
  0xd7   : > { %6855 = vsyncadd (%p9334_p5), [#allocation8], 4294964208 }
  0xd8   : > { %6857 = dma.done.wait (%p9335_p8), [#allocation11], 3088   ;;  %p9336_p9 = pmov %p9331_p1 }
  0xd9   : > { %p9337_p10 = pmov %p9331_p1 }
  0xda   : > { %6859 = vsyncadd (%p9336_p9), [#allocation11], 4294964208 }
  0xdb   : > { %6861 = dma.done.wait (%p9337_p10), [#allocation14], 16   ;;  %p9338_p11 = pmov %p9331_p1 }
  0xdc   : > { %p617_p12 = scmp.lt.s32.totalorder %s6968_s21, 5  ;;  %v639_v0 = vlaneseq  ;;  %v6471_v34 = vld [vmem:[%s9293_s5] sm:$0xff]   ;;  %v9307_v36 = vmov 0   ;;  %v6472_v38 = vld [vmem:[%s9293_s5 + $0x8] sm:$0xff]   ;;  %v6473_v40 = vld [vmem:[%s9293_s5 + $0x10] sm:$0xff]   ;;  %s6879_s4 = smov 64  }
  0xdd   : > { %6863 = vsyncadd (%p9338_p11), [#allocation14], 4294967280  ;;  %1679 = vmatprep.subr.bf16.mxu1 %v9307_v36  ;;  %v6474_v41 = vld [vmem:[%s9293_s5 + $0x18] sm:$0xff]   ;;  %v6475_v42 = vld [vmem:[%s9293_s5 + $0x20] sm:$0xff]   ;;  %vm1519_vm3 = vcmask 523264   ;;  %s9381_s28 = sld [smem:[#allocation26_spill]] }
  0xde   : > { %s618_s22 = scalar_select %p617_p12, %s6968_s21, 5  ;;  %v7207_v1 = vshrl.u32 %v639_v0, 7  ;;  %1680 = vmatpush1.bf16.msra.mxu1 %v6471_v34  ;;  %v6476_v43 = vld [vmem:[%s9293_s5 + $0x28] sm:$0xff]   ;;  %v6477_v44 = vld [vmem:[%s9293_s5 + $0x30] sm:$0xff]   ;;  %v6478_v45 = vld [vmem:[%s9293_s5 + $0x38] sm:$0xff]  }
  0xdf   : > { %1681 = vmatprep.subr.bf16.mxu1 %v9307_v36  ;;  %v6479_v46 = vld [vmem:[%s9293_s5 + $0x40] sm:$0xff]   ;;  %v6480_v48 = vld [vmem:[%s9293_s5 + $0x48] sm:$0xff]   ;;  %v6481_v53 = vld [vmem:[%s9293_s5 + $0x50] sm:$0xff]  }
  0xe0   : > { %s5930_s27 = sshll.u32 %s618_s22, 3  ;;  %v7210_v2 = vsub.s32 0, %v7207_v1  ;;  %v7228_v6 = vsub.s32 1, %v7207_v1  ;;  %v7241_v12 = vsub.s32 2, %v7207_v1  ;;  %v674_v17 = vsub.s32 3, %v7207_v1  ;;  %s9377_s22 = sld [smem:[#allocation25_spill]] }
  0xe1   : > { %s620_s19 = scalar_lea.vmem %s9288_s0, %s5930_s27  ;;  %s624_s20 = scalar_lea.vmem %s9289_s1, %s5930_s27  ;;  %v685_v21 = vsub.s32 4, %v7207_v1  ;;  %v696_v25 = vsub.s32 5, %v7207_v1  ;;  %v707_v29 = vsub.s32 6, %v7207_v1  ;;  %v718_v33 = vsub.s32 7, %v7207_v1  ;;  %v637_v47 = vld [vmem:[%s9291_s3] sm:$0x7] }
  0xe2   : > { %9339 = vst [vmem:[#allocation21_spill] sm:$0xff] %v7210_v2  ;;  %s628_s15 = scalar_lea.vmem %s9290_s2, %s5930_s27  ;;  %v7221_v3 = vld [vmem:[%s620_s19] sm:$0xff]  ;;  %9340 = vst [vmem:[#allocation22_spill] sm:$0xff] %v7228_v6  ;;  %1682 = vmatpush1.bf16.msra.mxu1 %v6472_v38  ;;  %v7315_v51 = vrot.slane %v637_v47, %v7210_v2  ;;  %v7318_v52 = vrot.slane %v637_v47, %v7228_v6  ;;  %v7325_v55 = vrot.slane %v637_v47, %v7241_v12  ;;  %s5933_s27 = sshll.u32 %s6968_s21, 2 }
  0xe3   : > { %v751_v4 = vrot.slane %v7221_v3, %v7210_v2  ;;  %v7225_v5 = vld [vmem:[%s624_s20] sm:$0xff]  ;;  %v762_v11 = vrot.slane %v7221_v3, %v7228_v6  ;;  %v773_v15 = vrot.slane %v7221_v3, %v7241_v12  ;;  %v784_v19 = vrot.slane %v7221_v3, %v674_v17  ;;  %1683 = vmatprep.subr.bf16.mxu1 %v9307_v36  ;;  %p9033_p13 = scmp.lt.s32.totalorder %s5933_s27, 23 }
  0xe4   : > { %v642_v7 = vrot.slane %v7225_v5, %v7210_v2  ;;  %v7232_v8 = vld [vmem:[%s628_s15] sm:$0xff]  ;;  %v653_v10 = vrot.slane %v7225_v5, %v7228_v6  ;;  %v664_v14 = vrot.slane %v7225_v5, %v7241_v12  ;;  %v675_v18 = vrot.slane %v7225_v5, %v674_v17 }
  0xe5   : > { %753 = vbcast.lane.b32.xlu1 %v751_v4, 256  ;;  %v876_v9 = vrot.slane %v7232_v8, %v7210_v2  ;;  %v887_v13 = vrot.slane %v7232_v8, %v7228_v6  ;;  %v898_v16 = vrot.slane %v7232_v8, %v7241_v12  ;;  %v909_v20 = vrot.slane %v7232_v8, %v674_v17  ;;  %s9384_s27 = smov (!%p9033_p13, %s5933_s27), 23 }
  0xe6   : > { %644 = vbcast.lane.b32.xlu0 %v642_v7, 256  ;;  %v686_v22 = vrot.slane %v7225_v5, %v685_v21  ;;  %v795_v23 = vrot.slane %v7221_v3, %v685_v21  ;;  %v920_v24 = vrot.slane %v7232_v8, %v685_v21  ;;  %v697_v26 = vrot.slane %v7225_v5, %v696_v25  ;;  %s6111_s21 = sshll.u32 %s9384_s27, 4 }
  0xe7   : > { %v806_v27 = vrot.slane %v7221_v3, %v696_v25  ;;  %v931_v28 = vrot.slane %v7232_v8, %v696_v25  ;;  %v708_v30 = vrot.slane %v7225_v5, %v707_v29  ;;  %v817_v31 = vrot.slane %v7221_v3, %v707_v29  ;;  %1684 = vmatpush1.bf16.msra.mxu1 %v6473_v40  ;;  %s9054_s16 = scalar_lea.vmem %s9381_s28, %s6111_s21 }
  0xe8   : > { %v942_v32 = vrot.slane %v7232_v8, %v707_v29  ;;  %v828_v35 = vrot.slane %v7221_v3, %v718_v33  ;;  %v719_v37 = vrot.slane %v7225_v5, %v718_v33  ;;  %v953_v39 = vrot.slane %v7232_v8, %v718_v33  ;;  %1685 = vmatprep.subr.bf16.mxu1 %v9307_v36  ;;  %v6482_v3 = vld [vmem:[%s9293_s5 + $0x58] sm:$0xff]   ;;  %v7336_v5 = vld [vmem:[#allocation2] ss:$0 sm:$0xff] }
  0xe9   : > { %757 = vbcast.lane.b32.xlu1 %v751_v4, 264  ;;  %vm1373_vm0 = vcmp.lt.s32.totalorder %v7207_v1, 1  ;;  %vm1422_vm2 = vcmp.lt.s32.totalorder %v7207_v1, 7 }
  0xea   : > { %648 = vbcast.lane.b32.xlu0 %v642_v7, 264 }
  0xeb   : > { %1686 = vmatpush1.bf16.msra.mxu1 %v6474_v41 }
  0xec   : > { %1687 = vmatprep.subr.bf16.mxu1 %v9307_v36 }
  0xed   : > { %882 = vbcast.lane.b32.xlu1 %v876_v9, 264 }
  0xee   : > { %878 = vbcast.lane.b32.xlu0 %v876_v9, 256 }
  0xef   : > { %1688 = vmatpush1.bf16.msra.mxu1 %v6475_v42 }
  0xf0   : > { %1689 = vmatprep.subr.bf16.mxu1 %v9307_v36 }
  0xf1   : > { %659 = vbcast.lane.b32.xlu1 %v653_v10, 264 }
  0xf2   : > { %655 = vbcast.lane.b32.xlu0 %v653_v10, 256 }
  0xf3   : > { %1690 = vmatpush1.bf16.msra.mxu1 %v6476_v43 }
  0xf4   : > { %1691 = vmatprep.subr.bf16.mxu1 %v9307_v36 }
  0xf5   : > { %768 = vbcast.lane.b32.xlu1 %v762_v11, 264 }
  0xf6   : > { %764 = vbcast.lane.b32.xlu0 %v762_v11, 256 }
  0xf7   : > { %1692 = vmatpush1.bf16.msra.mxu1 %v6477_v44 }
  0xf8   : > { %1693 = vmatprep.subr.bf16.mxu1 %v9307_v36 }
  0xf9   : > { %893 = vbcast.lane.b32.xlu1 %v887_v13, 264 }
  0xfa   : > { %889 = vbcast.lane.b32.xlu0 %v887_v13, 256 }
  0xfb   : > { %1694 = vmatpush1.bf16.msra.mxu1 %v6478_v45 }
  0xfc   : > { %1695 = vmatprep.subr.bf16.mxu1 %v9307_v36 }
  0xfd   : > { %670 = vbcast.lane.b32.xlu1 %v664_v14, 264 }
  0xfe   : > { %666 = vbcast.lane.b32.xlu0 %v664_v14, 256 }
  0xff   : > { %1696 = vmatpush1.bf16.msra.mxu1 %v6479_v46 }
 0x100   : > { %1697 = vmatprep.subr.bf16.mxu1 %v9307_v36 }
 0x101   : > { %779 = vbcast.lane.b32.xlu1 %v773_v15, 264 }
 0x102   : > { %775 = vbcast.lane.b32.xlu0 %v773_v15, 256 }
 0x103   : > { %1698 = vmatpush1.bf16.msra.mxu1 %v6480_v48 }
 0x104   : > { %1699 = vmatprep.subr.bf16.mxu1 %v9307_v36 }
 0x105   : > { %904 = vbcast.lane.b32.xlu1 %v898_v16, 264 }
 0x106   : > { %900 = vbcast.lane.b32.xlu0 %v898_v16, 256 }
 0x107   : > { %1700 = vmatpush1.bf16.msra.mxu1 %v6481_v53  ;;  %v9310_v53 = vmov 0.0  }
 0x108   : > { %1701 = vmatprep.subr.bf16.mxu1 %v9307_v36 }
 0x109   : > { %681 = vbcast.lane.b32.xlu1 %v675_v18, 264 }
 0x10a   : > { %677 = vbcast.lane.b32.xlu0 %v675_v18, 256 }
 0x10b   : > { %1702 = vmatpush1.bf16.msra.mxu1 %v6482_v3 }
 0x10c   : > { %2127 = vmatprep.subr.bf16.mxu1 %v9307_v36 }
 0x10d   : > { %790 = vbcast.lane.b32.xlu1 %v784_v19, 264 }
 0x10e   : > { %786 = vbcast.lane.b32.xlu0 %v784_v19, 256 }
 0x111   : > { %915 = vbcast.lane.b32.xlu1 %v909_v20, 264 }
 0x112   : > { %911 = vbcast.lane.b32.xlu0 %v909_v20, 256 }
 0x115   : > { %692 = vbcast.lane.b32.xlu1 %v686_v22, 264 }
 0x116   : > { %688 = vbcast.lane.b32.xlu0 %v686_v22, 256 }
 0x119   : > { %801 = vbcast.lane.b32.xlu1 %v795_v23, 264 }
 0x11a   : > { %797 = vbcast.lane.b32.xlu0 %v795_v23, 256 }
 0x11d   : > { %926 = vbcast.lane.b32.xlu1 %v920_v24, 264 }
 0x11e   : > { %922 = vbcast.lane.b32.xlu0 %v920_v24, 256  ;;  %v7351_v24 = vadd.s32 8, %v7207_v1 }
 0x121   : > { %703 = vbcast.lane.b32.xlu1 %v697_v26, 264 }
 0x122   : > { %699 = vbcast.lane.b32.xlu0 %v697_v26, 256 }
 0x125   : > { %812 = vbcast.lane.b32.xlu1 %v806_v27, 264 }
 0x126   : > { %808 = vbcast.lane.b32.xlu0 %v806_v27, 256 }
 0x129   : > { %937 = vbcast.lane.b32.xlu1 %v931_v28, 264 }
 0x12a   : > { %933 = vbcast.lane.b32.xlu0 %v931_v28, 256 }
 0x12d   : > { %714 = vbcast.lane.b32.xlu1 %v708_v30, 264 }
 0x12e   : > { %710 = vbcast.lane.b32.xlu0 %v708_v30, 256 }
 0x131   : > { %823 = vbcast.lane.b32.xlu1 %v817_v31, 264 }
 0x132   : > { %819 = vbcast.lane.b32.xlu0 %v817_v31, 256 }
 0x135   : > { %948 = vbcast.lane.b32.xlu1 %v942_v32, 264 }
 0x136   : > { %944 = vbcast.lane.b32.xlu0 %v942_v32, 256 }
 0x139   : > { %834 = vbcast.lane.b32.xlu1 %v828_v35, 264 }
 0x13a   : > { %725 = vbcast.lane.b32.xlu0 %v719_v37, 264 }
 0x13d   : > { %721 = vbcast.lane.b32.xlu1 %v719_v37, 256  ;;  %v1080_v37 = vand.u32 15, %v7351_v24 }
 0x13e   : > { %959 = vbcast.lane.b32.xlu0 %v953_v39, 264 }
 0x13f   : > { %vm1310_vm1 = vcmp.ne.s32.totalorder %v1080_v37, 15 }
 0x141   : > { %955 = vbcast.lane.b32.xlu1 %v953_v39, 256 }
 0x142   : > { %830 = vbcast.lane.b32.xlu0 %v828_v35, 256 }
 0x157   : > { %v754_v49 = vpop.permute.xlu1 %753 }
 0x158   : > { %v645_v50 = vpop.permute.xlu0 %644  ;;  %v840_v58 = vmul.f32 %v7318_v52, %v754_v49 }
 0x159   : > { %v731_v59 = vmul.f32 %v7315_v51, %v645_v50 }
 0x15b   : > { %v758_v54 = vpop.permute.xlu1 %757  ;;  %v856_v4 = vadd.f32 %v840_v58, %v731_v59 }
 0x15c   : > { %v841_v56 = vmul.f32 %v7318_v52, %v758_v54  ;;  %v649_v57 = vpop.permute.xlu0 %648  ;;  %v7376_v54 = vsel %vm1310_vm1, 1.0, %v9310_v53 }
 0x15d   : > { %v732_v60 = vmul.f32 %v7315_v51, %v649_v57 }
 0x15f   : > { %v883_v61 = vpop.permute.xlu1 %882  ;;  %v857_v62 = vadd.f32 %v841_v56, %v732_v60 }
 0x160   : > { %v966_v63 = vmul.f32 %v7325_v55, %v883_v61  ;;  %v879_v0 = vpop.permute.xlu0 %878 }
 0x161   : > { %v965_v7 = vmul.f32 %v7325_v55, %v879_v0 }
 0x162   : > { %v982_v8 = vadd.f32 %v966_v63, %v857_v62 }
 0x163   : > { %v981_v9 = vadd.f32 %v965_v7, %v856_v4  ;;  %v660_v10 = vpop.permute.xlu1 %659 }
 0x164   : > { %v1005_v11 = vadd.f32 %v7336_v5, %v982_v8  ;;  %v656_v12 = vpop.permute.xlu0 %655  ;;  %v734_v23 = vmul.f32 %v7315_v51, %v660_v10  ;;  %v7387_v10 = vadd.s32 24, %v7207_v1 }
 0x165   : > { %v1004_v13 = vadd.f32 %v7336_v5, %v981_v9  ;;  %v733_v26 = vmul.f32 %v7315_v51, %v656_v12 }
 0x166   : > { %v1021_v14 = vmul.f32 0.1, %v1005_v11 }
 0x167   : > { %v1020_v15 = vmul.f32 0.1, %v1004_v13  ;;  %v769_v16 = vpop.permute.xlu1 %768 }
 0x168   : > { %v7342_v17 = vmax.f32 %v1005_v11, %v1021_v14  ;;  %v843_v18 = vmul.f32 %v7318_v52, %v769_v16  ;;  %v765_v19 = vpop.permute.xlu0 %764 }
 0x169   : > { %v7345_v20 = vmax.f32 %v1004_v13, %v1020_v15  ;;  %v842_v21 = vmul.f32 %v7318_v52, %v765_v19 }
 0x16a   : > { %v1358_v22 = vrot.slane %v7342_v17, 7  ;;  %v859_v29 = vadd.f32 %v843_v18, %v734_v23  ;;  %v1407_v56 = vrot.slane %v7342_v17, 1 }
 0x16b   : > { %v9309_v25 = vrot.slane %v7345_v20, 7  ;;  %v894_v27 = vpop.permute.xlu1 %893  ;;  %v6391_v28 = vpack.i.bf16 %v7342_v17, %v7345_v20  ;;  %v858_v32 = vadd.f32 %v842_v21, %v733_v26  ;;  %v1406_v0 = vrot.slane %v7345_v20, 1 }
 0x16c   : > { %v968_v30 = vmul.f32 %v7325_v55, %v894_v27  ;;  %v890_v31 = vpop.permute.xlu0 %889 }
 0x16d   : > { %v967_v33 = vmul.f32 %v7325_v55, %v890_v31  ;;  %6392 = vrot.lane.b32.xlu0 %v6391_v28, %s6879_s4  ;;  %v7365_v34 = vsel %vm1373_vm0, %v9309_v25, %v1358_v22  ;;  %v1437_v21 = vsel %vm1422_vm2, %v1406_v0, %v1407_v56  ;;  %v1094_v28 = vand.u32 15, %v7387_v10 }
 0x16e   : > { %v984_v35 = vadd.f32 %v968_v30, %v859_v29 }
 0x16f   : > { %v983_v38 = vadd.f32 %v967_v33, %v858_v32  ;;  %v671_v39 = vpop.permute.xlu1 %670  ;;  %vm1312_vm4 = vcmp.ne.s32.totalorder %v1094_v28, 15 }
 0x170   : > { %v1007_v40 = vadd.f32 %v7336_v5, %v984_v35  ;;  %v667_v41 = vpop.permute.xlu0 %666  ;;  %v736_v59 = vmul.f32 %v7315_v51, %v671_v39 }
 0x171   : > { %v1006_v42 = vadd.f32 %v7336_v5, %v983_v38  ;;  %v735_v60 = vmul.f32 %v7315_v51, %v667_v41 }
 0x172   : > { %v1023_v43 = vmul.f32 0.1, %v1007_v40 }
 0x173   : > { %v1022_v44 = vmul.f32 0.1, %v1006_v42  ;;  %v780_v45 = vpop.permute.xlu1 %779 }
 0x174   : > { %v7370_v46 = vmax.f32 %v1007_v40, %v1023_v43  ;;  %v845_v47 = vmul.f32 %v7318_v52, %v780_v45  ;;  %v776_v48 = vpop.permute.xlu0 %775 }
 0x175   : > { %v1038_v49 = vmax.f32 %v1006_v42, %v1022_v44  ;;  %v844_v50 = vmul.f32 %v7318_v52, %v776_v48  ;;  %v7426_v48 = vsel %vm1312_vm4, 1.0, %v9310_v53 }
 0x176   : > { %v1360_v57 = vrot.slane %v7370_v46, 7  ;;  %v1409_v58 = vrot.slane %v7370_v46, 1  ;;  %v861_v4 = vadd.f32 %v845_v47, %v736_v59 }
 0x177   : > { %v1359_v61 = vrot.slane %v1038_v49, 7  ;;  %v905_v62 = vpop.permute.xlu1 %904  ;;  %v6396_v63 = vpack.i.bf16 %v7370_v46, %v1038_v49  ;;  %v1408_v3 = vrot.slane %v1038_v49, 1  ;;  %v860_v7 = vadd.f32 %v844_v50, %v735_v60 }
 0x178   : > { %v970_v8 = vmul.f32 %v7325_v55, %v905_v62  ;;  %v901_v9 = vpop.permute.xlu0 %900  ;;  %v7430_v60 = vadd.s32 40, %v7207_v1 }
 0x179   : > { %v969_v11 = vmul.f32 %v7325_v55, %v901_v9  ;;  %6397 = vrot.lane.b32.xlu1 %v6396_v63, %s6879_s4  ;;  %v1436_v12 = vsel %vm1422_vm2, %v1407_v56, %v1408_v3  ;;  %v7395_v13 = vsel %vm1422_vm2, %v1408_v3, %v1409_v58  ;;  %v7401_v14 = vsel %vm1373_vm0, %v1359_v61, %v1360_v57 }
 0x17a   : > { %v986_v15 = vadd.f32 %v970_v8, %v861_v4  ;;  %v1440_v16 = vmul.f32 %v7376_v54, %v1436_v12  ;;  %v7406_v17 = vsel %vm1373_vm0, %v1358_v22, %v1359_v61 }
 0x17b   : > { %v985_v18 = vadd.f32 %v969_v11, %v860_v7  ;;  %v682_v19 = vpop.permute.xlu1 %681 }
 0x17c   : > { %v1009_v23 = vadd.f32 %v7336_v5, %v986_v15  ;;  %v678_v26 = vpop.permute.xlu0 %677  ;;  %v1537_v27 = vpack.c.bf16 %v1440_v16, %v1437_v21  ;;  %v738_v41 = vmul.f32 %v7315_v51, %v682_v19  ;;  %v1108_v16 = vand.u32 15, %v7430_v60 }
 0x17d   : > { %v1008_v29 = vadd.f32 %v7336_v5, %v985_v18  ;;  %v737_v42 = vmul.f32 %v7315_v51, %v678_v26 }
 0x17e   : > { %v1025_v30 = vmul.f32 0.1, %v1009_v23  ;;  %5966 = vmatprep.mubr.msk.bf16.mxu1 %vm1519_vm3, %v1537_v27  ;;  %vm1314_vm5 = vcmp.ne.s32.totalorder %v1108_v16, 15 }
 0x17f   : > { %v1024_v22 = vmul.f32 0.1, %v1008_v29  ;;  %v791_v31 = vpop.permute.xlu1 %790 }
 0x180   : > { %v7416_v32 = vmax.f32 %v1009_v23, %v1025_v30  ;;  %v847_v33 = vmul.f32 %v7318_v52, %v791_v31  ;;  %v787_v35 = vpop.permute.xlu0 %786 }
 0x181   : > { %v1040_v37 = vmax.f32 %v1008_v29, %v1024_v22  ;;  %v846_v38 = vmul.f32 %v7318_v52, %v787_v35 }
 0x182   : > { %v1362_v39 = vrot.slane %v7416_v32, 7  ;;  %v1411_v40 = vrot.slane %v7416_v32, 1  ;;  %v863_v49 = vadd.f32 %v847_v33, %v738_v41 }
 0x183   : > { %v1361_v43 = vrot.slane %v1040_v37, 7  ;;  %v1410_v44 = vrot.slane %v1040_v37, 1  ;;  %v916_v45 = vpop.permute.xlu1 %915  ;;  %v6401_v47 = vpack.i.bf16 %v7416_v32, %v1040_v37  ;;  %v862_v50 = vadd.f32 %v846_v38, %v737_v42 }
 0x184   : > { %v972_v56 = vmul.f32 %v7325_v55, %v916_v45  ;;  %v912_v59 = vpop.permute.xlu0 %911  ;;  %v7468_v38 = vsel %vm1314_vm5, 1.0, %v9310_v53  ;;  %v7472_v45 = vadd.s32 56, %v7207_v1 }
 0x185   : > { %v971_v61 = vmul.f32 %v7325_v55, %v912_v59  ;;  %6402 = vrot.lane.b32.xlu0 %v6401_v47, %s6879_s4  ;;  %v1434_v62 = vsel %vm1422_vm2, %v1409_v58, %v1410_v44  ;;  %v7438_v63 = vsel %vm1422_vm2, %v1410_v44, %v1411_v40  ;;  %v7442_v3 = vsel %vm1373_vm0, %v1361_v43, %v1362_v39 }
 0x186   : > { %v988_v4 = vadd.f32 %v972_v56, %v863_v49  ;;  %v7445_v7 = vmul.f32 %v7426_v48, %v1434_v62  ;;  %v7451_v8 = vsel %vm1373_vm0, %v1360_v57, %v1361_v43 }
 0x187   : > { %v987_v9 = vadd.f32 %v971_v61, %v862_v50  ;;  %v693_v58 = vpop.permute.xlu1 %692 }
 0x188   : > { %v1011_v11 = vadd.f32 %v7336_v5, %v988_v4  ;;  %v689_v12 = vpop.permute.xlu0 %688  ;;  %v740_v22 = vmul.f32 %v7315_v51, %v693_v58 }
 0x189   : > { %v1010_v18 = vadd.f32 %v7336_v5, %v987_v9  ;;  %v739_v31 = vmul.f32 %v7315_v51, %v689_v12  ;;  %v1122_v12 = vand.u32 15, %v7472_v45 }
 0x18a   : > { %v1027_v19 = vmul.f32 0.1, %v1011_v11 }
 0x18b   : > { %v1026_v21 = vmul.f32 0.1, %v1010_v18  ;;  %v802_v23 = vpop.permute.xlu1 %801  ;;  %vm1316_vm6 = vcmp.ne.s32.totalorder %v1122_v12, 15 }
 0x18c   : > { %v7458_v46 = vmax.f32 %v1011_v11, %v1027_v19  ;;  %v849_v57 = vmul.f32 %v7318_v52, %v802_v23  ;;  %v798_v26 = vpop.permute.xlu0 %797 }
 0x18d   : > { %v1042_v27 = vmax.f32 %v1010_v18, %v1026_v21  ;;  %v848_v28 = vmul.f32 %v7318_v52, %v798_v26 }
 0x18e   : > { %v1364_v29 = vrot.slane %v7458_v46, 7  ;;  %v1413_v30 = vrot.slane %v7458_v46, 1  ;;  %v865_v41 = vadd.f32 %v849_v57, %v740_v22 }
 0x18f   : > { %v1363_v32 = vrot.slane %v1042_v27, 7  ;;  %v1412_v33 = vrot.slane %v1042_v27, 1  ;;  %v927_v35 = vpop.permute.xlu1 %926  ;;  %v6406_v37 = vpack.i.bf16 %v7458_v46, %v1042_v27  ;;  %v864_v42 = vadd.f32 %v848_v28, %v739_v31 }
 0x190   : > { %v974_v43 = vmul.f32 %v7325_v55, %v927_v35  ;;  %v923_v44 = vpop.permute.xlu0 %922  ;;  %v1062_v27 = vadd.s32 72, %v7207_v1 }
 0x191   : > { %v973_v47 = vmul.f32 %v7325_v55, %v923_v44  ;;  %6407 = vrot.lane.b32.xlu1 %v6406_v37, %s6879_s4  ;;  %v1432_v49 = vsel %vm1422_vm2, %v1411_v40, %v1412_v33  ;;  %v7480_v50 = vsel %vm1422_vm2, %v1412_v33, %v1413_v30  ;;  %v7484_v56 = vsel %vm1373_vm0, %v1363_v32, %v1364_v29 }
 0x192   : > { %v990_v59 = vadd.f32 %v974_v43, %v865_v41  ;;  %v7487_v61 = vmul.f32 %v7468_v38, %v1432_v49  ;;  %v7491_v62 = vsel %vm1373_vm0, %v1362_v39, %v1363_v32 }
 0x193   : > { %v989_v4 = vadd.f32 %v973_v47, %v864_v42  ;;  %v704_v9 = vpop.permute.xlu1 %703  ;;  %v7509_v42 = vsel %vm1316_vm6, 1.0, %v9310_v53  ;;  %vm2608_vm6 = vcmask 1041408  }
 0x194   : > { %v1013_v40 = vadd.f32 %v7336_v5, %v990_v59  ;;  %v700_v58 = vpop.permute.xlu0 %699  ;;  %v742_v31 = vmul.f32 %v7315_v51, %v704_v9 }
 0x195   : > { %v1012_v16 = vadd.f32 %v7336_v5, %v989_v4  ;;  %v741_v32 = vmul.f32 %v7315_v51, %v700_v58 }
 0x196   : > { %v1029_v18 = vmul.f32 0.1, %v1013_v40 }
 0x197   : > { %v1028_v19 = vmul.f32 0.1, %v1012_v16  ;;  %v813_v21 = vpop.permute.xlu1 %812 }
 0x198   : > { %v7498_v23 = vmax.f32 %v1013_v40, %v1029_v18  ;;  %v851_v39 = vmul.f32 %v7318_v52, %v813_v21  ;;  %v809_v46 = vpop.permute.xlu0 %808 }
 0x199   : > { %v1044_v57 = vmax.f32 %v1012_v16, %v1028_v19  ;;  %v850_v26 = vmul.f32 %v7318_v52, %v809_v46  ;;  %v1136_v16 = vand.u32 15, %v1062_v27 }
 0x19a   : > { %v1366_v28 = vrot.slane %v7498_v23, 7  ;;  %v1415_v22 = vrot.slane %v7498_v23, 1  ;;  %v867_v43 = vadd.f32 %v851_v39, %v742_v31 }
 0x19b   : > { %v1365_v33 = vrot.slane %v1044_v57, 7  ;;  %v1414_v35 = vrot.slane %v1044_v57, 1  ;;  %v938_v37 = vpop.permute.xlu1 %937  ;;  %v6411_v41 = vpack.i.bf16 %v7498_v23, %v1044_v57  ;;  %v866_v44 = vadd.f32 %v850_v26, %v741_v32 }
 0x19c   : > { %v976_v47 = vmul.f32 %v7325_v55, %v938_v37  ;;  %v934_v49 = vpop.permute.xlu0 %933  ;;  %vm1318_vm7 = vcmp.ne.s32.totalorder %v1136_v16, 15  ;;  %v1064_v16 = vadd.s32 88, %v7207_v1 }
 0x19d   : > { %v975_v59 = vmul.f32 %v7325_v55, %v934_v49  ;;  %6412 = vrot.lane.b32.xlu0 %v6411_v41, %s6879_s4  ;;  %v1430_v4 = vsel %vm1422_vm2, %v1413_v30, %v1414_v35  ;;  %v7518_v9 = vsel %vm1422_vm2, %v1414_v35, %v1415_v22  ;;  %v7522_v40 = vsel %vm1373_vm0, %v1365_v33, %v1366_v28 }
 0x19e   : > { %v992_v58 = vadd.f32 %v976_v47, %v867_v43  ;;  %v7525_v12 = vmul.f32 %v7509_v42, %v1430_v4  ;;  %v7529_v18 = vsel %vm1373_vm0, %v1364_v29, %v1365_v33  ;;  %v7540_v37 = vsel %vm1318_vm7, 1.0, %v9310_v53 }
 0x19f   : > { %v991_v19 = vadd.f32 %v975_v59, %v866_v44  ;;  %v715_v21 = vpop.permute.xlu1 %714 }
 0x1a0   : > { %v1015_v30 = vadd.f32 %v7336_v5, %v992_v58  ;;  %v711_v23 = vpop.permute.xlu0 %710  ;;  %v744_v44 = vmul.f32 %v7315_v51, %v715_v21 }
 0x1a1   : > { %v1014_v46 = vadd.f32 %v7336_v5, %v991_v19  ;;  %v743_v47 = vmul.f32 %v7315_v51, %v711_v23 }
 0x1a2   : > { %v1031_v57 = vmul.f32 0.1, %v1015_v30 }
 0x1a3   : > { %v1030_v26 = vmul.f32 0.1, %v1014_v46  ;;  %v824_v31 = vpop.permute.xlu1 %823 }
 0x1a4   : > { %v7535_v32 = vmax.f32 %v1015_v30, %v1031_v57  ;;  %v853_v27 = vmul.f32 %v7318_v52, %v824_v31  ;;  %v820_v29 = vpop.permute.xlu0 %819 }
 0x1a5   : > { %v1046_v33 = vmax.f32 %v1014_v46, %v1030_v26  ;;  %v852_v35 = vmul.f32 %v7318_v52, %v820_v29 }
 0x1a6   : > { %v1368_v41 = vrot.slane %v7535_v32, 7  ;;  %v1417_v43 = vrot.slane %v7535_v32, 1  ;;  %v869_v19 = vadd.f32 %v853_v27, %v744_v44  ;;  %v1150_v44 = vand.u32 15, %v1064_v16 }
 0x1a7   : > { %v1367_v49 = vrot.slane %v1046_v33, 7  ;;  %v1416_v59 = vrot.slane %v1046_v33, 1  ;;  %v949_v4 = vpop.permute.xlu1 %948  ;;  %v6416_v58 = vpack.i.bf16 %v7535_v32, %v1046_v33  ;;  %v868_v30 = vadd.f32 %v852_v35, %v743_v47 }
 0x1a8   : > { %v978_v46 = vmul.f32 %v7325_v55, %v949_v4  ;;  %v945_v57 = vpop.permute.xlu0 %944  ;;  %vm1320_vm8 = vcmp.ne.s32.totalorder %v1150_v44, 15 }
 0x1a9   : > { %v977_v26 = vmul.f32 %v7325_v55, %v945_v57  ;;  %6417 = vrot.lane.b32.xlu1 %v6416_v58, %s6879_s4  ;;  %v1428_v21 = vsel %vm1422_vm2, %v1415_v22, %v1416_v59  ;;  %v7555_v23 = vsel %vm1422_vm2, %v1416_v59, %v1417_v43  ;;  %v7559_v31 = vsel %vm1373_vm0, %v1367_v49, %v1368_v41 }
 0x1aa   : > { %v994_v32 = vadd.f32 %v978_v46, %v869_v19  ;;  %v7562_v27 = vmul.f32 %v7540_v37, %v1428_v21  ;;  %v7566_v29 = vsel %vm1373_vm0, %v1366_v28, %v1367_v49  ;;  %v7576_v59 = vsel %vm1320_vm8, 1.0, %v9310_v53 }
 0x1ab   : > { %v993_v33 = vadd.f32 %v977_v26, %v868_v30  ;;  %v835_v35 = vpop.permute.xlu1 %834 }
 0x1ac   : > { %v1017_v22 = vadd.f32 %v7336_v5, %v994_v32  ;;  %v726_v47 = vpop.permute.xlu0 %725  ;;  %v855_v58 = vmul.f32 %v7318_v52, %v835_v35 }
 0x1ad   : > { %v1016_v4 = vadd.f32 %v7336_v5, %v993_v33  ;;  %v746_v19 = vmul.f32 %v7315_v51, %v726_v47 }
 0x1ae   : > { %v1033_v46 = vmul.f32 0.1, %v1017_v22 }
 0x1af   : > { %v1032_v57 = vmul.f32 0.1, %v1016_v4  ;;  %v722_v21 = vpop.permute.xlu1 %721  ;;  %v871_v16 = vadd.f32 %v855_v58, %v746_v19 }
 0x1b0   : > { %v1049_v28 = vmax.f32 %v1017_v22, %v1033_v46  ;;  %v960_v49 = vpop.permute.xlu0 %959  ;;  %v745_v15 = vmul.f32 %v7315_v51, %v722_v21  ;;  %v1066_v22 = vadd.s32 104, %v7207_v1 }
 0x1b1   : > { %v1048_v30 = vmax.f32 %v1016_v4, %v1032_v57  ;;  %v980_v26 = vmul.f32 %v7325_v55, %v960_v49  ;;  %v1068_v4 = vadd.s32 120, %v7207_v1 }
 0x1b2   : > { %v1370_v32 = vrot.slane %v1049_v28, 7  ;;  %v1419_v36 = vrot.slane %v1049_v28, 1  ;;  %v1164_v49 = vand.u32 15, %v1066_v22 }
 0x1b3   : > { %v1369_v33 = vrot.slane %v1048_v30, 7  ;;  %v1418_v39 = vrot.slane %v1048_v30, 1  ;;  %v996_v35 = vadd.f32 %v980_v26, %v871_v16  ;;  %v6421_v11 = vpack.i.bf16 %v1049_v28, %v1048_v30  ;;  %v956_v47 = vpop.permute.xlu1 %955 }
 0x1b4   : > { %v831_v25 = vpop.permute.xlu0 %830  ;;  %v979_v44 = vmul.f32 %v7325_v55, %v956_v47  ;;  %vm1322_vm10 = vcmp.ne.s32.totalorder %v1164_v49, 15  ;;  %v7649_v49 = vadd.s32 16, %v7207_v1 }
 0x1b5   : > { %v1019_v58 = vadd.f32 %v7336_v5, %v996_v35  ;;  %v854_v19 = vmul.f32 %v7318_v52, %v831_v25  ;;  %6422 = vrot.lane.b32.xlu0 %v6421_v11, %s6879_s4  ;;  %v1426_v46 = vsel %vm1422_vm2, %v1417_v43, %v1418_v39  ;;  %v7589_v57 = vsel %vm1422_vm2, %v1418_v39, %v1419_v36 }
 0x1b6   : > { %v7592_v51 = vmul.f32 %v7576_v59, %v1426_v46  ;;  %v7596_v55 = vsel %vm1373_vm0, %v1369_v33, %v1370_v32  ;;  %v7600_v21 = vsel %vm1373_vm0, %v1368_v41, %v1369_v33  ;;  %v1178_v43 = vand.u32 15, %v1068_v4  ;;  %9342 = vst [vmem:[#allocation23_spill] sm:$0xff] %v7649_v49 }
 0x1b7   : > { %v1035_v52 = vmul.f32 0.1, %v1019_v58  ;;  %v870_v25 = vadd.f32 %v854_v19, %v745_v15  ;;  %v7613_v41 = vsel %vm1322_vm10, 1.0, %v9310_v53 }
 0x1b8   : > { %v1547_v11 = vpack.c.bf16 %v7592_v51, %v7555_v23  ;;  %vm1324_vm9 = vcmp.ne.s32.totalorder %v1178_v43, 15  ;;  %v1073_v43 = vand.u32 15, %v7207_v1 }
 0x1b9   : > { %v1051_v28 = vmax.f32 %v1019_v58, %v1035_v52  ;;  %v995_v39 = vadd.f32 %v979_v44, %v870_v25  ;;  %v7606_v47 = vsel %vm1324_vm9, 1.0, %v9310_v53  ;;  %vm3265_vm9 = vcmask 1041409  }
 0x1ba   : > { %vm1261_vm11 = vcmp.ne.s32.totalorder %v1073_v43, 0 }
 0x1bb   : > { %v1421_v30 = vrot.slane %v1051_v28, 1  ;;  %v1018_v16 = vadd.f32 %v7336_v5, %v995_v39  ;;  %v1372_v33 = vrot.slane %v1051_v28, 7  ;;  %v9341_v39 = vrot.slane %v7345_v20, 7 }
 0x1bc   : > { %v9343_v20 = vpack.c.bf16 %v7445_v7, %v7395_v13 }
 0x1bd   : > { %v1034_v26 = vmul.f32 0.1, %v1018_v16  ;;  %v1438_v15 = vsel %vm1422_vm2, %v1421_v30, %v1406_v0 }
 0x1be   : > { %v7616_v5 = vmul.f32 %v7606_v47, %v1438_v15 }
 0x1bf   : > { %v1050_v35 = vmax.f32 %v1018_v16, %v1034_v26 }
 0x1c1   : > { %v1371_v44 = vrot.slane %v1050_v35, 7  ;;  %v1420_v22 = vrot.slane %v1050_v35, 1  ;;  %v6426_v4 = vpack.i.bf16 %v1051_v28, %v1050_v35  ;;  %v7642_v28 = vsel %vm1261_vm11, 1.0, %v9310_v53 }
 0x1c2   : > { %vm3267_vm11 = vcmask 1042434  }
 0x1c3   : > { %6427 = vrot.lane.b32.xlu1 %v6426_v4, %s6879_s4  ;;  %v1424_v58 = vsel %vm1422_vm2, %v1419_v36, %v1420_v22  ;;  %v7623_v19 = vsel %vm1422_vm2, %v1420_v22, %v1421_v30  ;;  %v7627_v0 = vsel %vm1373_vm0, %v1371_v44, %v1372_v33  ;;  %v7631_v46 = vsel %vm1373_vm0, %v1370_v32, %v1371_v44 }
 0x1c4   : > { %v7634_v52 = vmul.f32 %v7613_v41, %v1424_v58  ;;  %v1551_v25 = vpack.c.bf16 %v7616_v5, %v7623_v19  ;;  %v1389_v32 = vsel %vm1373_vm0, %v1372_v33, %v9341_v39  ;;  %v1087_v22 = vand.u32 15, %v7649_v49  ;;  %v6483_v5 = vld [vmem:[#allocation6] sm:$0xff]  }
 0x1c5   : > { %v1390_v35 = vmul.f32 %v7642_v28, %v1389_v32  ;;  %v7664_v58 = vadd.s32 32, %v7207_v1  ;;  %v9347_v19 = vmov 0  }
 0x1c6   : > { %v1549_v36 = vpack.c.bf16 %v7634_v52, %v7589_v57  ;;  %vm1263_vm12 = vcmp.ne.s32.totalorder %v1087_v22, 0 }
 0x1c7   : > { %v7661_v33 = vsel %vm1263_vm12, 1.0, %v9310_v53  ;;  %v1101_v7 = vand.u32 15, %v7664_v58  ;;  %vm3269_vm12 = vcmask 1043459  }
 0x1c9   : > { %vm1265_vm13 = vcmp.ne.s32.totalorder %v1101_v7, 0 }
 0x1df   : > { %v6393_v30 = vpop.permute.xlu0 %6392 }
 0x1e0   : > { %v6395_v16 = vunpack.i.h.bf16 %v6393_v30  ;;  %v6394_v26 = vunpack.i.l.bf16 %v6393_v30 }
 0x1e2   : > { %v1520_v15 = vsel %vm1519_vm3, %v1390_v35, %v6394_v26  ;;  %v1521_v44 = vsel %vm1519_vm3, %v7365_v34, %v6395_v16  ;;  %v1392_v34 = vmul.f32 %v7661_v33, %v7406_v17  ;;  %v9344_v26 = vpack.c.bf16 %v7487_v61, %v7438_v63 }
 0x1e3   : > { %v1536_v4 = vpack.c.bf16 %v1521_v44, %v1520_v15  ;;  %v7677_v35 = vsel %vm1265_vm13, 1.0, %v9310_v53  ;;  %v7680_v17 = vadd.s32 48, %v7207_v1  ;;  %vm3271_vm13 = vcmask 1044484  }
 0x1e5   : > { %1712 = vmatmul.mubr.bf16.vlgmr.msra.gmra.mrb[0].mxu1 %v1536_v4  ;;  %v1115_v61 = vand.u32 15, %v7680_v17 }
 0x1e6   : > { %5967 = vmatprep.mubr.msk.bf16.mxu1 %vm1519_vm3, %v9343_v20  ;;  %2128 = vmatpush1.bf16.msra.mxu1 %v6483_v5 }
 0x1e7   : > { %vm1267_vm14 = vcmp.ne.s32.totalorder %v1115_v61, 0  ;;  %v1065_v61 = vadd.s32 96, %v7207_v1  ;;  %2129 = vmatprep.subr.bf16.mxu1 %v9347_v19 }
 0x1e9   : > { %v1157_v23 = vand.u32 15, %v1065_v61  ;;  %v7762_v61 = vld [vmem:[#allocation4] ss:$0 sm:$0xff] }
 0x1eb   : > { %v6398_v43 = vpop.permute.xlu1 %6397  ;;  %vm1273_vm4 = vcmp.ne.s32.totalorder %v1157_v23, 0 }
 0x1ec   : > { %v6400_v39 = vunpack.i.h.bf16 %v6398_v43  ;;  %v6399_v32 = vunpack.i.l.bf16 %v6398_v43  ;;  %v9345_v43 = vpack.c.bf16 %v7525_v12, %v7480_v50 }
 0x1ee   : > { %v1522_v30 = vsel %vm1519_vm3, %v1392_v34, %v6399_v32  ;;  %v1523_v13 = vsel %vm1519_vm3, %v7401_v14, %v6400_v39  ;;  %v1394_v14 = vmul.f32 %v7677_v35, %v7451_v8  ;;  %v7693_v39 = vsel %vm1267_vm14, 1.0, %v9310_v53 }
 0x1ef   : > { %v1538_v16 = vpack.c.bf16 %v1523_v13, %v1522_v30  ;;  %v1061_v8 = vadd.s32 64, %v7207_v1  ;;  %vm3273_vm14 = vcmask 1045509  }
 0x1f1   : > { %1720 = vmatmul.mubr.bf16.gmra.mrb[4].mxu1 %v1538_v16  ;;  %v1129_v50 = vand.u32 15, %v1061_v8  ;;  %v9346_v16 = vpack.c.bf16 %v7562_v27, %v7518_v9 }
 0x1f2   : > { %5968 = vmatprep.mubr.msk.bf16.mxu1 %vm1519_vm3, %v9344_v26 }
 0x1f3   : > { %vm1269_vm15 = vcmp.ne.s32.totalorder %v1129_v50, 0 }
 0x1f4   : > { %v7706_v26 = vsel %vm1269_vm15, 1.0, %v9310_v53  ;;  %vm3275_vm15 = vcmask 1046534  }
 0x1f7   : > { %v6403_v15 = vpop.permute.xlu0 %6402 }
 0x1f8   : > { %v6405_v44 = vunpack.i.h.bf16 %v6403_v15  ;;  %v6404_v22 = vunpack.i.l.bf16 %v6403_v15  ;;  %v1063_v15 = vadd.s32 80, %v7207_v1 }
 0x1fa   : > { %v1524_v4 = vsel %vm1519_vm3, %v1394_v14, %v6404_v22  ;;  %v1525_v63 = vsel %vm1519_vm3, %v7442_v3, %v6405_v44  ;;  %v1396_v3 = vmul.f32 %v7693_v39, %v7491_v62  ;;  %v1143_v9 = vand.u32 15, %v1063_v15 }
 0x1fb   : > { %v1540_v20 = vpack.c.bf16 %v1525_v63, %v1524_v4 }
 0x1fc   : > { %vm1271_vm1 = vcmp.ne.s32.totalorder %v1143_v9, 0  ;;  %v6492_v9 = vld [vmem:[#allocation6 + $0x48] sm:$0xff]  }
 0x1fd   : > { %1728 = vmatmul.mubr.bf16.gmra.mrb[8].mxu1 %v1540_v20  ;;  %v7719_v63 = vsel %vm1271_vm1, 1.0, %v9310_v53  ;;  %vm3277_vm1 = vcmask 1047559  }
 0x1fe   : > { %5969 = vmatprep.mubr.msk.bf16.mxu1 %vm1519_vm3, %v9345_v43 }
 0x203   : > { %v6408_v32 = vpop.permute.xlu1 %6407 }
 0x204   : > { %v6410_v34 = vunpack.i.h.bf16 %v6408_v32  ;;  %v6409_v30 = vunpack.i.l.bf16 %v6408_v32 }
 0x206   : > { %v1526_v13 = vsel %vm1519_vm3, %v1396_v3, %v6409_v30  ;;  %v1527_v7 = vsel %vm1519_vm3, %v7484_v56, %v6410_v34  ;;  %v1398_v56 = vmul.f32 %v7706_v26, %v7529_v18 }
 0x207   : > { %v1542_v12 = vpack.c.bf16 %v1527_v7, %v1526_v13 }
 0x209   : > { %1736 = vmatmul.mubr.bf16.gmra.mrb[12].mxu1 %v1542_v12 }
 0x20a   : > { %5970 = vmatprep.mubr.msk.bf16.mxu1 %vm1519_vm3, %v9346_v16 }
 0x20f   : > { %v6413_v62 = vpop.permute.xlu0 %6412 }
 0x210   : > { %v6415_v44 = vunpack.i.h.bf16 %v6413_v62  ;;  %v6414_v22 = vunpack.i.l.bf16 %v6413_v62 }
 0x212   : > { %v1528_v14 = vsel %vm1519_vm3, %v1398_v56, %v6414_v22  ;;  %v1529_v4 = vsel %vm1519_vm3, %v7522_v40, %v6415_v44  ;;  %v1400_v40 = vmul.f32 %v7719_v63, %v7566_v29  ;;  %v6485_v44 = vld [vmem:[#allocation6 + $0x10] sm:$0xff]   ;;  %v6487_v22 = vld [vmem:[#allocation6 + $0x20] sm:$0xff]  }
 0x213   : > { %v1544_v27 = vpack.c.bf16 %v1529_v4, %v1528_v14  ;;  %v6489_v56 = vld [vmem:[#allocation6 + $0x30] sm:$0xff]   ;;  %v6490_v14 = vld [vmem:[#allocation6 + $0x38] sm:$0xff]   ;;  %v6491_v4 = vld [vmem:[#allocation6 + $0x40] sm:$0xff]  }
 0x215   : > { %1744 = vmatmul.mubr.bf16.gmra.mrb[16].mxu1 %v1544_v27  ;;  %v6493_v27 = vld [vmem:[#allocation6 + $0x50] sm:$0xff]  }
 0x216   : > { %5971 = vmatprep.mubr.msk.bf16.mxu1 %vm1519_vm3, %v1547_v11  ;;  %v7732_v11 = vsel %vm1273_vm4, 1.0, %v9310_v53 }
 0x217   : > { %v1402_v3 = vmul.f32 %v7732_v11, %v7600_v21 }
 0x21b   : > { %v6418_v18 = vpop.permute.xlu1 %6417 }
 0x21c   : > { %v6420_v20 = vunpack.i.h.bf16 %v6418_v18  ;;  %v6419_v43 = vunpack.i.l.bf16 %v6418_v18  ;;  %v6494_v18 = vld [vmem:[#allocation6 + $0x58] sm:$0xff]  }
 0x21e   : > { %v1530_v8 = vsel %vm1519_vm3, %v1400_v40, %v6419_v43  ;;  %v1531_v32 = vsel %vm1519_vm3, %v7559_v31, %v6420_v20  ;;  %v1067_v31 = vadd.s32 112, %v7207_v1 }
 0x21f   : > { %v1546_v51 = vpack.c.bf16 %v1531_v32, %v1530_v8 }
 0x220   : > { %v1171_v52 = vand.u32 15, %v1067_v31 }
 0x221   : > { %1752 = vmatmul.mubr.bf16.gmra.mrb[20].mxu1 %v1546_v51 }
 0x222   : > { %5972 = vmatprep.mubr.msk.bf16.mxu1 %vm1519_vm3, %v1549_v36  ;;  %vm1275_vm5 = vcmp.ne.s32.totalorder %v1171_v52, 0 }
 0x223   : > { %v7745_v36 = vsel %vm1275_vm5, 1.0, %v9310_v53 }
 0x224   : > { %v1404_v16 = vmul.f32 %v7745_v36, %v7631_v46  ;;  %v6486_v46 = vld [vmem:[#allocation6 + $0x18] sm:$0xff]  }
 0x227   : > { %v6423_v34 = vpop.permute.xlu0 %6422 }
 0x228   : > { %v6425_v30 = vunpack.i.h.bf16 %v6423_v34  ;;  %v6424_v29 = vunpack.i.l.bf16 %v6423_v34 }
 0x22a   : > { %v1532_v13 = vsel %vm1519_vm3, %v1402_v3, %v6424_v29  ;;  %v1533_v7 = vsel %vm1519_vm3, %v7596_v55, %v6425_v30 }
 0x22b   : > { %v1548_v57 = vpack.c.bf16 %v1533_v7, %v1532_v13 }
 0x22d   : > { %1760 = vmatmul.mubr.bf16.gmra.mrb[24].mxu1 %v1548_v57 }
 0x22e   : > { %5973 = vmatprep.mubr.msk.bf16.mxu1 %vm1519_vm3, %v1551_v25  ;;  %v6484_v25 = vld [vmem:[#allocation6 + $0x8] sm:$0xff]  }
 0x22f   : > { %2130 = vmatpush1.bf16.msra.mxu1 %v6484_v25 }
 0x230   : > { %2131 = vmatprep.subr.bf16.mxu1 %v9347_v19 }
 0x233   : > { %2132 = vmatpush1.bf16.msra.mxu1 %v6485_v44 }
 0x234   : > { %2133 = vmatprep.subr.bf16.mxu1 %v9347_v19 }
 0x235   : > { %v6428_v21 = vpop.permute.xlu1 %6427 }
 0x236   : > { %v6430_v50 = vunpack.i.h.bf16 %v6428_v21  ;;  %v6429_v12 = vunpack.i.l.bf16 %v6428_v21 }
 0x237   : > { %2134 = vmatpush1.bf16.msra.mxu1 %v6486_v46 }
 0x238   : > { %v1534_v55 = vsel %vm1519_vm3, %v1404_v16, %v6429_v12  ;;  %v1535_v15 = vsel %vm1519_vm3, %v7627_v0, %v6430_v50  ;;  %2135 = vmatprep.subr.bf16.mxu1 %v9347_v19  ;;  %v6488_v0 = vld [vmem:[#allocation6 + $0x28] sm:$0xff]  }
 0x239   : > { %v1550_v62 = vpack.c.bf16 %v1535_v15, %v1534_v55 }
 0x23b   : > { %1768 = vmatmul.mubr.bf16.gmra.mrb[28].mxu1 %v1550_v62 }
 0x23c   : > { %2136 = vmatpush1.bf16.msra.mxu1 %v6487_v22 }
 0x23d   : > { %2137 = vmatprep.subr.bf16.mxu1 %v9347_v19 }
 0x240   : > { %2138 = vmatpush1.bf16.msra.mxu1 %v6488_v0 }
 0x241   : > { %2139 = vmatprep.subr.bf16.mxu1 %v9347_v19 }
 0x244   : > { %2140 = vmatpush1.bf16.msra.mxu1 %v6489_v56 }
 0x245   : > { %2141 = vmatprep.subr.bf16.mxu1 %v9347_v19 }
 0x248   : > { %2142 = vmatpush1.bf16.msra.mxu1 %v6490_v14 }
 0x249   : > { %2143 = vmatprep.subr.bf16.mxu1 %v9347_v19 }
 0x24c   : > { %2144 = vmatpush1.bf16.msra.mxu1 %v6491_v4 }
 0x24d   : > { %2145 = vmatprep.subr.bf16.mxu1 %v9347_v19 }
 0x250   : > { %2146 = vmatpush1.bf16.msra.mxu1 %v6492_v9 }
 0x251   : > { %2147 = vmatprep.subr.bf16.mxu1 %v9347_v19 }
 0x254   : > { %2148 = vmatpush1.bf16.msra.mxu1 %v6493_v27 }
 0x255   : > { %2149 = vmatprep.subr.bf16.mxu1 %v9347_v19 }
 0x258   : > { %2150 = vmatpush1.bf16.msra.mxu1 %v6494_v18 }
 0x2b8   : > { %v1713_v20 = vpop.f32.mrb[0].mxu1 }
 0x2b9   : > { %v1714_v43 = vadd.f32 %v7762_v61, %v1713_v20  ;;  %v1715_v40 = vpop.f32.mrb[1].mxu1 }
 0x2ba   : > { %v1716_v8 = vpop.f32.mrb[2].mxu1 }
 0x2bb   : > { %v1776_v32 = vmul.f32 0.1, %v1714_v43  ;;  %v1717_v23 = vadd.f32 %v7762_v61, %v1716_v8  ;;  %v1718_v51 = vpop.f32.mrb[3].mxu1 }
 0x2bd   : > { %v7767_v34 = vmax.f32 %v1714_v43, %v1776_v32  ;;  %v1777_v30 = vmul.f32 0.1, %v1717_v23 }
 0x2bf   : > { %v1793_v29 = vmax.f32 %v1717_v23, %v1777_v30  ;;  %v9313_v3 = vrot.slane %v7767_v34, 7  ;;  %v9312_v22 = vrot.slane %v7767_v34, 1 }
 0x2c1   : > { %v1809_v31 = vrot.slane %v1793_v29, 7  ;;  %v6431_v13 = vpack.i.bf16 %v1793_v29, %v7767_v34  ;;  %v1857_v5 = vrot.slane %v1793_v29, 1 }
 0x2c3   : > { %6432 = vrot.lane.b32.xlu0 %v6431_v13, %s6879_s4  ;;  %v7776_v7 = vsel %vm1373_vm0, %v9313_v3, %v1809_v31  ;;  %v1886_v18 = vsel %vm1422_vm2, %v9312_v22, %v1857_v5 }
 0x2c4   : > { %v1721_v57 = vpop.f32.mrb[4].mxu1 }
 0x2c5   : > { %v1722_v52 = vadd.f32 %v7762_v61, %v1721_v57  ;;  %v1723_v21 = vpop.f32.mrb[5].mxu1 }
 0x2c6   : > { %v1724_v50 = vpop.f32.mrb[6].mxu1 }
 0x2c7   : > { %v1778_v12 = vmul.f32 0.1, %v1722_v52  ;;  %v1725_v16 = vadd.f32 %v7762_v61, %v1724_v50  ;;  %v1726_v55 = vpop.f32.mrb[7].mxu1 }
 0x2c9   : > { %v1794_v15 = vmax.f32 %v1722_v52, %v1778_v12  ;;  %v1779_v62 = vmul.f32 0.1, %v1725_v16 }
 0x2cb   : > { %v1810_v25 = vrot.slane %v1794_v15, 7  ;;  %v1858_v44 = vrot.slane %v1794_v15, 1  ;;  %v1795_v46 = vmax.f32 %v1725_v16, %v1779_v62 }
 0x2cd   : > { %v1811_v0 = vrot.slane %v1795_v46, 7  ;;  %v1859_v56 = vrot.slane %v1795_v46, 1  ;;  %v6436_v14 = vpack.i.bf16 %v1795_v46, %v1794_v15  ;;  %v1885_v4 = vsel %vm1422_vm2, %v1857_v5, %v1858_v44 }
 0x2ce   : > { %v1889_v9 = vmul.f32 %v7376_v54, %v1885_v4  ;;  %v7786_v27 = vsel %vm1373_vm0, %v1809_v31, %v1810_v25 }
 0x2cf   : > { %6437 = vrot.lane.b32.xlu1 %v6436_v14, %s6879_s4  ;;  %v7795_v20 = vsel %vm1422_vm2, %v1858_v44, %v1859_v56  ;;  %v7799_v43 = vsel %vm1373_vm0, %v1810_v25, %v1811_v0 }
 0x2d0   : > { %v1729_v54 = vpop.f32.mrb[8].mxu1  ;;  %v1985_v40 = vpack.c.bf16 %v1889_v9, %v1886_v18 }
 0x2d1   : > { %v1730_v8 = vadd.f32 %v7762_v61, %v1729_v54  ;;  %v1731_v32 = vpop.f32.mrb[9].mxu1 }
 0x2d2   : > { %v1732_v23 = vpop.f32.mrb[10].mxu1  ;;  %5987 = vmatprep.mubr.msk.bf16.mxu1 %vm1519_vm3, %v1985_v40 }
 0x2d3   : > { %v1780_v51 = vmul.f32 0.1, %v1730_v8  ;;  %v1733_v30 = vadd.f32 %v7762_v61, %v1732_v23  ;;  %v1734_v29 = vpop.f32.mrb[11].mxu1 }
 0x2d5   : > { %v1796_v31 = vmax.f32 %v1730_v8, %v1780_v51  ;;  %v1781_v13 = vmul.f32 0.1, %v1733_v30 }
 0x2d7   : > { %v1812_v57 = vrot.slane %v1796_v31, 7  ;;  %v1860_v52 = vrot.slane %v1796_v31, 1  ;;  %v1797_v21 = vmax.f32 %v1733_v30, %v1781_v13 }
 0x2d9   : > { %v1813_v50 = vrot.slane %v1797_v21, 7  ;;  %v1861_v12 = vrot.slane %v1797_v21, 1  ;;  %v6441_v16 = vpack.i.bf16 %v1797_v21, %v1796_v31  ;;  %v1883_v55 = vsel %vm1422_vm2, %v1859_v56, %v1860_v52 }
 0x2da   : > { %v7807_v15 = vmul.f32 %v7426_v48, %v1883_v55  ;;  %v7811_v62 = vsel %vm1373_vm0, %v1811_v0, %v1812_v57 }
 0x2db   : > { %6442 = vrot.lane.b32.xlu0 %v6441_v16, %s6879_s4  ;;  %v7816_v5 = vsel %vm1422_vm2, %v1860_v52, %v1861_v12  ;;  %v7820_v25 = vsel %vm1373_vm0, %v1812_v57, %v1813_v50 }
 0x2dc   : > { %v1737_v44 = vpop.f32.mrb[12].mxu1 }
 0x2dd   : > { %v1738_v48 = vadd.f32 %v7762_v61, %v1737_v44  ;;  %v1739_v56 = vpop.f32.mrb[13].mxu1 }
 0x2de   : > { %v1740_v14 = vpop.f32.mrb[14].mxu1 }
 0x2df   : > { %v1782_v0 = vmul.f32 0.1, %v1738_v48  ;;  %v1741_v4 = vadd.f32 %v7762_v61, %v1740_v14  ;;  %v1742_v9 = vpop.f32.mrb[15].mxu1 }
 0x2e1   : > { %v1798_v18 = vmax.f32 %v1738_v48, %v1782_v0  ;;  %v1783_v54 = vmul.f32 0.1, %v1741_v4 }
 0x2e3   : > { %v1814_v40 = vrot.slane %v1798_v18, 7  ;;  %v1862_v8 = vrot.slane %v1798_v18, 1  ;;  %v1799_v32 = vmax.f32 %v1741_v4, %v1783_v54 }
 0x2e5   : > { %v1815_v23 = vrot.slane %v1799_v32, 7  ;;  %v1863_v51 = vrot.slane %v1799_v32, 1  ;;  %v6446_v30 = vpack.i.bf16 %v1799_v32, %v1798_v18  ;;  %v1881_v29 = vsel %vm1422_vm2, %v1861_v12, %v1862_v8 }
 0x2e6   : > { %v7829_v31 = vmul.f32 %v7468_v38, %v1881_v29  ;;  %v7833_v13 = vsel %vm1373_vm0, %v1813_v50, %v1814_v40 }
 0x2e7   : > { %6447 = vrot.lane.b32.xlu1 %v6446_v30, %s6879_s4  ;;  %v7838_v57 = vsel %vm1422_vm2, %v1862_v8, %v1863_v51  ;;  %v7842_v52 = vsel %vm1373_vm0, %v1814_v40, %v1815_v23 }
 0x2e8   : > { %v1745_v21 = vpop.f32.mrb[16].mxu1 }
 0x2e9   : > { %v1746_v38 = vadd.f32 %v7762_v61, %v1745_v21  ;;  %v1747_v16 = vpop.f32.mrb[17].mxu1 }
 0x2ea   : > { %v1748_v55 = vpop.f32.mrb[18].mxu1 }
 0x2eb   : > { %v1784_v50 = vmul.f32 0.1, %v1746_v38  ;;  %v1749_v44 = vadd.f32 %v7762_v61, %v1748_v55  ;;  %v1750_v48 = vpop.f32.mrb[19].mxu1 }
 0x2ed   : > { %v1800_v56 = vmax.f32 %v1746_v38, %v1784_v50  ;;  %v1785_v14 = vmul.f32 0.1, %v1749_v44 }
 0x2ef   : > { %v1816_v0 = vrot.slane %v1800_v56, 7  ;;  %v1864_v4 = vrot.slane %v1800_v56, 1  ;;  %v1801_v9 = vmax.f32 %v1749_v44, %v1785_v14 }
 0x2f1   : > { %v1817_v18 = vrot.slane %v1801_v9, 7  ;;  %v1865_v54 = vrot.slane %v1801_v9, 1  ;;  %v6451_v40 = vpack.i.bf16 %v1801_v9, %v1800_v56  ;;  %v1879_v8 = vsel %vm1422_vm2, %v1863_v51, %v1864_v4 }
 0x2f2   : > { %v7851_v32 = vmul.f32 %v7509_v42, %v1879_v8  ;;  %v7855_v30 = vsel %vm1373_vm0, %v1815_v23, %v1816_v0 }
 0x2f3   : > { %6452 = vrot.lane.b32.xlu0 %v6451_v40, %s6879_s4  ;;  %v7860_v29 = vsel %vm1422_vm2, %v1864_v4, %v1865_v54  ;;  %v7864_v21 = vsel %vm1373_vm0, %v1816_v0, %v1817_v18 }
 0x2f4   : > { %v1753_v38 = vpop.f32.mrb[20].mxu1 }
 0x2f5   : > { %v1754_v42 = vadd.f32 %v7762_v61, %v1753_v38  ;;  %v1755_v16 = vpop.f32.mrb[21].mxu1 }
 0x2f6   : > { %v1756_v55 = vpop.f32.mrb[22].mxu1 }
 0x2f7   : > { %v1786_v23 = vmul.f32 0.1, %v1754_v42  ;;  %v1757_v50 = vadd.f32 %v7762_v61, %v1756_v55  ;;  %v1758_v44 = vpop.f32.mrb[23].mxu1 }
 0x2f9   : > { %v1802_v48 = vmax.f32 %v1754_v42, %v1786_v23  ;;  %v1787_v56 = vmul.f32 0.1, %v1757_v50 }
 0x2fb   : > { %v1818_v14 = vrot.slane %v1802_v48, 7  ;;  %v1866_v4 = vrot.slane %v1802_v48, 1  ;;  %v1803_v9 = vmax.f32 %v1757_v50, %v1787_v56 }
 0x2fd   : > { %v1819_v40 = vrot.slane %v1803_v9, 7  ;;  %v1867_v0 = vrot.slane %v1803_v9, 1  ;;  %v6456_v8 = vpack.i.bf16 %v1803_v9, %v1802_v48  ;;  %v1877_v53 = vsel %vm1422_vm2, %v1865_v54, %v1866_v4 }
 0x2fe   : > { %v7873_v51 = vmul.f32 %v7540_v37, %v1877_v53  ;;  %v7877_v38 = vsel %vm1373_vm0, %v1817_v18, %v1818_v14 }
 0x2ff   : > { %6457 = vrot.lane.b32.xlu1 %v6456_v8, %s6879_s4  ;;  %v7882_v42 = vsel %vm1422_vm2, %v1866_v4, %v1867_v0  ;;  %v7886_v16 = vsel %vm1373_vm0, %v1818_v14, %v1819_v40 }
 0x300   : > { %v1761_v55 = vpop.f32.mrb[24].mxu1 }
 0x301   : > { %v1762_v53 = vadd.f32 %v7762_v61, %v1761_v55  ;;  %v1763_v37 = vpop.f32.mrb[25].mxu1 }
 0x302   : > { %v1764_v23 = vpop.f32.mrb[26].mxu1 }
 0x303   : > { %v1788_v18 = vmul.f32 0.1, %v1762_v53  ;;  %v1765_v50 = vadd.f32 %v7762_v61, %v1764_v23  ;;  %v1766_v44 = vpop.f32.mrb[27].mxu1 }
 0x305   : > { %v1804_v48 = vmax.f32 %v1762_v53, %v1788_v18  ;;  %v1789_v56 = vmul.f32 0.1, %v1765_v50 }
 0x307   : > { %v1820_v4 = vrot.slane %v1804_v48, 7  ;;  %v1868_v9 = vrot.slane %v1804_v48, 1  ;;  %v1805_v8 = vmax.f32 %v1765_v50, %v1789_v56 }
 0x309   : > { %v1821_v12 = vrot.slane %v1805_v8, 7  ;;  %v1869_v14 = vrot.slane %v1805_v8, 1  ;;  %v6461_v46 = vpack.i.bf16 %v1805_v8, %v1804_v48  ;;  %v1875_v22 = vsel %vm1422_vm2, %v1867_v0, %v1868_v9 }
 0x30a   : > { %v7895_v54 = vmul.f32 %v7576_v59, %v1875_v22  ;;  %v7899_v55 = vsel %vm1373_vm0, %v1819_v40, %v1820_v4 }
 0x30b   : > { %6462 = vrot.lane.b32.xlu0 %v6461_v46, %s6879_s4  ;;  %v7904_v53 = vsel %vm1422_vm2, %v1868_v9, %v1869_v14  ;;  %v7908_v37 = vsel %vm1373_vm0, %v1820_v4, %v1821_v12 }
 0x30e   : > { %v1769_v23 = vpop.f32.mrb[28].mxu1 }
 0x30f   : > { %v1770_v59 = vadd.f32 %v7762_v61, %v1769_v23  ;;  %v1771_v22 = vpop.f32.mrb[29].mxu1 }
 0x310   : > { %v1772_v18 = vpop.f32.mrb[30].mxu1 }
 0x311   : > { %v1790_v40 = vmul.f32 0.1, %v1770_v59  ;;  %v1773_v50 = vadd.f32 %v7762_v61, %v1772_v18  ;;  %v1774_v46 = vpop.f32.mrb[31].mxu1  ;;  %v9348_v61 = vrot.slane %v7767_v34, 7 }
 0x313   : > { %v1806_v44 = vmax.f32 %v1770_v59, %v1790_v40  ;;  %v1791_v48 = vmul.f32 0.1, %v1773_v50 }
 0x315   : > { %v1822_v56 = vrot.slane %v1806_v44, 7  ;;  %v1870_v9 = vrot.slane %v1806_v44, 1  ;;  %v1807_v8 = vmax.f32 %v1773_v50, %v1791_v48 }
 0x317   : > { %v1823_v3 = vrot.slane %v1807_v8, 7  ;;  %v1871_v4 = vrot.slane %v1807_v8, 1  ;;  %v6466_v6 = vpack.i.bf16 %v1807_v8, %v1806_v44  ;;  %v1873_v0 = vsel %vm1422_vm2, %v1869_v14, %v1870_v9 }
 0x318   : > { %v7917_v2 = vmul.f32 %v7613_v41, %v1873_v0  ;;  %v7921_v23 = vsel %vm1373_vm0, %v1821_v12, %v1822_v56  ;;  %v9349_v14 = vrot.slane %v7767_v34, 1 }
 0x319   : > { %v1839_v59 = vsel %vm1373_vm0, %v1823_v3, %v9348_v61  ;;  %6467 = vrot.lane.b32.xlu1 %v6466_v6, %s6879_s4  ;;  %v7930_v22 = vsel %vm1422_vm2, %v1870_v9, %v1871_v4  ;;  %v7938_v12 = vsel %vm1373_vm0, %v1822_v56, %v1823_v3  ;;  %v1842_v9 = vmul.f32 %v7661_v33, %v7786_v27 }
 0x31a   : > { %v1887_v41 = vsel %vm1422_vm2, %v1871_v4, %v9349_v14  ;;  %v1997_v0 = vpack.c.bf16 %v7917_v2, %v7904_v53  ;;  %v1840_v34 = vmul.f32 %v7642_v28, %v1839_v59  ;;  %v9350_v2 = vpack.c.bf16 %v7807_v15, %v7795_v20 }
 0x31b   : > { %v7943_v18 = vmul.f32 %v7606_v47, %v1887_v41  ;;  %v1844_v59 = vmul.f32 %v7677_v35, %v7811_v62 }
 0x31d   : > { %v1999_v6 = vpack.c.bf16 %v7943_v18, %v7930_v22  ;;  %v6497_v22 = vld [vmem:[#allocation9 + $0x90] sm:$0xff]   ;;  %v6881_v18 = vmov 1983009808  }
 0x335   : > { %v6433_v40 = vpop.permute.xlu0 %6432 }
 0x336   : > { %v6435_v50 = vunpack.i.h.bf16 %v6433_v40  ;;  %v6434_v46 = vunpack.i.l.bf16 %v6433_v40  ;;  %v1846_v40 = vmul.f32 %v7693_v39, %v7833_v13 }
 0x338   : > { %v1968_v44 = vsel %vm1519_vm3, %v1840_v34, %v6434_v46  ;;  %v1969_v3 = vsel %vm1519_vm3, %v7776_v7, %v6435_v50  ;;  %v9351_v7 = vpack.c.bf16 %v7829_v31, %v7816_v5  ;;  %v1848_v34 = vmul.f32 %v7706_v26, %v7855_v30 }
 0x339   : > { %v1984_v48 = vpack.c.bf16 %v1969_v3, %v1968_v44 }
 0x33b   : > { %2160 = vmatmul.mubr.bf16.vlgmr.msra.gmra.mrb[32].mxu1 %v1984_v48  ;;  %v1850_v48 = vmul.f32 %v7719_v63, %v7877_v38 }
 0x33c   : > { %5988 = vmatprep.mubr.msk.bf16.mxu1 %vm1519_vm3, %v9350_v2 }
 0x341   : > { %v6438_v47 = vpop.permute.xlu1 %6437 }
 0x342   : > { %v6440_v53 = vunpack.i.h.bf16 %v6438_v47  ;;  %v6439_v56 = vunpack.i.l.bf16 %v6438_v47 }
 0x344   : > { %v1970_v28 = vsel %vm1519_vm3, %v1842_v9, %v6439_v56  ;;  %v1971_v8 = vsel %vm1519_vm3, %v7799_v43, %v6440_v53  ;;  %v9352_v43 = vpack.c.bf16 %v7851_v32, %v7838_v57  ;;  %v1854_v9 = vmul.f32 %v7745_v36, %v7921_v23 }
 0x345   : > { %v1986_v4 = vpack.c.bf16 %v1971_v8, %v1970_v28  ;;  %v6496_v8 = vld [vmem:[#allocation9 + $0x88] sm:$0xff]  }
 0x347   : > { %2168 = vmatmul.mubr.bf16.gmra.mrb[36].mxu1 %v1986_v4  ;;  %v8011_v4 = vld [vmem:[#allocation7] ss:$0 sm:$0xff] }
 0x348   : > { %5989 = vmatprep.mubr.msk.bf16.mxu1 %vm1519_vm3, %v9351_v7 }
 0x34d   : > { %v6443_v20 = vpop.permute.xlu0 %6442 }
 0x34e   : > { %v6445_v15 = vunpack.i.h.bf16 %v6443_v20  ;;  %v6444_v61 = vunpack.i.l.bf16 %v6443_v20  ;;  %v9317_v20 = vand.u32 7, %v7207_v1 }
 0x350   : > { %v1972_v33 = vsel %vm1519_vm3, %v1844_v59, %v6444_v61  ;;  %v1973_v27 = vsel %vm1519_vm3, %v7820_v25, %v6445_v15  ;;  %v9353_v25 = vpack.c.bf16 %v7873_v51, %v7860_v29  ;;  %v3068_v59 = vand.u32 7, %v7351_v24 }
 0x351   : > { %v1988_v14 = vpack.c.bf16 %v1973_v27, %v1972_v33 }
 0x352   : > { %vm8022_vm7 = vcmp.ne.s32.totalorder %v3068_v59, 7  ;;  %vm3154_vm8 = vcmp.ne.s32.totalorder %v3068_v59, 0  ;;  %v6501_v59 = vld [vmem:[#allocation9 + $0xb0] sm:$0xff]  }
 0x353   : > { %2176 = vmatmul.mubr.bf16.gmra.mrb[40].mxu1 %v1988_v14 }
 0x354   : > { %5990 = vmatprep.mubr.msk.bf16.mxu1 %vm1519_vm3, %v9352_v43  ;;  %v6498_v43 = vld [vmem:[#allocation9 + $0x98] sm:$0xff]  }
 0x359   : > { %v6448_v5 = vpop.permute.xlu1 %6447 }
 0x35a   : > { %v6450_v31 = vunpack.i.h.bf16 %v6448_v5  ;;  %v6449_v41 = vunpack.i.l.bf16 %v6448_v5  ;;  %v6499_v5 = vld [vmem:[#allocation9 + $0xa0] sm:$0xff]  }
 0x35c   : > { %v1974_v35 = vsel %vm1519_vm3, %v1846_v40, %v6449_v41  ;;  %v1975_v62 = vsel %vm1519_vm3, %v7842_v52, %v6450_v31  ;;  %v9354_v52 = vpack.c.bf16 %v7895_v54, %v7882_v42  ;;  %v1852_v54 = vmul.f32 %v7732_v11, %v7899_v55 }
 0x35d   : > { %v1990_v50 = vpack.c.bf16 %v1975_v62, %v1974_v35 }
 0x35f   : > { %2184 = vmatmul.mubr.bf16.gmra.mrb[44].mxu1 %v1990_v50 }
 0x360   : > { %5991 = vmatprep.mubr.msk.bf16.mxu1 %vm1519_vm3, %v9353_v25  ;;  %v9316_v25 = vand.u32 7, %v7649_v49 }
 0x362   : > { %vm8053_vm10 = vcmp.ne.s32.totalorder %v9316_v25, 7 }
 0x365   : > { %v6453_v57 = vpop.permute.xlu0 %6452 }
 0x366   : > { %v6455_v32 = vunpack.i.h.bf16 %v6453_v57  ;;  %v6454_v46 = vunpack.i.l.bf16 %v6453_v57  ;;  %v9357_v57 = vmov 0.0  }
 0x368   : > { %v1976_v39 = vsel %vm1519_vm3, %v1848_v34, %v6454_v46  ;;  %v1977_v13 = vsel %vm1519_vm3, %v7864_v21, %v6455_v32 }
 0x369   : > { %v1992_v44 = vpack.c.bf16 %v1977_v13, %v1976_v39 }
 0x36b   : > { %2192 = vmatmul.mubr.bf16.gmra.mrb[48].mxu1 %v1992_v44 }
 0x36c   : > { %5992 = vmatprep.mubr.msk.bf16.mxu1 %vm1519_vm3, %v9354_v52 }
 0x371   : > { %v6458_v29 = vpop.permute.xlu1 %6457 }
 0x372   : > { %v6460_v51 = vunpack.i.h.bf16 %v6458_v29  ;;  %v6459_v3 = vunpack.i.l.bf16 %v6458_v29  ;;  %v8038_v29 = vsel %vm8022_vm7, 1.0, %v9357_v57 }
 0x374   : > { %v1978_v26 = vsel %vm1519_vm3, %v1850_v48, %v6459_v3  ;;  %v1979_v30 = vsel %vm1519_vm3, %v7886_v16, %v6460_v51  ;;  %v8041_v51 = vsel %vm3154_vm8, 1.0, %v9357_v57 }
 0x375   : > { %v1994_v2 = vpack.c.bf16 %v1979_v30, %v1978_v26 }
 0x377   : > { %2200 = vmatmul.mubr.bf16.gmra.mrb[52].mxu1 %v1994_v2 }
 0x378   : > { %5993 = vmatprep.mubr.msk.bf16.mxu1 %vm1519_vm3, %v1997_v0 }
 0x37d   : > { %v6463_v21 = vpop.permute.xlu0 %6462 }
 0x37e   : > { %v6465_v47 = vunpack.i.h.bf16 %v6463_v21  ;;  %v6464_v42 = vunpack.i.l.bf16 %v6463_v21 }
 0x380   : > { %v1980_v53 = vsel %vm1519_vm3, %v1852_v54, %v6464_v42  ;;  %v1981_v63 = vsel %vm1519_vm3, %v7908_v37, %v6465_v47  ;;  %v6495_v37 = vld [vmem:[#allocation9 + $0x80] sm:$0xff]  }
 0x381   : > { %v1996_v38 = vpack.c.bf16 %v1981_v63, %v1980_v53  ;;  %6216 = vmatprep.subr.bf16.mxu1 %v6495_v37  ;;  %v6500_v53 = vld [vmem:[#allocation9 + $0xa8] sm:$0xff]  }
 0x382   : > { %6217 = vmatpush3.bf16.msra.mxu1 %v6495_v37 }
 0x383   : > { %2208 = vmatmul.mubr.bf16.gmra.mrb[56].mxu1 %v1996_v38  ;;  %6218 = vmatprep.subr.bf16.mxu1 %v6496_v8 }
 0x384   : > { %5994 = vmatprep.mubr.msk.bf16.mxu1 %vm1519_vm3, %v1999_v6  ;;  %v2274_v6 = vunpack.c.l.s4 %v6881_v18 }
 0x386   : > { %6219 = vmatpush3.bf16.msra.mxu1 %v6496_v8  ;;  %v2275_v36 = vunpack.c.0.s8 %v2274_v6 }
 0x387   : > { %6220 = vmatprep.subr.bf16.mxu1 %v6497_v22 }
 0x388   : > { %v8016_v61 = vsub.s32 %v2275_v36, %v7207_v1 }
 0x38a   : > { %6221 = vmatpush3.bf16.msra.mxu1 %v6497_v22 }
 0x38b   : > { %v6468_v16 = vpop.permute.xlu1 %6467  ;;  %6222 = vmatprep.subr.bf16.mxu1 %v6498_v43 }
 0x38c   : > { %v6470_v0 = vunpack.i.h.bf16 %v6468_v16  ;;  %v6469_v56 = vunpack.i.l.bf16 %v6468_v16 }
 0x38e   : > { %v1982_v11 = vsel %vm1519_vm3, %v1854_v9, %v6469_v56  ;;  %v1983_v55 = vsel %vm1519_vm3, %v7938_v12, %v6470_v0  ;;  %vm3177_vm3 = vcmp.ne.s32.totalorder %v9317_v20, 7  ;;  %6223 = vmatpush3.bf16.msra.mxu1 %v6498_v43 }
 0x38f   : > { %v1998_v28 = vpack.c.bf16 %v1983_v55, %v1982_v11  ;;  %6224 = vmatprep.subr.bf16.mxu1 %v6499_v5  ;;  %v8030_v32 = vsel %vm3177_vm3, 1.0, %v9357_v57 }
 0x391   : > { %2216 = vmatmul.mubr.bf16.gmra.mrb[60].mxu1 %v1998_v28 }
 0x392   : > { %6225 = vmatpush3.bf16.msra.mxu1 %v6499_v5 }
 0x393   : > { %6226 = vmatprep.subr.bf16.mxu1 %v6500_v53 }
 0x396   : > { %6227 = vmatpush3.bf16.msra.mxu1 %v6500_v53 }
 0x397   : > { %6228 = vmatprep.subr.bf16.mxu1 %v6501_v59 }
 0x39a   : > { %6229 = vmatpush3.bf16.msra.mxu1 %v6501_v59 }
 0x40e   : > { %v2161_v23 = vpop.f32.mrb[32].mxu1 }
 0x40f   : > { %v2162_v7 = vadd.f32 %v8011_v4, %v2161_v23  ;;  %v2163_v12 = vpop.f32.mrb[33].mxu1 }
 0x410   : > { %v2164_v15 = vpop.f32.mrb[34].mxu1 }
 0x411   : > { %v2224_v33 = vmul.f32 0.1, %v2162_v7  ;;  %v2165_v27 = vadd.f32 %v8011_v4, %v2164_v15  ;;  %v2166_v14 = vpop.f32.mrb[35].mxu1 }
 0x413   : > { %v2240_v31 = vmax.f32 %v2162_v7, %v2224_v33  ;;  %v2225_v41 = vmul.f32 0.1, %v2165_v27 }
 0x415   : > { %v2272_v35 = vcombine.high %v2240_v31, %v2240_v31  ;;  %v2279_v24 = vrot.slane %v2240_v31, %v8016_v61  ;;  %v2241_v62 = vmax.f32 %v2165_v27, %v2225_v41 }
 0x417   : > { %v2286_v46 = vrot.slane %v2272_v35, %v8016_v61  ;;  %v2287_v34 = vcombine.high %v2279_v24, %v2279_v24  ;;  %v2609_v39 = vsel %vm2608_vm6, %v2279_v24, -inf  ;;  %v2289_v13 = vcombine.high %v2241_v62, %v2241_v62 }
 0x418   : > { %v2610_v44 = vrot.slane %v2609_v39, 4  ;;  %v2296_v52 = vrot.slane %v2241_v62, %v8016_v61 }
 0x419   : > { %v2288_v3 = vcombine.high %v2286_v46, %v2286_v46  ;;  %v2616_v48 = vsel %vm2608_vm6, %v2287_v34, -inf  ;;  %v2623_v26 = vsel %vm2608_vm6, %v2286_v46, -inf  ;;  %v2303_v30 = vrot.slane %v2289_v13, %v8016_v61 }
 0x41a   : > { %v2611_v2 = vmax.f32 %v2609_v39, %v2610_v44  ;;  %v2617_v21 = vrot.slane %v2616_v48, 4  ;;  %v2624_v47 = vrot.slane %v2623_v26, 4  ;;  %v2304_v42 = vcombine.high %v2296_v52, %v2296_v52  ;;  %v2169_v54 = vpop.f32.mrb[36].mxu1 }
 0x41b   : > { %v2630_v63 = vsel %vm2608_vm6, %v2288_v3, -inf  ;;  %v2305_v38 = vcombine.high %v2303_v30, %v2303_v30  ;;  %v2637_v16 = vsel %vm2608_vm6, %v2296_v52, -inf  ;;  %v2651_v0 = vsel %vm2608_vm6, %v2303_v30, -inf  ;;  %v2171_v56 = vpop.f32.mrb[37].mxu1  ;;  %v6502_v52 = vld [vmem:[#allocation9 + $0xb8] sm:$0xff]  }
 0x41c   : > { %v2612_v9 = vrot.slane %v2611_v2, 2  ;;  %v2618_v11 = vmax.f32 %v2616_v48, %v2617_v21  ;;  %v2625_v55 = vmax.f32 %v2623_v26, %v2624_v47  ;;  %v2631_v28 = vrot.slane %v2630_v63, 4  ;;  %v2172_v37 = vpop.f32.mrb[38].mxu1  ;;  %6230 = vmatprep.subr.bf16.mxu1 %v6502_v52 }
 0x41d   : > { %v2638_v8 = vrot.slane %v2637_v16, 4  ;;  %v2644_v22 = vsel %vm2608_vm6, %v2304_v42, -inf  ;;  %v2652_v18 = vrot.slane %v2651_v0, 4  ;;  %v2658_v6 = vsel %vm2608_vm6, %v2305_v38, -inf  ;;  %v2174_v36 = vpop.f32.mrb[39].mxu1  ;;  %6231 = vmatpush3.bf16.msra.mxu1 %v6502_v52 }
 0x41e   : > { %v2613_v23 = vmax.f32 %v2611_v2, %v2612_v9  ;;  %v2619_v7 = vrot.slane %v2618_v11, 2  ;;  %v2626_v12 = vrot.slane %v2625_v55, 2  ;;  %v2632_v15 = vmax.f32 %v2630_v63, %v2631_v28 }
 0x41f   : > { %v2639_v33 = vmax.f32 %v2637_v16, %v2638_v8  ;;  %v2645_v27 = vrot.slane %v2644_v22, 4  ;;  %v2653_v14 = vmax.f32 %v2651_v0, %v2652_v18  ;;  %v2659_v40 = vrot.slane %v2658_v6, 4 }
 0x420   : > { %v2620_v5 = vmax.f32 %v2618_v11, %v2619_v7  ;;  %v2627_v31 = vmax.f32 %v2625_v55, %v2626_v12  ;;  %v2633_v41 = vrot.slane %v2632_v15, 2  ;;  %v2170_v46 = vadd.f32 %v8011_v4, %v2169_v54 }
 0x421   : > { %v2640_v35 = vrot.slane %v2639_v33, 2  ;;  %v2646_v24 = vmax.f32 %v2644_v22, %v2645_v27  ;;  %v2654_v62 = vrot.slane %v2653_v14, 2  ;;  %v2614_v34 = vrot.slane %v2613_v23, 1 }
 0x422   : > { %v2621_v39 = vrot.slane %v2620_v5, 1  ;;  %v2628_v13 = vrot.slane %v2627_v31, 1  ;;  %v2634_v44 = vmax.f32 %v2632_v15, %v2633_v41  ;;  %v2226_v26 = vmul.f32 0.1, %v2170_v46 }
 0x423   : > { %v2641_v3 = vmax.f32 %v2639_v33, %v2640_v35  ;;  %v2647_v48 = vrot.slane %v2646_v24, 2  ;;  %v2173_v30 = vadd.f32 %v8011_v4, %v2172_v37  ;;  %v2655_v47 = vmax.f32 %v2653_v14, %v2654_v62 }
 0x424   : > { %v2622_v2 = vmax.f32 %v2620_v5, %v2621_v39  ;;  %v2635_v21 = vrot.slane %v2634_v44, 1  ;;  %v8062_v42 = vsel %vm8053_vm10, 1.0, %v9357_v57  ;;  %v2242_v63 = vmax.f32 %v2170_v46, %v2226_v26 }
 0x425   : > { %v2642_v54 = vrot.slane %v2641_v3, 1  ;;  %v8064_v53 = vmax.f32 %v2646_v24, %v2647_v48  ;;  %v2227_v38 = vmul.f32 0.1, %v2173_v30  ;;  %v2615_v16 = vmax.f32 %v2613_v23, %v2614_v34  ;;  %v6506_v23 = vld [vmem:[#allocation9 + $0x8] sm:$0xff]  }
 0x426   : > { %v8066_v0 = vmax.f32 %v2627_v31, %v2628_v13  ;;  %v8068_v56 = vmax.f32 %v2634_v44, %v2635_v21  ;;  %v2177_v9 = vpop.f32.mrb[40].mxu1  ;;  %v2656_v11 = vrot.slane %v2655_v47, 1  ;;  %v2306_v55 = vcombine.high %v2242_v63, %v2242_v63 }
 0x427   : > { %v2313_v28 = vrot.slane %v2242_v63, %v8016_v61  ;;  %v2243_v37 = vmax.f32 %v2173_v30, %v2227_v38  ;;  %v2179_v8 = vpop.f32.mrb[41].mxu1  ;;  %v8071_v22 = vmax.f32 %v2658_v6, %v2659_v40  ;;  %v8073_v18 = vmax.f32 %v2641_v3, %v2642_v54 }
 0x428   : > { %v2178_v36 = vadd.f32 %v8011_v4, %v2177_v9  ;;  %v2180_v7 = vpop.f32.mrb[42].mxu1  ;;  %v8078_v12 = vsel %vm3265_vm9, %v2622_v2, %v2615_v16  ;;  %v2320_v15 = vrot.slane %v2306_v55, %v8016_v61  ;;  %v8083_v31 = vmax.f32 %v2655_v47, %v2656_v11 }
 0x429   : > { %v2321_v59 = vcombine.high %v2313_v28, %v2313_v28  ;;  %v2665_v33 = vsel %vm2608_vm6, %v2313_v28, -inf  ;;  %v2323_v27 = vcombine.high %v2243_v37, %v2243_v37  ;;  %v2182_v14 = vpop.f32.mrb[43].mxu1  ;;  %v2330_v6 = vrot.slane %v2243_v37, %v8016_v61 }
 0x42a   : > { %v2666_v43 = vrot.slane %v2665_v33, 4  ;;  %v2228_v5 = vmul.f32 0.1, %v2178_v36  ;;  %v2322_v41 = vcombine.high %v2320_v15, %v2320_v15  ;;  %v2679_v35 = vsel %vm2608_vm6, %v2320_v15, -inf }
 0x42b   : > { %v2672_v40 = vsel %vm2608_vm6, %v2321_v59, -inf  ;;  %v2337_v24 = vrot.slane %v2323_v27, %v8016_v61  ;;  %v2680_v34 = vrot.slane %v2679_v35, 4  ;;  %v2338_v39 = vcombine.high %v2330_v6, %v2330_v6 }
 0x42c   : > { %v2667_v62 = vmax.f32 %v2665_v33, %v2666_v43  ;;  %v2673_v46 = vrot.slane %v2672_v40, 4  ;;  %v2686_v13 = vsel %vm2608_vm6, %v2322_v41, -inf  ;;  %v2693_v52 = vsel %vm2608_vm6, %v2330_v6, -inf }
 0x42d   : > { %v2339_v44 = vcombine.high %v2337_v24, %v2337_v24  ;;  %v2707_v3 = vsel %vm2608_vm6, %v2337_v24, -inf  ;;  %v2681_v30 = vmax.f32 %v2679_v35, %v2680_v34  ;;  %v2687_v2 = vrot.slane %v2686_v13, 4 }
 0x42e   : > { %v2668_v48 = vrot.slane %v2667_v62, 2  ;;  %v2674_v26 = vmax.f32 %v2672_v40, %v2673_v46  ;;  %v2694_v21 = vrot.slane %v2693_v52, 4  ;;  %v2700_v47 = vsel %vm2608_vm6, %v2338_v39, -inf }
 0x42f   : > { %v2708_v54 = vrot.slane %v2707_v3, 4  ;;  %v2181_v63 = vadd.f32 %v8011_v4, %v2180_v7  ;;  %v2682_v9 = vrot.slane %v2681_v30, 2  ;;  %v2688_v11 = vmax.f32 %v2686_v13, %v2687_v2 }
 0x430   : > { %v2669_v38 = vmax.f32 %v2667_v62, %v2668_v48  ;;  %v2675_v16 = vrot.slane %v2674_v26, 2  ;;  %v2695_v55 = vmax.f32 %v2693_v52, %v2694_v21  ;;  %v2701_v28 = vrot.slane %v2700_v47, 4 }
 0x431   : > { %v8093_v37 = vmax.f32 %v2707_v3, %v2708_v54  ;;  %v8096_v8 = vsel %vm2608_vm6, %v2339_v44, -inf  ;;  %v2683_v33 = vmax.f32 %v2681_v30, %v2682_v9  ;;  %v2689_v27 = vrot.slane %v2688_v11, 2 }
 0x432   : > { %v2670_v15 = vrot.slane %v2669_v38, 1  ;;  %v2676_v59 = vmax.f32 %v2674_v26, %v2675_v16  ;;  %v2185_v14 = vpop.f32.mrb[44].mxu1  ;;  %v2696_v43 = vrot.slane %v2695_v55, 2  ;;  %v2702_v6 = vmax.f32 %v2700_v47, %v2701_v28 }
 0x433   : > { %v2244_v41 = vmax.f32 %v2178_v36, %v2228_v5  ;;  %v2187_v7 = vpop.f32.mrb[45].mxu1  ;;  %v2684_v24 = vrot.slane %v2683_v33, 1  ;;  %v8099_v62 = vmax.f32 %v2688_v11, %v2689_v27  ;;  %v2229_v26 = vmul.f32 0.1, %v2181_v63 }
 0x434   : > { %v2677_v35 = vrot.slane %v2676_v59, 1  ;;  %v8102_v34 = vpop.f32.mrb[46].mxu1  ;;  %v8104_v39 = vmax.f32 %v2695_v55, %v2696_v43  ;;  %v2703_v13 = vrot.slane %v2702_v6, 2  ;;  %v8107_v48 = vmax.f32 %v2669_v38, %v2670_v15 }
 0x435   : > { %v2340_v44 = vcombine.high %v2244_v41, %v2244_v41  ;;  %v2347_v52 = vrot.slane %v2244_v41, %v8016_v61  ;;  %v2190_v3 = vpop.f32.mrb[47].mxu1  ;;  %v8112_v30 = vmax.f32 %v2683_v33, %v2684_v24  ;;  %v2245_v9 = vmax.f32 %v2181_v63, %v2229_v26 }
 0x436   : > { %v8109_v36 = vmax.f32 %v2676_v59, %v2677_v35  ;;  %v2186_v38 = vadd.f32 %v8011_v4, %v2185_v14  ;;  %v8119_v11 = vmax.f32 %v2702_v6, %v2703_v13 }
 0x437   : > { %v2354_v21 = vrot.slane %v2340_v44, %v8016_v61  ;;  %v2355_v47 = vcombine.high %v2347_v52, %v2347_v52  ;;  %v2721_v16 = vsel %vm2608_vm6, %v2347_v52, -inf  ;;  %v2357_v27 = vcombine.high %v2245_v9, %v2245_v9 }
 0x438   : > { %v2722_v28 = vrot.slane %v2721_v16, 4  ;;  %v2364_v43 = vrot.slane %v2245_v9, %v8016_v61  ;;  %v2230_v24 = vmul.f32 0.1, %v2186_v38 }
 0x439   : > { %v2356_v55 = vcombine.high %v2354_v21, %v2354_v21  ;;  %v2728_v15 = vsel %vm2608_vm6, %v2355_v47, -inf  ;;  %v2735_v33 = vsel %vm2608_vm6, %v2354_v21, -inf  ;;  %v2371_v14 = vrot.slane %v2357_v27, %v8016_v61  ;;  %v6503_v21 = vld [vmem:[#allocation9 + $0x40] sm:$0xff]  }
 0x43a   : > { %v2729_v59 = vrot.slane %v2728_v15, 4  ;;  %v2723_v41 = vmax.f32 %v2721_v16, %v2722_v28  ;;  %v2736_v7 = vrot.slane %v2735_v33, 4  ;;  %v2372_v6 = vcombine.high %v2364_v43, %v2364_v43  ;;  %6112 = vmatprep.subr.bf16.mxu0 %v6503_v21 }
 0x43b   : > { %v2742_v35 = vsel %vm2608_vm6, %v2356_v55, -inf  ;;  %v2749_v3 = vsel %vm2608_vm6, %v2364_v43, -inf  ;;  %v8127_v26 = vmax.f32 %v2186_v38, %v2230_v24  ;;  %v2373_v16 = vcombine.high %v2371_v14, %v2371_v14  ;;  %v6504_v55 = vld [vmem:[#allocation9] sm:$0xff]  }
 0x43c   : > { %v2730_v63 = vmax.f32 %v2728_v15, %v2729_v59  ;;  %v2743_v44 = vrot.slane %v2742_v35, 4  ;;  %v2724_v13 = vrot.slane %v2723_v41, 2  ;;  %v2737_v52 = vmax.f32 %v2735_v33, %v2736_v7  ;;  %6113 = vmatpush3.bf16.msra.mxu0 %v6504_v55 }
 0x43d   : > { %v2750_v9 = vrot.slane %v2749_v3, 4  ;;  %v2756_v27 = vsel %vm2608_vm6, %v2372_v6, -inf  ;;  %v2763_v20 = vsel %vm2608_vm6, %v2371_v14, -inf  ;;  %v6505_v6 = vld [vmem:[#allocation9 + $0x48] sm:$0xff]  }
 0x43e   : > { %v2731_v47 = vrot.slane %v2730_v63, 2  ;;  %v2744_v25 = vmax.f32 %v2742_v35, %v2743_v44  ;;  %v8129_v28 = vpop.f32.mrb[48].mxu1  ;;  %v2725_v15 = vmax.f32 %v2723_v41, %v2724_v13  ;;  %v2738_v59 = vrot.slane %v2737_v52, 2  ;;  %6114 = vmatprep.subr.bf16.mxu0 %v6505_v6  ;;  %v6510_v6 = vld [vmem:[#allocation9 + $0x18] sm:$0xff]  }
 0x43f   : > { %v2195_v33 = vpop.f32.mrb[49].mxu1  ;;  %v2751_v7 = vmax.f32 %v2749_v3, %v2750_v9  ;;  %v2757_v24 = vrot.slane %v2756_v27, 4  ;;  %v2764_v46 = vrot.slane %v2763_v20, 4  ;;  %v2770_v41 = vsel %vm2608_vm6, %v2373_v16, -inf  ;;  %v6508_v16 = vld [vmem:[#allocation9 + $0x10] sm:$0xff]  }
 0x440   : > { %v2732_v38 = vmax.f32 %v2730_v63, %v2731_v47  ;;  %v2745_v43 = vrot.slane %v2744_v25, 2  ;;  %v8133_v35 = vpop.f32.mrb[50].mxu1  ;;  %v2726_v44 = vrot.slane %v2725_v15, 1  ;;  %v2739_v50 = vmax.f32 %v2737_v52, %v2738_v59  ;;  %v6507_v63 = vld [vmem:[#allocation9 + $0x50] sm:$0xff]   ;;  %6115 = vmatpush3.bf16.msra.mxu0 %v6506_v23 }
 0x441   : > { %v2198_v13 = vpop.f32.mrb[51].mxu1  ;;  %v2752_v33 = vrot.slane %v2751_v7, 2  ;;  %v2758_v21 = vmax.f32 %v2756_v27, %v2757_v24  ;;  %v2765_v9 = vmax.f32 %v2763_v20, %v2764_v46  ;;  %v2771_v40 = vrot.slane %v2770_v41, 4  ;;  %6116 = vmatprep.subr.bf16.mxu0 %v6507_v63  ;;  %v6509_v27 = vld [vmem:[#allocation9 + $0x58] sm:$0xff]  }
 0x442   : > { %v2733_v14 = vrot.slane %v2732_v38, 1  ;;  %v2746_v5 = vmax.f32 %v2744_v25, %v2745_v43  ;;  %v2727_v47 = vmax.f32 %v2725_v15, %v2726_v44  ;;  %v2740_v3 = vrot.slane %v2739_v50, 1 }
 0x443   : > { %v2753_v59 = vmax.f32 %v2751_v7, %v2752_v33  ;;  %v2759_v54 = vrot.slane %v2758_v21, 2  ;;  %v2766_v2 = vrot.slane %v2765_v9, 2  ;;  %v2772_v19 = vmax.f32 %v2770_v41, %v2771_v40 }
 0x444   : > { %v2734_v55 = vmax.f32 %v2732_v38, %v2733_v14  ;;  %v2747_v52 = vrot.slane %v2746_v5, 1  ;;  %v2741_v13 = vmax.f32 %v2739_v50, %v2740_v3  ;;  %v2374_v25 = vcombine.high %v8127_v26, %v8127_v26  ;;  %6117 = vmatpush3.bf16.msra.mxu0 %v6508_v16 }
 0x445   : > { %v2754_v46 = vrot.slane %v2753_v59, 1  ;;  %v2760_v43 = vmax.f32 %v2758_v21, %v2759_v54  ;;  %v2767_v24 = vmax.f32 %v2765_v9, %v2766_v2  ;;  %v2773_v7 = vrot.slane %v2772_v19, 2  ;;  %6118 = vmatprep.subr.bf16.mxu0 %v6509_v27  ;;  %v6511_v21 = vld [vmem:[#allocation9 + $0x60] sm:$0xff]  }
 0x446   : > { %v2748_v15 = vmax.f32 %v2746_v5, %v2747_v52  ;;  %v3286_v20 = vsel %vm3265_vm9, %v2734_v55, %v2727_v47  ;;  %v2381_v23 = vrot.slane %v8127_v26, %v8016_v61  ;;  %v2388_v41 = vrot.slane %v2374_v25, %v8016_v61 }
 0x447   : > { %v3287_v38 = vsel %vm3267_vm11, %v2741_v13, %v3286_v20  ;;  %v2755_v50 = vmax.f32 %v2753_v59, %v2754_v46  ;;  %v2761_v44 = vrot.slane %v2760_v43, 1  ;;  %v2768_v5 = vrot.slane %v2767_v24, 1 }
 0x448   : > { %v3288_v40 = vsel %vm3269_vm12, %v2748_v15, %v3287_v38  ;;  %v2774_v14 = vmax.f32 %v2772_v19, %v2773_v7  ;;  %v2389_v33 = vcombine.high %v2381_v23, %v2381_v23  ;;  %v2777_v54 = vsel %vm2608_vm6, %v2381_v23, -inf  ;;  %6119 = vmatpush3.bf16.msra.mxu0 %v6510_v6 }
 0x449   : > { %v2762_v2 = vmax.f32 %v2760_v43, %v2761_v44  ;;  %v3289_v63 = vsel %vm3271_vm13, %v2755_v50, %v3288_v40  ;;  %v2390_v47 = vcombine.high %v2388_v41, %v2388_v41  ;;  %v2778_v26 = vrot.slane %v2777_v54, 4  ;;  %6120 = vmatprep.subr.bf16.mxu0 %v6511_v21  ;;  %v6513_v50 = vld [vmem:[#allocation9 + $0x68] sm:$0xff]  }
 0x44a   : > { %v8146_v3 = vpop.f32.mrb[52].mxu1  ;;  %v9360_v9 = vrot.slane %v8099_v62, 1  ;;  %v9361_v52 = vrot.slane %v8104_v39, 1  ;;  %v2784_v59 = vsel %vm2608_vm6, %v2389_v33, -inf  ;;  %v2791_v16 = vsel %vm2608_vm6, %v2388_v41, -inf }
 0x44b   : > { %v2203_v13 = vpop.f32.mrb[53].mxu1  ;;  %v8161_v25 = vsel %vm3273_vm14, %v2762_v2, %v3289_v63  ;;  %v2779_v27 = vmax.f32 %v2777_v54, %v2778_v26  ;;  %v2785_v15 = vrot.slane %v2784_v59, 4  ;;  %v2792_v20 = vrot.slane %v2791_v16, 4 }
 0x44c   : > { %v8151_v55 = vmax.f32 %v8099_v62, %v9360_v9  ;;  %v8156_v19 = vmax.f32 %v8104_v39, %v9361_v52  ;;  %v8163_v46 = vpop.f32.mrb[54].mxu1  ;;  %v6512_v62 = vld [vmem:[#allocation9 + $0x20] sm:$0xff]   ;;  %v8165_v43 = vmax.f32 %v2767_v24, %v2768_v5  ;;  %v2775_v38 = vrot.slane %v2774_v14, 1  ;;  %v6514_v9 = vld [vmem:[#allocation9 + $0x28] sm:$0xff]  }
 0x44d   : > { %v2798_v39 = vsel %vm2608_vm6, %v2390_v47, -inf  ;;  %v2189_v7 = vadd.f32 %v8011_v4, %v8102_v34  ;;  %v2206_v23 = vpop.f32.mrb[55].mxu1  ;;  %v2780_v44 = vrot.slane %v2779_v27, 2  ;;  %v2786_v40 = vmax.f32 %v2784_v59, %v2785_v15  ;;  %6121 = vmatpush3.bf16.msra.mxu0 %v6512_v62  ;;  %v6515_v15 = vld [vmem:[#allocation9 + $0x70] sm:$0xff]  }
 0x44e   : > { %v2793_v41 = vmax.f32 %v2791_v16, %v2792_v20  ;;  %v2799_v33 = vrot.slane %v2798_v39, 4  ;;  %v9362_v2 = vrot.slane %v8071_v22, 2  ;;  %v2705_v24 = vrot.slane %v8119_v11, 1  ;;  %6122 = vmatprep.subr.bf16.mxu0 %v6513_v50  ;;  %v6516_v50 = vld [vmem:[#allocation9 + $0x30] sm:$0xff]  }
 0x44f   : > { %v2231_v54 = vmul.f32 0.1, %v2189_v7  ;;  %v9363_v5 = vrot.slane %v8093_v37, 2  ;;  %v2781_v34 = vmax.f32 %v2779_v27, %v2780_v44  ;;  %v2787_v21 = vrot.slane %v2786_v40, 2 }
 0x450   : > { %v8173_v6 = vmax.f32 %v8071_v22, %v9362_v2  ;;  %v2794_v47 = vrot.slane %v2793_v41, 2  ;;  %v2800_v26 = vmax.f32 %v2798_v39, %v2799_v33  ;;  %v8181_v52 = vmax.f32 %v2774_v14, %v2775_v38 }
 0x451   : > { %v8179_v63 = vmax.f32 %v8093_v37, %v9363_v5  ;;  %v2247_v59 = vmax.f32 %v2189_v7, %v2231_v54  ;;  %v9364_v16 = vrot.slane %v8064_v53, 1  ;;  %v2782_v37 = vrot.slane %v2781_v34, 1  ;;  %6123 = vmatpush3.bf16.msra.mxu0 %v6514_v9 }
 0x452   : > { %v2663_v13 = vrot.slane %v8173_v6, 1  ;;  %v2788_v20 = vmax.f32 %v2786_v40, %v2787_v21  ;;  %v2795_v27 = vmax.f32 %v2793_v41, %v2794_v47  ;;  %v2801_v23 = vrot.slane %v2800_v26, 2  ;;  %6124 = vmatprep.subr.bf16.mxu0 %v6515_v15 }
 0x453   : > { %v8186_v22 = vmax.f32 %v8064_v53, %v9364_v16  ;;  %v2391_v44 = vcombine.high %v2247_v59, %v2247_v59  ;;  %v2398_v62 = vrot.slane %v2247_v59, %v8016_v61  ;;  %v8191_v14 = vmax.f32 %v8119_v11, %v2705_v24  ;;  %v6517_v24 = vld [vmem:[#allocation9 + $0x78] sm:$0xff]  }
 0x454   : > { %v2783_v39 = vmax.f32 %v2781_v34, %v2782_v37  ;;  %v2789_v7 = vrot.slane %v2788_v20, 1  ;;  %v2796_v53 = vrot.slane %v2795_v27, 1  ;;  %v2802_v33 = vmax.f32 %v2800_v26, %v2801_v23 }
 0x455   : > { %v2405_v54 = vrot.slane %v2391_v44, %v8016_v61  ;;  %v2406_v40 = vcombine.high %v2398_v62, %v2398_v62  ;;  %v2805_v41 = vsel %vm2608_vm6, %v2398_v62, -inf  ;;  %v9365_v2 = vrot.slane %v8096_v8, 4  ;;  %6125 = vmatpush3.bf16.msra.mxu0 %v6516_v50 }
 0x456   : > { %v2790_v5 = vmax.f32 %v2788_v20, %v2789_v7  ;;  %v2797_v34 = vmax.f32 %v2795_v27, %v2796_v53  ;;  %v2803_v21 = vrot.slane %v2802_v33, 1  ;;  %v2806_v47 = vrot.slane %v2805_v41, 4  ;;  %v8199_v26 = vpop.f32.mrb[56].mxu1  ;;  %v6518_v20 = vld [vmem:[#allocation9 + $0x38] sm:$0xff]   ;;  %6126 = vmatprep.subr.bf16.mxu0 %v6517_v24 }
 0x457   : > { %v2716_v11 = vmax.f32 %v8096_v8, %v9365_v2  ;;  %v2407_v9 = vcombine.high %v2405_v54, %v2405_v54  ;;  %v2812_v59 = vsel %vm2608_vm6, %v2406_v40, -inf  ;;  %v2819_v16 = vsel %vm2608_vm6, %v2405_v54, -inf  ;;  %v2211_v23 = vpop.f32.mrb[57].mxu1 }
 0x458   : > { %v2804_v44 = vmax.f32 %v2802_v33, %v2803_v21  ;;  %v3293_v62 = vsel %vm3265_vm9, %v2790_v5, %v2783_v39  ;;  %v2807_v38 = vmax.f32 %v2805_v41, %v2806_v47  ;;  %v2813_v8 = vrot.slane %v2812_v59, 4  ;;  %v8204_v15 = vpop.f32.mrb[58].mxu1 }
 0x459   : > { %v2717_v37 = vrot.slane %v2716_v11, 2  ;;  %v3294_v27 = vsel %vm3267_vm11, %v2797_v34, %v3293_v62  ;;  %v2820_v7 = vrot.slane %v2819_v16, 4  ;;  %v2826_v53 = vsel %vm2608_vm6, %v2407_v9, -inf  ;;  %v2214_v40 = vpop.f32.mrb[59].mxu1  ;;  %6127 = vmatpush3.bf16.msra.mxu0 %v6518_v20 }
 0x45a   : > { %v2808_v54 = vrot.slane %v2807_v38, 2  ;;  %v2814_v49 = vmax.f32 %v2812_v59, %v2813_v8  ;;  %v2827_v23 = vrot.slane %v2826_v53, 4  ;;  %v2664_v33 = vmax.f32 %v8173_v6, %v2663_v13 }
 0x45b   : > { %v2718_v2 = vmax.f32 %v2716_v11, %v2717_v37  ;;  %v2821_v39 = vmax.f32 %v2819_v16, %v2820_v7  ;;  %v3295_v41 = vsel %vm3269_vm12, %v2804_v44, %v3294_v27  ;;  %v3268_v50 = vsel %vm3267_vm11, %v8066_v0, %v8078_v12 }
 0x45c   : > { %v3279_v5 = vsel %vm3265_vm9, %v8109_v36, %v8107_v48  ;;  %v2809_v34 = vmax.f32 %v2807_v38, %v2808_v54  ;;  %v2815_v11 = vrot.slane %v2814_v49, 2  ;;  %v2828_v21 = vmax.f32 %v2826_v53, %v2827_v23 }
 0x45d   : > { %v3270_v24 = vsel %vm3269_vm12, %v8068_v56, %v3268_v50  ;;  %v2822_v47 = vrot.slane %v2821_v39, 2  ;;  %v2719_v6 = vrot.slane %v2718_v2, 1  ;;  %v3280_v9 = vsel %vm3267_vm11, %v8112_v30, %v3279_v5 }
 0x45e   : > { %v3272_v13 = vsel %vm3271_vm13, %v8073_v18, %v3270_v24  ;;  %v2810_v0 = vrot.slane %v2809_v34, 1  ;;  %v2816_v12 = vmax.f32 %v2814_v49, %v2815_v11  ;;  %v2829_v59 = vrot.slane %v2828_v21, 2 }
 0x45f   : > { %v3274_v48 = vsel %vm3273_vm14, %v8186_v22, %v3272_v13  ;;  %v2823_v36 = vmax.f32 %v2821_v39, %v2822_v47  ;;  %v3281_v56 = vsel %vm3269_vm12, %v8151_v55, %v3280_v9  ;;  %v2194_v16 = vadd.f32 %v8011_v4, %v8129_v28 }
 0x460   : > { %v3276_v38 = vsel %vm3275_vm15, %v8083_v31, %v3274_v48  ;;  %v2811_v18 = vmax.f32 %v2809_v34, %v2810_v0  ;;  %v2817_v37 = vrot.slane %v2816_v12, 1  ;;  %v2830_v44 = vmax.f32 %v2828_v21, %v2829_v59 }
 0x461   : > { %v8231_v30 = vsel %vm3277_vm1, %v2664_v33, %v3276_v38  ;;  %v2824_v49 = vrot.slane %v2823_v36, 1  ;;  %v9366_v62 = vrot.slane %v8179_v63, 1  ;;  %v2720_v8 = vmax.f32 %v2718_v2, %v2719_v6 }
 0x462   : > { %v3282_v31 = vsel %vm3271_vm13, %v8156_v19, %v3281_v56  ;;  %v2818_v20 = vmax.f32 %v2816_v12, %v2817_v37  ;;  %v2831_v55 = vrot.slane %v2830_v44, 1  ;;  %v3296_v27 = vsel %vm3271_vm13, %v2811_v18, %v3295_v41 }
 0x463   : > { %v2713_v22 = vmax.f32 %v8179_v63, %v9366_v62  ;;  %v3283_v28 = vsel %vm3273_vm14, %v8191_v14, %v3282_v31  ;;  %v2825_v7 = vmax.f32 %v2823_v36, %v2824_v49  ;;  %v2232_v40 = vmul.f32 0.1, %v2194_v16 }
 0x464   : > { %v2197_v54 = vadd.f32 %v8011_v4, %v8133_v35  ;;  %v2832_v23 = vmax.f32 %v2830_v44, %v2831_v55  ;;  %v3297_v63 = vsel %vm3273_vm14, %v2818_v20, %v3296_v27  ;;  %v2202_v19 = vadd.f32 %v8011_v4, %v8146_v3  ;;  %v8250_v33 = vpop.f32.mrb[60].mxu1 }
 0x465   : > { %v3284_v53 = vsel %vm3275_vm15, %v2713_v22, %v3283_v28  ;;  %v3298_v14 = vsel %vm3275_vm15, %v2825_v7, %v3297_v63  ;;  %v3360_v39 = vrot.slane %v8231_v30, 1  ;;  %v2219_v50 = vpop.f32.mrb[61].mxu1  ;;  %v2248_v34 = vmax.f32 %v2194_v16, %v2232_v40 }
 0x466   : > { %v8246_v2 = vsel %vm3277_vm1, %v2720_v8, %v3284_v53  ;;  %v8258_v5 = vsel %vm3277_vm1, %v2832_v23, %v3298_v14  ;;  %v2233_v11 = vmul.f32 0.1, %v2197_v54  ;;  %v2234_v21 = vmul.f32 0.1, %v2202_v19  ;;  %v8260_v24 = vpop.f32.mrb[62].mxu1 }
 0x467   : > { %v3361_v41 = vrot.slane %v8246_v2, 1  ;;  %v3385_v35 = vpack.c.bf16 %v8246_v2, %v8231_v30  ;;  %v8264_v3 = vadd.f32 %v8011_v4, %v8163_v46  ;;  %v3291_v47 = vsel %vm3275_vm15, %v8165_v43, %v8161_v25  ;;  %v2222_v9 = vpop.f32.mrb[63].mxu1 }
 0x468   : > { %v8277_v13 = vadd.f32 %v8011_v4, %v8199_v26  ;;  %v2408_v0 = vcombine.high %v2248_v34, %v2248_v34  ;;  %v2415_v46 = vrot.slane %v2248_v34, %v8016_v61  ;;  %v2249_v12 = vmax.f32 %v2197_v54, %v2233_v11 }
 0x469   : > { %3627 = vmatprep.mubr.bf16.mxu0 %v3385_v35  ;;  %v3374_v6 = vsel %vm1422_vm2, %v3360_v39, %v3361_v41  ;;  %v2250_v59 = vmax.f32 %v2202_v19, %v2234_v21  ;;  %v8281_v48 = vmul.f32 0.1, %v8264_v3  ;;  %v8285_v25 = vsel %vm3277_vm1, %v8181_v52, %v3291_v47 }
 0x46a   : > { %v8288_v43 = vmul.f32 %v8030_v32, %v3374_v6  ;;  %v8291_v36 = vmul.f32 0.1, %v8277_v13  ;;  %v2422_v4 = vrot.slane %v2408_v0, %v8016_v61  ;;  %v2423_v26 = vcombine.high %v2415_v46, %v2415_v46 }
 0x46b   : > { %v2833_v38 = vsel %vm2608_vm6, %v2415_v46, -inf  ;;  %v2425_v56 = vcombine.high %v2249_v12, %v2249_v12  ;;  %v2432_v18 = vrot.slane %v2249_v12, %v8016_v61  ;;  %v2442_v37 = vcombine.high %v2250_v59, %v2250_v59 }
 0x46c   : > { %v2834_v16 = vrot.slane %v2833_v38, 4  ;;  %v8297_v44 = vrot.slane %v2250_v59, %v8016_v61  ;;  %v2424_v52 = vcombine.high %v2422_v4, %v2422_v4  ;;  %v2840_v49 = vsel %vm2608_vm6, %v2423_v26, -inf }
 0x46d   : > { %v2847_v62 = vsel %vm2608_vm6, %v2422_v4, -inf  ;;  %v2439_v22 = vrot.slane %v2425_v56, %v8016_v61  ;;  %v2841_v31 = vrot.slane %v2840_v49, 4  ;;  %v2440_v55 = vcombine.high %v2432_v18, %v2432_v18 }
 0x46e   : > { %v2835_v8 = vmax.f32 %v2833_v38, %v2834_v16  ;;  %v2848_v20 = vrot.slane %v2847_v62, 4  ;;  %v2854_v27 = vsel %vm2608_vm6, %v2424_v52, -inf  ;;  %v2861_v7 = vsel %vm2608_vm6, %v2432_v18, -inf }
 0x46f   : > { %v2441_v28 = vcombine.high %v2439_v22, %v2439_v22  ;;  %v2875_v53 = vsel %vm2608_vm6, %v2439_v22, -inf  ;;  %v2842_v54 = vmax.f32 %v2840_v49, %v2841_v31  ;;  %v2855_v63 = vrot.slane %v2854_v27, 4 }
 0x470   : > { %v2836_v40 = vrot.slane %v2835_v8, 2  ;;  %v2849_v23 = vmax.f32 %v2847_v62, %v2848_v20  ;;  %v2862_v19 = vrot.slane %v2861_v7, 4  ;;  %v2868_v14 = vsel %vm2608_vm6, %v2440_v55, -inf }
 0x471   : > { %v2876_v35 = vrot.slane %v2875_v53, 4  ;;  %v2882_v50 = vsel %vm2608_vm6, %v2441_v28, -inf  ;;  %v2843_v11 = vrot.slane %v2842_v54, 2  ;;  %v2856_v47 = vmax.f32 %v2854_v27, %v2855_v63 }
 0x472   : > { %v2837_v34 = vmax.f32 %v2835_v8, %v2836_v40  ;;  %v2850_v21 = vrot.slane %v2849_v23, 2  ;;  %v2863_v6 = vmax.f32 %v2861_v7, %v2862_v19  ;;  %v2869_v9 = vrot.slane %v2868_v14, 4 }
 0x473   : > { %v2877_v0 = vmax.f32 %v2875_v53, %v2876_v35  ;;  %v2883_v46 = vrot.slane %v2882_v50, 4  ;;  %v2844_v59 = vmax.f32 %v2842_v54, %v2843_v11  ;;  %v2857_v26 = vrot.slane %v2856_v47, 2 }
 0x474   : > { %v2838_v12 = vrot.slane %v2837_v34, 1  ;;  %v2851_v4 = vmax.f32 %v2849_v23, %v2850_v21  ;;  %v2864_v38 = vrot.slane %v2863_v6, 2  ;;  %v2870_v56 = vmax.f32 %v2868_v14, %v2869_v9 }
 0x475   : > { %v2878_v16 = vrot.slane %v2877_v0, 2  ;;  %v2884_v18 = vmax.f32 %v2882_v50, %v2883_v46  ;;  %v2845_v49 = vrot.slane %v2844_v59, 1  ;;  %v2858_v22 = vmax.f32 %v2856_v47, %v2857_v26 }
 0x476   : > { %v2839_v52 = vmax.f32 %v2837_v34, %v2838_v12  ;;  %v2852_v62 = vrot.slane %v2851_v4, 1  ;;  %v2865_v8 = vmax.f32 %v2863_v6, %v2864_v38  ;;  %v2871_v31 = vrot.slane %v2870_v56, 2 }
 0x477   : > { %v2879_v20 = vmax.f32 %v2877_v0, %v2878_v16  ;;  %v2885_v55 = vrot.slane %v2884_v18, 2  ;;  %v2846_v27 = vmax.f32 %v2844_v59, %v2845_v49  ;;  %v2859_v7 = vrot.slane %v2858_v22, 1 }
 0x478   : > { %v2853_v28 = vmax.f32 %v2851_v4, %v2852_v62  ;;  %v2456_v53 = vrot.slane %v2442_v37, %v8016_v61  ;;  %v2866_v40 = vrot.slane %v2865_v8, 1  ;;  %v2872_v54 = vmax.f32 %v2870_v56, %v2871_v31 }
 0x479   : > { %v2880_v23 = vrot.slane %v2879_v20, 1  ;;  %v2886_v63 = vmax.f32 %v2884_v18, %v2885_v55  ;;  %v2860_v19 = vmax.f32 %v2858_v22, %v2859_v7  ;;  %v3300_v14 = vsel %vm3265_vm9, %v2846_v27, %v2839_v52 }
 0x47a   : > { %v2457_v35 = vcombine.high %v8297_v44, %v8297_v44  ;;  %v2458_v50 = vcombine.high %v2456_v53, %v2456_v53  ;;  %v3301_v34 = vsel %vm3267_vm11, %v2853_v28, %v3300_v14  ;;  %v2867_v11 = vmax.f32 %v2865_v8, %v2866_v40 }
 0x47b   : > { %v2873_v21 = vrot.slane %v2872_v54, 1  ;;  %v2881_v47 = vmax.f32 %v2879_v20, %v2880_v23  ;;  %v2887_v6 = vrot.slane %v2886_v63, 1  ;;  %v3302_v9 = vsel %vm3269_vm12, %v2860_v19, %v3301_v34 }
 0x47c   : > { %v2889_v37 = vsel %vm2608_vm6, %v8297_v44, -inf  ;;  %v2896_v0 = vsel %vm2608_vm6, %v2457_v35, -inf  ;;  %v3303_v12 = vsel %vm3271_vm13, %v2867_v11, %v3302_v9  ;;  %v2903_v38 = vsel %vm2608_vm6, %v2456_v53, -inf }
 0x47d   : > { %v2874_v46 = vmax.f32 %v2872_v54, %v2873_v21  ;;  %v2890_v59 = vrot.slane %v2889_v37, 4  ;;  %v2897_v4 = vrot.slane %v2896_v0, 4  ;;  %v2888_v26 = vmax.f32 %v2886_v63, %v2887_v6 }
 0x47e   : > { %v2910_v56 = vsel %vm2608_vm6, %v2458_v50, -inf  ;;  %v2251_v16 = vmax.f32 %v8264_v3, %v8281_v48  ;;  %v2904_v44 = vrot.slane %v2903_v38, 4 }
 0x47f   : > { %v3304_v18 = vsel %vm3273_vm14, %v2874_v46, %v3303_v12  ;;  %v2891_v52 = vmax.f32 %v2889_v37, %v2890_v59  ;;  %v2898_v49 = vmax.f32 %v2896_v0, %v2897_v4  ;;  %v2911_v22 = vrot.slane %v2910_v56, 4 }
 0x480   : > { %v3305_v62 = vsel %vm3275_vm15, %v2881_v47, %v3304_v18  ;;  %v2459_v8 = vcombine.high %v2251_v16, %v2251_v16  ;;  %v2466_v31 = vrot.slane %v2251_v16, %v8016_v61  ;;  %v2905_v28 = vmax.f32 %v2903_v38, %v2904_v44 }
 0x481   : > { %v8325_v20 = vsel %vm3277_vm1, %v2888_v26, %v3305_v62  ;;  %v2892_v55 = vrot.slane %v2891_v52, 2  ;;  %v2899_v27 = vrot.slane %v2898_v49, 2  ;;  %v2912_v7 = vmax.f32 %v2910_v56, %v2911_v22 }
 0x482   : > { %v2473_v3 = vrot.slane %v2459_v8, %v8016_v61  ;;  %v2474_v48 = vcombine.high %v2466_v31, %v2466_v31  ;;  %v2917_v53 = vsel %vm2608_vm6, %v2466_v31, -inf  ;;  %v2906_v23 = vrot.slane %v2905_v28, 2 }
 0x483   : > { %v2893_v40 = vmax.f32 %v2891_v52, %v2892_v55  ;;  %v2900_v54 = vmax.f32 %v2898_v49, %v2899_v27  ;;  %v2918_v63 = vrot.slane %v2917_v53, 4  ;;  %v2913_v19 = vrot.slane %v2912_v7, 2 }
 0x484   : > { %v2475_v14 = vcombine.high %v2473_v3, %v2473_v3  ;;  %v2924_v35 = vsel %vm2608_vm6, %v2474_v48, -inf  ;;  %v2931_v50 = vsel %vm2608_vm6, %v2473_v3, -inf  ;;  %v2907_v21 = vmax.f32 %v2905_v28, %v2906_v23 }
 0x485   : > { %v2894_v34 = vrot.slane %v2893_v40, 1  ;;  %v2901_v11 = vrot.slane %v2900_v54, 1  ;;  %v2919_v47 = vmax.f32 %v2917_v53, %v2918_v63  ;;  %v2914_v6 = vmax.f32 %v2912_v7, %v2913_v19 }
 0x486   : > { %v2925_v9 = vrot.slane %v2924_v35, 4  ;;  %v2932_v37 = vrot.slane %v2931_v50, 4  ;;  %v2938_v0 = vsel %vm2608_vm6, %v2475_v14, -inf  ;;  %v2908_v59 = vrot.slane %v2907_v21, 1 }
 0x487   : > { %v2895_v46 = vmax.f32 %v2893_v40, %v2894_v34  ;;  %v2902_v12 = vmax.f32 %v2900_v54, %v2901_v11  ;;  %v2920_v4 = vrot.slane %v2919_v47, 2  ;;  %v2915_v26 = vrot.slane %v2914_v6, 1  ;;  %v8347_v34 = vld [vmem:[#allocation7] ss:$0 sm:$0xff] }
 0x488   : > { %v2926_v38 = vmax.f32 %v2924_v35, %v2925_v9  ;;  %v2933_v56 = vmax.f32 %v2931_v50, %v2932_v37  ;;  %v2939_v16 = vrot.slane %v2938_v0, 4  ;;  %v2909_v18 = vmax.f32 %v2907_v21, %v2908_v59 }
 0x489   : > { %v3307_v52 = vsel %vm3265_vm9, %v2902_v12, %v2895_v46  ;;  %v2921_v49 = vmax.f32 %v2919_v47, %v2920_v4  ;;  %v3362_v44 = vrot.slane %v8285_v25, 1  ;;  %v2916_v62 = vmax.f32 %v2914_v6, %v2915_v26 }
 0x48a   : > { %v2927_v22 = vrot.slane %v2926_v38, 2  ;;  %v2934_v8 = vrot.slane %v2933_v56, 2  ;;  %v2940_v31 = vmax.f32 %v2938_v0, %v2939_v16  ;;  %v3308_v55 = vsel %vm3267_vm11, %v2909_v18, %v3307_v52 }
 0x48b   : > { %v2922_v27 = vrot.slane %v2921_v49, 1  ;;  %v3373_v28 = vsel %vm1422_vm2, %v3361_v41, %v3362_v44  ;;  %v2252_v7 = vmax.f32 %v8277_v13, %v8291_v36  ;;  %v3309_v40 = vsel %vm3269_vm12, %v2916_v62, %v3308_v55 }
 0x48c   : > { %v2928_v3 = vmax.f32 %v2926_v38, %v2927_v22  ;;  %v2935_v48 = vmax.f32 %v2933_v56, %v2934_v8  ;;  %v2941_v53 = vrot.slane %v2940_v31, 2  ;;  %v3377_v23 = vmul.f32 %v8038_v29, %v3373_v28 }
 0x48d   : > { %v2923_v54 = vmax.f32 %v2921_v49, %v2922_v27  ;;  %v2476_v63 = vcombine.high %v2252_v7, %v2252_v7  ;;  %v2483_v19 = vrot.slane %v2252_v7, %v8016_v61  ;;  %v3336_v14 = vrot.slane %v8231_v30, 7 }
 0x48e   : > { %v2929_v35 = vrot.slane %v2928_v3, 1  ;;  %v2942_v50 = vmax.f32 %v2940_v31, %v2941_v53  ;;  %v2213_v41 = vadd.f32 %v8347_v34, %v8204_v15  ;;  %v3386_v36 = vpack.c.bf16 %v3377_v23, %v8288_v43 }
 0x48f   : > { %v3310_v13 = vsel %vm3271_vm13, %v2923_v54, %v3309_v40  ;;  %v2490_v11 = vrot.slane %v2476_v63, %v8016_v61  ;;  %v2491_v21 = vcombine.high %v2483_v19, %v2483_v19  ;;  %v2936_v6 = vrot.slane %v2935_v48, 1 }
 0x490   : > { %v2930_v47 = vmax.f32 %v2928_v3, %v2929_v35  ;;  %v2943_v9 = vrot.slane %v2942_v50, 1  ;;  %v2945_v37 = vsel %vm2608_vm6, %v2483_v19, -inf  ;;  %6232 = vmatprep.mubr.bf16.mxu1 %v3386_v36  ;;  %v3337_v15 = vrot.slane %v8246_v2, 7 }
 0x491   : > { %v2492_v0 = vcombine.high %v2490_v11, %v2490_v11  ;;  %v2946_v46 = vrot.slane %v2945_v37, 4  ;;  %v2952_v12 = vsel %vm2608_vm6, %v2491_v21, -inf  ;;  %v2959_v59 = vsel %vm2608_vm6, %v2490_v11, -inf }
 0x492   : > { %v8359_v4 = vsel %vm3273_vm14, %v2930_v47, %v3310_v13  ;;  %v2953_v43 = vrot.slane %v2952_v12, 4  ;;  %v2960_v26 = vrot.slane %v2959_v59, 4  ;;  %v2237_v16 = vmul.f32 0.1, %v2213_v41 }
 0x493   : > { %v2947_v38 = vmax.f32 %v2945_v37, %v2946_v46  ;;  %v2966_v56 = vsel %vm2608_vm6, %v2492_v0, -inf  ;;  %v2218_v18 = vadd.f32 %v8347_v34, %v8250_v33  ;;  %v8364_v52 = vmax.f32 %v2935_v48, %v2936_v6 }
 0x494   : > { %v2954_v49 = vmax.f32 %v2952_v12, %v2953_v43  ;;  %v2961_v62 = vmax.f32 %v2959_v59, %v2960_v26  ;;  %v2967_v22 = vrot.slane %v2966_v56, 4  ;;  %v8366_v8 = vmax.f32 %v2942_v50, %v2943_v9 }
 0x495   : > { %v2948_v31 = vrot.slane %v2947_v38, 2  ;;  %v2253_v55 = vmax.f32 %v2213_v41, %v2237_v16  ;;  %v2238_v27 = vmul.f32 0.1, %v2218_v18  ;;  %v3363_v53 = vrot.slane %v8258_v5, 1 }
 0x496   : > { %v2955_v28 = vrot.slane %v2954_v49, 2  ;;  %v2962_v7 = vrot.slane %v2961_v62, 2  ;;  %v2968_v3 = vmax.f32 %v2966_v56, %v2967_v22  ;;  %v3364_v35 = vrot.slane %v8325_v20, 1 }
 0x497   : > { %v2949_v40 = vmax.f32 %v2947_v38, %v2948_v31  ;;  %v2493_v54 = vcombine.high %v2253_v55, %v2253_v55  ;;  %v2500_v23 = vrot.slane %v2253_v55, %v8016_v61  ;;  %v2254_v33 = vmax.f32 %v2218_v18, %v2238_v27 }
 0x498   : > { %v2956_v48 = vmax.f32 %v2954_v49, %v2955_v28  ;;  %v2963_v63 = vmax.f32 %v2961_v62, %v2962_v7  ;;  %v2969_v19 = vrot.slane %v2968_v3, 2  ;;  %v9367_v12 = vand.u32 7, %v7387_v10 }
 0x499   : > { %v2950_v50 = vrot.slane %v2949_v40, 1  ;;  %v2507_v13 = vrot.slane %v2493_v54, %v8016_v61  ;;  %v2508_v41 = vcombine.high %v2500_v23, %v2500_v23  ;;  %v2973_v36 = vsel %vm2608_vm6, %v2500_v23, -inf }
 0x49a   : > { %v2957_v11 = vrot.slane %v2956_v48, 1  ;;  %v2964_v21 = vrot.slane %v2963_v63, 1  ;;  %v2970_v47 = vmax.f32 %v2968_v3, %v2969_v19  ;;  %v2974_v6 = vrot.slane %v2973_v36, 4 }
 0x49b   : > { %v2951_v9 = vmax.f32 %v2949_v40, %v2950_v50  ;;  %v2509_v37 = vcombine.high %v2507_v13, %v2507_v13  ;;  %v2980_v0 = vsel %vm2608_vm6, %v2508_v41, -inf  ;;  %v2987_v46 = vsel %vm2608_vm6, %v2507_v13, -inf }
 0x49c   : > { %vm8377_vm4 = vcmp.ne.s32.totalorder %v9367_v12, 7  ;;  %v2958_v43 = vmax.f32 %v2956_v48, %v2957_v11  ;;  %v2965_v26 = vmax.f32 %v2963_v63, %v2964_v21  ;;  %v2971_v38 = vrot.slane %v2970_v47, 1 }
 0x49d   : > { %v2975_v56 = vmax.f32 %v2973_v36, %v2974_v6  ;;  %v2981_v16 = vrot.slane %v2980_v0, 4  ;;  %v2988_v18 = vrot.slane %v2987_v46, 4  ;;  %v2994_v49 = vsel %vm2608_vm6, %v2509_v37, -inf }
 0x49e   : > { %v2510_v62 = vcombine.high %v2254_v33, %v2254_v33  ;;  %v2972_v22 = vmax.f32 %v2970_v47, %v2971_v38  ;;  %v3314_v31 = vsel %vm3265_vm9, %v2958_v43, %v2951_v9  ;;  %v2995_v27 = vrot.slane %v2994_v49, 4 }
 0x49f   : > { %v2976_v55 = vrot.slane %v2975_v56, 2  ;;  %v3315_v28 = vsel %vm3267_vm11, %v2965_v26, %v3314_v31  ;;  %v2982_v7 = vmax.f32 %v2980_v0, %v2981_v16  ;;  %v2989_v3 = vmax.f32 %v2987_v46, %v2988_v18 }
 0x4a0   : > { %v2517_v40 = vrot.slane %v2254_v33, %v8016_v61  ;;  %v2996_v23 = vmax.f32 %v2994_v49, %v2995_v27  ;;  %v3316_v48 = vsel %vm3269_vm12, %v2972_v22, %v3315_v28  ;;  %v2524_v63 = vrot.slane %v2510_v62, %v8016_v61 }
 0x4a1   : > { %v2977_v54 = vmax.f32 %v2975_v56, %v2976_v55  ;;  %v2983_v19 = vrot.slane %v2982_v7, 2  ;;  %v2990_v50 = vrot.slane %v2989_v3, 2  ;;  %v8395_v22 = vsel %vm8377_vm4, 1.0, %v9357_v57 }
 0x4a2   : > { %v2525_v13 = vcombine.high %v2517_v40, %v2517_v40  ;;  %v3001_v41 = vsel %vm2608_vm6, %v2517_v40, -inf  ;;  %v2997_v11 = vrot.slane %v2996_v23, 2  ;;  %v2526_v21 = vcombine.high %v2524_v63, %v2524_v63 }
 0x4a3   : > { %v2978_v36 = vrot.slane %v2977_v54, 1  ;;  %v3002_v47 = vrot.slane %v3001_v41, 4  ;;  %v2984_v6 = vmax.f32 %v2982_v7, %v2983_v19  ;;  %v2991_v9 = vmax.f32 %v2989_v3, %v2990_v50 }
 0x4a4   : > { %v3008_v37 = vsel %vm2608_vm6, %v2525_v13, -inf  ;;  %v3015_v33 = vsel %vm2608_vm6, %v2524_v63, -inf  ;;  %v2998_v46 = vmax.f32 %v2996_v23, %v2997_v11  ;;  %v3022_v16 = vsel %vm2608_vm6, %v2526_v21, -inf }
 0x4a5   : > { %v2979_v0 = vmax.f32 %v2977_v54, %v2978_v36  ;;  %v3003_v12 = vmax.f32 %v3001_v41, %v3002_v47  ;;  %v3009_v43 = vrot.slane %v3008_v37, 4  ;;  %v2985_v26 = vrot.slane %v2984_v6, 1 }
 0x4a6   : > { %v2992_v38 = vrot.slane %v2991_v9, 1  ;;  %v3016_v56 = vrot.slane %v3015_v33, 4  ;;  %v2999_v55 = vrot.slane %v2998_v46, 1  ;;  %v3023_v28 = vrot.slane %v3022_v16, 4 }
 0x4a7   : > { %v3317_v18 = vsel %vm3271_vm13, %v2979_v0, %v3316_v48  ;;  %v3004_v49 = vrot.slane %v3003_v12, 2  ;;  %v3010_v62 = vmax.f32 %v3008_v37, %v3009_v43  ;;  %v2986_v31 = vmax.f32 %v2984_v6, %v2985_v26 }
 0x4a8   : > { %v3017_v27 = vmax.f32 %v3015_v33, %v3016_v56  ;;  %v2993_v7 = vmax.f32 %v2991_v9, %v2992_v38  ;;  %v3371_v54 = vsel %vm1422_vm2, %v3363_v53, %v3364_v35  ;;  %v3024_v59 = vmax.f32 %v3022_v16, %v3023_v28 }
 0x4a9   : > { %v3005_v3 = vmax.f32 %v3003_v12, %v3004_v49  ;;  %v3011_v40 = vrot.slane %v3010_v62, 2  ;;  %v3318_v23 = vsel %vm3273_vm14, %v2986_v31, %v3317_v18  ;;  %v3372_v63 = vsel %vm1422_vm2, %v3362_v44, %v3363_v53 }
 0x4aa   : > { %v3018_v48 = vrot.slane %v3017_v27, 2  ;;  %v3378_v13 = vmul.f32 %v8062_v42, %v3372_v63  ;;  %v3379_v41 = vmul.f32 %v8395_v22, %v3371_v54  ;;  %v3025_v11 = vrot.slane %v3024_v59, 2 }
 0x4ab   : > { %v3006_v19 = vrot.slane %v3005_v3, 1  ;;  %v3012_v50 = vmax.f32 %v3010_v62, %v3011_v40  ;;  %v2221_v21 = vadd.f32 %v8347_v34, %v8260_v24  ;;  %v3089_v47 = vand.u32 7, %v7664_v58 }
 0x4ac   : > { %v3019_v36 = vmax.f32 %v3017_v27, %v3018_v48  ;;  %v3000_v6 = vmax.f32 %v2998_v46, %v2999_v55  ;;  %v3389_v37 = vpack.c.bf16 %v3379_v41, %v3378_v13  ;;  %v3096_v33 = vand.u32 7, %v7430_v60 }
 0x4ad   : > { %v3013_v9 = vrot.slane %v3012_v50, 1  ;;  %v3026_v44 = vmax.f32 %v3024_v59, %v3025_v11  ;;  %v2239_v53 = vmul.f32 0.1, %v2221_v21  ;;  %vm3181_vm5 = vcmp.ne.s32.totalorder %v3089_v47, 7 }
 0x4ae   : > { %v3020_v0 = vrot.slane %v3019_v36, 1  ;;  %v3007_v12 = vmax.f32 %v3005_v3, %v3006_v19  ;;  %6233 = vmatmul.mubr.bf16.vlgmr.msra.gmra.mrb[64].mxu1 %v3389_v37  ;;  %vm3182_vm3 = vcmp.ne.s32.totalorder %v3096_v33, 7  ;;  %v3312_v24 = vsel %vm3275_vm15, %v8364_v52, %v8359_v4 }
 0x4af   : > { %v3014_v43 = vmax.f32 %v3012_v50, %v3013_v9  ;;  %v3027_v46 = vrot.slane %v3026_v44, 1  ;;  %v2255_v26 = vmax.f32 %v2221_v21, %v2239_v53  ;;  %v8424_v38 = vsel %vm3181_vm5, 1.0, %v9357_v57 }
 0x4b0   : > { %v3021_v34 = vmax.f32 %v3019_v36, %v3020_v0  ;;  %v8429_v16 = vsel %vm3277_vm1, %v8366_v8, %v3312_v24  ;;  %v3319_v18 = vsel %vm3275_vm15, %v2993_v7, %v3318_v23  ;;  %v9370_v49 = vand.u32 7, %v7207_v1 }
 0x4b1   : > { %v3321_v56 = vsel %vm3265_vm9, %v3014_v43, %v3007_v12  ;;  %v3028_v62 = vmax.f32 %v3026_v44, %v3027_v46  ;;  %v2527_v52 = vcombine.high %v2255_v26, %v2255_v26  ;;  %v2534_v31 = vrot.slane %v2255_v26, %v8016_v61 }
 0x4b2   : > { %vm3153_vm7 = vcmp.ne.s32.totalorder %v9370_v49, 0  ;;  %v3322_v4 = vsel %vm3267_vm11, %v3021_v34, %v3321_v56  ;;  %v8437_v55 = vsel %vm3182_vm3, 1.0, %v9357_v57  ;;  %v8440_v27 = vsel %vm3277_vm1, %v3000_v6, %v3319_v18 }
 0x4b3   : > { %v3365_v8 = vrot.slane %v8429_v16, 1  ;;  %v3350_v28 = vsel %vm1373_vm0, %v3336_v14, %v3337_v15  ;;  %v2541_v7 = vrot.slane %v2527_v52, %v8016_v61  ;;  %v2542_v3 = vcombine.high %v2534_v31, %v2534_v31 }
 0x4b4   : > { %v3029_v40 = vsel %vm2608_vm6, %v2534_v31, -inf  ;;  %v8452_v54 = vsel %vm3153_vm7, 1.0, %v9357_v57  ;;  %v3323_v48 = vsel %vm3269_vm12, %v3028_v62, %v3322_v4  ;;  %v3366_v59 = vrot.slane %v8440_v27, 1  ;;  %v9373_v62 = vld [vmem:[#allocation23_spill] sm:$0xff] }
 0x4b5   : > { %v3030_v23 = vrot.slane %v3029_v40, 4  ;;  %v3370_v63 = vsel %vm1422_vm2, %v3364_v35, %v3365_v8  ;;  %v2543_v19 = vcombine.high %v2541_v7, %v2541_v7  ;;  %v3036_v50 = vsel %vm2608_vm6, %v2542_v3, -inf }
 0x4b6   : > { %v3043_v13 = vsel %vm2608_vm6, %v2541_v7, -inf  ;;  %v3380_v41 = vmul.f32 %v8424_v38, %v3370_v63  ;;  %v3037_v11 = vrot.slane %v3036_v50, 4  ;;  %v3369_v6 = vsel %vm1422_vm2, %v3365_v8, %v3366_v59 }
 0x4b7   : > { %v3031_v36 = vmax.f32 %v3029_v40, %v3030_v23  ;;  %v3044_v21 = vrot.slane %v3043_v13, 4  ;;  %v3050_v9 = vsel %vm2608_vm6, %v2543_v19, -inf  ;;  %v3381_v37 = vmul.f32 %v8437_v55, %v3369_v6 }
 0x4b8   : > { %v3103_v35 = vand.u32 7, %v7680_v17  ;;  %v3110_v0 = vand.u32 7, %v7472_v45  ;;  %v3038_v53 = vmax.f32 %v3036_v50, %v3037_v11  ;;  %v3051_v43 = vrot.slane %v3050_v9, 4 }
 0x4b9   : > { %v3032_v44 = vrot.slane %v3031_v36, 2  ;;  %v3045_v12 = vmax.f32 %v3043_v13, %v3044_v21  ;;  %v3392_v24 = vpack.c.bf16 %v3381_v37, %v3380_v41  ;;  %v8472_v34 = vmul.f32 %v8041_v51, %v3350_v28 }
 0x4ba   : > { %vm3183_vm8 = vcmp.ne.s32.totalorder %v3103_v35, 7  ;;  %v3388_v46 = vpack.c.bf16 %v8258_v5, %v8285_v25  ;;  %v3039_v56 = vrot.slane %v3038_v53, 2  ;;  %v3052_v49 = vmax.f32 %v3050_v9, %v3051_v43 }
 0x4bb   : > { %v3033_v26 = vmax.f32 %v3031_v36, %v3032_v44  ;;  %v3046_v18 = vrot.slane %v3045_v12, 2  ;;  %6236 = vmatprep.mubr.bf16.mxu1 %v3392_v24  ;;  %vm8476_vm10 = vcmp.ne.s32.totalorder %v3110_v0, 7  ;;  %v8481_v45 = vsel %vm3183_vm8, 1.0, %v9357_v57 }
 0x4bc   : > { %v9374_v4 = vand.u32 7, %v9373_v62  ;;  %v9375_v52 = vand.u32 7, %v7387_v10  ;;  %v3040_v8 = vmax.f32 %v3038_v53, %v3039_v56  ;;  %v3053_v7 = vrot.slane %v3052_v49, 2 }
 0x4bd   : > { %v3034_v31 = vrot.slane %v3033_v26, 1  ;;  %v3047_v28 = vmax.f32 %v3045_v12, %v3046_v18  ;;  %v3338_v23 = vrot.slane %v8285_v25, 7  ;;  %v3339_v63 = vrot.slane %v8258_v5, 7  ;;  %v6526_v5 = vld [vmem:[#allocation12 + $0x8] sm:$0xff]   ;;  %v6527_v25 = vld [vmem:[#allocation12 + $0xa0] sm:$0xff]  }
 0x4be   : > { %vm3155_vm4 = vcmp.ne.s32.totalorder %v9374_v4, 0  ;;  %vm3156_vm5 = vcmp.ne.s32.totalorder %v9375_v52, 0  ;;  %v3041_v50 = vrot.slane %v3040_v8, 1  ;;  %v3054_v41 = vmax.f32 %v3052_v49, %v3053_v7 }
 0x4bf   : > { %v8488_v3 = vsel %vm3155_vm4, 1.0, %v9357_v57  ;;  %v8491_v40 = vsel %vm3156_vm5, 1.0, %v9357_v57  ;;  %v3035_v19 = vmax.f32 %v3033_v26, %v3034_v31  ;;  %v3048_v13 = vrot.slane %v3047_v28, 1 }
 0x4c0   : > { %v3348_v10 = vsel %vm1373_vm0, %v3338_v23, %v3339_v63  ;;  %v3349_v36 = vsel %vm1373_vm0, %v3337_v15, %v3338_v23  ;;  %v3391_v11 = vpack.c.bf16 %v8429_v16, %v8325_v20  ;;  %vm3157_vm3 = vcmp.ne.s32.totalorder %v3089_v47, 0 }
 0x4c1   : > { %v3042_v21 = vmax.f32 %v3040_v8, %v3041_v50  ;;  %v3049_v6 = vmax.f32 %v3047_v28, %v3048_v13  ;;  %v3055_v9 = vrot.slane %v3054_v41, 1  ;;  %v3324_v37 = vsel %vm3271_vm13, %v3035_v19, %v3323_v48  ;;  %v6519_v19 = vld [vmem:[#allocation12 + $0x80] sm:$0xff]   ;;  %v6520_v50 = vld [vmem:[#allocation12 + $0x88] sm:$0xff]  }
 0x4c2   : > { %v3354_v44 = vmul.f32 %v8488_v3, %v3349_v36  ;;  %v3355_v53 = vmul.f32 %v8491_v40, %v3348_v10  ;;  %vm3158_vm7 = vcmp.ne.s32.totalorder %v3096_v33, 0  ;;  %v8511_v2 = vsel %vm3157_vm3, 1.0, %v9357_v57  ;;  %6240 = vmatprep.subr.bf16.mxu1 %v6519_v19  ;;  %v6522_v13 = vld [vmem:[#allocation12 + $0x40] sm:$0xff]   ;;  %v6524_v10 = vld [vmem:[#allocation12 + $0x98] sm:$0xff]   ;;  %v6525_v36 = vld [vmem:[#allocation12 + $0x48] sm:$0xff]  }
 0x4c3   : > { %v3056_v15 = vmax.f32 %v3054_v41, %v3055_v9  ;;  %v3325_v12 = vsel %vm3273_vm14, %v3042_v21, %v3324_v37  ;;  %v8515_v58 = vsel %vm3158_vm7, 1.0, %v9357_v57  ;;  %v3340_v47 = vrot.slane %v8325_v20, 7  ;;  %6241 = vmatpush3.bf16.msra.mxu1 %v6519_v19  ;;  %v6523_v41 = vld [vmem:[#allocation12] sm:$0xff]   ;;  %6164 = vmatprep.subr.bf16.mxu0 %v6522_v13  ;;  %v6530_v21 = vld [vmem:[#allocation12 + $0xa8] sm:$0xff]   ;;  %v6532_v9 = vld [vmem:[#allocation12 + $0x18] sm:$0xff]  }
 0x4c4   : > { %v3326_v48 = vsel %vm3275_vm15, %v3049_v6, %v3325_v12  ;;  %v3387_v43 = vpack.c.bf16 %v3355_v53, %v3354_v44  ;;  %v3341_v24 = vrot.slane %v8429_v16, 7  ;;  %vm3159_vm8 = vcmp.ne.s32.totalorder %v3103_v35, 0  ;;  %6242 = vmatprep.subr.bf16.mxu1 %v6520_v50  ;;  %v6531_v6 = vld [vmem:[#allocation12 + $0x58] sm:$0xff]   ;;  %v6533_v37 = vld [vmem:[#allocation12 + $0xb0] sm:$0xff]   ;;  %v6534_v44 = vld [vmem:[#allocation12 + $0x60] sm:$0xff]  }
 0x4c5   : > { %v3327_v60 = vsel %vm3277_vm1, %v3056_v15, %v3326_v48  ;;  %v8524_v33 = vsel %vm8476_vm10, 1.0, %v9357_v57  ;;  %v3347_v26 = vsel %vm1373_vm0, %v3339_v63, %v3340_v47  ;;  %vm3160_vm4 = vcmp.ne.s32.totalorder %v3110_v0, 0  ;;  %v6535_v53 = vld [vmem:[#allocation12 + $0x20] sm:$0xff]   ;;  %v6536_v15 = vld [vmem:[#allocation12 + $0xb8] sm:$0xff]   ;;  %v6537_v12 = vld [vmem:[#allocation12 + $0x68] sm:$0xff]  }
 0x4c6   : > { %v3343_v56 = vrot.slane %v3327_v60, 7  ;;  %v3367_v18 = vrot.slane %v3327_v60, 1  ;;  %v3346_v20 = vsel %vm1373_vm0, %v3340_v47, %v3341_v24  ;;  %v8531_v49 = vsel %vm3159_vm8, 1.0, %v9357_v57  ;;  %v6538_v47 = vld [vmem:[#allocation12 + $0x28] sm:$0xff]   ;;  %v6539_v48 = vld [vmem:[#allocation12 + $0x70] sm:$0xff]  }
 0x4c7   : > { %v3356_v16 = vmul.f32 %v8511_v2, %v3347_v26  ;;  %v3357_v35 = vmul.f32 %v8515_v58, %v3346_v20  ;;  %v3394_v17 = vpack.c.bf16 %v3327_v60, %v8440_v27  ;;  %v3342_v62 = vrot.slane %v8440_v27, 7  ;;  %6243 = vmatpush3.bf16.msra.mxu1 %v6520_v50  ;;  %v6542_v60 = vld [vmem:[#allocation12 + $0x38] sm:$0xff]  }
 0x4c8   : > { %v3351_v0 = vsel %vm1373_vm0, %v3343_v56, %v3336_v14  ;;  %v3368_v4 = vsel %vm1422_vm2, %v3366_v59, %v3367_v18  ;;  %v3375_v52 = vsel %vm1422_vm2, %v3367_v18, %v3360_v39  ;;  %v8550_v31 = vsel %vm3160_vm4, 1.0, %v9357_v57  ;;  %v6545_v26 = vld [vmem:[%s9301_s13 + $0x4] ss:$8 sps:$4 sm:$0xff]  }
 0x4c9   : > { %v3352_v8 = vmul.f32 %v8452_v54, %v3351_v0  ;;  %v3382_v28 = vmul.f32 %v8481_v45, %v3368_v4  ;;  %v3383_v7 = vmul.f32 %v8524_v33, %v3375_v52  ;;  %v3390_v14 = vpack.c.bf16 %v3357_v35, %v3356_v16 }
 0x4ca   : > { %v3344_v27 = vsel %vm1373_vm0, %v3342_v62, %v3343_v56  ;;  %v3345_v59 = vsel %vm1373_vm0, %v3341_v24, %v3342_v62  ;;  %v6541_v24 = vld [vmem:[#allocation12 + $0x78] sm:$0xff]  }
 0x4cb   : > { %v3384_v30 = vpack.c.bf16 %v8472_v34, %v3352_v8  ;;  %v3395_v23 = vpack.c.bf16 %v3383_v7, %v3382_v28  ;;  %v3358_v39 = vmul.f32 %v8531_v49, %v3345_v59  ;;  %v3359_v57 = vmul.f32 %v8550_v31, %v3344_v27  ;;  %v6521_v34 = vld [vmem:[#allocation12 + $0x90] sm:$0xff]   ;;  %v8570_v62 = vld [vmem:[#allocation10] ss:$0 sm:$0xff] }
 0x4cc   : > { %6244 = vmatprep.subr.bf16.mxu1 %v6521_v34 }
 0x4cd   : > { %3628 = vmatmul.mubr.bf16.vlgmr.msra.gmra.mrb[0].mxu0 %v3384_v30  ;;  %6237 = vmatmul.mubr.bf16.gmra.mrb[68].mxu1 %v3395_v23  ;;  %v3393_v63 = vpack.c.bf16 %v3359_v57, %v3358_v39 }
 0x4ce   : > { %3635 = vmatprep.mubr.bf16.mxu0 %v3388_v46  ;;  %6245 = vmatpush3.bf16.msra.mxu1 %v6521_v34  ;;  %v6528_v46 = vld [vmem:[#allocation12 + $0x50] sm:$0xff]  }
 0x4cf   : > { %6165 = vmatpush3.bf16.msra.mxu0 %v6523_v41  ;;  %6246 = vmatprep.subr.bf16.mxu1 %v6524_v10 }
 0x4d0   : > { %6166 = vmatprep.subr.bf16.mxu0 %v6525_v36 }
 0x4d2   : > { %6247 = vmatpush3.bf16.msra.mxu1 %v6524_v10 }
 0x4d3   : > { %6167 = vmatpush3.bf16.msra.mxu0 %v6526_v5  ;;  %6248 = vmatprep.subr.bf16.mxu1 %v6527_v25 }
 0x4d4   : > { %6168 = vmatprep.subr.bf16.mxu0 %v6528_v46 }
 0x4d5   : > { %3636 = vmatmul.mubr.bf16.gmra.mrb[4].mxu0 %v3387_v43  ;;  %v6540_v43 = vld [vmem:[#allocation12 + $0x30] sm:$0xff]  }
 0x4d6   : > { %3643 = vmatprep.mubr.bf16.mxu0 %v3391_v11  ;;  %v6529_v11 = vld [vmem:[#allocation12 + $0x10] sm:$0xff]   ;;  %6249 = vmatpush3.bf16.msra.mxu1 %v6527_v25 }
 0x4d7   : > { %6169 = vmatpush3.bf16.msra.mxu0 %v6529_v11  ;;  %6250 = vmatprep.subr.bf16.mxu1 %v6530_v21 }
 0x4d8   : > { %6170 = vmatprep.subr.bf16.mxu0 %v6531_v6 }
 0x4da   : > { %6251 = vmatpush3.bf16.msra.mxu1 %v6530_v21 }
 0x4db   : > { %6171 = vmatpush3.bf16.msra.mxu0 %v6532_v9  ;;  %6252 = vmatprep.subr.bf16.mxu1 %v6533_v37 }
 0x4dc   : > { %6172 = vmatprep.subr.bf16.mxu0 %v6534_v44 }
 0x4dd   : > { %3644 = vmatmul.mubr.bf16.gmra.mrb[8].mxu0 %v3390_v14 }
 0x4de   : > { %3651 = vmatprep.mubr.bf16.mxu0 %v3394_v17  ;;  %6253 = vmatpush3.bf16.msra.mxu1 %v6533_v37 }
 0x4df   : > { %6173 = vmatpush3.bf16.msra.mxu0 %v6535_v53  ;;  %6254 = vmatprep.subr.bf16.mxu1 %v6536_v15 }
 0x4e0   : > { %6174 = vmatprep.subr.bf16.mxu0 %v6537_v12 }
 0x4e2   : > { %6255 = vmatpush3.bf16.msra.mxu1 %v6536_v15 }
 0x4e3   : > { %6175 = vmatpush3.bf16.msra.mxu0 %v6538_v47 }
 0x4e4   : > { %6176 = vmatprep.subr.bf16.mxu0 %v6539_v48 }
 0x4e5   : > { %3652 = vmatmul.mubr.bf16.gmra.mrb[12].mxu0 %v3393_v63 }
 0x4e7   : > { %6177 = vmatpush3.bf16.msra.mxu0 %v6540_v43 }
 0x4e8   : > { %6178 = vmatprep.subr.bf16.mxu0 %v6541_v24 }
 0x4eb   : > { %6179 = vmatpush3.bf16.msra.mxu0 %v6542_v60 }
 0x4ec   : > { %4506 = vmatprep.subr.bf16.mxu0 %v6545_v26 }
 0x581   : > { %v6234_v56 = vpop.f32.mrb[64].mxu1 }
 0x582   : > { %v3694_v18 = vpop.f32.mrb[65].mxu1 }
 0x583   : > { %v6235_v20 = vpop.f32.mrb[66].mxu1 }
 0x584   : > { %v3697_v16 = vpop.f32.mrb[67].mxu1 }
 0x5a0   : > { %v6128_v35 = vpop.f32.mrb[0].mxu0  ;;  %v8568_v17 = vpop.f32.mrb[68].mxu1 }
 0x5a1   : > { %v6129_v0 = vpop.f32.mrb[1].mxu0  ;;  %v3710_v4 = vpop.f32.mrb[69].mxu1 }
 0x5a2   : > { %v6130_v52 = vadd.f32 %v6129_v0, %v6128_v35  ;;  %v6131_v8 = vpop.f32.mrb[2].mxu0  ;;  %v8572_v28 = vpop.f32.mrb[70].mxu1 }
 0x5a3   : > { %v6132_v7 = vpop.f32.mrb[3].mxu0  ;;  %v3713_v14 = vpop.f32.mrb[71].mxu1 }
 0x5a4   : > { %v3630_v27 = vadd.f32 %v6130_v52, %v8570_v62  ;;  %v6133_v59 = vadd.f32 %v6132_v7, %v6131_v8 }
 0x5a6   : > { %v3695_v30 = vadd.f32 %v3694_v18, %v3630_v27  ;;  %v3633_v23 = vadd.f32 %v6133_v59, %v8570_v62 }
 0x5a8   : > { %v3725_v39 = vmul.f32 0.1, %v3695_v30  ;;  %v3698_v57 = vadd.f32 %v3697_v16, %v3633_v23  ;;  %v6134_v63 = vpop.f32.mrb[4].mxu0 }
 0x5a9   : > { %v6135_v19 = vpop.f32.mrb[5].mxu0 }
 0x5aa   : > { %v8576_v50 = vmax.f32 %v3695_v30, %v3725_v39  ;;  %v3726_v34 = vmul.f32 0.1, %v3698_v57  ;;  %v6136_v13 = vadd.f32 %v6135_v19, %v6134_v63  ;;  %v6137_v41 = vpop.f32.mrb[6].mxu0 }
 0x5ab   : > { %v6138_v10 = vpop.f32.mrb[7].mxu0 }
 0x5ac   : > { %v3734_v36 = vmax.f32 %v3698_v57, %v3726_v34  ;;  %v3638_v5 = vadd.f32 %v6136_v13, %v8570_v62  ;;  %v3741_v25 = vrot.slane %v8576_v50, 7  ;;  %v3765_v46 = vrot.slane %v8576_v50, 1 }
 0x5ad   : > { %v6139_v11 = vadd.f32 %v6138_v10, %v6137_v41 }
 0x5ae   : > { %v3742_v21 = vrot.slane %v3734_v36, 7  ;;  %v3766_v6 = vrot.slane %v3734_v36, 1  ;;  %v3703_v9 = vadd.f32 %v6234_v56, %v3638_v5  ;;  %v3790_v37 = vpack.c.bf16 %v3734_v36, %v8576_v50  ;;  %v6543_v50 = vld [vmem:[%s9301_s13] ss:$8 sps:$4 sm:$0xff]  }
 0x5af   : > { %v3641_v44 = vadd.f32 %v6139_v11, %v8570_v62 }
 0x5b0   : > { %v3727_v53 = vmul.f32 0.1, %v3703_v9  ;;  %v6140_v15 = vpop.f32.mrb[8].mxu0  ;;  %4032 = vmatprep.mubr.bf16.mxu0 %v3790_v37  ;;  %v3779_v12 = vsel %vm1422_vm2, %v3765_v46, %v3766_v6  ;;  %v8591_v47 = vsel %vm1373_vm0, %v3741_v25, %v3742_v21 }
 0x5b1   : > { %v3706_v48 = vadd.f32 %v6235_v20, %v3641_v44  ;;  %v6141_v43 = vpop.f32.mrb[9].mxu0  ;;  %v3781_v7 = vmul.f32 %v8030_v32, %v3779_v12 }
 0x5b2   : > { %v8593_v24 = vmax.f32 %v3703_v9, %v3727_v53  ;;  %v6142_v60 = vadd.f32 %v6141_v43, %v6140_v15  ;;  %v6143_v26 = vpop.f32.mrb[10].mxu0 }
 0x5b3   : > { %v3728_v56 = vmul.f32 0.1, %v3706_v48  ;;  %v6144_v18 = vpop.f32.mrb[11].mxu0 }
 0x5b4   : > { %v3743_v16 = vrot.slane %v8593_v24, 7  ;;  %v3767_v35 = vrot.slane %v8593_v24, 1  ;;  %v3646_v0 = vadd.f32 %v6142_v60, %v8570_v62  ;;  %v6145_v52 = vadd.f32 %v6144_v18, %v6143_v26 }
 0x5b5   : > { %v8598_v8 = vmax.f32 %v3706_v48, %v3728_v56 }
 0x5b6   : > { %v3711_v27 = vadd.f32 %v3710_v4, %v3646_v0  ;;  %v3649_v20 = vadd.f32 %v6145_v52, %v8570_v62  ;;  %v3778_v59 = vsel %vm1422_vm2, %v3766_v6, %v3767_v35  ;;  %v3754_v30 = vsel %vm1373_vm0, %v3742_v21, %v3743_v16 }
 0x5b7   : > { %v3744_v23 = vrot.slane %v8598_v8, 7  ;;  %v3768_v39 = vrot.slane %v8598_v8, 1  ;;  %v3782_v57 = vmul.f32 %v8038_v29, %v3778_v59  ;;  %v3793_v63 = vpack.c.bf16 %v8598_v8, %v8593_v24  ;;  %v6552_v24 = vld [vmem:[%s9301_s13 + $0x30] ss:$8 sps:$4 sm:$0xff]   ;;  %v6554_v8 = vld [vmem:[%s9301_s13 + $0x34] ss:$8 sps:$4 sm:$0xff]  }
 0x5b8   : > { %v3729_v19 = vmul.f32 0.1, %v3711_v27  ;;  %v3714_v34 = vadd.f32 %v3713_v14, %v3649_v20  ;;  %v6146_v4 = vpop.f32.mrb[12].mxu0  ;;  %v8618_v37 = vmul.f32 %v8488_v3, %v3754_v30 }
 0x5b9   : > { %v6147_v13 = vpop.f32.mrb[13].mxu0  ;;  %v3791_v41 = vpack.c.bf16 %v3782_v57, %v3781_v7  ;;  %v3777_v10 = vsel %vm1422_vm2, %v3767_v35, %v3768_v39  ;;  %v3753_v36 = vsel %vm1373_vm0, %v3743_v16, %v3744_v23 }
 0x5ba   : > { %v8615_v5 = vmax.f32 %v3711_v27, %v3729_v19  ;;  %v3730_v11 = vmul.f32 0.1, %v3714_v34  ;;  %v6148_v21 = vadd.f32 %v6147_v13, %v6146_v4  ;;  %v6149_v6 = vpop.f32.mrb[14].mxu0  ;;  %v8621_v14 = vmul.f32 %v8491_v40, %v3753_v36 }
 0x5bb   : > { %v6150_v9 = vpop.f32.mrb[15].mxu0  ;;  %6256 = vmatprep.mubr.bf16.mxu1 %v3791_v41  ;;  %v3783_v43 = vmul.f32 %v8062_v42, %v3777_v10 }
 0x5bc   : > { %v3745_v44 = vrot.slane %v8615_v5, 7  ;;  %v3769_v53 = vrot.slane %v8615_v5, 1  ;;  %v3738_v15 = vmax.f32 %v3714_v34, %v3730_v11  ;;  %v3654_v12 = vadd.f32 %v6148_v21, %v8570_v62 }
 0x5bd   : > { %v6151_v48 = vadd.f32 %v6150_v9, %v6149_v6  ;;  %v3792_v60 = vpack.c.bf16 %v8621_v14, %v8618_v37  ;;  %v3758_v6 = vmul.f32 %v8041_v51, %v8591_v47 }
 0x5be   : > { %v3746_v26 = vrot.slane %v3738_v15, 7  ;;  %v3770_v56 = vrot.slane %v3738_v15, 1  ;;  %v3719_v18 = vadd.f32 %v8568_v17, %v3654_v12  ;;  %v3776_v16 = vsel %vm1422_vm2, %v3768_v39, %v3769_v53 }
 0x5bf   : > { %v3657_v35 = vadd.f32 %v6151_v48, %v8570_v62  ;;  %v3784_v0 = vmul.f32 %v8395_v22, %v3776_v16  ;;  %v3796_v52 = vpack.c.bf16 %v3738_v15, %v8615_v5  ;;  %v3752_v7 = vsel %vm1373_vm0, %v3744_v23, %v3745_v44  ;;  %v6551_v16 = vld [vmem:[%s9301_s13 + $0x24] ss:$8 sps:$4 sm:$0xff]  }
 0x5c0   : > { %v3731_v27 = vmul.f32 0.1, %v3719_v18  ;;  %v3775_v20 = vsel %vm1422_vm2, %v3769_v53, %v3770_v56  ;;  %v3751_v59 = vsel %vm1373_vm0, %v3745_v44, %v3746_v26  ;;  %v3761_v39 = vmul.f32 %v8511_v2, %v3752_v7  ;;  %v6561_v7 = vld [vmem:[%s9301_s13 + $0x60] ss:$8 sps:$4 sm:$0xff]  }
 0x5c1   : > { %v3722_v17 = vadd.f32 %v8572_v28, %v3657_v35  ;;  %v3794_v30 = vpack.c.bf16 %v3784_v0, %v3783_v43  ;;  %v3762_v62 = vmul.f32 %v8515_v58, %v3751_v59  ;;  %v3785_v10 = vmul.f32 %v8424_v38, %v3775_v20  ;;  %v6549_v35 = vld [vmem:[%s9301_s13 + $0x20] ss:$8 sps:$4 sm:$0xff]   ;;  %v6558_v0 = vld [vmem:[%s9301_s13 + $0x50] ss:$8 sps:$4 sm:$0xff]   ;;  %v6566_v20 = vld [vmem:[%s9301_s13 + $0x74] ss:$8 sps:$4 sm:$0xff]  }
 0x5c2   : > { %v3739_v57 = vmax.f32 %v3719_v18, %v3731_v27  ;;  %v6546_v18 = vld [vmem:[%s9301_s13 + $0x10] ss:$8 sps:$4 sm:$0xff]   ;;  %v6563_v27 = vld [vmem:[%s9301_s13 + $0x64] ss:$8 sps:$4 sm:$0xff]  }
 0x5c3   : > { %v3732_v19 = vmul.f32 0.1, %v3722_v17  ;;  %6257 = vmatmul.mubr.bf16.vlgmr.msra.gmra.mrb[72].mxu1 %v3794_v30  ;;  %v3795_v34 = vpack.c.bf16 %v3762_v62, %v3761_v39  ;;  %v6564_v59 = vld [vmem:[%s9301_s13 + $0x70] ss:$8 sps:$4 sm:$0xff]   ;;  %v6569_v30 = vld [vmem:[%s9301_s13 + $0x84] ss:$8 sps:$4 sm:$0xff]  }
 0x5c4   : > { %v3747_v4 = vrot.slane %v3739_v57, 7  ;;  %v3771_v23 = vrot.slane %v3739_v57, 1  ;;  %v6572_v39 = vld [vmem:[%s9301_s13 + $0x94] ss:$8 sps:$4 sm:$0xff]   ;;  %v6570_v62 = vld [vmem:[%s9301_s13 + $0x90] ss:$8 sps:$4 sm:$0xff]  }
 0x5c5   : > { %v3740_v13 = vmax.f32 %v3722_v17, %v3732_v19  ;;  %v6567_v17 = vld [vmem:[%s9301_s13 + $0x80] ss:$8 sps:$4 sm:$0xff]   ;;  %v6575_v19 = vld [vmem:[%s9301_s13 + $0xa4] ss:$8 sps:$4 sm:$0xff]  }
 0x5c6   : > { %v3774_v41 = vsel %vm1422_vm2, %v3770_v56, %v3771_v23  ;;  %v3750_v28 = vsel %vm1373_vm0, %v3746_v26, %v3747_v4  ;;  %v6548_v26 = vld [vmem:[%s9301_s13 + $0x14] ss:$8 sps:$4 sm:$0xff]  }
 0x5c7   : > { %v3748_v36 = vrot.slane %v3740_v13, 7  ;;  %v3772_v5 = vrot.slane %v3740_v13, 1  ;;  %v3786_v11 = vmul.f32 %v8437_v55, %v3774_v41  ;;  %v3799_v21 = vpack.c.bf16 %v3740_v13, %v3739_v57  ;;  %v6573_v57 = vld [vmem:[%s9301_s13 + $0xa0] ss:$8 sps:$4 sm:$0xff]   ;;  %v6581_v13 = vld [vmem:[%s9301_s13 + $0xc4] ss:$8 sps:$4 sm:$0xff]  }
 0x5c8   : > { %v6584_v41 = vld [vmem:[%s9301_s13 + $0xd4] ss:$8 sps:$4 sm:$0xff]  }
 0x5c9   : > { %v3797_v9 = vpack.c.bf16 %v3786_v11, %v3785_v10  ;;  %v3756_v37 = vsel %vm1373_vm0, %v3748_v36, %v3741_v25  ;;  %v3773_v14 = vsel %vm1422_vm2, %v3771_v23, %v3772_v5  ;;  %v3780_v44 = vsel %vm1422_vm2, %v3772_v5, %v3765_v46  ;;  %v6579_v23 = vld [vmem:[%s9301_s13 + $0xc0] ss:$8 sps:$4 sm:$0xff]   ;;  %v6582_v10 = vld [vmem:[%s9301_s13 + $0xd0] ss:$8 sps:$4 sm:$0xff]   ;;  %v6590_v5 = vld [vmem:[%s9301_s13 + $0xf4] ss:$8 sps:$4 sm:$0xff]  }
 0x5ca   : > { %v3757_v53 = vmul.f32 %v8452_v54, %v3756_v37  ;;  %v3787_v15 = vmul.f32 %v8481_v45, %v3773_v14  ;;  %v3788_v47 = vmul.f32 %v8524_v33, %v3780_v44  ;;  %v3749_v12 = vsel %vm1373_vm0, %v3747_v4, %v3748_v36  ;;  %v6576_v4 = vld [vmem:[%s9301_s13 + $0xb0] ss:$8 sps:$4 sm:$0xff]   ;;  %v6585_v36 = vld [vmem:[%s9301_s13 + $0xe0] ss:$8 sps:$4 sm:$0xff]  }
 0x5cb   : > { %6260 = vmatprep.mubr.bf16.mxu1 %v3797_v9  ;;  %v3763_v25 = vmul.f32 %v8531_v49, %v3750_v28  ;;  %v3764_v48 = vmul.f32 %v8550_v31, %v3749_v12  ;;  %v6587_v28 = vld [vmem:[%s9301_s13 + $0xe4] ss:$8 sps:$4 sm:$0xff]   ;;  %v6588_v11 = vld [vmem:[%s9301_s13 + $0xf0] ss:$8 sps:$4 sm:$0xff]  }
 0x5cc   : > { %v3789_v43 = vpack.c.bf16 %v3758_v6, %v3757_v53  ;;  %v3800_v46 = vpack.c.bf16 %v3788_v47, %v3787_v15  ;;  %v8770_v15 = vld [vmem:[#allocation13] ss:$0 sm:$0xff] }
 0x5cd   : > { %v3798_v56 = vpack.c.bf16 %v3764_v48, %v3763_v25 }
 0x5ce   : > { %4033 = vmatmul.mubr.bf16.vlgmr.msra.gmra.mrb[16].mxu0 %v3789_v43  ;;  %6261 = vmatmul.mubr.bf16.gmra.mrb[76].mxu1 %v3800_v46 }
 0x5cf   : > { %4040 = vmatprep.mubr.bf16.mxu0 %v3793_v63  ;;  %4507 = vmatpush1.bf16.msra.mxu0 %v6543_v50  ;;  %v6557_v63 = vld [vmem:[%s9301_s13 + $0x44] ss:$8 sps:$4 sm:$0xff]  }
 0x5d0   : > { %4508 = vmatprep.subr.bf16.mxu0 %v6548_v26 }
 0x5d3   : > { %4509 = vmatpush1.bf16.msra.mxu0 %v6546_v18 }
 0x5d4   : > { %4510 = vmatprep.subr.bf16.mxu0 %v6551_v16 }
 0x5d6   : > { %4041 = vmatmul.mubr.bf16.gmra.mrb[20].mxu0 %v3792_v60  ;;  %v6555_v60 = vld [vmem:[%s9301_s13 + $0x40] ss:$8 sps:$4 sm:$0xff]  }
 0x5d7   : > { %4048 = vmatprep.mubr.bf16.mxu0 %v3796_v52  ;;  %4511 = vmatpush1.bf16.msra.mxu0 %v6549_v35  ;;  %v6560_v52 = vld [vmem:[%s9301_s13 + $0x54] ss:$8 sps:$4 sm:$0xff]  }
 0x5d8   : > { %4512 = vmatprep.subr.bf16.mxu0 %v6554_v8 }
 0x5db   : > { %4513 = vmatpush1.bf16.msra.mxu0 %v6552_v24 }
 0x5dc   : > { %4514 = vmatprep.subr.bf16.mxu0 %v6557_v63 }
 0x5de   : > { %4049 = vmatmul.mubr.bf16.gmra.mrb[24].mxu0 %v3795_v34  ;;  %v6578_v34 = vld [vmem:[%s9301_s13 + $0xb4] ss:$8 sps:$4 sm:$0xff]  }
 0x5df   : > { %4056 = vmatprep.mubr.bf16.mxu0 %v3799_v21  ;;  %4515 = vmatpush1.bf16.msra.mxu0 %v6555_v60  ;;  %v6593_v21 = vld [vmem:[%s9301_s13 + $0x104] ss:$8 sps:$4 sm:$0xff]  }
 0x5e0   : > { %4516 = vmatprep.subr.bf16.mxu0 %v6560_v52 }
 0x5e3   : > { %4517 = vmatpush1.bf16.msra.mxu0 %v6558_v0 }
 0x5e4   : > { %4518 = vmatprep.subr.bf16.mxu0 %v6563_v27 }
 0x5e6   : > { %4057 = vmatmul.mubr.bf16.gmra.mrb[28].mxu0 %v3798_v56 }
 0x5e7   : > { %4519 = vmatpush1.bf16.msra.mxu0 %v6561_v7 }
 0x5e8   : > { %4520 = vmatprep.subr.bf16.mxu0 %v6566_v20 }
 0x5eb   : > { %4521 = vmatpush1.bf16.msra.mxu0 %v6564_v59 }
 0x5ec   : > { %4522 = vmatprep.subr.bf16.mxu0 %v6569_v30 }
 0x5ef   : > { %4523 = vmatpush1.bf16.msra.mxu0 %v6567_v17 }
 0x5f0   : > { %4524 = vmatprep.subr.bf16.mxu0 %v6572_v39 }
 0x5f3   : > { %4525 = vmatpush1.bf16.msra.mxu0 %v6570_v62 }
 0x5f4   : > { %4526 = vmatprep.subr.bf16.mxu0 %v6575_v19 }
 0x5f7   : > { %4527 = vmatpush1.bf16.msra.mxu0 %v6573_v57 }
 0x5f8   : > { %4528 = vmatprep.subr.bf16.mxu0 %v6578_v34 }
 0x5fb   : > { %4529 = vmatpush1.bf16.msra.mxu0 %v6576_v4 }
 0x5fc   : > { %4530 = vmatprep.subr.bf16.mxu0 %v6581_v13 }
 0x5ff   : > { %4531 = vmatpush1.bf16.msra.mxu0 %v6579_v23 }
 0x600   : > { %4532 = vmatprep.subr.bf16.mxu0 %v6584_v41 }
 0x603   : > { %4533 = vmatpush1.bf16.msra.mxu0 %v6582_v10 }
 0x604   : > { %4534 = vmatprep.subr.bf16.mxu0 %v6587_v28 }
 0x607   : > { %4535 = vmatpush1.bf16.msra.mxu0 %v6585_v36 }
 0x608   : > { %4536 = vmatprep.subr.bf16.mxu0 %v6590_v5 }
 0x60b   : > { %4537 = vmatpush1.bf16.msra.mxu0 %v6588_v11 }
 0x60c   : > { %4579 = vmatprep.subr.bf16.mxu0 %v6593_v21 }
 0x696   : > { %v6258_v6 = vpop.f32.mrb[72].mxu1 }
 0x697   : > { %v4099_v9 = vpop.f32.mrb[73].mxu1 }
 0x698   : > { %v6259_v37 = vpop.f32.mrb[74].mxu1 }
 0x699   : > { %v4102_v14 = vpop.f32.mrb[75].mxu1 }
 0x6a1   : > { %v6180_v44 = vpop.f32.mrb[16].mxu0  ;;  %v8768_v53 = vpop.f32.mrb[76].mxu1 }
 0x6a2   : > { %v6181_v47 = vpop.f32.mrb[17].mxu0  ;;  %v4115_v12 = vpop.f32.mrb[77].mxu1 }
 0x6a3   : > { %v6182_v25 = vadd.f32 %v6181_v47, %v6180_v44  ;;  %v6183_v48 = vpop.f32.mrb[18].mxu0  ;;  %v8772_v50 = vpop.f32.mrb[78].mxu1 }
 0x6a4   : > { %v6184_v43 = vpop.f32.mrb[19].mxu0  ;;  %v4118_v46 = vpop.f32.mrb[79].mxu1 }
 0x6a5   : > { %v4035_v26 = vadd.f32 %v6182_v25, %v8770_v15  ;;  %v6185_v56 = vadd.f32 %v6184_v43, %v6183_v48 }
 0x6a7   : > { %v4100_v18 = vadd.f32 %v4099_v9, %v4035_v26  ;;  %v4038_v16 = vadd.f32 %v6185_v56, %v8770_v15 }
 0x6a9   : > { %v4130_v35 = vmul.f32 0.1, %v4100_v18  ;;  %v4103_v24 = vadd.f32 %v4102_v14, %v4038_v16  ;;  %v6186_v8 = vpop.f32.mrb[20].mxu0 }
 0x6aa   : > { %v6187_v63 = vpop.f32.mrb[21].mxu0 }
 0x6ab   : > { %v8776_v60 = vmax.f32 %v4100_v18, %v4130_v35  ;;  %v4131_v0 = vmul.f32 0.1, %v4103_v24  ;;  %v6188_v52 = vadd.f32 %v6187_v63, %v6186_v8  ;;  %v6189_v7 = vpop.f32.mrb[22].mxu0 }
 0x6ac   : > { %v6190_v27 = vpop.f32.mrb[23].mxu0 }
 0x6ad   : > { %v4139_v20 = vmax.f32 %v4103_v24, %v4131_v0  ;;  %v4043_v59 = vadd.f32 %v6188_v52, %v8770_v15  ;;  %v4146_v17 = vrot.slane %v8776_v60, 7  ;;  %v4170_v30 = vrot.slane %v8776_v60, 1 }
 0x6ae   : > { %v6191_v39 = vadd.f32 %v6190_v27, %v6189_v7 }
 0x6af   : > { %v4147_v62 = vrot.slane %v4139_v20, 7  ;;  %v4171_v57 = vrot.slane %v4139_v20, 1  ;;  %v4108_v19 = vadd.f32 %v6258_v6, %v4043_v59  ;;  %v4195_v34 = vpack.c.bf16 %v4139_v20, %v8776_v60  ;;  %v6596_v60 = vld [vmem:[%s9301_s13 + $0x114] ss:$8 sps:$4 sm:$0xff]  }
 0x6b0   : > { %v4046_v4 = vadd.f32 %v6191_v39, %v8770_v15 }
 0x6b1   : > { %v4132_v23 = vmul.f32 0.1, %v4108_v19  ;;  %v6192_v13 = vpop.f32.mrb[24].mxu0  ;;  %4538 = vmatprep.mubr.bf16.mxu0 %v4195_v34  ;;  %v8787_v41 = vsel %vm1373_vm0, %v4146_v17, %v4147_v62  ;;  %v4184_v10 = vsel %vm1422_vm2, %v4170_v30, %v4171_v57 }
 0x6b2   : > { %v4111_v28 = vadd.f32 %v6259_v37, %v4046_v4  ;;  %v6193_v36 = vpop.f32.mrb[25].mxu0  ;;  %v8815_v7 = vmul.f32 %v8030_v32, %v4184_v10 }
 0x6b3   : > { %v8793_v5 = vmax.f32 %v4108_v19, %v4132_v23  ;;  %v6194_v11 = vadd.f32 %v6193_v36, %v6192_v13  ;;  %v6195_v21 = vpop.f32.mrb[26].mxu0 }
 0x6b4   : > { %v4133_v6 = vmul.f32 0.1, %v4111_v28  ;;  %v6196_v9 = vpop.f32.mrb[27].mxu0 }
 0x6b5   : > { %v4148_v14 = vrot.slane %v8793_v5, 7  ;;  %v4172_v44 = vrot.slane %v8793_v5, 1  ;;  %v4051_v47 = vadd.f32 %v6194_v11, %v8770_v15  ;;  %v6197_v25 = vadd.f32 %v6196_v9, %v6195_v21 }
 0x6b6   : > { %v8798_v48 = vmax.f32 %v4111_v28, %v4133_v6 }
 0x6b7   : > { %v4116_v43 = vadd.f32 %v4115_v12, %v4051_v47  ;;  %v4054_v26 = vadd.f32 %v6197_v25, %v8770_v15  ;;  %v4159_v37 = vsel %vm1373_vm0, %v4147_v62, %v4148_v14  ;;  %v4183_v56 = vsel %vm1422_vm2, %v4171_v57, %v4172_v44 }
 0x6b8   : > { %v4149_v18 = vrot.slane %v8798_v48, 7  ;;  %v4173_v16 = vrot.slane %v8798_v48, 1  ;;  %v4198_v35 = vpack.c.bf16 %v8798_v48, %v8793_v5  ;;  %v8810_v12 = vmul.f32 %v8038_v29, %v4183_v56  ;;  %v6600_v5 = vld [vmem:[%s9301_s13 + $0x130] ss:$8 sps:$4 sm:$0xff]   ;;  %v6605_v48 = vld [vmem:[%s9301_s13 + $0x144] ss:$8 sps:$4 sm:$0xff]  }
 0x6b9   : > { %v4134_v24 = vmul.f32 0.1, %v4116_v43  ;;  %v4119_v8 = vadd.f32 %v4118_v46, %v4054_v26  ;;  %v6198_v63 = vpop.f32.mrb[28].mxu0  ;;  %v8825_v57 = vmul.f32 %v8488_v3, %v4159_v37 }
 0x6ba   : > { %v6199_v0 = vpop.f32.mrb[29].mxu0  ;;  %v4158_v52 = vsel %vm1373_vm0, %v4148_v14, %v4149_v18  ;;  %v4182_v27 = vsel %vm1422_vm2, %v4172_v44, %v4173_v16  ;;  %v4196_v19 = vpack.c.bf16 %v8810_v12, %v8815_v7  ;;  %v9379_v12 = vld [vmem:[#allocation22_spill] sm:$0xff] }
 0x6bb   : > { %v8819_v20 = vmax.f32 %v4116_v43, %v4134_v24  ;;  %v4135_v59 = vmul.f32 0.1, %v4119_v8  ;;  %v6200_v39 = vadd.f32 %v6199_v0, %v6198_v63  ;;  %v6201_v62 = vpop.f32.mrb[30].mxu0  ;;  %v8822_v46 = vmul.f32 %v8491_v40, %v4158_v52 }
 0x6bc   : > { %v6202_v29 = vpop.f32.mrb[31].mxu0  ;;  %v8844_v44 = vmul.f32 %v8062_v42, %v4182_v27  ;;  %v4163_v63 = vmul.f32 %v8041_v51, %v8787_v41 }
 0x6bd   : > { %v4150_v32 = vrot.slane %v8819_v20, 7  ;;  %v4174_v34 = vrot.slane %v8819_v20, 1  ;;  %v4143_v4 = vmax.f32 %v4119_v8, %v4135_v59  ;;  %v4059_v23 = vadd.f32 %v6200_v39, %v8770_v15 }
 0x6be   : > { %v6203_v13 = vadd.f32 %v6202_v29, %v6201_v62  ;;  %v4197_v10 = vpack.c.bf16 %v8822_v46, %v8825_v57  ;;  %v6608_v29 = vld [vmem:[%s9301_s13 + $0x154] ss:$8 sps:$4 sm:$0xff]   ;;  %v6606_v57 = vld [vmem:[%s9301_s13 + $0x150] ss:$8 sps:$4 sm:$0xff]  }
 0x6bf   : > { %v4151_v40 = vrot.slane %v4143_v4, 7  ;;  %v4175_v28 = vrot.slane %v4143_v4, 1  ;;  %v4124_v36 = vadd.f32 %v8768_v53, %v4059_v23  ;;  %v4201_v3 = vpack.c.bf16 %v4143_v4, %v8819_v20  ;;  %v6614_v4 = vld [vmem:[%s9301_s13 + $0x174] ss:$8 sps:$4 sm:$0xff]   ;;  %v6612_v23 = vld [vmem:[%s9301_s13 + $0x170] ss:$8 sps:$4 sm:$0xff]  }
 0x6c0   : > { %v4062_v11 = vadd.f32 %v6203_v13, %v8770_v15  ;;  %v4157_v21 = vsel %vm1373_vm0, %v4149_v18, %v4150_v32  ;;  %v4181_v6 = vsel %vm1422_vm2, %v4173_v16, %v4174_v34  ;;  %v9376_v13 = vmov 0  }
 0x6c1   : > { %v4136_v9 = vmul.f32 0.1, %v4124_v36  ;;  %v4156_v14 = vsel %vm1373_vm0, %v4150_v32, %v4151_v40  ;;  %v8847_v47 = vmul.f32 %v8395_v22, %v4181_v6  ;;  %v4166_v15 = vmul.f32 %v8511_v2, %v4157_v21  ;;  %v6611_v32 = vld [vmem:[%s9301_s13 + $0x164] ss:$8 sps:$4 sm:$0xff]  }
 0x6c2   : > { %v4127_v53 = vadd.f32 %v8772_v50, %v4062_v11  ;;  %v4167_v25 = vmul.f32 %v8515_v58, %v4156_v14  ;;  %v4180_v43 = vsel %vm1422_vm2, %v4174_v34, %v4175_v28  ;;  %v6609_v34 = vld [vmem:[%s9301_s13 + $0x160] ss:$8 sps:$4 sm:$0xff]  }
 0x6c3   : > { %v4144_v26 = vmax.f32 %v4124_v36, %v4136_v9  ;;  %v4199_v37 = vpack.c.bf16 %v8847_v47, %v8844_v44  ;;  %v4190_v52 = vmul.f32 %v8424_v38, %v4180_v43 }
 0x6c4   : > { %v4137_v56 = vmul.f32 0.1, %v4127_v53  ;;  %v4200_v18 = vpack.c.bf16 %v4167_v25, %v4166_v15 }
 0x6c5   : > { %v4152_v42 = vrot.slane %v4144_v26, 7  ;;  %v4176_v16 = vrot.slane %v4144_v26, 1 }
 0x6c6   : > { %v4145_v24 = vmax.f32 %v4127_v53, %v4137_v56 }
 0x6c7   : > { %v4155_v22 = vsel %vm1373_vm0, %v4151_v40, %v4152_v42  ;;  %v4179_v2 = vsel %vm1422_vm2, %v4175_v28, %v4176_v16  ;;  %v9378_v40 = vld [vmem:[#allocation21_spill] sm:$0xff] }
 0x6c8   : > { %v4153_v50 = vrot.slane %v4145_v24, 7  ;;  %v4177_v58 = vrot.slane %v4145_v24, 1  ;;  %v4204_v8 = vpack.c.bf16 %v4145_v24, %v4144_v26  ;;  %v4168_v0 = vmul.f32 %v8531_v49, %v4155_v22 }
 0x6c9   : > { %v4191_v27 = vmul.f32 %v8437_v55, %v4179_v2 }
 0x6ca   : > { %v4161_v20 = vsel %vm1373_vm0, %v4153_v50, %v4146_v17  ;;  %v4154_v59 = vsel %vm1373_vm0, %v4152_v42, %v4153_v50  ;;  %v4178_v39 = vsel %vm1422_vm2, %v4176_v16, %v4177_v58  ;;  %v4185_v51 = vsel %vm1422_vm2, %v4177_v58, %v4170_v30  ;;  %v6591_v17 = vld [vmem:[%s9301_s13 + $0x100] ss:$8 sps:$4 sm:$0xff]  }
 0x6cb   : > { %v4162_v38 = vmul.f32 %v8452_v54, %v4161_v20  ;;  %v4169_v55 = vmul.f32 %v8550_v31, %v4154_v59  ;;  %v4202_v49 = vpack.c.bf16 %v4191_v27, %v4190_v52  ;;  %v4192_v41 = vmul.f32 %v8481_v45, %v4178_v39  ;;  %v6594_v54 = vld [vmem:[%s9301_s13 + $0x110] ss:$8 sps:$4 sm:$0xff]   ;;  %v6599_v45 = vld [vmem:[%s9301_s13 + $0x124] ss:$8 sps:$4 sm:$0xff]   ;;  %v6602_v31 = vld [vmem:[%s9301_s13 + $0x134] ss:$8 sps:$4 sm:$0xff]  }
 0x6cc   : > { %v4193_v62 = vmul.f32 %v8524_v33, %v4185_v51  ;;  %v6597_v33 = vld [vmem:[%s9301_s13 + $0x120] ss:$8 sps:$4 sm:$0xff]  }
 0x6cd   : > { %v4194_v46 = vpack.c.bf16 %v4163_v63, %v4162_v38  ;;  %v4203_v1 = vpack.c.bf16 %v4169_v55, %v4168_v0 }
 0x6ce   : > { %v4205_v30 = vpack.c.bf16 %v4193_v62, %v4192_v41 }
 0x6cf   : > { %4539 = vmatmul.mubr.bf16.vlgmr.msra.gmra.mrb[32].mxu0 %v4194_v46 }
 0x6d0   : > { %4580 = vmatpush1.bf16.msra.mxu0 %v6591_v17  ;;  %4548 = vmatprep.mubr.bf16.mxu0 %v4198_v35  ;;  %v6603_v35 = vld [vmem:[%s9301_s13 + $0x140] ss:$8 sps:$4 sm:$0xff]  }
 0x6d1   : > { %4581 = vmatprep.subr.bf16.mxu0 %v6596_v60 }
 0x6d4   : > { %4582 = vmatpush1.bf16.msra.mxu0 %v6594_v54 }
 0x6d5   : > { %4583 = vmatprep.subr.bf16.mxu0 %v6599_v45 }
 0x6d7   : > { %4549 = vmatmul.mubr.bf16.gmra.mrb[36].mxu0 %v4197_v10  ;;  %v4254_v10 = vld [vmem:[%s9377_s22] sm:$0x3] }
 0x6d8   : > { %4584 = vmatpush1.bf16.msra.mxu0 %v6597_v33  ;;  %4558 = vmatprep.mubr.bf16.mxu0 %v4201_v3  ;;  %v8943_v28 = vrot.slane %v4254_v10, %v9378_v40  ;;  %v8946_v7 = vrot.slane %v4254_v10, %v9379_v12 }
 0x6d9   : > { %4585 = vmatprep.subr.bf16.mxu0 %v6602_v31 }
 0x6dc   : > { %4586 = vmatpush1.bf16.msra.mxu0 %v6600_v5 }
 0x6dd   : > { %4587 = vmatprep.subr.bf16.mxu0 %v6605_v48 }
 0x6df   : > { %4559 = vmatmul.mubr.bf16.gmra.mrb[40].mxu0 %v4200_v18 }
 0x6e0   : > { %4588 = vmatpush1.bf16.msra.mxu0 %v6603_v35  ;;  %4568 = vmatprep.mubr.bf16.mxu0 %v4204_v8 }
 0x6e1   : > { %4589 = vmatprep.subr.bf16.mxu0 %v6608_v29 }
 0x6e4   : > { %4590 = vmatpush1.bf16.msra.mxu0 %v6606_v57 }
 0x6e5   : > { %4591 = vmatprep.subr.bf16.mxu0 %v6611_v32 }
 0x6e7   : > { %4569 = vmatmul.mubr.bf16.gmra.mrb[44].mxu0 %v4203_v1 }
 0x6e8   : > { %4592 = vmatpush1.bf16.msra.mxu0 %v6609_v34  ;;  %4611 = vmatprep.mubr.bf16.mxu0 %v9376_v13 }
 0x6e9   : > { %4593 = vmatprep.subr.bf16.mxu0 %v6614_v4 }
 0x6ec   : > { %4594 = vmatpush1.bf16.msra.mxu0 %v6612_v23 }
 0x6ef   : > { %4612 = vmatmul.mubr.bf16.vlgmr.msra.gmra.mrb[32].mxu0 %v4196_v19 }
 0x6f0   : > { %4621 = vmatprep.mubr.bf16.mxu0 %v9376_v13 }
 0x6f7   : > { %4622 = vmatmul.mubr.bf16.gmra.mrb[36].mxu0 %v4199_v37 }
 0x6f8   : > { %4631 = vmatprep.mubr.bf16.mxu0 %v9376_v13 }
 0x6ff   : > { %4632 = vmatmul.mubr.bf16.gmra.mrb[40].mxu0 %v4202_v49 }
 0x700   : > { %4641 = vmatprep.mubr.bf16.mxu0 %v9376_v13 }
 0x707   : > { %4642 = vmatmul.mubr.bf16.gmra.mrb[44].mxu0 %v4205_v30 }
 0x7c2   : > { %v4613_v19 = vpop.f32.mrb[32].mxu0 }
 0x7c3   : > { %v6264_v36 = vadd.f32 %v4613_v19, %v8943_v28  ;;  %v4615_v3 = vpop.f32.mrb[33].mxu0 }
 0x7c4   : > { %v6265_v11 = vadd.f32 %v4615_v3, %v8946_v7  ;;  %v4617_v21 = vpop.f32.mrb[34].mxu0 }
 0x7c5   : > { %v4652_v6 = vmul.f32 0.1, %v6264_v36  ;;  %v6266_v9 = vadd.f32 %v4617_v21, %v8943_v28  ;;  %v4619_v14 = vpop.f32.mrb[35].mxu0 }
 0x7c6   : > { %v4653_v44 = vmul.f32 0.1, %v6265_v11  ;;  %v6267_v47 = vadd.f32 %v4619_v14, %v8946_v7 }
 0x7c7   : > { %v4668_v53 = vmax.f32 %v6264_v36, %v4652_v6  ;;  %v4654_v15 = vmul.f32 0.1, %v6266_v9 }
 0x7c8   : > { %v4669_v25 = vmax.f32 %v6265_v11, %v4653_v44  ;;  %v4655_v43 = vmul.f32 0.1, %v6267_v47 }
 0x7c9   : > { %v4670_v26 = vmax.f32 %v6266_v9, %v4654_v15 }
 0x7ca   : > { %v4700_v37 = vcombine.low %v4668_v53, %v4669_v25  ;;  %v4701_v56 = vcombine.high %v4668_v53, %v4669_v25  ;;  %v4671_v18 = vmax.f32 %v6267_v47, %v4655_v43  ;;  %v4623_v42 = vpop.f32.mrb[36].mxu0 }
 0x7cb   : > { %v6268_v16 = vadd.f32 %v4623_v42, %v8943_v28  ;;  %v4625_v24 = vpop.f32.mrb[37].mxu0 }
 0x7cc   : > { %v4708_v22 = vrot.slane %v4700_v37, %v8016_v61  ;;  %v4715_v2 = vrot.slane %v4701_v56, %v8016_v61  ;;  %v4718_v50 = vcombine.low %v4670_v26, %v4671_v18  ;;  %v4719_v58 = vcombine.high %v4670_v26, %v4671_v18  ;;  %v4627_v8 = vpop.f32.mrb[38].mxu0 }
 0x7cd   : > { %v4656_v63 = vmul.f32 0.1, %v6268_v16  ;;  %v8956_v0 = vadd.f32 %v4625_v24, %v8946_v7  ;;  %v8959_v52 = vadd.f32 %v4627_v8, %v8943_v28  ;;  %v8961_v27 = vpop.f32.mrb[39].mxu0 }
 0x7ce   : > { %v4716_v20 = vcombine.high %v4708_v22, %v4708_v22  ;;  %v4717_v59 = vcombine.high %v4715_v2, %v4715_v2  ;;  %v4850_v39 = vrot.slane %v4708_v22, %v8016_v61  ;;  %v4866_v51 = vrot.slane %v4715_v2, %v8016_v61 }
 0x7cf   : > { %v8966_v38 = vrot.slane %v4718_v50, %v8016_v61  ;;  %v8969_v55 = vrot.slane %v4719_v58, %v8016_v61  ;;  %v8971_v49 = vmax.f32 %v6268_v16, %v4656_v63  ;;  %v8974_v41 = vmul.f32 0.1, %v8956_v0 }
 0x7d0   : > { %v4851_v17 = vcombine.high %v4850_v39, %v4850_v39  ;;  %v4858_v62 = vrot.slane %v4716_v20, %v8016_v61  ;;  %v4867_v46 = vcombine.high %v4866_v51, %v4866_v51  ;;  %v4874_v60 = vrot.slane %v4717_v59, %v8016_v61 }
 0x7d1   : > { %v5164_v1 = vsel %vm2608_vm6, %v4850_v39, -inf  ;;  %v5192_v30 = vsel %vm2608_vm6, %v4866_v51, -inf  ;;  %v4734_v54 = vcombine.high %v8966_v38, %v8966_v38  ;;  %v4735_v45 = vcombine.high %v8969_v55, %v8969_v55 }
 0x7d2   : > { %v4859_v33 = vcombine.high %v4858_v62, %v4858_v62  ;;  %v4875_v31 = vcombine.high %v4874_v60, %v4874_v60  ;;  %v5165_v5 = vrot.slane %v5164_v1, 4  ;;  %v5171_v48 = vsel %vm2608_vm6, %v4851_v17, -inf  ;;  %v8985_v35 = vpop.f32.mrb[40].mxu0 }
 0x7d3   : > { %v5172_v29 = vrot.slane %v5171_v48, 4  ;;  %v5178_v57 = vsel %vm2608_vm6, %v4858_v62, -inf  ;;  %v5193_v32 = vrot.slane %v5192_v30, 4  ;;  %v5199_v34 = vsel %vm2608_vm6, %v4867_v46, -inf  ;;  %v8989_v4 = vpop.f32.mrb[41].mxu0 }
 0x7d4   : > { %v5166_v23 = vmax.f32 %v5164_v1, %v5165_v5  ;;  %v5179_v13 = vrot.slane %v5178_v57, 4  ;;  %v5185_v10 = vsel %vm2608_vm6, %v4859_v33, -inf  ;;  %v5200_v40 = vrot.slane %v5199_v34, 4  ;;  %v8992_v12 = vpop.f32.mrb[42].mxu0 }
 0x7d5   : > { %v5173_v19 = vmax.f32 %v5171_v48, %v5172_v29  ;;  %v5186_v36 = vrot.slane %v5185_v10, 4  ;;  %v5194_v3 = vmax.f32 %v5192_v30, %v5193_v32  ;;  %v5206_v11 = vsel %vm2608_vm6, %v4874_v60, -inf  ;;  %v8995_v21 = vpop.f32.mrb[43].mxu0 }
 0x7d6   : > { %v5167_v6 = vrot.slane %v5166_v23, 2  ;;  %v5180_v9 = vmax.f32 %v5178_v57, %v5179_v13  ;;  %v5201_v14 = vmax.f32 %v5199_v34, %v5200_v40  ;;  %v5207_v44 = vrot.slane %v5206_v11, 4 }
 0x7d7   : > { %v5174_v47 = vrot.slane %v5173_v19, 2  ;;  %v5187_v53 = vmax.f32 %v5185_v10, %v5186_v36  ;;  %v5195_v15 = vrot.slane %v5194_v3, 2  ;;  %v5213_v25 = vsel %vm2608_vm6, %v4875_v31, -inf }
 0x7d8   : > { %v5168_v43 = vmax.f32 %v5166_v23, %v5167_v6  ;;  %v5181_v26 = vrot.slane %v5180_v9, 2  ;;  %v5202_v37 = vrot.slane %v5201_v14, 2  ;;  %v5208_v56 = vmax.f32 %v5206_v11, %v5207_v44 }
 0x7d9   : > { %v5175_v18 = vmax.f32 %v5173_v19, %v5174_v47  ;;  %v5188_v42 = vrot.slane %v5187_v53, 2  ;;  %v5196_v16 = vmax.f32 %v5194_v3, %v5195_v15  ;;  %v5214_v24 = vrot.slane %v5213_v25, 4 }
 0x7da   : > { %v5169_v22 = vrot.slane %v5168_v43, 1  ;;  %v5182_v2 = vmax.f32 %v5180_v9, %v5181_v26  ;;  %v5203_v50 = vmax.f32 %v5201_v14, %v5202_v37  ;;  %v5209_v58 = vrot.slane %v5208_v56, 2  ;;  %v8998_v8 = vpop.f32.mrb[44].mxu0 }
 0x7db   : > { %v5176_v63 = vrot.slane %v5175_v18, 1  ;;  %v5189_v20 = vmax.f32 %v5187_v53, %v5188_v42  ;;  %v5197_v59 = vrot.slane %v5196_v16, 1  ;;  %v5215_v39 = vmax.f32 %v5213_v25, %v5214_v24  ;;  %v9000_v51 = vpop.f32.mrb[45].mxu0 }
 0x7dc   : > { %v5170_v17 = vmax.f32 %v5168_v43, %v5169_v22  ;;  %v5183_v62 = vrot.slane %v5182_v2, 1  ;;  %v5204_v46 = vrot.slane %v5203_v50, 1  ;;  %v5210_v60 = vmax.f32 %v5208_v56, %v5209_v58  ;;  %v9002_v1 = vpop.f32.mrb[46].mxu0 }
 0x7dd   : > { %v5177_v30 = vmax.f32 %v5175_v18, %v5176_v63  ;;  %v5190_v33 = vrot.slane %v5189_v20, 1  ;;  %v5198_v31 = vmax.f32 %v5196_v16, %v5197_v59  ;;  %v5216_v5 = vrot.slane %v5215_v39, 2  ;;  %v9004_v48 = vpop.f32.mrb[47].mxu0 }
 0x7de   : > { %v5184_v29 = vmax.f32 %v5182_v2, %v5183_v62  ;;  %v5205_v57 = vmax.f32 %v5203_v50, %v5204_v46  ;;  %v5211_v32 = vrot.slane %v5210_v60, 1  ;;  %v4882_v34 = vrot.slane %v8966_v38, %v8016_v61 }
 0x7df   : > { %v5191_v23 = vmax.f32 %v5189_v20, %v5190_v33  ;;  %v5217_v13 = vmax.f32 %v5215_v39, %v5216_v5  ;;  %v4890_v10 = vrot.slane %v4734_v54, %v8016_v61  ;;  %v4898_v40 = vrot.slane %v8969_v55, %v8016_v61 }
 0x7e0   : > { %v5212_v19 = vmax.f32 %v5210_v60, %v5211_v32  ;;  %v5676_v36 = vsel %vm3265_vm9, %v5184_v29, %v5170_v17  ;;  %v4883_v3 = vcombine.high %v4882_v34, %v4882_v34  ;;  %v4906_v11 = vrot.slane %v4735_v45, %v8016_v61 }
 0x7e1   : > { %v5218_v6 = vrot.slane %v5217_v13, 1  ;;  %v5677_v9 = vsel %vm3267_vm11, %v5198_v31, %v5676_v36  ;;  %v5683_v14 = vsel %vm3265_vm9, %v5191_v23, %v5177_v30  ;;  %v4891_v38 = vcombine.high %v4890_v10, %v4890_v10 }
 0x7e2   : > { %v5678_v54 = vsel %vm3269_vm12, %v5212_v19, %v5677_v9  ;;  %v5684_v44 = vsel %vm3267_vm11, %v5205_v57, %v5683_v14  ;;  %v4899_v47 = vcombine.high %v4898_v40, %v4898_v40  ;;  %v4907_v53 = vcombine.high %v4906_v11, %v4906_v11 }
 0x7e3   : > { %v5219_v15 = vmax.f32 %v5217_v13, %v5218_v6  ;;  %v5220_v25 = vsel %vm2608_vm6, %v4882_v34, -inf  ;;  %v5227_v43 = vsel %vm2608_vm6, %v4883_v3, -inf  ;;  %v5234_v55 = vsel %vm2608_vm6, %v4890_v10, -inf }
 0x7e4   : > { %v5221_v45 = vrot.slane %v5220_v25, 4  ;;  %v5228_v26 = vrot.slane %v5227_v43, 4  ;;  %v5235_v37 = vrot.slane %v5234_v55, 4  ;;  %v5241_v56 = vsel %vm2608_vm6, %v4891_v38, -inf }
 0x7e5   : > { %v5685_v18 = vsel %vm3269_vm12, %v5219_v15, %v5684_v44  ;;  %v5242_v42 = vrot.slane %v5241_v56, 4  ;;  %v5248_v16 = vsel %vm2608_vm6, %v4898_v40, -inf  ;;  %v5255_v24 = vsel %vm2608_vm6, %v4899_v47, -inf }
 0x7e6   : > { %v5222_v22 = vmax.f32 %v5220_v25, %v5221_v45  ;;  %v5229_v2 = vmax.f32 %v5227_v43, %v5228_v26  ;;  %v5236_v50 = vmax.f32 %v5234_v55, %v5235_v37  ;;  %v5249_v58 = vrot.slane %v5248_v16, 4 }
 0x7e7   : > { %v5243_v63 = vmax.f32 %v5241_v56, %v5242_v42  ;;  %v5256_v20 = vrot.slane %v5255_v24, 4  ;;  %v5262_v59 = vsel %vm2608_vm6, %v4906_v11, -inf  ;;  %v5269_v39 = vsel %vm2608_vm6, %v4907_v53, -inf }
 0x7e8   : > { %v5223_v17 = vrot.slane %v5222_v22, 2  ;;  %v5230_v62 = vrot.slane %v5229_v2, 2  ;;  %v5237_v46 = vrot.slane %v5236_v50, 2  ;;  %v5250_v60 = vmax.f32 %v5248_v16, %v5249_v58 }
 0x7e9   : > { %v5244_v30 = vrot.slane %v5243_v63, 2  ;;  %v5257_v33 = vmax.f32 %v5255_v24, %v5256_v20  ;;  %v5263_v31 = vrot.slane %v5262_v59, 4  ;;  %v5270_v5 = vrot.slane %v5269_v39, 4 }
 0x7ea   : > { %v5224_v29 = vmax.f32 %v5222_v22, %v5223_v17  ;;  %v5231_v57 = vmax.f32 %v5229_v2, %v5230_v62  ;;  %v5238_v32 = vmax.f32 %v5236_v50, %v5237_v46  ;;  %v5251_v34 = vrot.slane %v5250_v60, 2 }
 0x7eb   : > { %v5245_v23 = vmax.f32 %v5243_v63, %v5244_v30  ;;  %v5258_v13 = vrot.slane %v5257_v33, 2  ;;  %v5264_v10 = vmax.f32 %v5262_v59, %v5263_v31  ;;  %v5271_v40 = vmax.f32 %v5269_v39, %v5270_v5 }
 0x7ec   : > { %v5225_v19 = vrot.slane %v5224_v29, 1  ;;  %v5232_v36 = vrot.slane %v5231_v57, 1  ;;  %v5239_v3 = vrot.slane %v5238_v32, 1  ;;  %v5252_v11 = vmax.f32 %v5250_v60, %v5251_v34 }
 0x7ed   : > { %v5246_v6 = vrot.slane %v5245_v23, 1  ;;  %v5259_v9 = vmax.f32 %v5257_v33, %v5258_v13  ;;  %v5265_v14 = vrot.slane %v5264_v10, 2  ;;  %v5272_v38 = vrot.slane %v5271_v40, 2 }
 0x7ee   : > { %v5226_v44 = vmax.f32 %v5224_v29, %v5225_v19  ;;  %v5233_v47 = vmax.f32 %v5231_v57, %v5232_v36  ;;  %v5240_v53 = vmax.f32 %v5238_v32, %v5239_v3  ;;  %v5253_v15 = vrot.slane %v5252_v11, 1 }
 0x7ef   : > { %v5247_v25 = vmax.f32 %v5245_v23, %v5246_v6  ;;  %v5260_v43 = vrot.slane %v5259_v9, 1  ;;  %v5266_v55 = vmax.f32 %v5264_v10, %v5265_v14  ;;  %v5273_v45 = vmax.f32 %v5271_v40, %v5272_v38 }
 0x7f0   : > { %v5254_v26 = vmax.f32 %v5252_v11, %v5253_v15  ;;  %v5679_v37 = vsel %vm3271_vm13, %v5226_v44, %v5678_v54  ;;  %v5686_v56 = vsel %vm3271_vm13, %v5233_v47, %v5685_v18  ;;  %v4673_v42 = vmax.f32 %v8956_v0, %v8974_v41 }
 0x7f1   : > { %v5261_v16 = vmax.f32 %v5259_v9, %v5260_v43  ;;  %v5267_v24 = vrot.slane %v5266_v55, 1  ;;  %v5274_v22 = vrot.slane %v5273_v45, 1  ;;  %v5680_v2 = vsel %vm3273_vm14, %v5240_v53, %v5679_v37 }
 0x7f2   : > { %v5681_v50 = vsel %vm3275_vm15, %v5254_v26, %v5680_v2  ;;  %v5687_v58 = vsel %vm3273_vm14, %v5247_v25, %v5686_v56  ;;  %v4736_v63 = vcombine.low %v8971_v49, %v4673_v42  ;;  %v4737_v20 = vcombine.high %v8971_v49, %v4673_v42 }
 0x7f3   : > { %v5268_v0 = vmax.f32 %v5266_v55, %v5267_v24  ;;  %v5275_v41 = vmax.f32 %v5273_v45, %v5274_v22  ;;  %v5688_v54 = vsel %vm3275_vm15, %v5261_v16, %v5687_v58  ;;  %v4658_v18 = vmul.f32 0.1, %v8959_v52 }
 0x7f4   : > { %v4744_v59 = vrot.slane %v4736_v63, %v8016_v61  ;;  %v4751_v39 = vrot.slane %v4737_v20, %v8016_v61  ;;  %v6271_v49 = vadd.f32 %v8961_v27, %v8946_v7  ;;  %v6272_v17 = vadd.f32 %v8985_v35, %v8943_v28 }
 0x7f5   : > { %v5682_v62 = vsel %vm3277_vm1, %v5268_v0, %v5681_v50  ;;  %v5689_v46 = vsel %vm3277_vm1, %v5275_v41, %v5688_v54  ;;  %v9067_v60 = vmax.f32 %v8959_v52, %v4658_v18  ;;  %v9071_v30 = vadd.f32 %v8989_v4, %v8946_v7 }
 0x7f6   : > { %5740 = vst [vmem:[%s9054_s16] sm:$0xff] %v5682_v62  ;;  %5741 = vst [vmem:[%s9054_s16 + $0x8] sm:$0xff] %v5689_v46  ;;  %v4752_v33 = vcombine.high %v4744_v59, %v4744_v59  ;;  %v4753_v31 = vcombine.high %v4751_v39, %v4751_v39  ;;  %v4914_v27 = vrot.slane %v4744_v59, %v8016_v61  ;;  %v4659_v35 = vmul.f32 0.1, %v6271_v49 }
 0x7f7   : > { %v4930_v5 = vrot.slane %v4751_v39, %v8016_v61  ;;  %v4660_v29 = vmul.f32 0.1, %v6272_v17  ;;  %v9078_v57 = vmul.f32 0.1, %v9071_v30  ;;  %v9082_v52 = vadd.f32 %v8992_v12, %v8943_v28 }
 0x7f8   : > { %v4915_v32 = vcombine.high %v4914_v27, %v4914_v27  ;;  %v4922_v4 = vrot.slane %v4752_v33, %v8016_v61  ;;  %v4938_v23 = vrot.slane %v4753_v31, %v8016_v61  ;;  %v5276_v13 = vsel %vm2608_vm6, %v4914_v27, -inf }
 0x7f9   : > { %v4931_v34 = vcombine.high %v4930_v5, %v4930_v5  ;;  %v5304_v10 = vsel %vm2608_vm6, %v4930_v5, -inf  ;;  %v9088_v40 = vmax.f32 %v6271_v49, %v4659_v35  ;;  %v9090_v19 = vmax.f32 %v6272_v17, %v4660_v29 }
 0x7fa   : > { %v4923_v36 = vcombine.high %v4922_v4, %v4922_v4  ;;  %v4939_v3 = vcombine.high %v4938_v23, %v4938_v23  ;;  %v5277_v11 = vrot.slane %v5276_v13, 4  ;;  %v5283_v12 = vsel %vm2608_vm6, %v4915_v32, -inf }
 0x7fb   : > { %v5284_v6 = vrot.slane %v5283_v12, 4  ;;  %v5290_v9 = vsel %vm2608_vm6, %v4922_v4, -inf  ;;  %v5305_v14 = vrot.slane %v5304_v10, 4  ;;  %v5311_v38 = vsel %vm2608_vm6, %v4931_v34, -inf }
 0x7fc   : > { %v5278_v44 = vmax.f32 %v5276_v13, %v5277_v11  ;;  %v5291_v47 = vrot.slane %v5290_v9, 4  ;;  %v5297_v53 = vsel %vm2608_vm6, %v4923_v36, -inf  ;;  %v5312_v15 = vrot.slane %v5311_v38, 4 }
 0x7fd   : > { %v5285_v25 = vmax.f32 %v5283_v12, %v5284_v6  ;;  %v5298_v43 = vrot.slane %v5297_v53, 4  ;;  %v5306_v55 = vmax.f32 %v5304_v10, %v5305_v14  ;;  %v5318_v45 = vsel %vm2608_vm6, %v4938_v23, -inf }
 0x7fe   : > { %v5279_v26 = vrot.slane %v5278_v44, 2  ;;  %v5292_v37 = vmax.f32 %v5290_v9, %v5291_v47  ;;  %v5313_v56 = vmax.f32 %v5311_v38, %v5312_v15  ;;  %v5319_v42 = vrot.slane %v5318_v45, 4 }
 0x7ff   : > { %v5286_v16 = vrot.slane %v5285_v25, 2  ;;  %v5299_v24 = vmax.f32 %v5297_v53, %v5298_v43  ;;  %v5307_v22 = vrot.slane %v5306_v55, 2  ;;  %v5325_v2 = vsel %vm2608_vm6, %v4939_v3, -inf }
 0x800   : > { %v5280_v50 = vmax.f32 %v5278_v44, %v5279_v26  ;;  %v5293_v58 = vrot.slane %v5292_v37, 2  ;;  %v5314_v63 = vrot.slane %v5313_v56, 2  ;;  %v5320_v20 = vmax.f32 %v5318_v45, %v5319_v42 }
 0x801   : > { %v5287_v0 = vmax.f32 %v5285_v25, %v5286_v16  ;;  %v5300_v41 = vrot.slane %v5299_v24, 2  ;;  %v5308_v54 = vmax.f32 %v5306_v55, %v5307_v22  ;;  %v5326_v18 = vrot.slane %v5325_v2, 4 }
 0x802   : > { %v5281_v59 = vrot.slane %v5280_v50, 1  ;;  %v5294_v39 = vmax.f32 %v5292_v37, %v5293_v58  ;;  %v5315_v49 = vmax.f32 %v5313_v56, %v5314_v63  ;;  %v5321_v17 = vrot.slane %v5320_v20, 2 }
 0x803   : > { %v5288_v62 = vrot.slane %v5287_v0, 1  ;;  %v5301_v46 = vmax.f32 %v5299_v24, %v5300_v41  ;;  %v5309_v33 = vrot.slane %v5308_v54, 1  ;;  %v5327_v31 = vmax.f32 %v5325_v2, %v5326_v18 }
 0x804   : > { %v5282_v27 = vmax.f32 %v5280_v50, %v5281_v59  ;;  %v5295_v5 = vrot.slane %v5294_v39, 1  ;;  %v5316_v35 = vrot.slane %v5315_v49, 1  ;;  %v5322_v29 = vmax.f32 %v5320_v20, %v5321_v17 }
 0x805   : > { %v5289_v32 = vmax.f32 %v5287_v0, %v5288_v62  ;;  %v5302_v4 = vrot.slane %v5301_v46, 1  ;;  %v5310_v34 = vmax.f32 %v5308_v54, %v5309_v33  ;;  %v5328_v23 = vrot.slane %v5327_v31, 2 }
 0x806   : > { %v5296_v13 = vmax.f32 %v5294_v39, %v5295_v5  ;;  %v5317_v10 = vmax.f32 %v5315_v49, %v5316_v35  ;;  %v5323_v36 = vrot.slane %v5322_v29, 1  ;;  %v4754_v3 = vcombine.low %v9067_v60, %v9088_v40 }
 0x807   : > { %v5303_v11 = vmax.f32 %v5301_v46, %v5302_v4  ;;  %v5329_v12 = vmax.f32 %v5327_v31, %v5328_v23  ;;  %v4755_v6 = vcombine.high %v9067_v60, %v9088_v40  ;;  %v9104_v9 = vmax.f32 %v9071_v30, %v9078_v57 }
 0x808   : > { %v5324_v14 = vmax.f32 %v5322_v29, %v5323_v36  ;;  %v5690_v38 = vsel %vm3265_vm9, %v5296_v13, %v5282_v27  ;;  %v4762_v44 = vrot.slane %v4754_v3, %v8016_v61  ;;  %v9109_v47 = vmul.f32 0.1, %v9082_v52 }
 0x809   : > { %v5330_v53 = vrot.slane %v5329_v12, 1  ;;  %v5691_v15 = vsel %vm3267_vm11, %v5310_v34, %v5690_v38  ;;  %v5697_v25 = vsel %vm3265_vm9, %v5303_v11, %v5289_v32  ;;  %v4769_v43 = vrot.slane %v4755_v6, %v8016_v61 }
 0x80a   : > { %v9115_v60 = vsel %vm3269_vm12, %v5324_v14, %v5691_v15  ;;  %v5698_v30 = vsel %vm3267_vm11, %v5317_v10, %v5697_v25  ;;  %v4770_v57 = vcombine.high %v4762_v44, %v4762_v44  ;;  %v4946_v40 = vrot.slane %v4762_v44, %v8016_v61 }
 0x80b   : > { %v5331_v55 = vmax.f32 %v5329_v12, %v5330_v53  ;;  %v4771_v45 = vcombine.high %v4769_v43, %v4769_v43  ;;  %v4962_v26 = vrot.slane %v4769_v43, %v8016_v61  ;;  %v4772_v37 = vcombine.low %v9090_v19, %v9104_v9 }
 0x80c   : > { %v4947_v56 = vcombine.high %v4946_v40, %v4946_v40  ;;  %v4954_v42 = vrot.slane %v4770_v57, %v8016_v61  ;;  %v5332_v16 = vsel %vm2608_vm6, %v4946_v40, -inf  ;;  %v4773_v24 = vcombine.high %v9090_v19, %v9104_v9 }
 0x80d   : > { %v5699_v22 = vsel %vm3269_vm12, %v5331_v55, %v5698_v30  ;;  %v4963_v2 = vcombine.high %v4962_v26, %v4962_v26  ;;  %v4970_v50 = vrot.slane %v4771_v45, %v8016_v61  ;;  %v5333_v58 = vrot.slane %v5332_v16, 4 }
 0x80e   : > { %v4955_v63 = vcombine.high %v4954_v42, %v4954_v42  ;;  %v5339_v20 = vsel %vm2608_vm6, %v4947_v56, -inf  ;;  %v5346_v0 = vsel %vm2608_vm6, %v4954_v42, -inf  ;;  %v5360_v41 = vsel %vm2608_vm6, %v4962_v26, -inf }
 0x80f   : > { %v4971_v54 = vcombine.high %v4970_v50, %v4970_v50  ;;  %v5334_v18 = vmax.f32 %v5332_v16, %v5333_v58  ;;  %v5340_v59 = vrot.slane %v5339_v20, 4  ;;  %v5347_v39 = vrot.slane %v5346_v0, 4 }
 0x810   : > { %v5353_v49 = vsel %vm2608_vm6, %v4955_v63, -inf  ;;  %v5361_v17 = vrot.slane %v5360_v41, 4  ;;  %v5367_v62 = vsel %vm2608_vm6, %v4963_v2, -inf  ;;  %v5374_v46 = vsel %vm2608_vm6, %v4970_v50, -inf }
 0x811   : > { %v5335_v33 = vrot.slane %v5334_v18, 2  ;;  %v5341_v31 = vmax.f32 %v5339_v20, %v5340_v59  ;;  %v5348_v27 = vmax.f32 %v5346_v0, %v5347_v39  ;;  %v5354_v5 = vrot.slane %v5353_v49, 4 }
 0x812   : > { %v5362_v35 = vmax.f32 %v5360_v41, %v5361_v17  ;;  %v5368_v29 = vrot.slane %v5367_v62, 4  ;;  %v5375_v32 = vrot.slane %v5374_v46, 4  ;;  %v5381_v4 = vsel %vm2608_vm6, %v4971_v54, -inf }
 0x813   : > { %v5336_v34 = vmax.f32 %v5334_v18, %v5335_v33  ;;  %v5342_v23 = vrot.slane %v5341_v31, 2  ;;  %v5349_v13 = vrot.slane %v5348_v27, 2  ;;  %v5355_v10 = vmax.f32 %v5353_v49, %v5354_v5 }
 0x814   : > { %v5363_v36 = vrot.slane %v5362_v35, 2  ;;  %v5369_v3 = vmax.f32 %v5367_v62, %v5368_v29  ;;  %v5376_v11 = vmax.f32 %v5374_v46, %v5375_v32  ;;  %v5382_v12 = vrot.slane %v5381_v4, 4 }
 0x815   : > { %v5337_v6 = vrot.slane %v5336_v34, 1  ;;  %v5343_v14 = vmax.f32 %v5341_v31, %v5342_v23  ;;  %v5350_v38 = vmax.f32 %v5348_v27, %v5349_v13  ;;  %v5356_v44 = vrot.slane %v5355_v10, 2 }
 0x816   : > { %v5364_v53 = vmax.f32 %v5362_v35, %v5363_v36  ;;  %v5370_v15 = vrot.slane %v5369_v3, 2  ;;  %v5377_v25 = vrot.slane %v5376_v11, 2  ;;  %v5383_v43 = vmax.f32 %v5381_v4, %v5382_v12 }
 0x817   : > { %v5338_v30 = vmax.f32 %v5336_v34, %v5337_v6  ;;  %v5344_v57 = vrot.slane %v5343_v14, 1  ;;  %v5351_v40 = vrot.slane %v5350_v38, 1  ;;  %v5357_v55 = vmax.f32 %v5355_v10, %v5356_v44 }
 0x818   : > { %v5365_v45 = vrot.slane %v5364_v53, 1  ;;  %v5371_v26 = vmax.f32 %v5369_v3, %v5370_v15  ;;  %v5378_v56 = vmax.f32 %v5376_v11, %v5377_v25  ;;  %v5384_v42 = vrot.slane %v5383_v43, 2 }
 0x819   : > { %v5345_v16 = vmax.f32 %v5343_v14, %v5344_v57  ;;  %v5352_v2 = vmax.f32 %v5350_v38, %v5351_v40  ;;  %v5358_v50 = vrot.slane %v5357_v55, 1  ;;  %v5693_v58 = vsel %vm3271_vm13, %v5338_v30, %v9115_v60 }
 0x81a   : > { %v5366_v63 = vmax.f32 %v5364_v53, %v5365_v45  ;;  %v5372_v20 = vrot.slane %v5371_v26, 1  ;;  %v5379_v0 = vrot.slane %v5378_v56, 1  ;;  %v5385_v41 = vmax.f32 %v5383_v43, %v5384_v42 }
 0x81b   : > { %v5359_v54 = vmax.f32 %v5357_v55, %v5358_v50  ;;  %v5694_v18 = vsel %vm3273_vm14, %v5352_v2, %v5693_v58  ;;  %v5700_v59 = vsel %vm3271_vm13, %v5345_v16, %v5699_v22  ;;  %v4780_v39 = vrot.slane %v4772_v37, %v8016_v61 }
 0x81c   : > { %v5373_v49 = vmax.f32 %v5371_v26, %v5372_v20  ;;  %v5380_v17 = vmax.f32 %v5378_v56, %v5379_v0  ;;  %v5386_v62 = vrot.slane %v5385_v41, 1  ;;  %v5695_v60 = vsel %vm3275_vm15, %v5366_v63, %v5694_v18 }
 0x81d   : > { %v5701_v46 = vsel %vm3273_vm14, %v5359_v54, %v5700_v59  ;;  %v4787_v33 = vrot.slane %v4773_v24, %v8016_v61  ;;  %v4788_v31 = vcombine.high %v4780_v39, %v4780_v39  ;;  %v4978_v22 = vrot.slane %v4780_v39, %v8016_v61 }
 0x81e   : > { %v5387_v27 = vmax.f32 %v5385_v41, %v5386_v62  ;;  %v5696_v5 = vsel %vm3277_vm1, %v5380_v17, %v5695_v60  ;;  %v5702_v37 = vsel %vm3275_vm15, %v5373_v49, %v5701_v46  ;;  %v9154_v35 = vmax.f32 %v9082_v52, %v9109_v47 }
 0x81f   : > { %5742 = vst [vmem:[%s9054_s16 + $0x10] sm:$0xff] %v5696_v5  ;;  %v4789_v29 = vcombine.high %v4787_v33, %v4787_v33  ;;  %v4979_v32 = vcombine.high %v4978_v22, %v4978_v22  ;;  %v4986_v4 = vrot.slane %v4788_v31, %v8016_v61  ;;  %v4994_v19 = vrot.slane %v4787_v33, %v8016_v61 }
 0x820   : > { %v5703_v9 = vsel %vm3277_vm1, %v5387_v27, %v5702_v37  ;;  %v5388_v24 = vsel %vm2608_vm6, %v4978_v22, -inf  ;;  %v6275_v34 = vadd.f32 %v8995_v21, %v8946_v7  ;;  %v9165_v23 = vadd.f32 %v8998_v8, %v8943_v28 }
 0x821   : > { %5743 = vst [vmem:[%s9054_s16 + $0x18] sm:$0xff] %v5703_v9  ;;  %v4987_v52 = vcombine.high %v4986_v4, %v4986_v4  ;;  %v4995_v47 = vcombine.high %v4994_v19, %v4994_v19  ;;  %v5002_v13 = vrot.slane %v4789_v29, %v8016_v61  ;;  %v5389_v10 = vrot.slane %v5388_v24, 4 }
 0x822   : > { %v5395_v36 = vsel %vm2608_vm6, %v4979_v32, -inf  ;;  %v5402_v3 = vsel %vm2608_vm6, %v4986_v4, -inf  ;;  %v5416_v11 = vsel %vm2608_vm6, %v4994_v19, -inf  ;;  %v4663_v12 = vmul.f32 0.1, %v6275_v34 }
 0x823   : > { %v5003_v6 = vcombine.high %v5002_v13, %v5002_v13  ;;  %v5390_v14 = vmax.f32 %v5388_v24, %v5389_v10  ;;  %v5396_v21 = vrot.slane %v5395_v36, 4  ;;  %v5403_v38 = vrot.slane %v5402_v3, 4 }
 0x824   : > { %v5409_v8 = vsel %vm2608_vm6, %v4987_v52, -inf  ;;  %v5417_v44 = vrot.slane %v5416_v11, 4  ;;  %v5423_v53 = vsel %vm2608_vm6, %v4995_v47, -inf  ;;  %v5430_v15 = vsel %vm2608_vm6, %v5002_v13, -inf }
 0x825   : > { %v5391_v25 = vrot.slane %v5390_v14, 2  ;;  %v5397_v43 = vmax.f32 %v5395_v36, %v5396_v21  ;;  %v5404_v30 = vmax.f32 %v5402_v3, %v5403_v38  ;;  %v5410_v57 = vrot.slane %v5409_v8, 4 }
 0x826   : > { %v5418_v40 = vmax.f32 %v5416_v11, %v5417_v44  ;;  %v5424_v55 = vrot.slane %v5423_v53, 4  ;;  %v5431_v45 = vrot.slane %v5430_v15, 4  ;;  %v5437_v26 = vsel %vm2608_vm6, %v5003_v6, -inf }
 0x827   : > { %v5392_v56 = vmax.f32 %v5390_v14, %v5391_v25  ;;  %v5398_v42 = vrot.slane %v5397_v43, 2  ;;  %v5405_v16 = vrot.slane %v5404_v30, 2  ;;  %v5411_v2 = vmax.f32 %v5409_v8, %v5410_v57 }
 0x828   : > { %v5419_v50 = vrot.slane %v5418_v40, 2  ;;  %v5425_v58 = vmax.f32 %v5423_v53, %v5424_v55  ;;  %v5432_v63 = vmax.f32 %v5430_v15, %v5431_v45  ;;  %v5438_v20 = vrot.slane %v5437_v26, 4 }
 0x829   : > { %v5393_v0 = vrot.slane %v5392_v56, 1  ;;  %v5399_v41 = vmax.f32 %v5397_v43, %v5398_v42  ;;  %v5406_v54 = vmax.f32 %v5404_v30, %v5405_v16  ;;  %v5412_v18 = vrot.slane %v5411_v2, 2 }
 0x82a   : > { %v5420_v59 = vmax.f32 %v5418_v40, %v5419_v50  ;;  %v5426_v39 = vrot.slane %v5425_v58, 2  ;;  %v5433_v49 = vrot.slane %v5432_v63, 2  ;;  %v5439_v17 = vmax.f32 %v5437_v26, %v5438_v20 }
 0x82b   : > { %v5394_v62 = vmax.f32 %v5392_v56, %v5393_v0  ;;  %v5400_v60 = vrot.slane %v5399_v41, 1  ;;  %v5407_v46 = vrot.slane %v5406_v54, 1  ;;  %v5413_v33 = vmax.f32 %v5411_v2, %v5412_v18 }
 0x82c   : > { %v5421_v31 = vrot.slane %v5420_v59, 1  ;;  %v5427_v22 = vmax.f32 %v5425_v58, %v5426_v39  ;;  %v5434_v27 = vmax.f32 %v5432_v63, %v5433_v49  ;;  %v5440_v5 = vrot.slane %v5439_v17, 2 }
 0x82d   : > { %v5401_v37 = vmax.f32 %v5399_v41, %v5400_v60  ;;  %v5408_v29 = vmax.f32 %v5406_v54, %v5407_v46  ;;  %v5414_v32 = vrot.slane %v5413_v33, 1  ;;  %v4679_v4 = vmax.f32 %v6275_v34, %v4663_v12 }
 0x82e   : > { %v5422_v19 = vmax.f32 %v5420_v59, %v5421_v31  ;;  %v5428_v9 = vrot.slane %v5427_v22, 1  ;;  %v5435_v24 = vrot.slane %v5434_v27, 1  ;;  %v5441_v52 = vmax.f32 %v5439_v17, %v5440_v5 }
 0x82f   : > { %v5415_v47 = vmax.f32 %v5413_v33, %v5414_v32  ;;  %v5704_v13 = vsel %vm3265_vm9, %v5408_v29, %v5394_v62  ;;  %v4790_v10 = vcombine.low %v9154_v35, %v4679_v4  ;;  %v4791_v36 = vcombine.high %v9154_v35, %v4679_v4 }
 0x830   : > { %v5429_v3 = vmax.f32 %v5427_v22, %v5428_v9  ;;  %v5436_v11 = vmax.f32 %v5434_v27, %v5435_v24  ;;  %v5442_v6 = vrot.slane %v5441_v52, 1  ;;  %v5705_v14 = vsel %vm3267_vm11, %v5422_v19, %v5704_v13 }
 0x831   : > { %v5711_v21 = vsel %vm3265_vm9, %v5415_v47, %v5401_v37  ;;  %v4798_v34 = vrot.slane %v4790_v10, %v8016_v61  ;;  %v4805_v12 = vrot.slane %v4791_v36, %v8016_v61  ;;  %v4664_v38 = vmul.f32 0.1, %v9165_v23 }
 0x832   : > { %v5443_v8 = vmax.f32 %v5441_v52, %v5442_v6  ;;  %v9185_v44 = vsel %vm3269_vm12, %v5436_v11, %v5705_v14  ;;  %v5712_v53 = vsel %vm3267_vm11, %v5429_v3, %v5711_v21  ;;  %v6277_v35 = vadd.f32 %v9000_v51, %v8946_v7 }
 0x833   : > { %v4806_v15 = vcombine.high %v4798_v34, %v4798_v34  ;;  %v4807_v25 = vcombine.high %v4805_v12, %v4805_v12  ;;  %v5010_v43 = vrot.slane %v4798_v34, %v8016_v61  ;;  %v5026_v30 = vrot.slane %v4805_v12, %v8016_v61 }
 0x834   : > { %v9193_v57 = vsel %vm3269_vm12, %v5443_v8, %v5712_v53  ;;  %v4665_v40 = vmul.f32 0.1, %v6277_v35  ;;  %v9200_v16 = vmax.f32 %v9165_v23, %v4664_v38 }
 0x835   : > { %v5011_v55 = vcombine.high %v5010_v43, %v5010_v43  ;;  %v5018_v45 = vrot.slane %v4806_v15, %v8016_v61  ;;  %v5027_v26 = vcombine.high %v5026_v30, %v5026_v30  ;;  %v5034_v56 = vrot.slane %v4807_v25, %v8016_v61 }
 0x836   : > { %v5444_v42 = vsel %vm2608_vm6, %v5010_v43, -inf  ;;  %v5472_v51 = vsel %vm2608_vm6, %v5026_v30, -inf  ;;  %v9202_v2 = vmax.f32 %v6277_v35, %v4665_v40  ;;  %v9212_v30 = vadd.f32 %v9002_v1, %v8943_v28 }
 0x837   : > { %v5019_v50 = vcombine.high %v5018_v45, %v5018_v45  ;;  %v5035_v58 = vcombine.high %v5034_v56, %v5034_v56  ;;  %v5445_v63 = vrot.slane %v5444_v42, 4  ;;  %v5451_v20 = vsel %vm2608_vm6, %v5011_v55, -inf }
 0x838   : > { %v5452_v0 = vrot.slane %v5451_v20, 4  ;;  %v5458_v41 = vsel %vm2608_vm6, %v5018_v45, -inf  ;;  %v5473_v54 = vrot.slane %v5472_v51, 4  ;;  %v5479_v18 = vsel %vm2608_vm6, %v5027_v26, -inf }
 0x839   : > { %v5446_v59 = vmax.f32 %v5444_v42, %v5445_v63  ;;  %v5459_v39 = vrot.slane %v5458_v41, 4  ;;  %v5465_v49 = vsel %vm2608_vm6, %v5019_v50, -inf  ;;  %v5480_v17 = vrot.slane %v5479_v18, 4 }
 0x83a   : > { %v5453_v23 = vmax.f32 %v5451_v20, %v5452_v0  ;;  %v5466_v62 = vrot.slane %v5465_v49, 4  ;;  %v5474_v60 = vmax.f32 %v5472_v51, %v5473_v54  ;;  %v5486_v46 = vsel %vm2608_vm6, %v5034_v56, -inf }
 0x83b   : > { %v5447_v33 = vrot.slane %v5446_v59, 2  ;;  %v5460_v31 = vmax.f32 %v5458_v41, %v5459_v39  ;;  %v5481_v22 = vmax.f32 %v5479_v18, %v5480_v17  ;;  %v5487_v27 = vrot.slane %v5486_v46, 4 }
 0x83c   : > { %v5454_v5 = vrot.slane %v5453_v23, 2  ;;  %v5467_v37 = vmax.f32 %v5465_v49, %v5466_v62  ;;  %v5475_v29 = vrot.slane %v5474_v60, 2  ;;  %v5493_v32 = vsel %vm2608_vm6, %v5035_v58, -inf }
 0x83d   : > { %v5448_v4 = vmax.f32 %v5446_v59, %v5447_v33  ;;  %v5461_v19 = vrot.slane %v5460_v31, 2  ;;  %v5482_v9 = vrot.slane %v5481_v22, 2  ;;  %v5488_v24 = vmax.f32 %v5486_v46, %v5487_v27 }
 0x83e   : > { %v5455_v52 = vmax.f32 %v5453_v23, %v5454_v5  ;;  %v5468_v47 = vrot.slane %v5467_v37, 2  ;;  %v5476_v13 = vmax.f32 %v5474_v60, %v5475_v29  ;;  %v5494_v10 = vrot.slane %v5493_v32, 4 }
 0x83f   : > { %v5449_v36 = vrot.slane %v5448_v4, 1  ;;  %v5462_v3 = vmax.f32 %v5460_v31, %v5461_v19  ;;  %v5483_v11 = vmax.f32 %v5481_v22, %v5482_v9  ;;  %v5489_v6 = vrot.slane %v5488_v24, 2 }
 0x840   : > { %v5456_v14 = vrot.slane %v5455_v52, 1  ;;  %v5469_v21 = vmax.f32 %v5467_v37, %v5468_v47  ;;  %v5477_v34 = vrot.slane %v5476_v13, 1  ;;  %v5495_v12 = vmax.f32 %v5493_v32, %v5494_v10 }
 0x841   : > { %v5450_v38 = vmax.f32 %v5448_v4, %v5449_v36  ;;  %v5463_v8 = vrot.slane %v5462_v3, 1  ;;  %v5484_v53 = vrot.slane %v5483_v11, 1  ;;  %v5490_v35 = vmax.f32 %v5488_v24, %v5489_v6 }
 0x842   : > { %v5457_v15 = vmax.f32 %v5455_v52, %v5456_v14  ;;  %v5470_v25 = vrot.slane %v5469_v21, 1  ;;  %v5496_v43 = vrot.slane %v5495_v12, 2  ;;  %v5478_v55 = vmax.f32 %v5476_v13, %v5477_v34 }
 0x843   : > { %v5464_v40 = vmax.f32 %v5462_v3, %v5463_v8  ;;  %v5491_v45 = vrot.slane %v5490_v35, 1  ;;  %v5707_v26 = vsel %vm3271_vm13, %v5450_v38, %v9185_v44  ;;  %v4808_v50 = vcombine.low %v9200_v16, %v9202_v2 }
 0x844   : > { %v5471_v56 = vmax.f32 %v5469_v21, %v5470_v25  ;;  %v5497_v42 = vmax.f32 %v5495_v12, %v5496_v43  ;;  %v5714_v51 = vsel %vm3271_vm13, %v5457_v15, %v9193_v57  ;;  %v5485_v58 = vmax.f32 %v5483_v11, %v5484_v53 }
 0x845   : > { %v5492_v63 = vmax.f32 %v5490_v35, %v5491_v45  ;;  %v5708_v28 = vsel %vm3273_vm14, %v5464_v40, %v5707_v26  ;;  %v4809_v1 = vcombine.high %v9200_v16, %v9202_v2  ;;  %v4816_v41 = vrot.slane %v4808_v50, %v8016_v61 }
 0x846   : > { %v5498_v20 = vrot.slane %v5497_v42, 1  ;;  %v5709_v0 = vsel %vm3275_vm15, %v5478_v55, %v5708_v28  ;;  %v5715_v44 = vsel %vm3273_vm14, %v5471_v56, %v5714_v51  ;;  %v9231_v59 = vadd.f32 %v9004_v48, %v8946_v7 }
 0x847   : > { %v5710_v54 = vsel %vm3277_vm1, %v5492_v63, %v5709_v0  ;;  %v5716_v57 = vsel %vm3275_vm15, %v5485_v58, %v5715_v44  ;;  %v4823_v18 = vrot.slane %v4809_v1, %v8016_v61  ;;  %v4824_v16 = vcombine.high %v4816_v41, %v4816_v41 }
 0x848   : > { %v5499_v39 = vmax.f32 %v5497_v42, %v5498_v20  ;;  %5744 = vst [vmem:[%s9054_s16 + $0x20] sm:$0xff] %v5710_v54  ;;  %v5042_v2 = vrot.slane %v4816_v41, %v8016_v61  ;;  %v4666_v23 = vmul.f32 0.1, %v9212_v30  ;;  %v4667_v62 = vmul.f32 0.1, %v9231_v59 }
 0x849   : > { %v4825_v49 = vcombine.high %v4823_v18, %v4823_v18  ;;  %v5058_v17 = vrot.slane %v4823_v18, %v8016_v61  ;;  %v5050_v33 = vrot.slane %v4824_v16, %v8016_v61 }
 0x84a   : > { %v5717_v60 = vsel %vm3277_vm1, %v5499_v39, %v5716_v57  ;;  %v5043_v46 = vcombine.high %v5042_v2, %v5042_v2  ;;  %v5500_v7 = vsel %vm2608_vm6, %v5042_v2, -inf  ;;  %v4682_v20 = vmax.f32 %v9212_v30, %v4666_v23 }
 0x84b   : > { %5745 = vst [vmem:[%s9054_s16 + $0x28] sm:$0xff] %v5717_v60  ;;  %v5059_v48 = vcombine.high %v5058_v17, %v5058_v17  ;;  %v5066_v31 = vrot.slane %v4825_v49, %v8016_v61  ;;  %v5501_v22 = vrot.slane %v5500_v7, 4  ;;  %v5528_v27 = vsel %vm2608_vm6, %v5058_v17, -inf }
 0x84c   : > { %v5051_v5 = vcombine.high %v5050_v33, %v5050_v33  ;;  %v5507_v37 = vsel %vm2608_vm6, %v5043_v46, -inf  ;;  %v5514_v29 = vsel %vm2608_vm6, %v5050_v33, -inf  ;;  %v5529_v32 = vrot.slane %v5528_v27, 4 }
 0x84d   : > { %v5067_v4 = vcombine.high %v5066_v31, %v5066_v31  ;;  %v5502_v19 = vmax.f32 %v5500_v7, %v5501_v22  ;;  %v5508_v9 = vrot.slane %v5507_v37, 4  ;;  %v5515_v24 = vrot.slane %v5514_v29, 4 }
 0x84e   : > { %v5521_v52 = vsel %vm2608_vm6, %v5051_v5, -inf  ;;  %v5530_v47 = vmax.f32 %v5528_v27, %v5529_v32  ;;  %v5535_v13 = vsel %vm2608_vm6, %v5059_v48, -inf  ;;  %v5542_v10 = vsel %vm2608_vm6, %v5066_v31, -inf }
 0x84f   : > { %v5503_v36 = vrot.slane %v5502_v19, 2  ;;  %v5509_v3 = vmax.f32 %v5507_v37, %v5508_v9  ;;  %v5516_v11 = vmax.f32 %v5514_v29, %v5515_v24  ;;  %v5522_v6 = vrot.slane %v5521_v52, 4 }
 0x850   : > { %v5531_v14 = vrot.slane %v5530_v47, 2  ;;  %v5536_v21 = vrot.slane %v5535_v13, 4  ;;  %v5543_v34 = vrot.slane %v5542_v10, 4  ;;  %v5549_v12 = vsel %vm2608_vm6, %v5067_v4, -inf }
 0x851   : > { %v5504_v38 = vmax.f32 %v5502_v19, %v5503_v36  ;;  %v5510_v8 = vrot.slane %v5509_v3, 2  ;;  %v5517_v53 = vrot.slane %v5516_v11, 2  ;;  %v5523_v35 = vmax.f32 %v5521_v52, %v5522_v6 }
 0x852   : > { %v5532_v15 = vmax.f32 %v5530_v47, %v5531_v14  ;;  %v5537_v25 = vmax.f32 %v5535_v13, %v5536_v21  ;;  %v5544_v43 = vmax.f32 %v5542_v10, %v5543_v34  ;;  %v5550_v40 = vrot.slane %v5549_v12, 4 }
 0x853   : > { %v5505_v55 = vrot.slane %v5504_v38, 1  ;;  %v5511_v45 = vmax.f32 %v5509_v3, %v5510_v8  ;;  %v5518_v26 = vmax.f32 %v5516_v11, %v5517_v53  ;;  %v5524_v56 = vrot.slane %v5523_v35, 2 }
 0x854   : > { %v5533_v42 = vrot.slane %v5532_v15, 1  ;;  %v5538_v51 = vrot.slane %v5537_v25, 2  ;;  %v5545_v50 = vrot.slane %v5544_v43, 2  ;;  %v5551_v58 = vmax.f32 %v5549_v12, %v5550_v40 }
 0x855   : > { %v5512_v63 = vrot.slane %v5511_v45, 1  ;;  %v5519_v28 = vrot.slane %v5518_v26, 1  ;;  %v5525_v1 = vmax.f32 %v5523_v35, %v5524_v56  ;;  %v5506_v0 = vmax.f32 %v5504_v38, %v5505_v55 }
 0x856   : > { %v5539_v44 = vmax.f32 %v5537_v25, %v5538_v51  ;;  %v5546_v41 = vmax.f32 %v5544_v43, %v5545_v50  ;;  %v5552_v54 = vrot.slane %v5551_v58, 2  ;;  %v5534_v39 = vmax.f32 %v5532_v15, %v5533_v42 }
 0x857   : > { %v5520_v57 = vmax.f32 %v5518_v26, %v5519_v28  ;;  %v5526_v18 = vrot.slane %v5525_v1, 1  ;;  %v4683_v16 = vmax.f32 %v9231_v59, %v4667_v62  ;;  %v5513_v2 = vmax.f32 %v5511_v45, %v5512_v63 }
 0x858   : > { %v5540_v49 = vrot.slane %v5539_v44, 1  ;;  %v5547_v17 = vrot.slane %v5546_v41, 1  ;;  %v5553_v60 = vmax.f32 %v5551_v58, %v5552_v54 }
 0x859   : > { %v5527_v46 = vmax.f32 %v5525_v1, %v5526_v18  ;;  %v5718_v33 = vsel %vm3265_vm9, %v5520_v57, %v5506_v0  ;;  %v4826_v7 = vcombine.low %v4682_v20, %v4683_v16  ;;  %v4827_v48 = vcombine.high %v4682_v20, %v4683_v16 }
 0x85a   : > { %v5541_v31 = vmax.f32 %v5539_v44, %v5540_v49  ;;  %v5548_v30 = vmax.f32 %v5546_v41, %v5547_v17  ;;  %v5554_v23 = vrot.slane %v5553_v60, 1  ;;  %v5719_v22 = vsel %vm3267_vm11, %v5534_v39, %v5718_v33 }
 0x85b   : > { %v5725_v27 = vsel %vm3265_vm9, %v5527_v46, %v5513_v2  ;;  %v4834_v5 = vrot.slane %v4826_v7, %v8016_v61  ;;  %v4841_v59 = vrot.slane %v4827_v48, %v8016_v61 }
 0x85c   : > { %v5555_v62 = vmax.f32 %v5553_v60, %v5554_v23  ;;  %v9258_v37 = vsel %vm3269_vm12, %v5548_v30, %v5719_v22  ;;  %v5726_v29 = vsel %vm3267_vm11, %v5541_v31, %v5725_v27 }
 0x85d   : > { %v4842_v32 = vcombine.high %v4834_v5, %v4834_v5  ;;  %v4843_v4 = vcombine.high %v4841_v59, %v4841_v59  ;;  %v5074_v19 = vrot.slane %v4834_v5, %v8016_v61  ;;  %v5090_v9 = vrot.slane %v4841_v59, %v8016_v61 }
 0x85e   : > { %v5727_v24 = vsel %vm3269_vm12, %v5555_v62, %v5726_v29 }
 0x85f   : > { %v5075_v52 = vcombine.high %v5074_v19, %v5074_v19  ;;  %v5082_v47 = vrot.slane %v4842_v32, %v8016_v61  ;;  %v5091_v13 = vcombine.high %v5090_v9, %v5090_v9  ;;  %v5098_v10 = vrot.slane %v4843_v4, %v8016_v61 }
 0x860   : > { %v5556_v36 = vsel %vm2608_vm6, %v5074_v19, -inf  ;;  %v5584_v3 = vsel %vm2608_vm6, %v5090_v9, -inf }
 0x861   : > { %v5083_v11 = vcombine.high %v5082_v47, %v5082_v47  ;;  %v5099_v6 = vcombine.high %v5098_v10, %v5098_v10  ;;  %v5557_v14 = vrot.slane %v5556_v36, 4  ;;  %v5563_v21 = vsel %vm2608_vm6, %v5075_v52, -inf }
 0x862   : > { %v5564_v34 = vrot.slane %v5563_v21, 4  ;;  %v5570_v12 = vsel %vm2608_vm6, %v5082_v47, -inf  ;;  %v5585_v38 = vrot.slane %v5584_v3, 4  ;;  %v5591_v8 = vsel %vm2608_vm6, %v5091_v13, -inf }
 0x863   : > { %v5558_v53 = vmax.f32 %v5556_v36, %v5557_v14  ;;  %v5571_v35 = vrot.slane %v5570_v12, 4  ;;  %v5577_v15 = vsel %vm2608_vm6, %v5083_v11, -inf  ;;  %v5592_v61 = vrot.slane %v5591_v8, 4 }
 0x864   : > { %v5565_v25 = vmax.f32 %v5563_v21, %v5564_v34  ;;  %v5578_v43 = vrot.slane %v5577_v15, 4  ;;  %v5586_v40 = vmax.f32 %v5584_v3, %v5585_v38  ;;  %v5598_v55 = vsel %vm2608_vm6, %v5098_v10, -inf }
 0x865   : > { %v5559_v45 = vrot.slane %v5558_v53, 2  ;;  %v5572_v26 = vmax.f32 %v5570_v12, %v5571_v35  ;;  %v5593_v56 = vmax.f32 %v5591_v8, %v5592_v61  ;;  %v5599_v42 = vrot.slane %v5598_v55, 4 }
 0x866   : > { %v5566_v51 = vrot.slane %v5565_v25, 2  ;;  %v5579_v50 = vmax.f32 %v5577_v15, %v5578_v43  ;;  %v5587_v58 = vrot.slane %v5586_v40, 2  ;;  %v5605_v63 = vsel %vm2608_vm6, %v5099_v6, -inf }
 0x867   : > { %v5560_v28 = vmax.f32 %v5558_v53, %v5559_v45  ;;  %v5573_v1 = vrot.slane %v5572_v26, 2  ;;  %v5594_v20 = vrot.slane %v5593_v56, 2  ;;  %v5600_v0 = vmax.f32 %v5598_v55, %v5599_v42 }
 0x868   : > { %v5567_v44 = vmax.f32 %v5565_v25, %v5566_v51  ;;  %v5580_v41 = vrot.slane %v5579_v50, 2  ;;  %v5588_v54 = vmax.f32 %v5586_v40, %v5587_v58  ;;  %v5606_v57 = vrot.slane %v5605_v63, 4 }
 0x869   : > { %v5561_v18 = vrot.slane %v5560_v28, 1  ;;  %v5574_v39 = vmax.f32 %v5572_v26, %v5573_v1  ;;  %v5595_v16 = vmax.f32 %v5593_v56, %v5594_v20  ;;  %v5601_v2 = vrot.slane %v5600_v0, 2 }
 0x86a   : > { %v5568_v49 = vrot.slane %v5567_v44, 1  ;;  %v5581_v17 = vmax.f32 %v5579_v50, %v5580_v41  ;;  %v5589_v60 = vrot.slane %v5588_v54, 1  ;;  %v5607_v46 = vmax.f32 %v5605_v63, %v5606_v57 }
 0x86b   : > { %v5562_v33 = vmax.f32 %v5560_v28, %v5561_v18  ;;  %v5575_v7 = vrot.slane %v5574_v39, 1  ;;  %v5596_v48 = vrot.slane %v5595_v16, 1  ;;  %v5602_v31 = vmax.f32 %v5600_v0, %v5601_v2 }
 0x86c   : > { %v5569_v30 = vmax.f32 %v5567_v44, %v5568_v49  ;;  %v5582_v23 = vrot.slane %v5581_v17, 1  ;;  %v5608_v22 = vrot.slane %v5607_v46, 2  ;;  %v5590_v29 = vmax.f32 %v5588_v54, %v5589_v60 }
 0x86d   : > { %v5576_v27 = vmax.f32 %v5574_v39, %v5575_v7  ;;  %v5603_v5 = vrot.slane %v5602_v31, 1  ;;  %v5721_v59 = vsel %vm3271_vm13, %v5562_v33, %v9258_v37  ;;  %v5597_v19 = vmax.f32 %v5595_v16, %v5596_v48 }
 0x86e   : > { %v5583_v62 = vmax.f32 %v5581_v17, %v5582_v23  ;;  %v5609_v32 = vmax.f32 %v5607_v46, %v5608_v22  ;;  %v5728_v4 = vsel %vm3271_vm13, %v5569_v30, %v5727_v24 }
 0x86f   : > { %v5604_v9 = vmax.f32 %v5602_v31, %v5603_v5  ;;  %v5722_v52 = vsel %vm3273_vm14, %v5576_v27, %v5721_v59 }
 0x870   : > { %v5610_v47 = vrot.slane %v5609_v32, 1  ;;  %v5723_v13 = vsel %vm3275_vm15, %v5590_v29, %v5722_v52  ;;  %v5729_v10 = vsel %vm3273_vm14, %v5583_v62, %v5728_v4 }
 0x871   : > { %v5724_v36 = vsel %vm3277_vm1, %v5604_v9, %v5723_v13  ;;  %v5730_v3 = vsel %vm3275_vm15, %v5597_v19, %v5729_v10 }
 0x872   : > { %v5611_v37 = vmax.f32 %v5609_v32, %v5610_v47  ;;  %5746 = vst [vmem:[%s9054_s16 + $0x30] sm:$0xff] %v5724_v36 }
 0x874   : > { %v5731_v11 = vsel %vm3277_vm1, %v5611_v37, %v5730_v3 }
 0x875   : > { %5747 = vst [vmem:[%s9054_s16 + $0x38] sm:$0xff] %v5731_v11 }
 0x876 PF: > { %s9382_s20 = sld [smem:[#allocation20_spill]] }
 0x87c   : > { %s30_s18 = sadd.s32 1, %s9382_s20  }
 0x87d   : > { %p27_p0 = scmp.ge.s32.totalorder %s30_s18, 8  }
 0x87f   :  { %29 = sbr.rel (!%p27_p0) target bundleno = 9 (0x9), region = 149 }
 0x886   :  { %5772 = vsyncpa [#allocation3], 1 }
 0x887   :  { %5774 = vsyncpa [#allocation3 + $0x1], 1 }
 0x888   :  { %5775 = vsyncpa [#allocation5], 1 }
 0x889   :  { %5776 = vsyncpa [#allocation8], 1 }
 0x88a   :  { %5777 = vsyncpa [#allocation11], 1 }
 0x88b   :  { %5778 = vsyncpa [#allocation14], 1 }

// kernel: dr_spaam_forward.5
= control target key start
LH: loop header
LB: loop body
LE: loop exit
PB: predicated region body
PF: predicated region fallthrough
CT: control target
= control target key end

     0   :  { %18 = vsyncpa [#allocation3], 0  ;;  %s12710_s0 = inlined_call_operand.vmem [shape: f32[64,256], index: 0, kind: input, shape index: {}]   ;;  %s12711_s1 = inlined_call_operand.vmem [shape: bf16[768,256], index: 1, kind: input, shape index: {}]   ;;  %s12712_s2 = inlined_call_operand.hbm [shape: f32[1,256], index: 2, kind: input, shape index: {}]   ;;  %s12713_s3 = inlined_call_operand.vmem [shape: bf16[768,256], index: 3, kind: input, shape index: {}]   ;;  %s12714_s4 = inlined_call_operand.hbm [shape: f32[1,256], index: 4, kind: input, shape index: {}]   ;;  %s12715_s5 = inlined_call_operand.vmem [shape: bf16[768,512], index: 5, kind: input, shape index: {}]   ;;  %s12716_s6 = inlined_call_operand.vmem [shape: f32[1,512], index: 6, kind: input, shape index: {}]   ;;  %s12717_s7 = inlined_call_operand.vmem [shape: bf16[1536,256], index: 7, kind: input, shape index: {}]   ;;  %s12718_s8 = inlined_call_operand.hbm [shape: f32[1,256], index: 8, kind: input, shape index: {}]   ;;  %s12719_s9 = inlined_call_operand.vmem [shape: bf16[768,128], index: 9, kind: input, shape index: {}]   ;;  %s12720_s10 = inlined_call_operand.vmem [shape: f32[1,128], index: 10, kind: input, shape index: {}]   ;;  %s12721_s11 = inlined_call_operand.vmem [shape: bf16[128,128], index: 11, kind: input, shape index: {}]   ;;  %s12722_s12 = inlined_call_operand.hbm [shape: f32[1,128], index: 12, kind: input, shape index: {}]   ;;  %s12723_s13 = inlined_call_operand.vmem [shape: f32[16,128], index: 13, kind: output, shape index: {}]  }
   0x1   :  { %19 = vsyncpa [#allocation5], 0 }
   0x2   :  { %20 = vsyncpa [#allocation8], 0  ;;  %s9393_s25 = smov 0  }
   0x3 LB: > { %12736 = sst [smem:[#allocation12_spill]] %s9314_s25  ;;  %s9399_s26 = sadd.s32 4294967295, %s9314_s25   ;;  %s9314_s25 = sphi %s9393_s25, %s26_s25  }
   0x4   : > { %p7317_p0 = scmp.ge.s32.totalorder %s9314_s25, 1  ;;  %p335_p1 = scmp.lt.s32.totalorder %s9314_s25, 3 }
   0x5   : > { %p12724_p2 = scmp.eq.s32.totalorder %s9399_s26, 0  ;;  %s9316_s27 = smov [#allocation4]  }
   0x6   : > { %s365_s28 = sshll.u32 %s9316_s27, 4  ;;  %p9404_p3 = pnand %p7317_p0, %p335_p1  ;;  %s366_s28 = int_to_ptr.vmem [resolvable:$true] %s365_s28 }
   0x7   : > { %s9317_s30 = smov [#allocation2]   ;;  %s9318_s15 = smov [#allocation6]  }
   0x8   : > { %s12737_s29 = scalar_select %p9404_p3, 1, 0 }
   0x9   : > { %s351_s14 = sshll.u32 %s9317_s30, 4  ;;  %p8228_p4 = pneg %p9404_p3  ;;  %s9416_s14 = int_to_ptr.vmem [resolvable:$true] %s351_s14 }
   0xa   : > { %s385_s16 = sshll.u32 %s9318_s15, 4  ;;  %s9319_s18 = smov [#allocation7]   ;;  %s9418_s16 = int_to_ptr.vmem [resolvable:$true] %s385_s16 }
   0xb   : > { %p9412_p5 = pnand %p12724_p2, %p8228_p4  ;;  %s405_s19 = sshll.u32 %s9319_s18, 4  ;;  %s9420_s19 = int_to_ptr.vmem [resolvable:$true] %s405_s19 }
   0xc   : > { %s9184_s22 = scalar_lea.hbm %s12714_s4, 32 }
   0xd   : > { %p9185_p6 = scmp.ne.s32.totalorder %s12714_s4, %s9184_s22  ;;  %p9430_p7 = pneg %p9412_p5 }
   0xe   : > { %p9191_p10 = scmp.lt.u32.totalorder %s9184_s22, %s12714_s4 }
   0xf   : > { %p9187_p8 = pnand %p9430_p7, %p9185_p6 }
  0x11   : > { %p9188_p9 = pneg %p9187_p8 }
  0x13   : > { %p9193_p11 = pnand %p9191_p10, %p9188_p9 }
  0x15   : > { %9196 = shalt.err (!%p9193_p11)
}
  0x16   : > { %s9197_s18 = scalar_lea.vmem %s366_s28, 32  ;;  %p9205_p1 = scmp.lt.s32.totalorder %s366_s28, %s366_s28 }
  0x17   : > { %p9198_p12 = scmp.ne.s32.totalorder %s366_s28, %s9197_s18  ;;  %p9206_p4 = scmp.lt.s32.totalorder %s9197_s18, %s9197_s18 }
  0x19   : > { %p9200_p13 = pnand %p9198_p12, %p9430_p7  ;;  %p9207_p2 = por %p9206_p4, %p9205_p1 }
  0x1b   : > { %p9201_p0 = pneg %p9200_p13 }
  0x1d   : > { %p9208_p3 = pnand %p9207_p2, %p9201_p0 }
  0x1f   : > { %9211 = shalt.err (!%p9208_p3)
}
  0x20   : > { %8234 = dma.hbm_to_vmem [thread:$0]  (!%p9412_p5), %s12714_s4, 32, %s366_s28, [#allocation5]  }
  0x21   : > { %s9212_s24 = scalar_lea.hbm %s12712_s2, 32 }
  0x22   : > { %p9213_p6 = scmp.ne.s32.totalorder %s12712_s2, %s9212_s24  ;;  %p9219_p2 = scmp.lt.u32.totalorder %s9212_s24, %s12712_s2 }
  0x24   : > { %p9215_p8 = pnand %p9213_p6, %p9430_p7 }
  0x26   : > { %p9216_p9 = pneg %p9215_p8 }
  0x28   : > { %p9221_p3 = pnand %p9219_p2, %p9216_p9 }
  0x2a   : > { %9224 = shalt.err (!%p9221_p3)
}
  0x2b   : > { %s9225_s28 = scalar_lea.vmem %s9416_s14, 32  ;;  %p9233_p13 = scmp.lt.s32.totalorder %s9416_s14, %s9416_s14 }
  0x2c   : > { %p9226_p10 = scmp.ne.s32.totalorder %s9416_s14, %s9225_s28  ;;  %p9234_p0 = scmp.lt.s32.totalorder %s9225_s28, %s9225_s28 }
  0x2e   : > { %p9228_p11 = pnand %p9226_p10, %p9430_p7  ;;  %p9235_p1 = por %p9234_p0, %p9233_p13 }
  0x30   : > { %p9229_p12 = pneg %p9228_p11 }
  0x32   : > { %p9236_p4 = pnand %p9235_p1, %p9229_p12 }
  0x34   : > { %9239 = shalt.err (!%p9236_p4)
}
  0x35   : > { %8231 = dma.hbm_to_vmem [thread:$0]  (!%p9412_p5), %s12712_s2, 32, %s9416_s14, [#allocation3]  }
  0x36   : > { %s9240_s23 = scalar_lea.hbm %s12718_s8, 32 }
  0x37   : > { %p9241_p6 = scmp.ne.s32.totalorder %s12718_s8, %s9240_s23  ;;  %p9247_p2 = scmp.lt.u32.totalorder %s9240_s23, %s12718_s8 }
  0x39   : > { %p9243_p8 = pnand %p9241_p6, %p9430_p7 }
  0x3b   : > { %p9244_p9 = pneg %p9243_p8 }
  0x3d   : > { %p9249_p3 = pnand %p9247_p2, %p9244_p9 }
  0x3f   : > { %9252 = shalt.err (!%p9249_p3)
}
  0x40   : > { %s9253_s14 = scalar_lea.vmem %s9418_s16, 32  ;;  %p9261_p13 = scmp.lt.s32.totalorder %s9418_s16, %s9418_s16 }
  0x41   : > { %p9254_p10 = scmp.ne.s32.totalorder %s9418_s16, %s9253_s14  ;;  %p9262_p0 = scmp.lt.s32.totalorder %s9253_s14, %s9253_s14 }
  0x43   : > { %p9256_p11 = pnand %p9254_p10, %p9430_p7  ;;  %p9263_p1 = por %p9262_p0, %p9261_p13 }
  0x45   : > { %p9257_p12 = pneg %p9256_p11 }
  0x47   : > { %p9264_p4 = pnand %p9263_p1, %p9257_p12 }
  0x49   : > { %9267 = shalt.err (!%p9264_p4)
}
  0x4a   : > { %8237 = dma.hbm_to_vmem [thread:$0]  (!%p9412_p5), %s12718_s8, 32, %s9418_s16, [#allocation5]  }
  0x4b   : > { %s9268_s22 = scalar_lea.hbm %s12722_s12, 16 }
  0x4c   : > { %p9269_p6 = scmp.ne.s32.totalorder %s12722_s12, %s9268_s22  ;;  %p9275_p2 = scmp.lt.u32.totalorder %s9268_s22, %s12722_s12 }
  0x4e   : > { %p9271_p8 = pnand %p9269_p6, %p9430_p7 }
  0x50   : > { %p9272_p9 = pneg %p9271_p8 }
  0x52   : > { %p9277_p3 = pnand %p9275_p2, %p9272_p9 }
  0x54   : > { %9280 = shalt.err (!%p9277_p3)
}
  0x55   : > { %s9281_s16 = scalar_lea.vmem %s9420_s19, 16  ;;  %s9288_s18 = scalar_lea.vmem %s9420_s19, 32 }
  0x56   : > { %p9282_p10 = scmp.ne.s32.totalorder %s9420_s19, %s9281_s16  ;;  %p9289_p13 = scmp.lt.s32.totalorder %s9420_s19, %s9420_s19 }
  0x57   : > { %p9290_p0 = scmp.lt.s32.totalorder %s9288_s18, %s9281_s16 }
  0x58   : > { %p9284_p11 = pnand %p9282_p10, %p9430_p7 }
  0x59   : > { %p9291_p1 = por %p9290_p0, %p9289_p13 }
  0x5a   : > { %p9285_p12 = pneg %p9284_p11 }
  0x5c   : > { %p9292_p4 = pnand %p9291_p1, %p9285_p12 }
  0x5e   : > { %9295 = shalt.err (!%p9292_p4)
}
  0x5f   : > { %8240 = dma.hbm_to_vmem [thread:$0]  (!%p9412_p5), %s12722_s12, 16, %s9420_s19, [#allocation8]  }
  0x60   : > { %p12740_p6 = scmp.ne.s32.totalorder %s12737_s29, 0 }
  0x62   : > { %428 = sbr.rel (%p12740_p6) target bundleno = 2444 (0x98c), region = 72 }
  0x69   : > { %p12741_p7 = scmp.eq.s32.totalorder %s9399_s26, 0 }
  0x6b   : > { %9301 = dma.done.wait (%p12741_p7), [#allocation3], 32   ;;  %p12742_p8 = pmov %p12741_p7 }
  0x6c   : > { %p12743_p9 = pmov %p12741_p7 }
  0x6d   : > { %9303 = vsyncadd (%p12742_p8), [#allocation3], 4294967264 }
  0x6e   : > { %9305 = dma.done.wait (%p12743_p9), [#allocation5], 64   ;;  %p12744_p2 = pmov %p12741_p7 }
  0x70   : > { %9307 = vsyncadd (%p12744_p2), [#allocation5], 4294967232  ;;  %p12745_p3 = pmov %p12744_p2 }
  0x71   : > { %p12746_p5 = pmov %p12744_p2 }
  0x72   : > { %9309 = dma.done.wait (%p12745_p3), [#allocation8], 16  }
  0x73   : > { %9311 = vsyncadd (%p12746_p5), [#allocation8], 4294967280  ;;  %v8264_v0 = vld [vmem:[%s12711_s1 + $0x4] ss:$8 sps:$4 sm:$0xff]   ;;  %v8266_v1 = vld [vmem:[%s12711_s1] ss:$8 sps:$4 sm:$0xff]   ;;  %v504_v5 = vlaneseq }
  0x74   : > { %1231 = vmatprep.subr.bf16.mxu1 %v8264_v0  ;;  %v8267_v2 = vld [vmem:[%s12711_s1 + $0x14] ss:$8 sps:$4 sm:$0xff]   ;;  %v8269_v3 = vld [vmem:[%s12711_s1 + $0x10] ss:$8 sps:$4 sm:$0xff]   ;;  %v8270_v4 = vld [vmem:[%s12711_s1 + $0x24] ss:$8 sps:$4 sm:$0xff]  }
  0x75   : > { %1232 = vmatpush1.bf16.msra.mxu1 %v8266_v1  ;;  %s7328_s30 = sshll.u32 %s9399_s26, 2  ;;  %v8272_v6 = vld [vmem:[%s12711_s1 + $0x20] ss:$8 sps:$4 sm:$0xff]   ;;  %v8273_v7 = vld [vmem:[%s12711_s1 + $0x34] ss:$8 sps:$4 sm:$0xff]   ;;  %v9552_v8 = vshrl.u32 %v504_v5, 7 }
  0x76   : > { %1233 = vmatprep.subr.bf16.mxu1 %v8267_v2  ;;  %p485_p10 = scmp.lt.s32.totalorder %s7328_s30, 7  ;;  %v8275_v9 = vld [vmem:[%s12711_s1 + $0x30] ss:$8 sps:$4 sm:$0xff]   ;;  %v8276_v10 = vld [vmem:[%s12711_s1 + $0x44] ss:$8 sps:$4 sm:$0xff]   ;;  %v12727_v23 = vmov 0.0  }
  0x77   : > { %v9561_v11 = vadd.s32 8, %v9552_v8  ;;  %v8278_v12 = vld [vmem:[%s12711_s1 + $0x40] ss:$8 sps:$4 sm:$0xff]   ;;  %v8279_v13 = vld [vmem:[%s12711_s1 + $0x54] ss:$8 sps:$4 sm:$0xff]   ;;  %v513_v15 = vand.u32 3, %v9552_v8 }
  0x78   : > { %s12803_s30 = smov (!%p485_p10, %s7328_s30), 7  ;;  %v8281_v16 = vld [vmem:[%s12711_s1 + $0x50] ss:$8 sps:$4 sm:$0xff]   ;;  %v8282_v17 = vld [vmem:[%s12711_s1 + $0x64] ss:$8 sps:$4 sm:$0xff]   ;;  %vm589_vm2 = vcmp.lt.s32.totalorder %v9552_v8, 1 }
  0x79   : > { %1234 = vmatpush1.bf16.msra.mxu1 %v8269_v3  ;;  %s7996_s22 = sshll.u32 %s12803_s30, 4  ;;  %v520_v14 = vand.u32 3, %v9561_v11  ;;  %v8284_v18 = vld [vmem:[%s12711_s1 + $0x60] ss:$8 sps:$4 sm:$0xff]   ;;  %vm557_vm1 = vcmp.ne.s32.totalorder %v513_v15, 0  ;;  %v9705_v62 = vadd.s32 16, %v9552_v8 }
  0x7a   : > { %1235 = vmatprep.subr.bf16.mxu1 %v8270_v4  ;;  %s9577_s18 = scalar_lea.vmem %s12710_s0, %s7996_s22  ;;  %v8312_v19 = vld [vmem:[%s12711_s1 + $0x204] ss:$8 sps:$4 sm:$0xff]   ;;  %v8285_v27 = vld [vmem:[%s12711_s1 + $0x74] ss:$8 sps:$4 sm:$0xff]   ;;  %v9611_v28 = vsel %vm557_vm1, 1.0, %v12727_v23  ;;  %v9714_v1 = vadd.s32 24, %v9552_v8 }
  0x7b   : > { %vm558_vm0 = vcmp.ne.s32.totalorder %v520_v14, 0  ;;  %v9593_v20 = vld [vmem:[%s9577_s18 + $0x8] sm:$0xff]  ;;  %v9596_v21 = vld [vmem:[%s9577_s18 + $0x18] sm:$0xff]  ;;  %1337 = vmatprep.subr.bf16.mxu0 %v8312_v19  ;;  %v9637_v38 = vld [vmem:[%s9577_s18] sm:$0xff]  ;;  %v527_v4 = vand.u32 3, %v9705_v62  ;;  %vm614_vm3 = vcmp.lt.s32.totalorder %v9552_v8, 7 }
  0x7c   : > { %v9600_v22 = vld [vmem:[%s9577_s18 + $0x38] sm:$0xff]  ;;  %v9603_v24 = vsel %vm558_vm0, 1.0, %v12727_v23  ;;  %v582_v25 = vrot.slane %v9593_v20, 7  ;;  %v584_v26 = vrot.slane %v9596_v21, 7  ;;  %v8317_v32 = vld [vmem:[%s12711_s1 + $0x200] ss:$8 sps:$4 sm:$0xff]  }
  0x7d   : > { %1236 = vmatpush1.bf16.msra.mxu1 %v8272_v6  ;;  %v588_v29 = vrot.slane %v9600_v22, 7  ;;  %v8287_v30 = vld [vmem:[%s12711_s1 + $0x70] ss:$8 sps:$4 sm:$0xff]   ;;  %v8288_v33 = vld [vmem:[%s12711_s1 + $0x84] ss:$8 sps:$4 sm:$0xff]   ;;  %1338 = vmatpush1.bf16.msra.mxu0 %v8317_v32  ;;  %v581_v5 = vrot.slane %v9637_v38, 7 }
  0x7e   : > { %1237 = vmatprep.subr.bf16.mxu1 %v8273_v7  ;;  %v595_v31 = vsel %vm589_vm2, %v582_v25, %v584_v26  ;;  %v8318_v36 = vld [vmem:[%s12711_s1 + $0x214] ss:$8 sps:$4 sm:$0xff]   ;;  %v8323_v40 = vld [vmem:[%s12711_s1 + $0x210] ss:$8 sps:$4 sm:$0xff]   ;;  %v8324_v42 = vld [vmem:[%s12711_s1 + $0x224] ss:$8 sps:$4 sm:$0xff]  }
  0x7f   : > { %v597_v34 = vsel %vm589_vm2, %v588_v29, %v582_v25  ;;  %v601_v35 = vmul.f32 %v9603_v24, %v595_v31  ;;  %v9640_v39 = vld [vmem:[%s9577_s18 + $0x10] sm:$0xff]  ;;  %1339 = vmatprep.subr.bf16.mxu0 %v8318_v36  ;;  %v8290_v43 = vld [vmem:[%s12711_s1 + $0x80] ss:$8 sps:$4 sm:$0xff]   ;;  %v8294_v49 = vld [vmem:[%s12711_s1 + $0xa4] ss:$8 sps:$4 sm:$0xff]   ;;  %vm9742_vm4 = vcmp.ne.s32.totalorder %v527_v4, 0 }
  0x80   : > { %v599_v37 = vmul.f32 %v9611_v28, %v597_v34  ;;  %v633_v44 = vpack.c.bf16 %v9640_v39, %v9637_v38  ;;  %v8291_v45 = vld [vmem:[%s12711_s1 + $0x94] ss:$8 sps:$4 sm:$0xff]   ;;  %v8329_v46 = vld [vmem:[%s12711_s1 + $0x220] ss:$8 sps:$4 sm:$0xff]   ;;  %v8293_v48 = vld [vmem:[%s12711_s1 + $0x90] ss:$8 sps:$4 sm:$0xff]  }
  0x81   : > { %1238 = vmatpush1.bf16.msra.mxu1 %v8275_v9  ;;  %1340 = vmatpush1.bf16.msra.mxu0 %v8323_v40  ;;  %v8330_v47 = vld [vmem:[%s12711_s1 + $0x234] ss:$8 sps:$4 sm:$0xff]   ;;  %v8335_v50 = vld [vmem:[%s12711_s1 + $0x230] ss:$8 sps:$4 sm:$0xff]   ;;  %v8336_v51 = vld [vmem:[%s12711_s1 + $0x244] ss:$8 sps:$4 sm:$0xff]  }
  0x82   : > { %1239 = vmatprep.subr.bf16.mxu1 %v8276_v10  ;;  %v632_v41 = vpack.c.bf16 %v601_v35, %v599_v37  ;;  %1341 = vmatprep.subr.bf16.mxu0 %v8324_v42  ;;  %v8296_v52 = vld [vmem:[%s12711_s1 + $0xa0] ss:$8 sps:$4 sm:$0xff]   ;;  %v8297_v53 = vld [vmem:[%s12711_s1 + $0xb4] ss:$8 sps:$4 sm:$0xff]   ;;  %v8299_v56 = vld [vmem:[%s12711_s1 + $0xb0] ss:$8 sps:$4 sm:$0xff]  }
  0x83   : > { %v8341_v54 = vld [vmem:[%s12711_s1 + $0x240] ss:$8 sps:$4 sm:$0xff]   ;;  %v8342_v55 = vld [vmem:[%s12711_s1 + $0x254] ss:$8 sps:$4 sm:$0xff]   ;;  %v8300_v57 = vld [vmem:[%s12711_s1 + $0xc4] ss:$8 sps:$4 sm:$0xff]  }
  0x84   : > { %1263 = vmatprep.mubr.bf16.mxu1 %v632_v41  ;;  %v8347_v58 = vld [vmem:[%s12711_s1 + $0x250] ss:$8 sps:$4 sm:$0xff]   ;;  %v8348_v59 = vld [vmem:[%s12711_s1 + $0x264] ss:$8 sps:$4 sm:$0xff]   ;;  %v8302_v60 = vld [vmem:[%s12711_s1 + $0xc0] ss:$8 sps:$4 sm:$0xff]  }
  0x85   : > { %1240 = vmatpush1.bf16.msra.mxu1 %v8278_v12  ;;  %1342 = vmatpush1.bf16.msra.mxu0 %v8329_v46  ;;  %v8303_v61 = vld [vmem:[%s12711_s1 + $0xd4] ss:$8 sps:$4 sm:$0xff]   ;;  %v8353_v0 = vld [vmem:[%s12711_s1 + $0x260] ss:$8 sps:$4 sm:$0xff]   ;;  %v8305_v3 = vld [vmem:[%s12711_s1 + $0xd0] ss:$8 sps:$4 sm:$0xff]  }
  0x86   : > { %1241 = vmatprep.subr.bf16.mxu1 %v8279_v13  ;;  %1343 = vmatprep.subr.bf16.mxu0 %v8330_v47  ;;  %v9708_v63 = vld [vmem:[%s9577_s18 + $0x30] sm:$0xff]  ;;  %v583_v6 = vrot.slane %v9640_v39, 7  ;;  %v8306_v9 = vld [vmem:[%s12711_s1 + $0xe4] ss:$8 sps:$4 sm:$0xff]   ;;  %v534_v12 = vand.u32 3, %v9714_v1  ;;  %vm569_vm6 = vcmp.ne.s32.totalorder %v513_v15, 3 }
  0x87   : > { %v8354_v2 = vld [vmem:[%s12711_s1 + $0x274] ss:$8 sps:$4 sm:$0xff]   ;;  %v587_v7 = vrot.slane %v9708_v63, 7  ;;  %v8359_v10 = vld [vmem:[%s12711_s1 + $0x270] ss:$8 sps:$4 sm:$0xff]   ;;  %vm570_vm7 = vcmp.ne.s32.totalorder %v520_v14, 3 }
  0x88   : > { %v8360_v13 = vld [vmem:[%s12711_s1 + $0x284] ss:$8 sps:$4 sm:$0xff]   ;;  %v594_v19 = vsel %vm589_vm2, %v581_v5, %v583_v6  ;;  %v8365_v31 = vld [vmem:[%s12711_s1 + $0x280] ss:$8 sps:$4 sm:$0xff]   ;;  %vm560_vm5 = vcmp.ne.s32.totalorder %v534_v12, 0  ;;  %v9776_v35 = vsel %vm9742_vm4, 1.0, %v12727_v23 }
  0x89   : > { %1242 = vmatpush1.bf16.msra.mxu1 %v8281_v16  ;;  %1344 = vmatpush1.bf16.msra.mxu0 %v8335_v50  ;;  %v8308_v16 = vld [vmem:[%s12711_s1 + $0xe0] ss:$8 sps:$4 sm:$0xff]   ;;  %v596_v25 = vsel %vm589_vm2, %v587_v7, %v581_v5  ;;  %v8366_v32 = vld [vmem:[%s12711_s1 + $0x294] ss:$8 sps:$4 sm:$0xff]   ;;  %v600_v34 = vmul.f32 %v9603_v24, %v594_v19  ;;  %v8311_v15 = vld [vmem:[%s12711_s1 + $0xf0] ss:$8 sps:$4 sm:$0xff]  }
  0x8a   : > { %1243 = vmatprep.subr.bf16.mxu1 %v8282_v17  ;;  %1345 = vmatprep.subr.bf16.mxu0 %v8336_v51  ;;  %v9782_v36 = vsel %vm560_vm5, 1.0, %v12727_v23  ;;  %v9785_v14 = vsel %vm569_vm6, 1.0, %v12727_v23  ;;  %v8316_v40 = vld [vmem:[%s12711_s1 + $0x104] ss:$8 sps:$4 sm:$0xff]   ;;  %v8371_v41 = vld [vmem:[%s12711_s1 + $0x290] ss:$8 sps:$4 sm:$0xff]  }
  0x8b   : > { %v9798_v42 = vld [vmem:[%s9577_s18 + $0x28] sm:$0xff]  ;;  %v9811_v50 = vld [vmem:[%s9577_s18 + $0x20] sm:$0xff]  ;;  %v8334_v19 = vld [vmem:[%s12711_s1 + $0x134] ss:$8 sps:$4 sm:$0xff]   ;;  %vm571_vm8 = vcmp.ne.s32.totalorder %v527_v4, 3  ;;  %vm572_vm9 = vcmp.ne.s32.totalorder %v534_v12, 3 }
  0x8c   : > { %v586_v46 = vrot.slane %v9798_v42, 7  ;;  %v611_v47 = vrot.slane %v9798_v42, 1  ;;  %v9920_v1 = vsel %vm571_vm8, 1.0, %v12727_v23  ;;  %v9923_v12 = vsel %vm572_vm9, 1.0, %v12727_v23  ;;  %p491_p11 = scmp.lt.s32.totalorder %s9399_s26, 1 }
  0x8d   : > { %1244 = vmatpush1.bf16.msra.mxu1 %v8284_v18  ;;  %1346 = vmatpush1.bf16.msra.mxu0 %v8341_v54  ;;  %v8309_v18 = vld [vmem:[%s12711_s1 + $0xf4] ss:$8 sps:$4 sm:$0xff]   ;;  %vm4309_vm10 = vcmask 1041408   ;;  %vm4858_vm11 = vcmask 1041409   ;;  %vm4860_vm12 = vcmask 1042434   ;;  %vm4862_vm13 = vcmask 1043459  }
  0x8e   : > { %1245 = vmatprep.subr.bf16.mxu1 %v8285_v27  ;;  %1347 = vmatprep.subr.bf16.mxu0 %v8342_v55  ;;  %v607_v27 = vrot.slane %v9593_v20, 1  ;;  %v593_v54 = vsel %vm589_vm2, %v584_v26, %v586_v46  ;;  %v585_v55 = vrot.slane %v9811_v50, 7  ;;  %vm4864_vm14 = vcmask 1044484   ;;  %s12805_s26 = smov (!%p491_p11, %s9399_s26), 1 }
  0x8f   : > { %vm4866_vm0 = vcmask 1045509   ;;  %vm4868_vm4 = vcmask 1046534   ;;  %vm4870_vm5 = vcmask 1047559   ;;  %s7331_s30 = sshll.u32 %s12805_s26, 3 }
  0x90   : > { %s494_s17 = scalar_lea.vmem %s12723_s13, %s7331_s30 }
  0x91   : > { %1246 = vmatpush1.bf16.msra.mxu1 %v8287_v30  ;;  %1348 = vmatpush1.bf16.msra.mxu0 %v8347_v58  ;;  %v609_v30 = vrot.slane %v9596_v21, 1  ;;  %v603_v58 = vmul.f32 %v9776_v35, %v593_v54 }
  0x92   : > { %1247 = vmatprep.subr.bf16.mxu1 %v8288_v33  ;;  %1349 = vmatprep.subr.bf16.mxu0 %v8348_v59  ;;  %v598_v33 = vmul.f32 %v9611_v28, %v596_v25  ;;  %v634_v25 = vpack.c.bf16 %v9596_v21, %v9593_v20  ;;  %v8340_v21 = vld [vmem:[%s12711_s1 + $0x144] ss:$8 sps:$4 sm:$0xff]  }
  0x93   : > { %v620_v37 = vsel %vm614_vm3, %v607_v27, %v609_v30 }
  0x94   : > { %v624_v51 = vmul.f32 %v9785_v14, %v620_v37  ;;  %v610_v37 = vrot.slane %v9811_v50, 1 }
  0x95   : > { %1248 = vmatpush1.bf16.msra.mxu1 %v8290_v43  ;;  %1350 = vmatpush1.bf16.msra.mxu0 %v8353_v0  ;;  %v9801_v43 = vsel %vm570_vm7, 1.0, %v12727_v23  ;;  %v592_v0 = vsel %vm589_vm2, %v583_v6, %v585_v55  ;;  %v8383_v6 = vld [vmem:[%s12711_s1 + $0x2b0] ss:$8 sps:$4 sm:$0xff]  }
  0x96   : > { %1249 = vmatprep.subr.bf16.mxu1 %v8291_v45  ;;  %1351 = vmatprep.subr.bf16.mxu0 %v8354_v2  ;;  %v8372_v45 = vld [vmem:[%s12711_s1 + $0x2a4] ss:$8 sps:$4 sm:$0xff]   ;;  %v639_v2 = vpack.c.bf16 %v9708_v63, %v9811_v50  ;;  %v602_v5 = vmul.f32 %v9776_v35, %v592_v0  ;;  %v8431_v50 = vld [vmem:[%s12713_s3 + $0x74] ss:$8 sps:$4 sm:$0xff]  }
  0x99   : > { %1250 = vmatpush1.bf16.msra.mxu1 %v8293_v48  ;;  %1352 = vmatpush1.bf16.msra.mxu0 %v8359_v10  ;;  %v640_v48 = vpack.c.bf16 %v9600_v22, %v9798_v42  ;;  %v8428_v42 = vld [vmem:[%s12713_s3 + $0x64] ss:$8 sps:$4 sm:$0xff]  }
  0x9a   : > { %1251 = vmatprep.subr.bf16.mxu1 %v8294_v49  ;;  %1353 = vmatprep.subr.bf16.mxu0 %v8360_v13  ;;  %v631_v49 = vpack.c.bf16 %v600_v34, %v598_v33  ;;  %v8328_v13 = vld [vmem:[%s12711_s1 + $0x124] ss:$8 sps:$4 sm:$0xff]   ;;  %v606_v33 = vrot.slane %v9637_v38, 1  ;;  %v8395_v34 = vld [vmem:[%s12711_s1 + $0x2d0] ss:$8 sps:$4 sm:$0xff]  }
  0x9b   : > { %v8417_v38 = vld [vmem:[%s12713_s3 + $0x30] ss:$8 sps:$4 sm:$0xff]  }
  0x9d   : > { %1252 = vmatpush1.bf16.msra.mxu1 %v8296_v52  ;;  %1354 = vmatpush1.bf16.msra.mxu0 %v8365_v31  ;;  %v8314_v52 = vld [vmem:[%s12711_s1 + $0x100] ss:$8 sps:$4 sm:$0xff]   ;;  %v8390_v31 = vld [vmem:[%s12711_s1 + $0x2d4] ss:$8 sps:$4 sm:$0xff]  }
  0x9e   : > { %1253 = vmatprep.subr.bf16.mxu1 %v8297_v53  ;;  %1355 = vmatprep.subr.bf16.mxu0 %v8366_v32  ;;  %v591_v53 = vsel %vm589_vm2, %v586_v46, %v588_v29  ;;  %v8377_v29 = vld [vmem:[%s12711_s1 + $0x2a0] ss:$8 sps:$4 sm:$0xff]   ;;  %v8332_v32 = vld [vmem:[%s12711_s1 + $0x130] ss:$8 sps:$4 sm:$0xff]   ;;  %v8346_v46 = vld [vmem:[%s12711_s1 + $0x154] ss:$8 sps:$4 sm:$0xff]  }
  0x9f   : > { %v605_v26 = vmul.f32 %v9782_v36, %v591_v53 }
  0xa1   : > { %1254 = vmatpush1.bf16.msra.mxu1 %v8299_v56  ;;  %v618_v56 = vsel %vm614_vm3, %v609_v30, %v611_v47  ;;  %1356 = vmatpush1.bf16.msra.mxu0 %v8371_v41  ;;  %v8389_v30 = vld [vmem:[%s12711_s1 + $0x2c0] ss:$8 sps:$4 sm:$0xff]   ;;  %v8396_v41 = vld [vmem:[%s12711_s1 + $0x2e4] ss:$8 sps:$4 sm:$0xff]  }
  0xa2   : > { %1255 = vmatprep.subr.bf16.mxu1 %v8300_v57  ;;  %v8322_v57 = vld [vmem:[%s12711_s1 + $0x114] ss:$8 sps:$4 sm:$0xff]   ;;  %v626_v59 = vmul.f32 %v9801_v43, %v618_v56  ;;  %1357 = vmatprep.subr.bf16.mxu0 %v8372_v45  ;;  %v613_v45 = vrot.slane %v9600_v22, 1  ;;  %v8407_v56 = vld [vmem:[%s12711_s1 + $0x2f0] ss:$8 sps:$4 sm:$0xff]  }
  0xa3   : > { %v8422_v22 = vld [vmem:[%s12713_s3 + $0x44] ss:$8 sps:$4 sm:$0xff]  }
  0xa4   : > { %v636_v10 = vpack.c.bf16 %v626_v59, %v624_v51  ;;  %v8402_v51 = vld [vmem:[%s12711_s1 + $0x2f4] ss:$8 sps:$4 sm:$0xff]   ;;  %v616_v53 = vsel %vm614_vm3, %v611_v47, %v613_v45  ;;  %v622_v54 = vsel %vm614_vm3, %v613_v45, %v607_v27  ;;  %v612_v27 = vrot.slane %v9708_v63, 1  ;;  %v8423_v63 = vld [vmem:[%s12713_s3 + $0x50] ss:$8 sps:$4 sm:$0xff]  }
  0xa5   : > { %1256 = vmatpush1.bf16.msra.mxu1 %v8302_v60  ;;  %v8378_v60 = vld [vmem:[%s12711_s1 + $0x2b4] ss:$8 sps:$4 sm:$0xff]   ;;  %1358 = vmatpush1.bf16.msra.mxu0 %v8377_v29  ;;  %v628_v20 = vmul.f32 %v9920_v1, %v616_v53  ;;  %v630_v47 = vmul.f32 %v9923_v12, %v622_v54  ;;  %v8435_v53 = vld [vmem:[%s12713_s3 + $0x90] ss:$8 sps:$4 sm:$0xff]  }
  0xa6   : > { %1257 = vmatprep.subr.bf16.mxu1 %v8303_v61  ;;  %v590_v61 = vsel %vm589_vm2, %v585_v55, %v587_v7  ;;  %v8320_v7 = vld [vmem:[%s12711_s1 + $0x110] ss:$8 sps:$4 sm:$0xff]   ;;  %1359 = vmatprep.subr.bf16.mxu0 %v8378_v60  ;;  %v8352_v55 = vld [vmem:[%s12711_s1 + $0x164] ss:$8 sps:$4 sm:$0xff]   ;;  %v621_v0 = vsel %vm614_vm3, %v612_v27, %v606_v33  ;;  %v8413_v45 = vld [vmem:[%s12713_s3 + $0x14] ss:$8 sps:$4 sm:$0xff]  }
  0xa7   : > { %1369 = vmatprep.mubr.bf16.mxu0 %v636_v10  ;;  %v642_v60 = vpack.c.bf16 %v630_v47, %v628_v20  ;;  %v629_v10 = vmul.f32 %v9923_v12, %v621_v0  ;;  %v8437_v54 = vld [vmem:[%s12713_s3 + $0x94] ss:$8 sps:$4 sm:$0xff]   ;;  %v8446_v20 = vld [vmem:[%s12713_s3 + $0xc4] ss:$8 sps:$4 sm:$0xff]   ;;  %v8444_v47 = vld [vmem:[%s12713_s3 + $0xc0] ss:$8 sps:$4 sm:$0xff]  }
  0xa8   : > { %v8458_v0 = vld [vmem:[%s12713_s3 + $0x104] ss:$8 sps:$4 sm:$0xff]  }
  0xa9   : > { %1258 = vmatpush1.bf16.msra.mxu1 %v8305_v3  ;;  %v638_v3 = vpack.c.bf16 %v605_v26, %v603_v58  ;;  %1360 = vmatpush1.bf16.msra.mxu0 %v8383_v6  ;;  %v8350_v58 = vld [vmem:[%s12711_s1 + $0x160] ss:$8 sps:$4 sm:$0xff]   ;;  %v8358_v26 = vld [vmem:[%s12711_s1 + $0x174] ss:$8 sps:$4 sm:$0xff]  }
  0xaa   : > { %1259 = vmatprep.subr.bf16.mxu1 %v8306_v9  ;;  %v604_v9 = vmul.f32 %v9782_v36, %v590_v61  ;;  %v615_v61 = vsel %vm614_vm3, %v610_v37, %v612_v27  ;;  %v8449_v27 = vld [vmem:[%s12713_s3 + $0xd4] ss:$8 sps:$4 sm:$0xff]  }
  0xac   : > { %v637_v17 = vpack.c.bf16 %v604_v9, %v602_v5  ;;  %v8364_v5 = vld [vmem:[%s12711_s1 + $0x184] ss:$8 sps:$4 sm:$0xff]   ;;  %v627_v9 = vmul.f32 %v9920_v1, %v615_v61  ;;  %v8455_v61 = vld [vmem:[%s12713_s3 + $0xf4] ss:$8 sps:$4 sm:$0xff]  }
  0xad   : > { %1260 = vmatpush1.bf16.msra.mxu1 %v8308_v16  ;;  %v8384_v16 = vld [vmem:[%s12711_s1 + $0x2c4] ss:$8 sps:$4 sm:$0xff]  }
  0xae   : > { %1261 = vmatprep.subr.bf16.mxu1 %v8309_v18  ;;  %v8326_v18 = vld [vmem:[%s12711_s1 + $0x120] ss:$8 sps:$4 sm:$0xff]   ;;  %1361 = vmatprep.subr.bf16.mxu0 %v8384_v16  ;;  %v641_v6 = vpack.c.bf16 %v629_v10, %v627_v9  ;;  %v8368_v16 = vld [vmem:[%s12711_s1 + $0x190] ss:$8 sps:$4 sm:$0xff]  }
  0xaf   : > { %1362 = vmatpush1.bf16.msra.mxu0 %v8389_v30  ;;  %v8388_v30 = vld [vmem:[%s12711_s1 + $0x1c4] ss:$8 sps:$4 sm:$0xff]  }
  0xb0   : > { %1363 = vmatprep.subr.bf16.mxu0 %v8390_v31  ;;  %v8386_v31 = vld [vmem:[%s12711_s1 + $0x1c0] ss:$8 sps:$4 sm:$0xff]  }
  0xb1   : > { %1262 = vmatpush1.bf16.msra.mxu1 %v8311_v15  ;;  %v608_v15 = vrot.slane %v9640_v39, 1  ;;  %v8420_v39 = vld [vmem:[%s12713_s3 + $0x40] ss:$8 sps:$4 sm:$0xff]  }
  0xb2   : > { %1284 = vmatprep.subr.bf16.mxu1 %v8316_v40  ;;  %v8338_v40 = vld [vmem:[%s12711_s1 + $0x140] ss:$8 sps:$4 sm:$0xff]  }
  0xb3   : > { %1364 = vmatpush1.bf16.msra.mxu0 %v8395_v34  ;;  %v617_v62 = vsel %vm614_vm3, %v608_v15, %v610_v37  ;;  %v619_v4 = vsel %vm614_vm3, %v606_v33, %v608_v15  ;;  %v8400_v33 = vld [vmem:[%s12711_s1 + $0x1e4] ss:$8 sps:$4 sm:$0xff]   ;;  %v8398_v34 = vld [vmem:[%s12711_s1 + $0x1e0] ss:$8 sps:$4 sm:$0xff]   ;;  %v8406_v15 = vld [vmem:[%s12711_s1 + $0x1f4] ss:$8 sps:$4 sm:$0xff]  }
  0xb4   : > { %1264 = vmatmul.mubr.bf16.vlgmr.msra.gmra.mrb[0].mxu1 %v631_v49  ;;  %v8401_v49 = vld [vmem:[%s12711_s1 + $0x2e0] ss:$8 sps:$4 sm:$0xff]   ;;  %1365 = vmatprep.subr.bf16.mxu0 %v8396_v41  ;;  %v625_v29 = vmul.f32 %v9801_v43, %v617_v62  ;;  %v8404_v37 = vld [vmem:[%s12711_s1 + $0x1f0] ss:$8 sps:$4 sm:$0xff]   ;;  %v8419_v62 = vld [vmem:[%s12713_s3 + $0x34] ss:$8 sps:$4 sm:$0xff]  }
  0xb5   : > { %1285 = vmatpush1.bf16.msra.mxu1 %v8314_v52  ;;  %1273 = vmatprep.mubr.bf16.mxu1 %v638_v3  ;;  %v8344_v52 = vld [vmem:[%s12711_s1 + $0x150] ss:$8 sps:$4 sm:$0xff]   ;;  %v8408_v41 = vld [vmem:[%s12713_s3] ss:$8 sps:$4 sm:$0xff]  }
  0xb6   : > { %1286 = vmatprep.subr.bf16.mxu1 %v8322_v57  ;;  %v623_v57 = vmul.f32 %v9785_v14, %v619_v4  ;;  %v8356_v3 = vld [vmem:[%s12711_s1 + $0x170] ss:$8 sps:$4 sm:$0xff]   ;;  %v8434_v4 = vld [vmem:[%s12713_s3 + $0x84] ss:$8 sps:$4 sm:$0xff]  }
  0xb7   : > { %1366 = vmatpush1.bf16.msra.mxu0 %v8401_v49  ;;  %v8416_v49 = vld [vmem:[%s12713_s3 + $0x24] ss:$8 sps:$4 sm:$0xff]  }
  0xb8   : > { %1367 = vmatprep.subr.bf16.mxu0 %v8402_v51  ;;  %v635_v59 = vpack.c.bf16 %v625_v29, %v623_v57  ;;  %v8414_v51 = vld [vmem:[%s12713_s3 + $0x20] ss:$8 sps:$4 sm:$0xff]   ;;  %v8443_v57 = vld [vmem:[%s12713_s3 + $0xb4] ss:$8 sps:$4 sm:$0xff]   ;;  %v8441_v29 = vld [vmem:[%s12713_s3 + $0xb0] ss:$8 sps:$4 sm:$0xff]  }
  0xb9   : > { %1287 = vmatpush1.bf16.msra.mxu1 %v8320_v7  ;;  %v8362_v7 = vld [vmem:[%s12711_s1 + $0x180] ss:$8 sps:$4 sm:$0xff]  }
  0xba   : > { %1288 = vmatprep.subr.bf16.mxu1 %v8328_v13  ;;  %v8370_v13 = vld [vmem:[%s12711_s1 + $0x194] ss:$8 sps:$4 sm:$0xff]  }
  0xbb   : > { %1368 = vmatpush1.bf16.msra.mxu0 %v8407_v56  ;;  %v8438_v56 = vld [vmem:[%s12713_s3 + $0xa0] ss:$8 sps:$4 sm:$0xff]  }
  0xbc   : > { %1274 = vmatmul.mubr.bf16.gmra.mrb[4].mxu1 %v637_v17  ;;  %v8376_v17 = vld [vmem:[%s12711_s1 + $0x1a4] ss:$8 sps:$4 sm:$0xff]  }
  0xbd   : > { %1289 = vmatpush1.bf16.msra.mxu1 %v8326_v18  ;;  %1316 = vmatprep.mubr.bf16.mxu1 %v634_v25  ;;  %v8374_v18 = vld [vmem:[%s12711_s1 + $0x1a0] ss:$8 sps:$4 sm:$0xff]   ;;  %v8380_v25 = vld [vmem:[%s12711_s1 + $0x1b0] ss:$8 sps:$4 sm:$0xff]  }
  0xbe   : > { %1290 = vmatprep.subr.bf16.mxu1 %v8334_v19  ;;  %1370 = vmatmul.mubr.bf16.vlgmr.msra.gmra.mrb[0].mxu0 %v635_v59  ;;  %v8382_v19 = vld [vmem:[%s12711_s1 + $0x1b4] ss:$8 sps:$4 sm:$0xff]   ;;  %v8450_v59 = vld [vmem:[%s12713_s3 + $0xe0] ss:$8 sps:$4 sm:$0xff]  }
  0xbf   : > { %1379 = vmatprep.mubr.bf16.mxu0 %v642_v60  ;;  %v8453_v60 = vld [vmem:[%s12713_s3 + $0xf0] ss:$8 sps:$4 sm:$0xff]  }
  0xc1   : > { %1291 = vmatpush1.bf16.msra.mxu1 %v8332_v32  ;;  %v8394_v32 = vld [vmem:[%s12711_s1 + $0x1d4] ss:$8 sps:$4 sm:$0xff]  }
  0xc2   : > { %1292 = vmatprep.subr.bf16.mxu1 %v8340_v21  ;;  %v8392_v21 = vld [vmem:[%s12711_s1 + $0x1d0] ss:$8 sps:$4 sm:$0xff]  }
  0xc5   : > { %1293 = vmatpush1.bf16.msra.mxu1 %v8338_v40  ;;  %v8410_v40 = vld [vmem:[%s12713_s3 + $0x4] ss:$8 sps:$4 sm:$0xff]  }
  0xc6   : > { %1294 = vmatprep.subr.bf16.mxu1 %v8346_v46  ;;  %1380 = vmatmul.mubr.bf16.gmra.mrb[4].mxu0 %v641_v6  ;;  %v8411_v46 = vld [vmem:[%s12713_s3 + $0x10] ss:$8 sps:$4 sm:$0xff]  }
  0xc9   : > { %1295 = vmatpush1.bf16.msra.mxu1 %v8344_v52  ;;  %v8432_v52 = vld [vmem:[%s12713_s3 + $0x80] ss:$8 sps:$4 sm:$0xff]  }
  0xca   : > { %1296 = vmatprep.subr.bf16.mxu1 %v8352_v55  ;;  %v8440_v55 = vld [vmem:[%s12713_s3 + $0xa4] ss:$8 sps:$4 sm:$0xff]  }
  0xcd   : > { %1297 = vmatpush1.bf16.msra.mxu1 %v8350_v58  ;;  %v8447_v58 = vld [vmem:[%s12713_s3 + $0xd0] ss:$8 sps:$4 sm:$0xff]  }
  0xce   : > { %1298 = vmatprep.subr.bf16.mxu1 %v8358_v26  ;;  %v8452_v26 = vld [vmem:[%s12713_s3 + $0xe4] ss:$8 sps:$4 sm:$0xff]  }
  0xd1   : > { %1299 = vmatpush1.bf16.msra.mxu1 %v8356_v3 }
  0xd2   : > { %1300 = vmatprep.subr.bf16.mxu1 %v8364_v5 }
  0xd5   : > { %1301 = vmatpush1.bf16.msra.mxu1 %v8362_v7 }
  0xd6   : > { %1302 = vmatprep.subr.bf16.mxu1 %v8370_v13 }
  0xd9   : > { %1303 = vmatpush1.bf16.msra.mxu1 %v8368_v16 }
  0xda   : > { %1304 = vmatprep.subr.bf16.mxu1 %v8376_v17  ;;  %v10116_v17 = vsub.s32 0, %v9552_v8 }
  0xdc   : > { %12749 = vst [vmem:[#allocation13_spill] sm:$0xff] %v10116_v17 }
  0xdd   : > { %1305 = vmatpush1.bf16.msra.mxu1 %v8374_v18  ;;  %v739_v18 = vld [vmem:[#allocation2] sm:$0x3] }
  0xde   : > { %1306 = vmatprep.subr.bf16.mxu1 %v8382_v19  ;;  %v10119_v19 = vsub.s32 1, %v9552_v8 }
  0xe0   : > { %12750 = vst [vmem:[#allocation14_spill] sm:$0xff] %v10119_v19 }
  0xe1   : > { %1307 = vmatpush1.bf16.msra.mxu1 %v8380_v25  ;;  %v744_v25 = vrot.slane %v739_v18, %v10116_v17 }
  0xe2   : > { %1308 = vmatprep.subr.bf16.mxu1 %v8388_v30  ;;  %v748_v30 = vrot.slane %v739_v18, %v10119_v19 }
  0xe5   : > { %1309 = vmatpush1.bf16.msra.mxu1 %v8386_v31 }
  0xe6   : > { %1310 = vmatprep.subr.bf16.mxu1 %v8394_v32 }
  0xe9   : > { %1311 = vmatpush1.bf16.msra.mxu1 %v8392_v21 }
  0xea   : > { %1312 = vmatprep.subr.bf16.mxu1 %v8400_v33 }
  0xed   : > { %1313 = vmatpush1.bf16.msra.mxu1 %v8398_v34 }
  0xee   : > { %1314 = vmatprep.subr.bf16.mxu1 %v8406_v15 }
  0xf1   : > { %1315 = vmatpush1.bf16.msra.mxu1 %v8404_v37 }
  0xf2   : > { %2054 = vmatprep.subr.bf16.mxu1 %v8410_v40 }
  0xf4   : > { %1317 = vmatmul.mubr.bf16.vlgmr.msra.gmra.mrb[0].mxu1 %v633_v44  ;;  %v8425_v44 = vld [vmem:[%s12713_s3 + $0x54] ss:$8 sps:$4 sm:$0xff]  }
  0xf5   : > { %1326 = vmatprep.mubr.bf16.mxu1 %v640_v48  ;;  %2055 = vmatpush1.bf16.msra.mxu1 %v8408_v41  ;;  %v8426_v48 = vld [vmem:[%s12713_s3 + $0x60] ss:$8 sps:$4 sm:$0xff]  }
  0xf6   : > { %2056 = vmatprep.subr.bf16.mxu1 %v8413_v45 }
  0xf9   : > { %2057 = vmatpush1.bf16.msra.mxu1 %v8411_v46 }
  0xfa   : > { %2058 = vmatprep.subr.bf16.mxu1 %v8416_v49 }
  0xfc   : > { %1327 = vmatmul.mubr.bf16.gmra.mrb[4].mxu1 %v639_v2  ;;  %v8429_v2 = vld [vmem:[%s12713_s3 + $0x70] ss:$8 sps:$4 sm:$0xff]  }
  0xfd   : > { %2059 = vmatpush1.bf16.msra.mxu1 %v8414_v51 }
  0xfe   : > { %2060 = vmatprep.subr.bf16.mxu1 %v8419_v62 }
 0x101   : > { %2061 = vmatpush1.bf16.msra.mxu1 %v8417_v38 }
 0x102   : > { %2062 = vmatprep.subr.bf16.mxu1 %v8422_v22 }
 0x105   : > { %2063 = vmatpush1.bf16.msra.mxu1 %v8420_v39 }
 0x106   : > { %2064 = vmatprep.subr.bf16.mxu1 %v8425_v44 }
 0x109   : > { %2065 = vmatpush1.bf16.msra.mxu1 %v8423_v63 }
 0x10a   : > { %2066 = vmatprep.subr.bf16.mxu1 %v8428_v42 }
 0x10d   : > { %2067 = vmatpush1.bf16.msra.mxu1 %v8426_v48 }
 0x10e   : > { %2068 = vmatprep.subr.bf16.mxu1 %v8431_v50 }
 0x111   : > { %2069 = vmatpush1.bf16.msra.mxu1 %v8429_v2 }
 0x112   : > { %2070 = vmatprep.subr.bf16.mxu1 %v8434_v4 }
 0x115   : > { %2071 = vmatpush1.bf16.msra.mxu1 %v8432_v52 }
 0x116   : > { %2072 = vmatprep.subr.bf16.mxu1 %v8437_v54 }
 0x119   : > { %2073 = vmatpush1.bf16.msra.mxu1 %v8435_v53 }
 0x11a   : > { %2074 = vmatprep.subr.bf16.mxu1 %v8440_v55 }
 0x11d   : > { %2075 = vmatpush1.bf16.msra.mxu1 %v8438_v56 }
 0x11e   : > { %2076 = vmatprep.subr.bf16.mxu1 %v8443_v57 }
 0x121   : > { %2077 = vmatpush1.bf16.msra.mxu1 %v8441_v29 }
 0x122   : > { %2078 = vmatprep.subr.bf16.mxu1 %v8446_v20 }
 0x125   : > { %2079 = vmatpush1.bf16.msra.mxu1 %v8444_v47 }
 0x126   : > { %2080 = vmatprep.subr.bf16.mxu1 %v8449_v27 }
 0x129   : > { %2081 = vmatpush1.bf16.msra.mxu1 %v8447_v58 }
 0x12a   : > { %2082 = vmatprep.subr.bf16.mxu1 %v8452_v26 }
 0x12d   : > { %2083 = vmatpush1.bf16.msra.mxu1 %v8450_v59 }
 0x12e   : > { %2084 = vmatprep.subr.bf16.mxu1 %v8455_v61 }
 0x131   : > { %2085 = vmatpush1.bf16.msra.mxu1 %v8453_v60 }
 0x132   : > { %2107 = vmatprep.subr.bf16.mxu1 %v8458_v0 }
 0x191   : > { %v1371_v3 = vpop.f32.mrb[0].mxu0 }
 0x192   : > { %v1373_v5 = vpop.f32.mrb[1].mxu0 }
 0x193   : > { %v1375_v9 = vpop.f32.mrb[2].mxu0 }
 0x194   : > { %v1377_v10 = vpop.f32.mrb[3].mxu0 }
 0x199   : > { %v1381_v7 = vpop.f32.mrb[4].mxu0 }
 0x19a   : > { %v1383_v13 = vpop.f32.mrb[5].mxu0 }
 0x19b   : > { %v1385_v6 = vpop.f32.mrb[6].mxu0 }
 0x19c   : > { %v1387_v16 = vpop.f32.mrb[7].mxu0 }
 0x1c7   : > { %v1318_v31 = vpop.f32.mrb[0].mxu1 }
 0x1c8   : > { %v8092_v32 = vadd.f32 %v1318_v31, %v744_v25  ;;  %v1320_v21 = vpop.f32.mrb[1].mxu1 }
 0x1c9   : > { %v8094_v33 = vadd.f32 %v1320_v21, %v748_v30  ;;  %v1322_v34 = vpop.f32.mrb[2].mxu1 }
 0x1ca   : > { %v8093_v15 = vadd.f32 %v8092_v32, %v1371_v3  ;;  %v8096_v37 = vadd.f32 %v1322_v34, %v744_v25  ;;  %v1324_v40 = vpop.f32.mrb[3].mxu1 }
 0x1cb   : > { %v8095_v41 = vadd.f32 %v8094_v33, %v1373_v5  ;;  %v8098_v45 = vadd.f32 %v1324_v40, %v748_v30 }
 0x1cc   : > { %v1390_v46 = vmul.f32 0.1, %v8093_v15  ;;  %v8097_v49 = vadd.f32 %v8096_v37, %v1375_v9 }
 0x1cd   : > { %v1391_v51 = vmul.f32 0.1, %v8095_v41  ;;  %v8099_v62 = vadd.f32 %v8098_v45, %v1377_v10 }
 0x1ce   : > { %v10123_v38 = vmax.f32 %v8093_v15, %v1390_v46  ;;  %v1392_v22 = vmul.f32 0.1, %v8097_v49 }
 0x1cf   : > { %v10125_v39 = vmax.f32 %v8095_v41, %v1391_v51  ;;  %v1393_v44 = vmul.f32 0.1, %v8099_v62  ;;  %v1328_v63 = vpop.f32.mrb[4].mxu1 }
 0x1d0   : > { %v1406_v42 = vrot.slane %v10123_v38, 7  ;;  %v10128_v48 = vmax.f32 %v8097_v49, %v1392_v22  ;;  %v8100_v50 = vadd.f32 %v1328_v63, %v744_v25  ;;  %v1330_v2 = vpop.f32.mrb[5].mxu1  ;;  %v1430_v4 = vrot.slane %v10123_v38, 1 }
 0x1d1   : > { %v1407_v52 = vrot.slane %v10125_v39, 7  ;;  %v10132_v53 = vmax.f32 %v8099_v62, %v1393_v44  ;;  %v8102_v54 = vadd.f32 %v1330_v2, %v748_v30  ;;  %v1332_v55 = vpop.f32.mrb[6].mxu1  ;;  %v1431_v5 = vrot.slane %v10125_v39, 1 }
 0x1d2   : > { %v1408_v56 = vrot.slane %v10128_v48, 7  ;;  %v1432_v57 = vrot.slane %v10128_v48, 1  ;;  %v1456_v29 = vpack.c.bf16 %v10128_v48, %v10123_v38  ;;  %v8101_v20 = vadd.f32 %v8100_v50, %v1381_v7  ;;  %v1334_v47 = vpop.f32.mrb[7].mxu1  ;;  %v8510_v38 = vld [vmem:[%s12713_s3 + $0x220] ss:$8 sps:$4 sm:$0xff]  }
 0x1d3   : > { %v1409_v27 = vrot.slane %v10132_v53, 7  ;;  %v1433_v58 = vrot.slane %v10132_v53, 1  ;;  %v8103_v26 = vadd.f32 %v8102_v54, %v1383_v13  ;;  %v8104_v59 = vadd.f32 %v1332_v55, %v744_v25  ;;  %v8515_v48 = vld [vmem:[%s12713_s3 + $0x234] ss:$8 sps:$4 sm:$0xff]  }
 0x1d4   : > { %v1418_v60 = vsel %vm589_vm2, %v1406_v42, %v1408_v56  ;;  %v1442_v61 = vsel %vm614_vm3, %v1430_v4, %v1432_v57  ;;  %v1394_v0 = vmul.f32 0.1, %v8101_v20  ;;  %v8106_v3 = vadd.f32 %v1334_v47, %v748_v30 }
 0x1d5   : > { %v1395_v9 = vmul.f32 0.1, %v8103_v26  ;;  %v8105_v10 = vadd.f32 %v8104_v59, %v1385_v6  ;;  %v1419_v7 = vsel %vm589_vm2, %v1407_v52, %v1409_v27  ;;  %v1457_v25 = vpack.c.bf16 %v10132_v53, %v10125_v39  ;;  %v8558_v39 = vld [vmem:[%s12715_s5 + $0x20] ss:$16 sps:$4 sm:$0xff]   ;;  %v8566_v53 = vld [vmem:[%s12715_s5 + $0x44] ss:$16 sps:$4 sm:$0xff]  }
 0x1d6   : > { %v10149_v18 = vmax.f32 %v8101_v20, %v1394_v0  ;;  %v8107_v13 = vadd.f32 %v8106_v3, %v1387_v16  ;;  %v1424_v21 = vmul.f32 %v9603_v24, %v1418_v60  ;;  %v1443_v30 = vsel %vm614_vm3, %v1431_v5, %v1433_v58 }
 0x1d7   : > { %v10153_v31 = vmax.f32 %v8103_v26, %v1395_v9  ;;  %v1396_v32 = vmul.f32 0.1, %v8105_v10  ;;  %v1425_v15 = vmul.f32 %v9603_v24, %v1419_v7  ;;  %v10166_v41 = vmul.f32 %v9785_v14, %v1442_v61 }
 0x1d8   : > { %v1410_v33 = vrot.slane %v10149_v18, 7  ;;  %v1434_v6 = vrot.slane %v10149_v18, 1  ;;  %v1397_v34 = vmul.f32 0.1, %v8107_v13  ;;  %v10175_v51 = vmul.f32 %v9785_v14, %v1443_v30 }
 0x1d9   : > { %v1411_v16 = vrot.slane %v10153_v31, 7  ;;  %v1435_v37 = vrot.slane %v10153_v31, 1  ;;  %v10163_v40 = vmax.f32 %v8105_v10, %v1396_v32 }
 0x1da   : > { %v1440_v45 = vsel %vm614_vm3, %v1432_v57, %v1434_v6  ;;  %v10170_v46 = vmax.f32 %v8107_v13, %v1397_v34  ;;  %v1416_v49 = vsel %vm589_vm2, %v1408_v56, %v1410_v33  ;;  %v8456_v13 = vld [vmem:[%s12713_s3 + $0x100] ss:$8 sps:$4 sm:$0xff]  }
 0x1db   : > { %v1412_v62 = vrot.slane %v10163_v40, 7  ;;  %v1436_v22 = vrot.slane %v10163_v40, 1  ;;  %v1417_v44 = vsel %vm589_vm2, %v1409_v27, %v1411_v16  ;;  %v1426_v63 = vmul.f32 %v9776_v35, %v1416_v49 }
 0x1dc   : > { %v1413_v50 = vrot.slane %v10170_v46, 7  ;;  %v1437_v2 = vrot.slane %v10170_v46, 1  ;;  %v1427_v54 = vmul.f32 %v9776_v35, %v1417_v44  ;;  %v1463_v55 = vpack.c.bf16 %v10170_v46, %v10153_v31  ;;  %v8467_v44 = vld [vmem:[%s12713_s3 + $0x134] ss:$8 sps:$4 sm:$0xff]   ;;  %v8518_v31 = vld [vmem:[%s12713_s3 + $0x244] ss:$8 sps:$4 sm:$0xff]  }
 0x1dd   : > { %v1420_v56 = vsel %vm589_vm2, %v1412_v62, %v1406_v42  ;;  %v1414_v57 = vsel %vm589_vm2, %v1410_v33, %v1412_v62  ;;  %v1462_v20 = vpack.c.bf16 %v10163_v40, %v10149_v18  ;;  %v1441_v47 = vsel %vm614_vm3, %v1433_v58, %v1435_v37  ;;  %v8464_v62 = vld [vmem:[%s12713_s3 + $0x124] ss:$8 sps:$4 sm:$0xff]   ;;  %v8516_v18 = vld [vmem:[%s12713_s3 + $0x240] ss:$8 sps:$4 sm:$0xff]   ;;  %v8521_v40 = vld [vmem:[%s12713_s3 + $0x254] ss:$8 sps:$4 sm:$0xff]  }
 0x1de   : > { %v1421_v27 = vsel %vm589_vm2, %v1413_v50, %v1407_v52  ;;  %v1422_v26 = vmul.f32 %v9611_v28, %v1420_v56  ;;  %v1415_v59 = vsel %vm589_vm2, %v1411_v16, %v1413_v50  ;;  %v1428_v60 = vmul.f32 %v9782_v36, %v1414_v57  ;;  %v8554_v50 = vld [vmem:[%s12715_s5 + $0x4] ss:$16 sps:$4 sm:$0xff]   ;;  %v8519_v46 = vld [vmem:[%s12713_s3 + $0x250] ss:$8 sps:$4 sm:$0xff]  }
 0x1df   : > { %v1423_v42 = vmul.f32 %v9611_v28, %v1421_v27  ;;  %v1429_v61 = vmul.f32 %v9782_v36, %v1415_v59  ;;  %v10204_v0 = vmul.f32 %v9801_v43, %v1441_v47  ;;  %v10207_v3 = vmul.f32 %v9801_v43, %v1440_v45  ;;  %v8470_v56 = vld [vmem:[%s12713_s3 + $0x144] ss:$8 sps:$4 sm:$0xff]   ;;  %3463 = vmatprep.subr.bf16.mxu0 %v8554_v50  ;;  %v8473_v57 = vld [vmem:[%s12713_s3 + $0x154] ss:$8 sps:$4 sm:$0xff]   ;;  %v8564_v47 = vld [vmem:[%s12715_s5 + $0x40] ss:$16 sps:$4 sm:$0xff]  }
 0x1e0   : > { %v1454_v58 = vpack.c.bf16 %v1424_v21, %v1422_v26  ;;  %v1460_v9 = vpack.c.bf16 %v1428_v60, %v1426_v63  ;;  %v1439_v52 = vsel %vm614_vm3, %v1435_v37, %v1437_v2  ;;  %v1445_v10 = vsel %vm614_vm3, %v1437_v2, %v1431_v5  ;;  %v8461_v21 = vld [vmem:[%s12713_s3 + $0x114] ss:$8 sps:$4 sm:$0xff]   ;;  %v8552_v63 = vld [vmem:[%s12715_s5] ss:$16 sps:$4 sm:$0xff]   ;;  %v8476_v59 = vld [vmem:[%s12713_s3 + $0x164] ss:$8 sps:$4 sm:$0xff]  }
 0x1e1   : > { %v1455_v7 = vpack.c.bf16 %v1425_v15, %v1423_v42  ;;  %v1461_v32 = vpack.c.bf16 %v1429_v61, %v1427_v54  ;;  %v1459_v30 = vpack.c.bf16 %v10204_v0, %v10175_v51  ;;  %v1458_v33 = vpack.c.bf16 %v10207_v3, %v10166_v41  ;;  %v8465_v2 = vld [vmem:[%s12713_s3 + $0x130] ss:$8 sps:$4 sm:$0xff]   ;;  %v8560_v54 = vld [vmem:[%s12715_s5 + $0x24] ss:$16 sps:$4 sm:$0xff]   ;;  %3464 = vmatpush1.bf16.msra.mxu0 %v8552_v63  ;;  %v8474_v61 = vld [vmem:[%s12713_s3 + $0x160] ss:$8 sps:$4 sm:$0xff]  }
 0x1e2   : > { %v10224_v34 = vmul.f32 %v9920_v1, %v1439_v52  ;;  %v10227_v5 = vmul.f32 %v9923_v12, %v1445_v10  ;;  %v1438_v15 = vsel %vm614_vm3, %v1434_v6, %v1436_v22  ;;  %v1444_v16 = vsel %vm614_vm3, %v1436_v22, %v1430_v4  ;;  %v8459_v6 = vld [vmem:[%s12713_s3 + $0x110] ss:$8 sps:$4 sm:$0xff]   ;;  %v8462_v22 = vld [vmem:[%s12713_s3 + $0x120] ss:$8 sps:$4 sm:$0xff]   ;;  %3465 = vmatprep.subr.bf16.mxu0 %v8560_v54  ;;  %v8572_v27 = vld [vmem:[%s12715_s5 + $0x64] ss:$16 sps:$4 sm:$0xff]  }
 0x1e3   : > { %2086 = vmatprep.mubr.bf16.mxu1 %v1455_v7  ;;  %v10236_v37 = vmul.f32 %v9920_v1, %v1438_v15  ;;  %v10239_v45 = vmul.f32 %v9923_v12, %v1444_v16  ;;  %v8471_v26 = vld [vmem:[%s12713_s3 + $0x150] ss:$8 sps:$4 sm:$0xff]   ;;  %v8578_v42 = vld [vmem:[%s12715_s5 + $0x84] ss:$16 sps:$4 sm:$0xff]   ;;  %v8486_v50 = vld [vmem:[%s12713_s3 + $0x1a0] ss:$8 sps:$4 sm:$0xff]  }
 0x1e4   : > { %2087 = vmatmul.mubr.bf16.vlgmr.msra.gmra.mrb[8].mxu1 %v1454_v58  ;;  %v1465_v49 = vpack.c.bf16 %v10227_v5, %v10224_v34  ;;  %v8570_v60 = vld [vmem:[%s12715_s5 + $0x60] ss:$16 sps:$4 sm:$0xff]   ;;  %v8479_v58 = vld [vmem:[%s12713_s3 + $0x174] ss:$8 sps:$4 sm:$0xff]   ;;  %v8482_v7 = vld [vmem:[%s12713_s3 + $0x184] ss:$8 sps:$4 sm:$0xff]  }
 0x1e5   : > { %2108 = vmatpush1.bf16.msra.mxu1 %v8456_v13  ;;  %2096 = vmatprep.mubr.bf16.mxu1 %v1461_v32  ;;  %v1464_v4 = vpack.c.bf16 %v10239_v45, %v10236_v37  ;;  %v8584_v52 = vld [vmem:[%s12715_s5 + $0xa4] ss:$16 sps:$4 sm:$0xff]   ;;  %v8477_v10 = vld [vmem:[%s12713_s3 + $0x170] ss:$8 sps:$4 sm:$0xff]   ;;  %v8575_v3 = vld [vmem:[%s12715_s5 + $0x6c] ss:$16 sps:$4 sm:$0xff]  }
 0x1e6   : > { %2109 = vmatprep.subr.bf16.mxu1 %v8461_v21  ;;  %3466 = vmatpush1.bf16.msra.mxu0 %v8558_v39  ;;  %v8582_v13 = vld [vmem:[%s12715_s5 + $0xa0] ss:$16 sps:$4 sm:$0xff]   ;;  %v8590_v32 = vld [vmem:[%s12715_s5 + $0xc4] ss:$16 sps:$4 sm:$0xff]   ;;  %v8567_v41 = vld [vmem:[%s12715_s5 + $0x48] ss:$16 sps:$4 sm:$0xff]  }
 0x1e7   : > { %3467 = vmatprep.subr.bf16.mxu0 %v8566_v53  ;;  %v8480_v21 = vld [vmem:[%s12713_s3 + $0x180] ss:$8 sps:$4 sm:$0xff]   ;;  %v8485_v15 = vld [vmem:[%s12713_s3 + $0x194] ss:$8 sps:$4 sm:$0xff]   ;;  %v8489_v39 = vld [vmem:[%s12713_s3 + $0x1b0] ss:$8 sps:$4 sm:$0xff]  }
 0x1e8   : > { %v8588_v16 = vld [vmem:[%s12715_s5 + $0xc0] ss:$16 sps:$4 sm:$0xff]   ;;  %v8602_v63 = vld [vmem:[%s12715_s5 + $0x104] ss:$16 sps:$4 sm:$0xff]   ;;  %v8581_v34 = vld [vmem:[%s12715_s5 + $0x8c] ss:$16 sps:$4 sm:$0xff]  }
 0x1e9   : > { %2110 = vmatpush1.bf16.msra.mxu1 %v8459_v6  ;;  %v8596_v6 = vld [vmem:[%s12715_s5 + $0xe4] ss:$16 sps:$4 sm:$0xff]   ;;  %v8600_v54 = vld [vmem:[%s12715_s5 + $0x100] ss:$16 sps:$4 sm:$0xff]   ;;  %v8579_v5 = vld [vmem:[%s12715_s5 + $0x88] ss:$16 sps:$4 sm:$0xff]  }
 0x1ea   : > { %2111 = vmatprep.subr.bf16.mxu1 %v8464_v62  ;;  %3468 = vmatpush1.bf16.msra.mxu0 %v8564_v47  ;;  %v8483_v62 = vld [vmem:[%s12713_s3 + $0x190] ss:$8 sps:$4 sm:$0xff]   ;;  %v8494_v53 = vld [vmem:[%s12713_s3 + $0x1c4] ss:$8 sps:$4 sm:$0xff]   ;;  %v8497_v47 = vld [vmem:[%s12713_s3 + $0x1d4] ss:$8 sps:$4 sm:$0xff]  }
 0x1eb   : > { %3469 = vmatprep.subr.bf16.mxu0 %v8572_v27  ;;  %v8495_v27 = vld [vmem:[%s12713_s3 + $0x1d0] ss:$8 sps:$4 sm:$0xff]   ;;  %v8524_v51 = vld [vmem:[%s12713_s3 + $0x264] ss:$8 sps:$4 sm:$0xff]  }
 0x1ec   : > { %2097 = vmatmul.mubr.bf16.gmra.mrb[12].mxu1 %v1460_v9  ;;  %v8576_v9 = vld [vmem:[%s12715_s5 + $0x80] ss:$16 sps:$4 sm:$0xff]   ;;  %v8587_v37 = vld [vmem:[%s12715_s5 + $0xac] ss:$16 sps:$4 sm:$0xff]   ;;  %v8585_v45 = vld [vmem:[%s12715_s5 + $0xa8] ss:$16 sps:$4 sm:$0xff]  }
 0x1ed   : > { %2112 = vmatpush1.bf16.msra.mxu1 %v8462_v22  ;;  %2139 = vmatprep.mubr.bf16.mxu1 %v1457_v25  ;;  %v8468_v25 = vld [vmem:[%s12713_s3 + $0x140] ss:$8 sps:$4 sm:$0xff]   ;;  %v8488_v22 = vld [vmem:[%s12713_s3 + $0x1a4] ss:$8 sps:$4 sm:$0xff]   ;;  %v8525_v0 = vld [vmem:[%s12713_s3 + $0x270] ss:$8 sps:$4 sm:$0xff]  }
 0x1ee   : > { %2113 = vmatprep.subr.bf16.mxu1 %v8467_v44  ;;  %3470 = vmatpush1.bf16.msra.mxu0 %v8570_v60  ;;  %v8594_v44 = vld [vmem:[%s12715_s5 + $0xe0] ss:$16 sps:$4 sm:$0xff]   ;;  %v8503_v60 = vld [vmem:[%s12713_s3 + $0x1f4] ss:$8 sps:$4 sm:$0xff]  }
 0x1ef   : > { %3471 = vmatprep.subr.bf16.mxu0 %v8578_v42  ;;  %v8501_v42 = vld [vmem:[%s12713_s3 + $0x1f0] ss:$8 sps:$4 sm:$0xff]  }
 0x1f1   : > { %2114 = vmatpush1.bf16.msra.mxu1 %v8465_v2  ;;  %v8491_v2 = vld [vmem:[%s12713_s3 + $0x1b4] ss:$8 sps:$4 sm:$0xff]  }
 0x1f2   : > { %2115 = vmatprep.subr.bf16.mxu1 %v8470_v56  ;;  %3472 = vmatpush1.bf16.msra.mxu0 %v8576_v9  ;;  %v8608_v56 = vld [vmem:[%s12715_s5 + $0x124] ss:$16 sps:$4 sm:$0xff]  }
 0x1f3   : > { %3473 = vmatprep.subr.bf16.mxu0 %v8584_v52  ;;  %v8509_v9 = vld [vmem:[%s12713_s3 + $0x214] ss:$8 sps:$4 sm:$0xff]   ;;  %v8507_v52 = vld [vmem:[%s12713_s3 + $0x210] ss:$8 sps:$4 sm:$0xff]  }
 0x1f5   : > { %2116 = vmatpush1.bf16.msra.mxu1 %v8468_v25  ;;  %v8606_v25 = vld [vmem:[%s12715_s5 + $0x120] ss:$16 sps:$4 sm:$0xff]  }
 0x1f6   : > { %2117 = vmatprep.subr.bf16.mxu1 %v8473_v57  ;;  %3474 = vmatpush1.bf16.msra.mxu0 %v8582_v13  ;;  %v8492_v57 = vld [vmem:[%s12713_s3 + $0x1c0] ss:$8 sps:$4 sm:$0xff]   ;;  %v8533_v13 = vld [vmem:[%s12713_s3 + $0x294] ss:$8 sps:$4 sm:$0xff]  }
 0x1f7   : > { %3475 = vmatprep.subr.bf16.mxu0 %v8590_v32  ;;  %v8531_v32 = vld [vmem:[%s12713_s3 + $0x290] ss:$8 sps:$4 sm:$0xff]  }
 0x1f9   : > { %2118 = vmatpush1.bf16.msra.mxu1 %v8471_v26  ;;  %v8500_v26 = vld [vmem:[%s12713_s3 + $0x1e4] ss:$8 sps:$4 sm:$0xff]  }
 0x1fa   : > { %2119 = vmatprep.subr.bf16.mxu1 %v8476_v59  ;;  %3476 = vmatpush1.bf16.msra.mxu0 %v8588_v16  ;;  %v8498_v59 = vld [vmem:[%s12713_s3 + $0x1e0] ss:$8 sps:$4 sm:$0xff]   ;;  %v8539_v16 = vld [vmem:[%s12713_s3 + $0x2b4] ss:$8 sps:$4 sm:$0xff]  }
 0x1fb   : > { %3477 = vmatprep.subr.bf16.mxu0 %v8596_v6  ;;  %v8537_v6 = vld [vmem:[%s12713_s3 + $0x2b0] ss:$8 sps:$4 sm:$0xff]  }
 0x1fd   : > { %2120 = vmatpush1.bf16.msra.mxu1 %v8474_v61  ;;  %v8506_v61 = vld [vmem:[%s12713_s3 + $0x204] ss:$8 sps:$4 sm:$0xff]  }
 0x1fe   : > { %2121 = vmatprep.subr.bf16.mxu1 %v8479_v58  ;;  %3478 = vmatpush1.bf16.msra.mxu0 %v8594_v44  ;;  %v8504_v58 = vld [vmem:[%s12713_s3 + $0x200] ss:$8 sps:$4 sm:$0xff]   ;;  %v8545_v44 = vld [vmem:[%s12713_s3 + $0x2d4] ss:$8 sps:$4 sm:$0xff]  }
 0x1ff   : > { %3479 = vmatprep.subr.bf16.mxu0 %v8602_v63  ;;  %v8543_v63 = vld [vmem:[%s12713_s3 + $0x2d0] ss:$8 sps:$4 sm:$0xff]  }
 0x201   : > { %2122 = vmatpush1.bf16.msra.mxu1 %v8477_v10  ;;  %v8512_v10 = vld [vmem:[%s12713_s3 + $0x224] ss:$8 sps:$4 sm:$0xff]  }
 0x202   : > { %2123 = vmatprep.subr.bf16.mxu1 %v8482_v7  ;;  %3480 = vmatpush1.bf16.msra.mxu0 %v8600_v54  ;;  %v8528_v7 = vld [vmem:[%s12713_s3 + $0x280] ss:$8 sps:$4 sm:$0xff]   ;;  %v8551_v54 = vld [vmem:[%s12713_s3 + $0x2f4] ss:$8 sps:$4 sm:$0xff]  }
 0x203   : > { %3481 = vmatprep.subr.bf16.mxu0 %v8608_v56  ;;  %v8549_v56 = vld [vmem:[%s12713_s3 + $0x2f0] ss:$8 sps:$4 sm:$0xff]  }
 0x205   : > { %2124 = vmatpush1.bf16.msra.mxu1 %v8480_v21  ;;  %v8536_v21 = vld [vmem:[%s12713_s3 + $0x2a4] ss:$8 sps:$4 sm:$0xff]  }
 0x206   : > { %2125 = vmatprep.subr.bf16.mxu1 %v8485_v15  ;;  %3482 = vmatpush1.bf16.msra.mxu0 %v8606_v25  ;;  %v8534_v15 = vld [vmem:[%s12713_s3 + $0x2a0] ss:$8 sps:$4 sm:$0xff]   ;;  %v8563_v25 = vld [vmem:[%s12715_s5 + $0x2c] ss:$16 sps:$4 sm:$0xff]  }
 0x209   : > { %2126 = vmatpush1.bf16.msra.mxu1 %v8483_v62  ;;  %v8542_v62 = vld [vmem:[%s12713_s3 + $0x2c4] ss:$8 sps:$4 sm:$0xff]  }
 0x20a   : > { %2127 = vmatprep.subr.bf16.mxu1 %v8488_v22  ;;  %v8540_v22 = vld [vmem:[%s12713_s3 + $0x2c0] ss:$8 sps:$4 sm:$0xff]  }
 0x20d   : > { %2128 = vmatpush1.bf16.msra.mxu1 %v8486_v50  ;;  %v8548_v50 = vld [vmem:[%s12713_s3 + $0x2e4] ss:$8 sps:$4 sm:$0xff]  }
 0x20e   : > { %2129 = vmatprep.subr.bf16.mxu1 %v8491_v2  ;;  %v8546_v2 = vld [vmem:[%s12713_s3 + $0x2e0] ss:$8 sps:$4 sm:$0xff]  }
 0x211   : > { %2130 = vmatpush1.bf16.msra.mxu1 %v8489_v39  ;;  %v8557_v39 = vld [vmem:[%s12715_s5 + $0xc] ss:$16 sps:$4 sm:$0xff]  }
 0x212   : > { %2131 = vmatprep.subr.bf16.mxu1 %v8494_v53  ;;  %v8555_v53 = vld [vmem:[%s12715_s5 + $0x8] ss:$16 sps:$4 sm:$0xff]  }
 0x215   : > { %2132 = vmatpush1.bf16.msra.mxu1 %v8492_v57  ;;  %v8561_v57 = vld [vmem:[%s12715_s5 + $0x28] ss:$16 sps:$4 sm:$0xff]  }
 0x216   : > { %2133 = vmatprep.subr.bf16.mxu1 %v8497_v47  ;;  %v8569_v47 = vld [vmem:[%s12715_s5 + $0x4c] ss:$16 sps:$4 sm:$0xff]  }
 0x219   : > { %2134 = vmatpush1.bf16.msra.mxu1 %v8495_v27  ;;  %v8599_v27 = vld [vmem:[%s12715_s5 + $0xec] ss:$16 sps:$4 sm:$0xff]  }
 0x21a   : > { %2135 = vmatprep.subr.bf16.mxu1 %v8500_v26  ;;  %v8597_v26 = vld [vmem:[%s12715_s5 + $0xe8] ss:$16 sps:$4 sm:$0xff]  }
 0x21d   : > { %2136 = vmatpush1.bf16.msra.mxu1 %v8498_v59  ;;  %v8605_v59 = vld [vmem:[%s12715_s5 + $0x10c] ss:$16 sps:$4 sm:$0xff]  }
 0x21e   : > { %2137 = vmatprep.subr.bf16.mxu1 %v8503_v60  ;;  %v8603_v60 = vld [vmem:[%s12715_s5 + $0x108] ss:$16 sps:$4 sm:$0xff]  }
 0x221   : > { %2138 = vmatpush1.bf16.msra.mxu1 %v8501_v42  ;;  %v8611_v42 = vld [vmem:[%s12715_s5 + $0x12c] ss:$16 sps:$4 sm:$0xff]  }
 0x222   : > { %2160 = vmatprep.subr.bf16.mxu1 %v8506_v61  ;;  %v8609_v61 = vld [vmem:[%s12715_s5 + $0x128] ss:$16 sps:$4 sm:$0xff]  }
 0x224   : > { %2140 = vmatmul.mubr.bf16.vlgmr.msra.gmra.mrb[8].mxu1 %v1456_v29  ;;  %v8513_v29 = vld [vmem:[%s12713_s3 + $0x230] ss:$8 sps:$4 sm:$0xff]  }
 0x225   : > { %2149 = vmatprep.mubr.bf16.mxu1 %v1463_v55  ;;  %2161 = vmatpush1.bf16.msra.mxu1 %v8504_v58  ;;  %v8522_v55 = vld [vmem:[%s12713_s3 + $0x260] ss:$8 sps:$4 sm:$0xff]   ;;  %v8614_v58 = vld [vmem:[%s12715_s5 + $0x144] ss:$16 sps:$4 sm:$0xff]  }
 0x226   : > { %2162 = vmatprep.subr.bf16.mxu1 %v8509_v9  ;;  %v8617_v9 = vld [vmem:[%s12715_s5 + $0x14c] ss:$16 sps:$4 sm:$0xff]   ;;  %3483 = vmatprep.subr.bf16.mxu0 %v8614_v58 }
 0x229   : > { %2163 = vmatpush1.bf16.msra.mxu1 %v8507_v52  ;;  %v8612_v52 = vld [vmem:[%s12715_s5 + $0x140] ss:$16 sps:$4 sm:$0xff]  }
 0x22a   : > { %2164 = vmatprep.subr.bf16.mxu1 %v8512_v10  ;;  %v8615_v10 = vld [vmem:[%s12715_s5 + $0x148] ss:$16 sps:$4 sm:$0xff]   ;;  %3484 = vmatpush1.bf16.msra.mxu0 %v8612_v52 }
 0x22c   : > { %2150 = vmatmul.mubr.bf16.gmra.mrb[12].mxu1 %v1462_v20  ;;  %v8527_v20 = vld [vmem:[%s12713_s3 + $0x274] ss:$8 sps:$4 sm:$0xff]  }
 0x22d   : > { %2165 = vmatpush1.bf16.msra.mxu1 %v8510_v38  ;;  %2192 = vmatprep.mubr.bf16.mxu1 %v1459_v30  ;;  %v8530_v30 = vld [vmem:[%s12713_s3 + $0x284] ss:$8 sps:$4 sm:$0xff]  }
 0x22e   : > { %2166 = vmatprep.subr.bf16.mxu1 %v8515_v48  ;;  %v8620_v38 = vld [vmem:[%s12715_s5 + $0x164] ss:$16 sps:$4 sm:$0xff]   ;;  %v8623_v48 = vld [vmem:[%s12715_s5 + $0x16c] ss:$16 sps:$4 sm:$0xff]  }
 0x22f   : > { %3485 = vmatprep.subr.bf16.mxu0 %v8620_v38 }
 0x231   : > { %2167 = vmatpush1.bf16.msra.mxu1 %v8513_v29  ;;  %v8618_v29 = vld [vmem:[%s12715_s5 + $0x160] ss:$16 sps:$4 sm:$0xff]  }
 0x232   : > { %2168 = vmatprep.subr.bf16.mxu1 %v8518_v31  ;;  %v8621_v31 = vld [vmem:[%s12715_s5 + $0x168] ss:$16 sps:$4 sm:$0xff]   ;;  %3486 = vmatpush1.bf16.msra.mxu0 %v8618_v29 }
 0x235   : > { %2169 = vmatpush1.bf16.msra.mxu1 %v8516_v18  ;;  %v8626_v18 = vld [vmem:[%s12715_s5 + $0x184] ss:$16 sps:$4 sm:$0xff]  }
 0x236   : > { %2170 = vmatprep.subr.bf16.mxu1 %v8521_v40  ;;  %v8629_v40 = vld [vmem:[%s12715_s5 + $0x18c] ss:$16 sps:$4 sm:$0xff]   ;;  %3487 = vmatprep.subr.bf16.mxu0 %v8626_v18 }
 0x239   : > { %2171 = vmatpush1.bf16.msra.mxu1 %v8519_v46  ;;  %v8624_v46 = vld [vmem:[%s12715_s5 + $0x180] ss:$16 sps:$4 sm:$0xff]  }
 0x23a   : > { %2172 = vmatprep.subr.bf16.mxu1 %v8524_v51  ;;  %v8627_v51 = vld [vmem:[%s12715_s5 + $0x188] ss:$16 sps:$4 sm:$0xff]   ;;  %3488 = vmatpush1.bf16.msra.mxu0 %v8624_v46 }
 0x23d   : > { %2173 = vmatpush1.bf16.msra.mxu1 %v8522_v55  ;;  %v8632_v55 = vld [vmem:[%s12715_s5 + $0x1a4] ss:$16 sps:$4 sm:$0xff]  }
 0x23e   : > { %2174 = vmatprep.subr.bf16.mxu1 %v8527_v20  ;;  %v8635_v20 = vld [vmem:[%s12715_s5 + $0x1ac] ss:$16 sps:$4 sm:$0xff]   ;;  %3489 = vmatprep.subr.bf16.mxu0 %v8632_v55 }
 0x241   : > { %2175 = vmatpush1.bf16.msra.mxu1 %v8525_v0  ;;  %v8630_v0 = vld [vmem:[%s12715_s5 + $0x1a0] ss:$16 sps:$4 sm:$0xff]  }
 0x242   : > { %2176 = vmatprep.subr.bf16.mxu1 %v8530_v30  ;;  %v8633_v30 = vld [vmem:[%s12715_s5 + $0x1a8] ss:$16 sps:$4 sm:$0xff]   ;;  %3490 = vmatpush1.bf16.msra.mxu0 %v8630_v0 }
 0x245   : > { %2177 = vmatpush1.bf16.msra.mxu1 %v8528_v7  ;;  %v8638_v7 = vld [vmem:[%s12715_s5 + $0x1c4] ss:$16 sps:$4 sm:$0xff]  }
 0x246   : > { %2178 = vmatprep.subr.bf16.mxu1 %v8533_v13  ;;  %v8641_v13 = vld [vmem:[%s12715_s5 + $0x1cc] ss:$16 sps:$4 sm:$0xff]   ;;  %3491 = vmatprep.subr.bf16.mxu0 %v8638_v7 }
 0x249   : > { %2179 = vmatpush1.bf16.msra.mxu1 %v8531_v32  ;;  %v8636_v32 = vld [vmem:[%s12715_s5 + $0x1c0] ss:$16 sps:$4 sm:$0xff]  }
 0x24a   : > { %2180 = vmatprep.subr.bf16.mxu1 %v8536_v21  ;;  %v8639_v21 = vld [vmem:[%s12715_s5 + $0x1c8] ss:$16 sps:$4 sm:$0xff]   ;;  %3492 = vmatpush1.bf16.msra.mxu0 %v8636_v32 }
 0x24d   : > { %2181 = vmatpush1.bf16.msra.mxu1 %v8534_v15  ;;  %v8644_v15 = vld [vmem:[%s12715_s5 + $0x1e4] ss:$16 sps:$4 sm:$0xff]  }
 0x24e   : > { %2182 = vmatprep.subr.bf16.mxu1 %v8539_v16  ;;  %v8647_v16 = vld [vmem:[%s12715_s5 + $0x1ec] ss:$16 sps:$4 sm:$0xff]   ;;  %3493 = vmatprep.subr.bf16.mxu0 %v8644_v15 }
 0x251   : > { %2183 = vmatpush1.bf16.msra.mxu1 %v8537_v6  ;;  %v8642_v6 = vld [vmem:[%s12715_s5 + $0x1e0] ss:$16 sps:$4 sm:$0xff]  }
 0x252   : > { %2184 = vmatprep.subr.bf16.mxu1 %v8542_v62  ;;  %v8645_v62 = vld [vmem:[%s12715_s5 + $0x1e8] ss:$16 sps:$4 sm:$0xff]   ;;  %3494 = vmatpush1.bf16.msra.mxu0 %v8642_v6 }
 0x255   : > { %2185 = vmatpush1.bf16.msra.mxu1 %v8540_v22  ;;  %v8650_v22 = vld [vmem:[%s12715_s5 + $0x204] ss:$16 sps:$4 sm:$0xff]  }
 0x256   : > { %2186 = vmatprep.subr.bf16.mxu1 %v8545_v44  ;;  %v8653_v44 = vld [vmem:[%s12715_s5 + $0x20c] ss:$16 sps:$4 sm:$0xff]   ;;  %3516 = vmatprep.subr.bf16.mxu0 %v8650_v22 }
 0x259   : > { %2187 = vmatpush1.bf16.msra.mxu1 %v8543_v63  ;;  %v1562_v63 = vld [vmem:[#allocation4] sm:$0x3] }
 0x25a   : > { %2188 = vmatprep.subr.bf16.mxu1 %v8548_v50  ;;  %v1567_v50 = vrot.slane %v1562_v63, %v10116_v17 }
 0x25d   : > { %2189 = vmatpush1.bf16.msra.mxu1 %v8546_v2  ;;  %v1571_v2 = vrot.slane %v1562_v63, %v10119_v19 }
 0x25e   : > { %2190 = vmatprep.subr.bf16.mxu1 %v8551_v54 }
 0x261   : > { %2191 = vmatpush1.bf16.msra.mxu1 %v8549_v56 }
 0x262   : > { %3622 = vmatprep.subr.bf16.mxu1 %v8557_v39 }
 0x264   : > { %2193 = vmatmul.mubr.bf16.vlgmr.msra.gmra.mrb[8].mxu1 %v1458_v33  ;;  %v8573_v33 = vld [vmem:[%s12715_s5 + $0x68] ss:$16 sps:$4 sm:$0xff]  }
 0x265   : > { %2202 = vmatprep.mubr.bf16.mxu1 %v1465_v49  ;;  %3623 = vmatpush1.bf16.msra.mxu1 %v8555_v53  ;;  %v8593_v49 = vld [vmem:[%s12715_s5 + $0xcc] ss:$16 sps:$4 sm:$0xff]  }
 0x266   : > { %3624 = vmatprep.subr.bf16.mxu1 %v8563_v25 }
 0x269   : > { %3625 = vmatpush1.bf16.msra.mxu1 %v8561_v57 }
 0x26a   : > { %3626 = vmatprep.subr.bf16.mxu1 %v8569_v47 }
 0x26c   : > { %2203 = vmatmul.mubr.bf16.gmra.mrb[12].mxu1 %v1464_v4  ;;  %v8591_v4 = vld [vmem:[%s12715_s5 + $0xc8] ss:$16 sps:$4 sm:$0xff]  }
 0x26d   : > { %3627 = vmatpush1.bf16.msra.mxu1 %v8567_v41 }
 0x26e   : > { %3628 = vmatprep.subr.bf16.mxu1 %v8575_v3 }
 0x271   : > { %3629 = vmatpush1.bf16.msra.mxu1 %v8573_v33 }
 0x272   : > { %3630 = vmatprep.subr.bf16.mxu1 %v8581_v34 }
 0x275   : > { %3631 = vmatpush1.bf16.msra.mxu1 %v8579_v5 }
 0x276   : > { %3632 = vmatprep.subr.bf16.mxu1 %v8587_v37 }
 0x279   : > { %3633 = vmatpush1.bf16.msra.mxu1 %v8585_v45 }
 0x27a   : > { %3634 = vmatprep.subr.bf16.mxu1 %v8593_v49 }
 0x27d   : > { %3635 = vmatpush1.bf16.msra.mxu1 %v8591_v4 }
 0x27e   : > { %3636 = vmatprep.subr.bf16.mxu1 %v8599_v27 }
 0x281   : > { %3637 = vmatpush1.bf16.msra.mxu1 %v8597_v26 }
 0x282   : > { %3638 = vmatprep.subr.bf16.mxu1 %v8605_v59 }
 0x285   : > { %3639 = vmatpush1.bf16.msra.mxu1 %v8603_v60 }
 0x286   : > { %3640 = vmatprep.subr.bf16.mxu1 %v8611_v42 }
 0x289   : > { %3641 = vmatpush1.bf16.msra.mxu1 %v8609_v61 }
 0x28a   : > { %3642 = vmatprep.subr.bf16.mxu1 %v8617_v9 }
 0x28d   : > { %3643 = vmatpush1.bf16.msra.mxu1 %v8615_v10 }
 0x28e   : > { %3644 = vmatprep.subr.bf16.mxu1 %v8623_v48 }
 0x291   : > { %3645 = vmatpush1.bf16.msra.mxu1 %v8621_v31 }
 0x292   : > { %3646 = vmatprep.subr.bf16.mxu1 %v8629_v40 }
 0x295   : > { %3647 = vmatpush1.bf16.msra.mxu1 %v8627_v51 }
 0x296   : > { %3648 = vmatprep.subr.bf16.mxu1 %v8635_v20 }
 0x299   : > { %3649 = vmatpush1.bf16.msra.mxu1 %v8633_v30 }
 0x29a   : > { %3650 = vmatprep.subr.bf16.mxu1 %v8641_v13 }
 0x29d   : > { %3651 = vmatpush1.bf16.msra.mxu1 %v8639_v21 }
 0x29e   : > { %3652 = vmatprep.subr.bf16.mxu1 %v8647_v16 }
 0x2a1   : > { %3653 = vmatpush1.bf16.msra.mxu1 %v8645_v62 }
 0x2a2   : > { %3675 = vmatprep.subr.bf16.mxu1 %v8653_v44 }
 0x337   : > { %v2194_v54 = vpop.f32.mrb[8].mxu1 }
 0x338   : > { %v8108_v56 = vadd.f32 %v2194_v54, %v1567_v50  ;;  %v2196_v39 = vpop.f32.mrb[9].mxu1 }
 0x339   : > { %v8109_v53 = vadd.f32 %v2196_v39, %v1571_v2  ;;  %v2198_v25 = vpop.f32.mrb[10].mxu1 }
 0x33a   : > { %v2213_v57 = vmul.f32 0.1, %v8108_v56  ;;  %v8110_v47 = vadd.f32 %v2198_v25, %v1567_v50  ;;  %v2200_v41 = vpop.f32.mrb[11].mxu1 }
 0x33b   : > { %v2214_v3 = vmul.f32 0.1, %v8109_v53  ;;  %v8111_v33 = vadd.f32 %v2200_v41, %v1571_v2 }
 0x33c   : > { %v10652_v34 = vmax.f32 %v8108_v56, %v2213_v57  ;;  %v2215_v5 = vmul.f32 0.1, %v8110_v47 }
 0x33d   : > { %v10654_v37 = vmax.f32 %v8109_v53, %v2214_v3  ;;  %v2216_v45 = vmul.f32 0.1, %v8111_v33 }
 0x33e   : > { %v2229_v49 = vrot.slane %v10652_v34, 7  ;;  %v2223_v4 = vmax.f32 %v8110_v47, %v2215_v5  ;;  %v2253_v27 = vrot.slane %v10652_v34, 1 }
 0x33f   : > { %v2230_v26 = vrot.slane %v10654_v37, 7  ;;  %v2254_v59 = vrot.slane %v10654_v37, 1  ;;  %v2224_v60 = vmax.f32 %v8111_v33, %v2216_v45  ;;  %v2204_v42 = vpop.f32.mrb[12].mxu1 }
 0x340   : > { %v2231_v61 = vrot.slane %v2223_v4, 7  ;;  %v2255_v58 = vrot.slane %v2223_v4, 1  ;;  %v10661_v9 = vpack.c.bf16 %v2223_v4, %v10652_v34  ;;  %v8112_v52 = vadd.f32 %v2204_v42, %v1567_v50  ;;  %v2206_v10 = vpop.f32.mrb[13].mxu1 }
 0x341   : > { %v2232_v38 = vrot.slane %v2224_v60, 7  ;;  %v2256_v48 = vrot.slane %v2224_v60, 1  ;;  %v8113_v29 = vadd.f32 %v2206_v10, %v1571_v2  ;;  %v2208_v31 = vpop.f32.mrb[14].mxu1  ;;  %v10664_v18 = vpack.c.bf16 %v2224_v60, %v10654_v37  ;;  %v8659_v37 = vld [vmem:[%s12715_s5 + $0x22c] ss:$16 sps:$4 sm:$0xff]  }
 0x342   : > { %v2241_v40 = vsel %vm589_vm2, %v2229_v49, %v2231_v61  ;;  %v2265_v46 = vsel %vm614_vm3, %v2253_v27, %v2255_v58  ;;  %v2217_v51 = vmul.f32 0.1, %v8112_v52  ;;  %v8114_v55 = vadd.f32 %v2208_v31, %v1567_v50  ;;  %v2210_v20 = vpop.f32.mrb[15].mxu1 }
 0x343   : > { %v2218_v0 = vmul.f32 0.1, %v8113_v29  ;;  %v8115_v30 = vadd.f32 %v2210_v20, %v1571_v2  ;;  %v2242_v32 = vsel %vm589_vm2, %v2230_v26, %v2232_v38  ;;  %v2266_v21 = vsel %vm614_vm3, %v2254_v59, %v2256_v48 }
 0x344   : > { %v2225_v7 = vmax.f32 %v8112_v52, %v2217_v51  ;;  %v2219_v13 = vmul.f32 0.1, %v8114_v55  ;;  %v2247_v15 = vmul.f32 %v9603_v24, %v2241_v40  ;;  %v2269_v16 = vmul.f32 %v9785_v14, %v2265_v46  ;;  %v8648_v46 = vld [vmem:[%s12715_s5 + $0x200] ss:$16 sps:$4 sm:$0xff]  }
 0x345   : > { %v2226_v6 = vmax.f32 %v8113_v29, %v2218_v0  ;;  %v2220_v62 = vmul.f32 0.1, %v8115_v30  ;;  %v2248_v50 = vmul.f32 %v9603_v24, %v2242_v32  ;;  %v2270_v39 = vmul.f32 %v9785_v14, %v2266_v21  ;;  %v8657_v32 = vld [vmem:[%s12715_s5 + $0x228] ss:$16 sps:$4 sm:$0xff]  }
 0x346   : > { %v2233_v22 = vrot.slane %v2225_v7, 7  ;;  %v2257_v44 = vrot.slane %v2225_v7, 1  ;;  %v2227_v63 = vmax.f32 %v8114_v55, %v2219_v13 }
 0x347   : > { %v2234_v2 = vrot.slane %v2226_v6, 7  ;;  %v2258_v54 = vrot.slane %v2226_v6, 1  ;;  %v2228_v56 = vmax.f32 %v8115_v30, %v2220_v62  ;;  %v8668_v62 = vld [vmem:[%s12715_s5 + $0x264] ss:$16 sps:$4 sm:$0xff]  }
 0x348   : > { %v2263_v53 = vsel %vm614_vm3, %v2255_v58, %v2257_v44  ;;  %v2235_v25 = vrot.slane %v2227_v63, 7  ;;  %v2259_v57 = vrot.slane %v2227_v63, 1  ;;  %v2239_v47 = vsel %vm589_vm2, %v2231_v61, %v2233_v22 }
 0x349   : > { %v2271_v41 = vmul.f32 %v9801_v43, %v2263_v53  ;;  %v2236_v3 = vrot.slane %v2228_v56, 7  ;;  %v2260_v33 = vrot.slane %v2228_v56, 1  ;;  %v2240_v24 = vsel %vm589_vm2, %v2232_v38, %v2234_v2  ;;  %v8678_v53 = vld [vmem:[%s12715_s5 + $0x2a0] ss:$16 sps:$4 sm:$0xff]  }
 0x34a   : > { %v2243_v5 = vsel %vm589_vm2, %v2235_v25, %v2229_v49  ;;  %v2250_v14 = vmul.f32 %v9776_v35, %v2240_v24  ;;  %v2237_v45 = vsel %vm589_vm2, %v2233_v22, %v2235_v25  ;;  %v2249_v4 = vmul.f32 %v9776_v35, %v2239_v47  ;;  %v8671_v22 = vld [vmem:[%s12715_s5 + $0x26c] ss:$16 sps:$4 sm:$0xff]   ;;  %v8681_v25 = vld [vmem:[%s12715_s5 + $0x2a8] ss:$16 sps:$4 sm:$0xff]  }
 0x34b   : > { %v2245_v60 = vmul.f32 %v9611_v28, %v2243_v5  ;;  %v2244_v42 = vsel %vm589_vm2, %v2236_v3, %v2230_v26  ;;  %v2238_v61 = vsel %vm589_vm2, %v2234_v2, %v2236_v3  ;;  %v2251_v58 = vmul.f32 %v9782_v36, %v2237_v45  ;;  %v8677_v2 = vld [vmem:[%s12715_s5 + $0x28c] ss:$16 sps:$4 sm:$0xff]   ;;  %v8687_v3 = vld [vmem:[%s12715_s5 + $0x2c8] ss:$16 sps:$4 sm:$0xff]   ;;  %v8690_v5 = vld [vmem:[%s12715_s5 + $0x2e0] ss:$16 sps:$4 sm:$0xff]  }
 0x34c   : > { %v2246_v52 = vmul.f32 %v9611_v28, %v2244_v42  ;;  %v2252_v49 = vmul.f32 %v9782_v36, %v2238_v61  ;;  %v10703_v10 = vpack.c.bf16 %v2228_v56, %v2226_v6  ;;  %v10705_v38 = vpack.c.bf16 %v2227_v63, %v2225_v7  ;;  %v8651_v28 = vld [vmem:[%s12715_s5 + $0x208] ss:$16 sps:$4 sm:$0xff]   ;;  %v8680_v56 = vld [vmem:[%s12715_s5 + $0x2a4] ss:$16 sps:$4 sm:$0xff]   ;;  %v8689_v47 = vld [vmem:[%s12715_s5 + $0x2cc] ss:$16 sps:$4 sm:$0xff]  }
 0x34d   : > { %v2277_v29 = vpack.c.bf16 %v2247_v15, %v2245_v60  ;;  %v2283_v35 = vpack.c.bf16 %v2251_v58, %v2249_v4  ;;  %v2264_v31 = vsel %vm614_vm3, %v2256_v48, %v2258_v54  ;;  %v10709_v40 = vpack.c.bf16 %v2271_v41, %v2269_v16  ;;  %v8660_v16 = vld [vmem:[%s12715_s5 + $0x240] ss:$16 sps:$4 sm:$0xff]   ;;  %v8663_v6 = vld [vmem:[%s12715_s5 + $0x248] ss:$16 sps:$4 sm:$0xff]   ;;  %v8695_v24 = vld [vmem:[%s12715_s5 + $0x2ec] ss:$16 sps:$4 sm:$0xff]  }
 0x34e   : > { %v2278_v26 = vpack.c.bf16 %v2248_v50, %v2246_v52  ;;  %v2284_v36 = vpack.c.bf16 %v2252_v49, %v2250_v14  ;;  %v2272_v51 = vmul.f32 %v9801_v43, %v2264_v31  ;;  %v2262_v55 = vsel %vm614_vm3, %v2258_v54, %v2260_v33  ;;  %v8656_v43 = vld [vmem:[%s12715_s5 + $0x224] ss:$16 sps:$4 sm:$0xff]   ;;  %v8669_v63 = vld [vmem:[%s12715_s5 + $0x268] ss:$16 sps:$4 sm:$0xff]   ;;  %v8672_v54 = vld [vmem:[%s12715_s5 + $0x280] ss:$16 sps:$4 sm:$0xff]  }
 0x34f   : > { %v2268_v48 = vsel %vm614_vm3, %v2260_v33, %v2254_v59  ;;  %v2274_v20 = vmul.f32 %v9920_v1, %v2262_v55  ;;  %v2261_v0 = vsel %vm614_vm3, %v2257_v44, %v2259_v57  ;;  %v2267_v30 = vsel %vm614_vm3, %v2259_v57, %v2253_v27  ;;  %v8654_v27 = vld [vmem:[%s12715_s5 + $0x220] ss:$16 sps:$4 sm:$0xff]   ;;  %v8674_v50 = vld [vmem:[%s12715_s5 + $0x284] ss:$16 sps:$4 sm:$0xff]   ;;  %v8693_v14 = vld [vmem:[%s12715_s5 + $0x2e8] ss:$16 sps:$4 sm:$0xff]  }
 0x350   : > { %3495 = vmatprep.mubr.bf16.mxu0 %v2278_v26  ;;  %3654 = vmatprep.mubr.bf16.mxu1 %v2278_v26  ;;  %v10737_v59 = vpack.c.bf16 %v2272_v51, %v2270_v39  ;;  %v2276_v7 = vmul.f32 %v9923_v12, %v2268_v48  ;;  %v2273_v13 = vmul.f32 %v9920_v1, %v2261_v0  ;;  %v8662_v1 = vld [vmem:[%s12715_s5 + $0x244] ss:$16 sps:$4 sm:$0xff]   ;;  %v8666_v44 = vld [vmem:[%s12715_s5 + $0x260] ss:$16 sps:$4 sm:$0xff]   ;;  %v8683_v39 = vld [vmem:[%s12715_s5 + $0x2ac] ss:$16 sps:$4 sm:$0xff]  }
 0x351   : > { %3496 = vmatmul.mubr.bf16.vlgmr.msra.gmra.mrb[8].mxu0 %v2277_v29  ;;  %3655 = vmatmul.mubr.bf16.vlgmr.msra.gmra.mrb[16].mxu1 %v2277_v29  ;;  %v2275_v34 = vmul.f32 %v9923_v12, %v2267_v30  ;;  %v8665_v12 = vld [vmem:[%s12715_s5 + $0x24c] ss:$16 sps:$4 sm:$0xff]   ;;  %v8686_v57 = vld [vmem:[%s12715_s5 + $0x2c4] ss:$16 sps:$4 sm:$0xff]   ;;  %v8684_v41 = vld [vmem:[%s12715_s5 + $0x2c0] ss:$16 sps:$4 sm:$0xff]  }
 0x352   : > { %3517 = vmatpush1.bf16.msra.mxu0 %v8648_v46  ;;  %3676 = vmatpush1.bf16.msra.mxu1 %v8651_v28  ;;  %v10748_v21 = vpack.c.bf16 %v2276_v7, %v2274_v20  ;;  %v8692_v33 = vld [vmem:[%s12715_s5 + $0x2e4] ss:$16 sps:$4 sm:$0xff]   ;;  %v8701_v4 = vld [vmem:[%s12715_s5 + $0x30c] ss:$16 sps:$4 sm:$0xff]   ;;  %v8696_v60 = vld [vmem:[%s12715_s5 + $0x300] ss:$16 sps:$4 sm:$0xff]  }
 0x353   : > { %3505 = vmatprep.mubr.bf16.mxu0 %v2284_v36  ;;  %3664 = vmatprep.mubr.bf16.mxu1 %v2284_v36  ;;  %v10756_v15 = vpack.c.bf16 %v2275_v34, %v2273_v13  ;;  %v8698_v45 = vld [vmem:[%s12715_s5 + $0x304] ss:$16 sps:$4 sm:$0xff]   ;;  %v8699_v42 = vld [vmem:[%s12715_s5 + $0x308] ss:$16 sps:$4 sm:$0xff]   ;;  %v8707_v58 = vld [vmem:[%s12715_s5 + $0x32c] ss:$16 sps:$4 sm:$0xff]  }
 0x354   : > { %3518 = vmatprep.subr.bf16.mxu0 %v8656_v43  ;;  %3677 = vmatprep.subr.bf16.mxu1 %v8659_v37  ;;  %v8704_v61 = vld [vmem:[%s12715_s5 + $0x324] ss:$16 sps:$4 sm:$0xff]   ;;  %v8702_v52 = vld [vmem:[%s12715_s5 + $0x320] ss:$16 sps:$4 sm:$0xff]   ;;  %v8705_v49 = vld [vmem:[%s12715_s5 + $0x328] ss:$16 sps:$4 sm:$0xff]  }
 0x355   : > { %v8710_v29 = vld [vmem:[%s12715_s5 + $0x344] ss:$16 sps:$4 sm:$0xff]   ;;  %v8708_v31 = vld [vmem:[%s12715_s5 + $0x340] ss:$16 sps:$4 sm:$0xff]   ;;  %v8711_v26 = vld [vmem:[%s12715_s5 + $0x348] ss:$16 sps:$4 sm:$0xff]  }
 0x356   : > { %3519 = vmatpush1.bf16.msra.mxu0 %v8654_v27  ;;  %3678 = vmatpush1.bf16.msra.mxu1 %v8657_v32  ;;  %v8716_v46 = vld [vmem:[%s12715_s5 + $0x364] ss:$16 sps:$4 sm:$0xff]   ;;  %v8719_v28 = vld [vmem:[%s12715_s5 + $0x36c] ss:$16 sps:$4 sm:$0xff]   ;;  %v8714_v36 = vld [vmem:[%s12715_s5 + $0x360] ss:$16 sps:$4 sm:$0xff]  }
 0x357   : > { %3520 = vmatprep.subr.bf16.mxu0 %v8662_v1  ;;  %3679 = vmatprep.subr.bf16.mxu1 %v8665_v12  ;;  %v8717_v51 = vld [vmem:[%s12715_s5 + $0x368] ss:$16 sps:$4 sm:$0xff]   ;;  %v8722_v55 = vld [vmem:[%s12715_s5 + $0x384] ss:$16 sps:$4 sm:$0xff]   ;;  %v8725_v48 = vld [vmem:[%s12715_s5 + $0x38c] ss:$16 sps:$4 sm:$0xff]  }
 0x358   : > { %v8720_v20 = vld [vmem:[%s12715_s5 + $0x380] ss:$16 sps:$4 sm:$0xff]   ;;  %v8723_v0 = vld [vmem:[%s12715_s5 + $0x388] ss:$16 sps:$4 sm:$0xff]   ;;  %v8728_v30 = vld [vmem:[%s12715_s5 + $0x3a4] ss:$16 sps:$4 sm:$0xff]  }
 0x359   : > { %3506 = vmatmul.mubr.bf16.gmra.mrb[12].mxu0 %v2283_v35  ;;  %3665 = vmatmul.mubr.bf16.gmra.mrb[20].mxu1 %v2283_v35  ;;  %v8713_v35 = vld [vmem:[%s12715_s5 + $0x34c] ss:$16 sps:$4 sm:$0xff]   ;;  %v8726_v37 = vld [vmem:[%s12715_s5 + $0x3a0] ss:$16 sps:$4 sm:$0xff]   ;;  %v8729_v7 = vld [vmem:[%s12715_s5 + $0x3a8] ss:$16 sps:$4 sm:$0xff]  }
 0x35a   : > { %3521 = vmatpush1.bf16.msra.mxu0 %v8660_v16  ;;  %3680 = vmatpush1.bf16.msra.mxu1 %v8663_v6  ;;  %v8731_v43 = vld [vmem:[%s12715_s5 + $0x3ac] ss:$16 sps:$4 sm:$0xff]   ;;  %v8734_v13 = vld [vmem:[%s12715_s5 + $0x3c4] ss:$16 sps:$4 sm:$0xff]   ;;  %v8732_v27 = vld [vmem:[%s12715_s5 + $0x3c0] ss:$16 sps:$4 sm:$0xff]  }
 0x35b   : > { %3548 = vmatprep.mubr.bf16.mxu0 %v10664_v18  ;;  %3707 = vmatprep.mubr.bf16.mxu1 %v10664_v18  ;;  %v8675_v18 = vld [vmem:[%s12715_s5 + $0x288] ss:$16 sps:$4 sm:$0xff]   ;;  %v8737_v34 = vld [vmem:[%s12715_s5 + $0x3cc] ss:$16 sps:$4 sm:$0xff]   ;;  %v8740_v1 = vld [vmem:[%s12715_s5 + $0x3e4] ss:$16 sps:$4 sm:$0xff]  }
 0x35c   : > { %3522 = vmatprep.subr.bf16.mxu0 %v8668_v62  ;;  %3681 = vmatprep.subr.bf16.mxu1 %v8671_v22  ;;  %v8735_v32 = vld [vmem:[%s12715_s5 + $0x3c8] ss:$16 sps:$4 sm:$0xff]   ;;  %v8743_v12 = vld [vmem:[%s12715_s5 + $0x3ec] ss:$16 sps:$4 sm:$0xff]   ;;  %v8738_v16 = vld [vmem:[%s12715_s5 + $0x3e0] ss:$16 sps:$4 sm:$0xff]  }
 0x35d   : > { %v8741_v6 = vld [vmem:[%s12715_s5 + $0x3e8] ss:$16 sps:$4 sm:$0xff]   ;;  %v8746_v62 = vld [vmem:[%s12715_s5 + $0x404] ss:$16 sps:$4 sm:$0xff]   ;;  %v8749_v22 = vld [vmem:[%s12715_s5 + $0x40c] ss:$16 sps:$4 sm:$0xff]  }
 0x35e   : > { %3523 = vmatpush1.bf16.msra.mxu0 %v8666_v44  ;;  %3682 = vmatpush1.bf16.msra.mxu1 %v8669_v63  ;;  %v8744_v44 = vld [vmem:[%s12715_s5 + $0x400] ss:$16 sps:$4 sm:$0xff]   ;;  %v8747_v63 = vld [vmem:[%s12715_s5 + $0x408] ss:$16 sps:$4 sm:$0xff]  }
 0x35f   : > { %3524 = vmatprep.subr.bf16.mxu0 %v8674_v50  ;;  %3683 = vmatprep.subr.bf16.mxu1 %v8677_v2  ;;  %v8752_v50 = vld [vmem:[%s12715_s5 + $0x424] ss:$16 sps:$4 sm:$0xff]   ;;  %v8755_v2 = vld [vmem:[%s12715_s5 + $0x42c] ss:$16 sps:$4 sm:$0xff]  }
 0x362   : > { %3525 = vmatpush1.bf16.msra.mxu0 %v8672_v54  ;;  %3684 = vmatpush1.bf16.msra.mxu1 %v8675_v18  ;;  %v8750_v54 = vld [vmem:[%s12715_s5 + $0x420] ss:$16 sps:$4 sm:$0xff]   ;;  %v8753_v18 = vld [vmem:[%s12715_s5 + $0x428] ss:$16 sps:$4 sm:$0xff]  }
 0x363   : > { %3526 = vmatprep.subr.bf16.mxu0 %v8680_v56  ;;  %3685 = vmatprep.subr.bf16.mxu1 %v8683_v39  ;;  %v8758_v56 = vld [vmem:[%s12715_s5 + $0x444] ss:$16 sps:$4 sm:$0xff]   ;;  %v8759_v39 = vld [vmem:[%s12715_s5 + $0x448] ss:$16 sps:$4 sm:$0xff]  }
 0x366   : > { %3527 = vmatpush1.bf16.msra.mxu0 %v8678_v53  ;;  %3686 = vmatpush1.bf16.msra.mxu1 %v8681_v25  ;;  %v8764_v53 = vld [vmem:[%s12715_s5 + $0x464] ss:$16 sps:$4 sm:$0xff]   ;;  %v8767_v25 = vld [vmem:[%s12715_s5 + $0x46c] ss:$16 sps:$4 sm:$0xff]  }
 0x367   : > { %3528 = vmatprep.subr.bf16.mxu0 %v8686_v57  ;;  %3687 = vmatprep.subr.bf16.mxu1 %v8689_v47  ;;  %v8762_v57 = vld [vmem:[%s12715_s5 + $0x460] ss:$16 sps:$4 sm:$0xff]   ;;  %v8765_v47 = vld [vmem:[%s12715_s5 + $0x468] ss:$16 sps:$4 sm:$0xff]  }
 0x36a   : > { %3529 = vmatpush1.bf16.msra.mxu0 %v8684_v41  ;;  %3688 = vmatpush1.bf16.msra.mxu1 %v8687_v3  ;;  %v8770_v41 = vld [vmem:[%s12715_s5 + $0x484] ss:$16 sps:$4 sm:$0xff]   ;;  %v8768_v3 = vld [vmem:[%s12715_s5 + $0x480] ss:$16 sps:$4 sm:$0xff]  }
 0x36b   : > { %3530 = vmatprep.subr.bf16.mxu0 %v8692_v33  ;;  %3689 = vmatprep.subr.bf16.mxu1 %v8695_v24  ;;  %v8776_v33 = vld [vmem:[%s12715_s5 + $0x4a4] ss:$16 sps:$4 sm:$0xff]   ;;  %v8779_v24 = vld [vmem:[%s12715_s5 + $0x4ac] ss:$16 sps:$4 sm:$0xff]  }
 0x36e   : > { %3531 = vmatpush1.bf16.msra.mxu0 %v8690_v5  ;;  %3690 = vmatpush1.bf16.msra.mxu1 %v8693_v14  ;;  %v8774_v5 = vld [vmem:[%s12715_s5 + $0x4a0] ss:$16 sps:$4 sm:$0xff]   ;;  %v8777_v14 = vld [vmem:[%s12715_s5 + $0x4a8] ss:$16 sps:$4 sm:$0xff]  }
 0x36f   : > { %3532 = vmatprep.subr.bf16.mxu0 %v8698_v45  ;;  %3691 = vmatprep.subr.bf16.mxu1 %v8701_v4  ;;  %v8782_v45 = vld [vmem:[%s12715_s5 + $0x4c4] ss:$16 sps:$4 sm:$0xff]   ;;  %v8785_v4 = vld [vmem:[%s12715_s5 + $0x4cc] ss:$16 sps:$4 sm:$0xff]  }
 0x372   : > { %3533 = vmatpush1.bf16.msra.mxu0 %v8696_v60  ;;  %3692 = vmatpush1.bf16.msra.mxu1 %v8699_v42  ;;  %v8780_v60 = vld [vmem:[%s12715_s5 + $0x4c0] ss:$16 sps:$4 sm:$0xff]   ;;  %v8783_v42 = vld [vmem:[%s12715_s5 + $0x4c8] ss:$16 sps:$4 sm:$0xff]  }
 0x373   : > { %3534 = vmatprep.subr.bf16.mxu0 %v8704_v61  ;;  %3693 = vmatprep.subr.bf16.mxu1 %v8707_v58  ;;  %v8788_v61 = vld [vmem:[%s12715_s5 + $0x4e4] ss:$16 sps:$4 sm:$0xff]   ;;  %v8791_v58 = vld [vmem:[%s12715_s5 + $0x4ec] ss:$16 sps:$4 sm:$0xff]  }
 0x376   : > { %3535 = vmatpush1.bf16.msra.mxu0 %v8702_v52  ;;  %3694 = vmatpush1.bf16.msra.mxu1 %v8705_v49  ;;  %v8786_v52 = vld [vmem:[%s12715_s5 + $0x4e0] ss:$16 sps:$4 sm:$0xff]   ;;  %v8789_v49 = vld [vmem:[%s12715_s5 + $0x4e8] ss:$16 sps:$4 sm:$0xff]  }
 0x377   : > { %3536 = vmatprep.subr.bf16.mxu0 %v8710_v29  ;;  %3695 = vmatprep.subr.bf16.mxu1 %v8713_v35  ;;  %v8794_v29 = vld [vmem:[%s12715_s5 + $0x504] ss:$16 sps:$4 sm:$0xff]   ;;  %v8797_v35 = vld [vmem:[%s12715_s5 + $0x50c] ss:$16 sps:$4 sm:$0xff]  }
 0x37a   : > { %3537 = vmatpush1.bf16.msra.mxu0 %v8708_v31  ;;  %3696 = vmatpush1.bf16.msra.mxu1 %v8711_v26  ;;  %v8792_v31 = vld [vmem:[%s12715_s5 + $0x500] ss:$16 sps:$4 sm:$0xff]   ;;  %v8795_v26 = vld [vmem:[%s12715_s5 + $0x508] ss:$16 sps:$4 sm:$0xff]  }
 0x37b   : > { %3538 = vmatprep.subr.bf16.mxu0 %v8716_v46  ;;  %3697 = vmatprep.subr.bf16.mxu1 %v8719_v28  ;;  %v8800_v46 = vld [vmem:[%s12715_s5 + $0x524] ss:$16 sps:$4 sm:$0xff]   ;;  %v8803_v28 = vld [vmem:[%s12715_s5 + $0x52c] ss:$16 sps:$4 sm:$0xff]  }
 0x37e   : > { %3539 = vmatpush1.bf16.msra.mxu0 %v8714_v36  ;;  %3698 = vmatpush1.bf16.msra.mxu1 %v8717_v51  ;;  %v8798_v36 = vld [vmem:[%s12715_s5 + $0x520] ss:$16 sps:$4 sm:$0xff]   ;;  %v8801_v51 = vld [vmem:[%s12715_s5 + $0x528] ss:$16 sps:$4 sm:$0xff]  }
 0x37f   : > { %3540 = vmatprep.subr.bf16.mxu0 %v8722_v55  ;;  %3699 = vmatprep.subr.bf16.mxu1 %v8725_v48  ;;  %v8806_v55 = vld [vmem:[%s12715_s5 + $0x544] ss:$16 sps:$4 sm:$0xff]   ;;  %v8809_v48 = vld [vmem:[%s12715_s5 + $0x54c] ss:$16 sps:$4 sm:$0xff]  }
 0x382   : > { %3541 = vmatpush1.bf16.msra.mxu0 %v8720_v20  ;;  %3700 = vmatpush1.bf16.msra.mxu1 %v8723_v0  ;;  %v8804_v20 = vld [vmem:[%s12715_s5 + $0x540] ss:$16 sps:$4 sm:$0xff]   ;;  %v8807_v0 = vld [vmem:[%s12715_s5 + $0x548] ss:$16 sps:$4 sm:$0xff]  }
 0x383   : > { %3542 = vmatprep.subr.bf16.mxu0 %v8728_v30  ;;  %3701 = vmatprep.subr.bf16.mxu1 %v8731_v43  ;;  %v8812_v30 = vld [vmem:[%s12715_s5 + $0x564] ss:$16 sps:$4 sm:$0xff]   ;;  %v8815_v43 = vld [vmem:[%s12715_s5 + $0x56c] ss:$16 sps:$4 sm:$0xff]  }
 0x386   : > { %3543 = vmatpush1.bf16.msra.mxu0 %v8726_v37  ;;  %3702 = vmatpush1.bf16.msra.mxu1 %v8729_v7  ;;  %v8810_v37 = vld [vmem:[%s12715_s5 + $0x560] ss:$16 sps:$4 sm:$0xff]   ;;  %v8813_v7 = vld [vmem:[%s12715_s5 + $0x568] ss:$16 sps:$4 sm:$0xff]  }
 0x387   : > { %3544 = vmatprep.subr.bf16.mxu0 %v8734_v13  ;;  %3703 = vmatprep.subr.bf16.mxu1 %v8737_v34  ;;  %v8818_v13 = vld [vmem:[%s12715_s5 + $0x584] ss:$16 sps:$4 sm:$0xff]   ;;  %v8821_v34 = vld [vmem:[%s12715_s5 + $0x58c] ss:$16 sps:$4 sm:$0xff]  }
 0x38a   : > { %3545 = vmatpush1.bf16.msra.mxu0 %v8732_v27  ;;  %3704 = vmatpush1.bf16.msra.mxu1 %v8735_v32  ;;  %v8816_v27 = vld [vmem:[%s12715_s5 + $0x580] ss:$16 sps:$4 sm:$0xff]   ;;  %v8819_v32 = vld [vmem:[%s12715_s5 + $0x588] ss:$16 sps:$4 sm:$0xff]  }
 0x38b   : > { %3546 = vmatprep.subr.bf16.mxu0 %v8740_v1  ;;  %3705 = vmatprep.subr.bf16.mxu1 %v8743_v12  ;;  %v8824_v1 = vld [vmem:[%s12715_s5 + $0x5a4] ss:$16 sps:$4 sm:$0xff]   ;;  %v8827_v12 = vld [vmem:[%s12715_s5 + $0x5ac] ss:$16 sps:$4 sm:$0xff]  }
 0x38e   : > { %3547 = vmatpush1.bf16.msra.mxu0 %v8738_v16  ;;  %3706 = vmatpush1.bf16.msra.mxu1 %v8741_v6  ;;  %v8822_v16 = vld [vmem:[%s12715_s5 + $0x5a0] ss:$16 sps:$4 sm:$0xff]   ;;  %v8825_v6 = vld [vmem:[%s12715_s5 + $0x5a8] ss:$16 sps:$4 sm:$0xff]  }
 0x38f   : > { %3569 = vmatprep.subr.bf16.mxu0 %v8746_v62  ;;  %3728 = vmatprep.subr.bf16.mxu1 %v8749_v22  ;;  %v8830_v62 = vld [vmem:[%s12715_s5 + $0x5c4] ss:$16 sps:$4 sm:$0xff]   ;;  %v8833_v22 = vld [vmem:[%s12715_s5 + $0x5cc] ss:$16 sps:$4 sm:$0xff]  }
 0x391   : > { %3549 = vmatmul.mubr.bf16.vlgmr.msra.gmra.mrb[8].mxu0 %v10661_v9  ;;  %3708 = vmatmul.mubr.bf16.vlgmr.msra.gmra.mrb[16].mxu1 %v10661_v9  ;;  %v8761_v9 = vld [vmem:[%s12715_s5 + $0x44c] ss:$16 sps:$4 sm:$0xff]  }
 0x392   : > { %3558 = vmatprep.mubr.bf16.mxu0 %v10703_v10  ;;  %3570 = vmatpush1.bf16.msra.mxu0 %v8744_v44  ;;  %v8828_v44 = vld [vmem:[%s12715_s5 + $0x5c0] ss:$16 sps:$4 sm:$0xff]  }
 0x393   : > { %3717 = vmatprep.mubr.bf16.mxu1 %v10703_v10  ;;  %3729 = vmatpush1.bf16.msra.mxu1 %v8747_v63  ;;  %v8756_v10 = vld [vmem:[%s12715_s5 + $0x440] ss:$16 sps:$4 sm:$0xff]   ;;  %v8831_v63 = vld [vmem:[%s12715_s5 + $0x5c8] ss:$16 sps:$4 sm:$0xff]  }
 0x394   : > { %3571 = vmatprep.subr.bf16.mxu0 %v8752_v50  ;;  %3730 = vmatprep.subr.bf16.mxu1 %v8755_v2  ;;  %v8836_v50 = vld [vmem:[%s12715_s5 + $0x5e4] ss:$16 sps:$4 sm:$0xff]   ;;  %v8839_v2 = vld [vmem:[%s12715_s5 + $0x5ec] ss:$16 sps:$4 sm:$0xff]  }
 0x396   : > { %3572 = vmatpush1.bf16.msra.mxu0 %v8750_v54  ;;  %v8834_v54 = vld [vmem:[%s12715_s5 + $0x5e0] ss:$16 sps:$4 sm:$0xff]  }
 0x397   : > { %3731 = vmatpush1.bf16.msra.mxu1 %v8753_v18  ;;  %3573 = vmatprep.subr.bf16.mxu0 %v8758_v56  ;;  %v8837_v18 = vld [vmem:[%s12715_s5 + $0x5e8] ss:$16 sps:$4 sm:$0xff]   ;;  %v8842_v56 = vld [vmem:[%s12717_s7 + $0x4] ss:$8 sps:$4 sm:$0xff]  }
 0x398   : > { %3732 = vmatprep.subr.bf16.mxu1 %v8761_v9  ;;  %v8840_v9 = vld [vmem:[%s12717_s7] ss:$8 sps:$4 sm:$0xff]  }
 0x399   : > { %3559 = vmatmul.mubr.bf16.gmra.mrb[12].mxu0 %v10705_v38  ;;  %3718 = vmatmul.mubr.bf16.gmra.mrb[20].mxu1 %v10705_v38  ;;  %v8773_v38 = vld [vmem:[%s12715_s5 + $0x48c] ss:$16 sps:$4 sm:$0xff]  }
 0x39a   : > { %3574 = vmatpush1.bf16.msra.mxu0 %v8756_v10  ;;  %3601 = vmatprep.mubr.bf16.mxu0 %v10737_v59  ;;  %v8845_v10 = vld [vmem:[%s12717_s7 + $0x14] ss:$8 sps:$4 sm:$0xff]  }
 0x39b   : > { %3733 = vmatpush1.bf16.msra.mxu1 %v8759_v39  ;;  %3760 = vmatprep.mubr.bf16.mxu1 %v10737_v59  ;;  %v8771_v59 = vld [vmem:[%s12715_s5 + $0x488] ss:$16 sps:$4 sm:$0xff]  }
 0x39c   : > { %3575 = vmatprep.subr.bf16.mxu0 %v8764_v53  ;;  %3734 = vmatprep.subr.bf16.mxu1 %v8767_v25  ;;  %v8843_v39 = vld [vmem:[%s12717_s7 + $0x10] ss:$8 sps:$4 sm:$0xff]   ;;  %v8848_v53 = vld [vmem:[%s12717_s7 + $0x24] ss:$8 sps:$4 sm:$0xff]   ;;  %v8846_v25 = vld [vmem:[%s12717_s7 + $0x20] ss:$8 sps:$4 sm:$0xff]  }
 0x39e   : > { %3576 = vmatpush1.bf16.msra.mxu0 %v8762_v57  ;;  %v8854_v57 = vld [vmem:[%s12717_s7 + $0x44] ss:$8 sps:$4 sm:$0xff]  }
 0x39f   : > { %3735 = vmatpush1.bf16.msra.mxu1 %v8765_v47  ;;  %3577 = vmatprep.subr.bf16.mxu0 %v8770_v41  ;;  %v8852_v47 = vld [vmem:[%s12717_s7 + $0x40] ss:$8 sps:$4 sm:$0xff]   ;;  %v8855_v41 = vld [vmem:[%s12717_s7 + $0x50] ss:$8 sps:$4 sm:$0xff]  }
 0x3a0   : > { %3736 = vmatprep.subr.bf16.mxu1 %v8773_v38  ;;  %v2481_v38 = vld [vmem:[%s12716_s6] sm:$0xf] }
 0x3a2   : > { %3578 = vmatpush1.bf16.msra.mxu0 %v8768_v3  ;;  %v2493_v3 = vsub.s32 2, %v9552_v8 }
 0x3a3   : > { %3737 = vmatpush1.bf16.msra.mxu1 %v8771_v59  ;;  %3579 = vmatprep.subr.bf16.mxu0 %v8776_v33  ;;  %v9321_v59 = vmov 1983009808  }
 0x3a4   : > { %3738 = vmatprep.subr.bf16.mxu1 %v8779_v24  ;;  %v3834_v33 = vunpack.c.l.s4 %v9321_v59  ;;  %v2497_v24 = vsub.s32 3, %v9552_v8 }
 0x3a6   : > { %3580 = vmatpush1.bf16.msra.mxu0 %v8774_v5  ;;  %v11170_v5 = vrot.slane %v2481_v38, %v10116_v17 }
 0x3a7   : > { %3739 = vmatpush1.bf16.msra.mxu1 %v8777_v14  ;;  %3581 = vmatprep.subr.bf16.mxu0 %v8782_v45  ;;  %v11172_v14 = vrot.slane %v2481_v38, %v2493_v3  ;;  %v11175_v45 = vrot.slane %v2481_v38, %v10119_v19 }
 0x3a8   : > { %3740 = vmatprep.subr.bf16.mxu1 %v8785_v4  ;;  %v3835_v4 = vunpack.c.0.s8 %v3834_v33 }
 0x3aa   : > { %3582 = vmatpush1.bf16.msra.mxu0 %v8780_v60  ;;  %v11177_v60 = vrot.slane %v2481_v38, %v2497_v24 }
 0x3ab   : > { %3741 = vmatpush1.bf16.msra.mxu1 %v8783_v42  ;;  %3583 = vmatprep.subr.bf16.mxu0 %v8788_v61 }
 0x3ac   : > { %3742 = vmatprep.subr.bf16.mxu1 %v8791_v58 }
 0x3ae   : > { %3584 = vmatpush1.bf16.msra.mxu0 %v8786_v52 }
 0x3af   : > { %3743 = vmatpush1.bf16.msra.mxu1 %v8789_v49  ;;  %3585 = vmatprep.subr.bf16.mxu0 %v8794_v29 }
 0x3b0   : > { %3744 = vmatprep.subr.bf16.mxu1 %v8797_v35 }
 0x3b2   : > { %3586 = vmatpush1.bf16.msra.mxu0 %v8792_v31 }
 0x3b3   : > { %3745 = vmatpush1.bf16.msra.mxu1 %v8795_v26  ;;  %3587 = vmatprep.subr.bf16.mxu0 %v8800_v46  ;;  %v11183_v26 = vsub.s32 %v3835_v4, %v9552_v8 }
 0x3b4   : > { %3746 = vmatprep.subr.bf16.mxu1 %v8803_v28 }
 0x3b5   : > { %12751 = vst [vmem:[#allocation15_spill] sm:$0xff] %v11183_v26 }
 0x3b6   : > { %3588 = vmatpush1.bf16.msra.mxu0 %v8798_v36 }
 0x3b7   : > { %3747 = vmatpush1.bf16.msra.mxu1 %v8801_v51  ;;  %3589 = vmatprep.subr.bf16.mxu0 %v8806_v55 }
 0x3b8   : > { %3748 = vmatprep.subr.bf16.mxu1 %v8809_v48 }
 0x3ba   : > { %3590 = vmatpush1.bf16.msra.mxu0 %v8804_v20 }
 0x3bb   : > { %3749 = vmatpush1.bf16.msra.mxu1 %v8807_v0  ;;  %3591 = vmatprep.subr.bf16.mxu0 %v8812_v30 }
 0x3bc   : > { %3750 = vmatprep.subr.bf16.mxu1 %v8815_v43 }
 0x3be   : > { %3592 = vmatpush1.bf16.msra.mxu0 %v8810_v37 }
 0x3bf   : > { %3751 = vmatpush1.bf16.msra.mxu1 %v8813_v7  ;;  %3593 = vmatprep.subr.bf16.mxu0 %v8818_v13 }
 0x3c0   : > { %3752 = vmatprep.subr.bf16.mxu1 %v8821_v34 }
 0x3c2   : > { %3594 = vmatpush1.bf16.msra.mxu0 %v8816_v27  ;;  %v8858_v27 = vld [vmem:[%s12717_s7 + $0x60] ss:$8 sps:$4 sm:$0xff]  }
 0x3c3   : > { %3753 = vmatpush1.bf16.msra.mxu1 %v8819_v32  ;;  %3595 = vmatprep.subr.bf16.mxu0 %v8824_v1 }
 0x3c4   : > { %3754 = vmatprep.subr.bf16.mxu1 %v8827_v12 }
 0x3c6   : > { %3596 = vmatpush1.bf16.msra.mxu0 %v8822_v16 }
 0x3c7   : > { %3755 = vmatpush1.bf16.msra.mxu1 %v8825_v6  ;;  %3597 = vmatprep.subr.bf16.mxu0 %v8830_v62  ;;  %v8860_v6 = vld [vmem:[%s12717_s7 + $0x64] ss:$8 sps:$4 sm:$0xff]  }
 0x3c8   : > { %3756 = vmatprep.subr.bf16.mxu1 %v8833_v22 }
 0x3ca   : > { %3598 = vmatpush1.bf16.msra.mxu0 %v8828_v44 }
 0x3cb   : > { %3757 = vmatpush1.bf16.msra.mxu1 %v8831_v63  ;;  %3599 = vmatprep.subr.bf16.mxu0 %v8836_v50 }
 0x3cc   : > { %3758 = vmatprep.subr.bf16.mxu1 %v8839_v2 }
 0x3ce   : > { %3600 = vmatpush1.bf16.msra.mxu0 %v8834_v54 }
 0x3cf   : > { %3759 = vmatpush1.bf16.msra.mxu1 %v8837_v18  ;;  %6153 = vmatprep.subr.bf16.mxu0 %v8842_v56  ;;  %v8863_v56 = vld [vmem:[%s12717_s7 + $0x74] ss:$8 sps:$4 sm:$0xff]  }
 0x3d1   : > { %3602 = vmatmul.mubr.bf16.vlgmr.msra.gmra.mrb[8].mxu0 %v10709_v40 }
 0x3d2   : > { %3761 = vmatmul.mubr.bf16.vlgmr.msra.gmra.mrb[16].mxu1 %v10709_v40  ;;  %3611 = vmatprep.mubr.bf16.mxu0 %v10748_v21  ;;  %v8851_v40 = vld [vmem:[%s12717_s7 + $0x34] ss:$8 sps:$4 sm:$0xff]  }
 0x3d3   : > { %3770 = vmatprep.mubr.bf16.mxu1 %v10748_v21  ;;  %6154 = vmatpush1.bf16.msra.mxu0 %v8840_v9  ;;  %v8849_v21 = vld [vmem:[%s12717_s7 + $0x30] ss:$8 sps:$4 sm:$0xff]  }
 0x3d4   : > { %6155 = vmatprep.subr.bf16.mxu0 %v8845_v10 }
 0x3d7   : > { %6156 = vmatpush1.bf16.msra.mxu0 %v8843_v39 }
 0x3d8   : > { %6157 = vmatprep.subr.bf16.mxu0 %v8848_v53 }
 0x3d9   : > { %3612 = vmatmul.mubr.bf16.gmra.mrb[12].mxu0 %v10756_v15 }
 0x3da   : > { %3771 = vmatmul.mubr.bf16.gmra.mrb[20].mxu1 %v10756_v15  ;;  %v8857_v15 = vld [vmem:[%s12717_s7 + $0x54] ss:$8 sps:$4 sm:$0xff]  }
 0x3db   : > { %6158 = vmatpush1.bf16.msra.mxu0 %v8846_v25 }
 0x3dc   : > { %6159 = vmatprep.subr.bf16.mxu0 %v8851_v40  ;;  %v8861_v40 = vld [vmem:[%s12717_s7 + $0x70] ss:$8 sps:$4 sm:$0xff]  }
 0x3df   : > { %6160 = vmatpush1.bf16.msra.mxu0 %v8849_v21 }
 0x3e0   : > { %6161 = vmatprep.subr.bf16.mxu0 %v8854_v57 }
 0x3e3   : > { %6162 = vmatpush1.bf16.msra.mxu0 %v8852_v47 }
 0x3e4   : > { %6163 = vmatprep.subr.bf16.mxu0 %v8857_v15 }
 0x3e7   : > { %6164 = vmatpush1.bf16.msra.mxu0 %v8855_v41 }
 0x3e8   : > { %6165 = vmatprep.subr.bf16.mxu0 %v8860_v6 }
 0x3eb   : > { %6166 = vmatpush1.bf16.msra.mxu0 %v8858_v27 }
 0x3ec   : > { %6167 = vmatprep.subr.bf16.mxu0 %v8863_v56 }
 0x3ef   : > { %6168 = vmatpush1.bf16.msra.mxu0 %v8861_v40 }
 0x4a4   : > { %v3603_v42 = vpop.f32.mrb[8].mxu0 }
 0x4a5   : > { %v8116_v61 = vadd.f32 %v3603_v42, %v11170_v5  ;;  %v3762_v58 = vpop.f32.mrb[16].mxu1  ;;  %v3605_v52 = vpop.f32.mrb[9].mxu0 }
 0x4a6   : > { %v8124_v49 = vadd.f32 %v3762_v58, %v11172_v14  ;;  %v8117_v29 = vadd.f32 %v3605_v52, %v11175_v45  ;;  %v3764_v35 = vpop.f32.mrb[17].mxu1  ;;  %v3607_v31 = vpop.f32.mrb[10].mxu0 }
 0x4a7   : > { %v3781_v46 = vmul.f32 0.1, %v8116_v61  ;;  %v8125_v28 = vadd.f32 %v3764_v35, %v11177_v60  ;;  %v8118_v36 = vadd.f32 %v3607_v31, %v11170_v5  ;;  %v3766_v51 = vpop.f32.mrb[18].mxu1  ;;  %v3609_v55 = vpop.f32.mrb[11].mxu0 }
 0x4a8   : > { %v3783_v48 = vmul.f32 0.1, %v8124_v49  ;;  %v3782_v20 = vmul.f32 0.1, %v8117_v29  ;;  %v8126_v0 = vadd.f32 %v3766_v51, %v11172_v14  ;;  %v8119_v30 = vadd.f32 %v3609_v55, %v11175_v45  ;;  %v3768_v43 = vpop.f32.mrb[19].mxu1 }
 0x4a9   : > { %v3797_v37 = vmax.f32 %v8116_v61, %v3781_v46  ;;  %v3784_v7 = vmul.f32 0.1, %v8125_v28  ;;  %v3785_v13 = vmul.f32 0.1, %v8118_v36  ;;  %v8127_v34 = vadd.f32 %v3768_v43, %v11177_v60 }
 0x4aa   : > { %v3799_v32 = vmax.f32 %v8124_v49, %v3783_v48  ;;  %v3798_v1 = vmax.f32 %v8117_v29, %v3782_v20  ;;  %v3787_v12 = vmul.f32 0.1, %v8126_v0  ;;  %v3786_v16 = vmul.f32 0.1, %v8119_v30  ;;  %v8866_v29 = vld [vmem:[%s12717_s7 + $0x84] ss:$8 sps:$4 sm:$0xff]  }
 0x4ab   : > { %v3800_v62 = vmax.f32 %v8125_v28, %v3784_v7  ;;  %v3801_v22 = vmax.f32 %v8118_v36, %v3785_v13  ;;  %v3788_v44 = vmul.f32 0.1, %v8127_v34  ;;  %v8864_v36 = vld [vmem:[%s12717_s7 + $0x80] ss:$8 sps:$4 sm:$0xff]   ;;  %6169 = vmatprep.subr.bf16.mxu0 %v8866_v29 }
 0x4ac   : > { %v3829_v63 = vcombine.low %v3797_v37, %v3798_v1  ;;  %v3830_v50 = vcombine.high %v3797_v37, %v3798_v1  ;;  %v11196_v2 = vmax.f32 %v8126_v0, %v3787_v12  ;;  %v3802_v54 = vmax.f32 %v8119_v30, %v3786_v16  ;;  %v3613_v18 = vpop.f32.mrb[12].mxu0  ;;  %6170 = vmatpush1.bf16.msra.mxu0 %v8864_v36  ;;  %v8870_v29 = vld [vmem:[%s12717_s7 + $0xa0] ss:$8 sps:$4 sm:$0xff]  }
 0x4ad   : > { %v3831_v9 = vcombine.low %v3799_v32, %v3800_v62  ;;  %v3832_v10 = vcombine.high %v3799_v32, %v3800_v62  ;;  %v11201_v39 = vmax.f32 %v8127_v34, %v3788_v44  ;;  %v3772_v53 = vpop.f32.mrb[20].mxu1  ;;  %v11203_v25 = vpop.f32.mrb[13].mxu0  ;;  %v11231_v52 = vadd.f32 %v3613_v18, %v11170_v5  ;;  %v8869_v32 = vld [vmem:[%s12717_s7 + $0x94] ss:$8 sps:$4 sm:$0xff]   ;;  %v8867_v62 = vld [vmem:[%s12717_s7 + $0x90] ss:$8 sps:$4 sm:$0xff]  }
 0x4ae   : > { %v3839_v21 = vrot.slane %v3829_v63, %v11183_v26  ;;  %v3846_v57 = vrot.slane %v3830_v50, %v11183_v26  ;;  %v3865_v47 = vcombine.low %v3801_v22, %v3802_v54  ;;  %v3866_v15 = vcombine.high %v3801_v22, %v3802_v54  ;;  %v11210_v41 = vpop.f32.mrb[21].mxu1  ;;  %v11212_v38 = vpop.f32.mrb[14].mxu0  ;;  %6171 = vmatprep.subr.bf16.mxu0 %v8869_v32 }
 0x4af   : > { %v3853_v3 = vrot.slane %v3831_v9, %v11183_v26  ;;  %v3860_v59 = vrot.slane %v3832_v10, %v11183_v26  ;;  %v3867_v33 = vcombine.low %v11196_v2, %v11201_v39  ;;  %v11220_v4 = vpop.f32.mrb[22].mxu1  ;;  %v11222_v42 = vpop.f32.mrb[15].mxu0  ;;  %v11252_v34 = vmul.f32 0.1, %v11231_v52 }
 0x4b0   : > { %v11225_v61 = vrot.slane %v3865_v47, %v11183_v26  ;;  %v11228_v58 = vrot.slane %v3866_v15, %v11183_v26  ;;  %v11233_v49 = vpop.f32.mrb[23].mxu1  ;;  %v11255_v27 = vadd.f32 %v3772_v53, %v11172_v14  ;;  %6172 = vmatpush1.bf16.msra.mxu0 %v8867_v62 }
 0x4b1   : > { %v3861_v35 = vcombine.low %v3839_v21, %v3853_v3  ;;  %v3862_v31 = vcombine.high %v3839_v21, %v3853_v3  ;;  %v3863_v46 = vcombine.low %v3846_v57, %v3860_v59  ;;  %v3864_v28 = vcombine.high %v3846_v57, %v3860_v59  ;;  %v8872_v57 = vld [vmem:[%s12717_s7 + $0xa4] ss:$8 sps:$4 sm:$0xff]  }
 0x4b2   : > { %v7724_v51 = vcombine.low %v3853_v3, %v3853_v3  ;;  %v7725_v55 = vcombine.high %v3853_v3, %v3853_v3  ;;  %v7726_v48 = vcombine.low %v3860_v59, %v3860_v59  ;;  %v7727_v20 = vcombine.high %v3860_v59, %v3860_v59  ;;  %6173 = vmatprep.subr.bf16.mxu0 %v8872_v57 }
 0x4b3   : > { %v3980_v0 = vrot.slane %v3861_v35, %v11183_v26  ;;  %v3997_v30 = vrot.slane %v3862_v31, %v11183_v26  ;;  %v11244_v43 = vrot.slane %v3863_v46, %v11183_v26  ;;  %v11247_v37 = vrot.slane %v3864_v28, %v11183_v26 }
 0x4b4   : > { %v3987_v7 = vrot.slane %v7724_v51, %v11183_v26  ;;  %v4004_v13 = vrot.slane %v7725_v55, %v11183_v26  ;;  %v11261_v16 = vrot.slane %v7726_v48, %v11183_v26  ;;  %v11264_v6 = vrot.slane %v7727_v20, %v11183_v26  ;;  %6174 = vmatpush1.bf16.msra.mxu0 %v8870_v29 }
 0x4b5   : > { %v3988_v1 = vcombine.high %v3980_v0, %v3980_v0  ;;  %v4005_v12 = vcombine.high %v3997_v30, %v3997_v30  ;;  %v4022_v63 = vcombine.high %v11244_v43, %v11244_v43  ;;  %v4039_v50 = vcombine.high %v11247_v37, %v11247_v37 }
 0x4b6   : > { %v3989_v22 = vcombine.high %v3987_v7, %v3987_v7  ;;  %v4006_v44 = vcombine.high %v4004_v13, %v4004_v13  ;;  %v4310_v54 = vsel %vm4309_vm10, %v3980_v0, -inf  ;;  %v4324_v56 = vsel %vm4309_vm10, %v3987_v7, -inf }
 0x4b7   : > { %v4317_v18 = vsel %vm4309_vm10, %v3988_v1, -inf  ;;  %v4338_v9 = vsel %vm4309_vm10, %v3997_v30, -inf  ;;  %v4311_v10 = vrot.slane %v4310_v54, 4  ;;  %v4325_v40 = vrot.slane %v4324_v56, 4 }
 0x4b8   : > { %v4318_v53 = vrot.slane %v4317_v18, 4  ;;  %v4331_v21 = vsel %vm4309_vm10, %v3989_v22, -inf  ;;  %v4339_v15 = vrot.slane %v4338_v9, 4  ;;  %v4345_v3 = vsel %vm4309_vm10, %v4005_v12, -inf  ;;  %v8873_v22 = vld [vmem:[%s12717_s7 + $0xb0] ss:$8 sps:$4 sm:$0xff]  }
 0x4b9   : > { %v4332_v47 = vrot.slane %v4331_v21, 4  ;;  %v4352_v59 = vsel %vm4309_vm10, %v4004_v13, -inf  ;;  %v4312_v35 = vmax.f32 %v4310_v54, %v4311_v10  ;;  %v4326_v46 = vmax.f32 %v4324_v56, %v4325_v40  ;;  %v8875_v13 = vld [vmem:[%s12717_s7 + $0xb4] ss:$8 sps:$4 sm:$0xff]  }
 0x4ba   : > { %v4319_v31 = vmax.f32 %v4317_v18, %v4318_v53  ;;  %v4346_v28 = vrot.slane %v4345_v3, 4  ;;  %v4340_v51 = vmax.f32 %v4338_v9, %v4339_v15  ;;  %v4353_v55 = vrot.slane %v4352_v59, 4  ;;  %6175 = vmatprep.subr.bf16.mxu0 %v8875_v13 }
 0x4bb   : > { %v4333_v36 = vmax.f32 %v4331_v21, %v4332_v47  ;;  %v4359_v48 = vsel %vm4309_vm10, %v4006_v44, -inf  ;;  %v4313_v20 = vrot.slane %v4312_v35, 2  ;;  %v4327_v30 = vrot.slane %v4326_v46, 2  ;;  %6176 = vmatpush1.bf16.msra.mxu0 %v8873_v22 }
 0x4bc   : > { %v4320_v0 = vrot.slane %v4319_v31, 2  ;;  %v4347_v7 = vmax.f32 %v4345_v3, %v4346_v28  ;;  %v4341_v1 = vrot.slane %v4340_v51, 2  ;;  %v4354_v12 = vmax.f32 %v4352_v59, %v4353_v55  ;;  %v8876_v3 = vld [vmem:[%s12717_s7 + $0xc0] ss:$8 sps:$4 sm:$0xff]  }
 0x4bd   : > { %v4334_v32 = vrot.slane %v4333_v36, 2  ;;  %v4360_v62 = vrot.slane %v4359_v48, 4  ;;  %v4314_v54 = vmax.f32 %v4312_v35, %v4313_v20  ;;  %v4328_v44 = vmax.f32 %v4326_v46, %v4327_v30  ;;  %v8878_v46 = vld [vmem:[%s12717_s7 + $0xc4] ss:$8 sps:$4 sm:$0xff]  }
 0x4be   : > { %v4321_v18 = vmax.f32 %v4319_v31, %v4320_v0  ;;  %v4348_v56 = vrot.slane %v4347_v7, 2  ;;  %v4342_v10 = vmax.f32 %v4340_v51, %v4341_v1  ;;  %v4355_v53 = vrot.slane %v4354_v12, 2  ;;  %6177 = vmatprep.subr.bf16.mxu0 %v8878_v46 }
 0x4bf   : > { %v4335_v9 = vmax.f32 %v4333_v36, %v4334_v32  ;;  %v4361_v40 = vmax.f32 %v4359_v48, %v4360_v62  ;;  %v4315_v21 = vrot.slane %v4314_v54, 1  ;;  %v4329_v47 = vrot.slane %v4328_v44, 1  ;;  %v8881_v48 = vld [vmem:[%s12717_s7 + $0xd4] ss:$8 sps:$4 sm:$0xff]   ;;  %6178 = vmatpush1.bf16.msra.mxu0 %v8876_v3 }
 0x4c0   : > { %v4322_v57 = vrot.slane %v4321_v18, 1  ;;  %v11293_v15 = vmax.f32 %v4347_v7, %v4348_v56  ;;  %v4343_v29 = vrot.slane %v4342_v10, 1  ;;  %v4356_v35 = vmax.f32 %v4354_v12, %v4355_v53  ;;  %6179 = vmatprep.subr.bf16.mxu0 %v8881_v48 }
 0x4c1   : > { %v4336_v59 = vrot.slane %v4335_v9, 1  ;;  %v4362_v31 = vrot.slane %v4361_v40, 2  ;;  %v4023_v28 = vcombine.high %v11261_v16, %v11261_v16  ;;  %v4040_v36 = vcombine.high %v11264_v6, %v11264_v6 }
 0x4c2   : > { %v11305_v51 = vmax.f32 %v4314_v54, %v4315_v21  ;;  %v11307_v55 = vmax.f32 %v4321_v18, %v4322_v57  ;;  %v11312_v20 = vmax.f32 %v4328_v44, %v4329_v47  ;;  %v4350_v0 = vrot.slane %v11293_v15, 1  ;;  %v8879_v44 = vld [vmem:[%s12717_s7 + $0xd0] ss:$8 sps:$4 sm:$0xff]  }
 0x4c3   : > { %v4357_v30 = vrot.slane %v4356_v35, 1  ;;  %v11315_v7 = vmax.f32 %v4361_v40, %v4362_v31  ;;  %v11317_v13 = vmax.f32 %v4335_v9, %v4336_v59  ;;  %v4366_v32 = vsel %vm4309_vm10, %v11244_v43, -inf  ;;  %6180 = vmatpush1.bf16.msra.mxu0 %v8879_v44  ;;  %v8882_v31 = vld [vmem:[%s12717_s7 + $0xe0] ss:$8 sps:$4 sm:$0xff]  }
 0x4c4   : > { %v4373_v1 = vsel %vm4309_vm10, %v4022_v63, -inf  ;;  %v4380_v12 = vsel %vm4309_vm10, %v11261_v16, -inf  ;;  %v11327_v62 = vmax.f32 %v4342_v10, %v4343_v29  ;;  %v4367_v54 = vrot.slane %v4366_v32, 4  ;;  %v8884_v63 = vld [vmem:[%s12717_s7 + $0xe4] ss:$8 sps:$4 sm:$0xff]  }
 0x4c5   : > { %12752 = vst [vmem:[#allocation16_spill] sm:$0xff] %v11317_v13  ;;  %v11329_v22 = vmax.f32 %v4356_v35, %v4357_v30  ;;  %v4374_v18 = vrot.slane %v4373_v1, 4  ;;  %v4381_v56 = vrot.slane %v4380_v12, 4  ;;  %v4387_v9 = vsel %vm4309_vm10, %v4023_v28, -inf  ;;  %6181 = vmatprep.subr.bf16.mxu0 %v8884_v63 }
 0x4c6   : > { %v4394_v43 = vsel %vm4309_vm10, %v11247_v37, -inf  ;;  %v4401_v16 = vsel %vm4309_vm10, %v4039_v50, -inf  ;;  %v4364_v10 = vrot.slane %v11315_v7, 1  ;;  %v4368_v53 = vmax.f32 %v4366_v32, %v4367_v54 }
 0x4c7   : > { %v4375_v40 = vmax.f32 %v4373_v1, %v4374_v18  ;;  %v4388_v21 = vrot.slane %v4387_v9, 4  ;;  %v4382_v57 = vmax.f32 %v4380_v12, %v4381_v56  ;;  %v4395_v47 = vrot.slane %v4394_v43, 4  ;;  %6182 = vmatpush1.bf16.msra.mxu0 %v8882_v31 }
 0x4c8   : > { %v4402_v3 = vrot.slane %v4401_v16, 4  ;;  %v4408_v37 = vsel %vm4309_vm10, %v11264_v6, -inf  ;;  %v4369_v59 = vrot.slane %v4368_v53, 2  ;;  %v4415_v30 = vsel %vm4309_vm10, %v4040_v36, -inf  ;;  %v8887_v6 = vld [vmem:[%s12717_s7 + $0xf4] ss:$8 sps:$4 sm:$0xff]  }
 0x4c9   : > { %v4376_v50 = vrot.slane %v4375_v40, 2  ;;  %v4389_v29 = vmax.f32 %v4387_v9, %v4388_v21  ;;  %v4409_v35 = vrot.slane %v4408_v37, 4  ;;  %v4383_v46 = vrot.slane %v4382_v57, 2  ;;  %v8885_v36 = vld [vmem:[%s12717_s7 + $0xf0] ss:$8 sps:$4 sm:$0xff]   ;;  %6183 = vmatprep.subr.bf16.mxu0 %v8887_v6 }
 0x4ca   : > { %v4396_v28 = vmax.f32 %v4394_v43, %v4395_v47  ;;  %v4403_v48 = vmax.f32 %v4401_v16, %v4402_v3  ;;  %v4370_v32 = vmax.f32 %v4368_v53, %v4369_v59  ;;  %v4416_v9 = vrot.slane %v4415_v30, 4 }
 0x4cb   : > { %v4377_v1 = vmax.f32 %v4375_v40, %v4376_v50  ;;  %v4390_v12 = vrot.slane %v4389_v29, 2  ;;  %v4410_v54 = vmax.f32 %v4408_v37, %v4409_v35  ;;  %v4384_v18 = vmax.f32 %v4382_v57, %v4383_v46  ;;  %6184 = vmatpush1.bf16.msra.mxu0 %v8885_v36 }
 0x4cc   : > { %v4397_v44 = vrot.slane %v4396_v28, 2  ;;  %v4404_v56 = vrot.slane %v4403_v48, 2  ;;  %v4371_v21 = vrot.slane %v4370_v32, 1  ;;  %v4417_v53 = vmax.f32 %v4415_v30, %v4416_v9 }
 0x4cd   : > { %v4378_v23 = vrot.slane %v4377_v1, 1  ;;  %v4391_v24 = vmax.f32 %v4389_v29, %v4390_v12  ;;  %v4411_v43 = vrot.slane %v4410_v54, 2  ;;  %v4385_v16 = vrot.slane %v4384_v18, 1 }
 0x4ce   : > { %v4398_v63 = vmax.f32 %v4396_v28, %v4397_v44  ;;  %v4405_v47 = vmax.f32 %v4403_v48, %v4404_v56  ;;  %v11358_v40 = vmax.f32 %v11293_v15, %v4350_v0  ;;  %v4372_v57 = vmax.f32 %v4370_v32, %v4371_v21  ;;  %v8890_v0 = vld [vmem:[%s12717_s7 + $0x104] ss:$8 sps:$4 sm:$0xff]  }
 0x4cf   : > { %v4392_v3 = vrot.slane %v4391_v24, 1  ;;  %v4412_v37 = vmax.f32 %v4410_v54, %v4411_v43  ;;  %v4386_v59 = vmax.f32 %v4384_v18, %v4385_v16  ;;  %v4418_v35 = vrot.slane %v4417_v53, 2  ;;  %6196 = vmatprep.subr.bf16.mxu0 %v8890_v0 }
 0x4d0   : > { %v4399_v50 = vrot.slane %v4398_v63, 1  ;;  %v4406_v29 = vrot.slane %v4405_v47, 1  ;;  %v11361_v31 = vmax.f32 %v11315_v7, %v4364_v10  ;;  %v4859_v28 = vsel %vm4858_vm11, %v11327_v62, %v11305_v51 }
 0x4d1   : > { %v4413_v46 = vrot.slane %v4412_v37, 1  ;;  %v4879_v15 = vsel %vm4858_vm11, %v11329_v22, %v11312_v20  ;;  %v11372_v48 = vmax.f32 %v4377_v1, %v4378_v23  ;;  %v4419_v6 = vmax.f32 %v4417_v53, %v4418_v35 }
 0x4d2   : > { %12753 = vst [vmem:[#allocation17_spill] sm:$0xff] %v11361_v31  ;;  %v4400_v30 = vmax.f32 %v4398_v63, %v4399_v50  ;;  %v4861_v7 = vsel %vm4860_vm12, %v4372_v57, %v4859_v28  ;;  %v11375_v10 = vmax.f32 %v4391_v24, %v4392_v3  ;;  %v11378_v32 = vsel %vm4860_vm12, %v4386_v59, %v4879_v15 }
 0x4d3   : > { %12755 = vst [vmem:[#allocation19_spill] sm:$0xff] %v11378_v32  ;;  %v3889_v51 = vrot.slane %v3867_v33, %v11183_v26  ;;  %v12756_v20 = vcombine.high %v11196_v2, %v11201_v39  ;;  %v11388_v62 = vmax.f32 %v4405_v47, %v4406_v29  ;;  %v11390_v22 = vmax.f32 %v4412_v37, %v4413_v46 }
 0x4d4   : > { %12754 = vst [vmem:[#allocation18_spill] sm:$0xff] %v11375_v10  ;;  %v4420_v24 = vrot.slane %v4419_v6, 1  ;;  %v11393_v1 = vsel %vm4862_vm13, %v4400_v30, %v4861_v7  ;;  %v11401_v56 = vmax.f32 %v11231_v52, %v11252_v34  ;;  %v11414_v63 = vmul.f32 0.1, %v11255_v27 }
 0x4d5   : > { %v3896_v23 = vrot.slane %v12756_v20, %v11183_v26  ;;  %12757 = vst [vmem:[#allocation20_spill] sm:$0xff] %v11390_v22  ;;  %v3897_v12 = vcombine.low %v11225_v61, %v3889_v51  ;;  %v3898_v54 = vcombine.high %v11225_v61, %v3889_v51  ;;  %v7728_v44 = vcombine.low %v3889_v51, %v3889_v51 }
 0x4d6   : > { %v7729_v2 = vcombine.high %v3889_v51, %v3889_v51  ;;  %v11416_v52 = vmax.f32 %v4419_v6, %v4420_v24 }
 0x4d7   : > { %v3899_v33 = vcombine.low %v11228_v58, %v3896_v23  ;;  %v3900_v18 = vcombine.high %v11228_v58, %v3896_v23  ;;  %v7730_v39 = vcombine.low %v3896_v23, %v3896_v23  ;;  %v4048_v9 = vrot.slane %v3897_v12, %v11183_v26 }
 0x4d8   : > { %v4065_v21 = vrot.slane %v3898_v54, %v11183_v26  ;;  %v7731_v36 = vcombine.high %v3896_v23, %v3896_v23  ;;  %v4055_v61 = vrot.slane %v7728_v44, %v11183_v26  ;;  %v4072_v16 = vrot.slane %v7729_v2, %v11183_v26  ;;  %12758 = vst [vmem:[#allocation21_spill] sm:$0xff] %v11416_v52 }
 0x4d9   : > { %v11406_v43 = vrot.slane %v3899_v33, %v11183_v26  ;;  %v11411_v58 = vrot.slane %v7730_v39, %v11183_v26  ;;  %v4056_v34 = vcombine.high %v4048_v9, %v4048_v9  ;;  %v11419_v53 = vrot.slane %v3900_v18, %v11183_v26 }
 0x4da   : > { %v4073_v47 = vcombine.high %v4065_v21, %v4065_v21  ;;  %v4057_v57 = vcombine.high %v4055_v61, %v4055_v61  ;;  %v4074_v3 = vcombine.high %v4072_v16, %v4072_v16  ;;  %v11424_v59 = vrot.slane %v7731_v36, %v11183_v26 }
 0x4db   : > { %v4090_v37 = vcombine.high %v11406_v43, %v11406_v43  ;;  %v4091_v50 = vcombine.high %v11411_v58, %v11411_v58  ;;  %v4422_v29 = vsel %vm4309_vm10, %v4048_v9, -inf  ;;  %v4429_v35 = vsel %vm4309_vm10, %v4056_v34, -inf }
 0x4dc   : > { %v4436_v46 = vsel %vm4309_vm10, %v4055_v61, -inf  ;;  %v4423_v28 = vrot.slane %v4422_v29, 4  ;;  %v4430_v15 = vrot.slane %v4429_v35, 4  ;;  %v4443_v30 = vsel %vm4309_vm10, %v4057_v57, -inf }
 0x4dd   : > { %v4437_v0 = vrot.slane %v4436_v46, 4  ;;  %v4444_v6 = vrot.slane %v4443_v30, 4  ;;  %v4450_v7 = vsel %vm4309_vm10, %v4065_v21, -inf  ;;  %v4457_v51 = vsel %vm4309_vm10, %v4073_v47, -inf }
 0x4de   : > { %v4464_v20 = vsel %vm4309_vm10, %v4072_v16, -inf  ;;  %v4424_v23 = vmax.f32 %v4422_v29, %v4423_v28  ;;  %v4431_v24 = vmax.f32 %v4429_v35, %v4430_v15  ;;  %v4451_v54 = vrot.slane %v4450_v7, 4 }
 0x4df   : > { %v4438_v12 = vmax.f32 %v4436_v46, %v4437_v0  ;;  %v4445_v33 = vmax.f32 %v4443_v30, %v4444_v6  ;;  %v4458_v18 = vrot.slane %v4457_v51, 4  ;;  %v4465_v44 = vrot.slane %v4464_v20, 4 }
 0x4e0   : > { %v4471_v2 = vsel %vm4309_vm10, %v4074_v3, -inf  ;;  %v4425_v39 = vrot.slane %v4424_v23, 2  ;;  %v4432_v9 = vrot.slane %v4431_v24, 2  ;;  %v4452_v61 = vmax.f32 %v4450_v7, %v4451_v54 }
 0x4e1   : > { %v4439_v36 = vrot.slane %v4438_v12, 2  ;;  %v4446_v34 = vrot.slane %v4445_v33, 2  ;;  %v4459_v57 = vmax.f32 %v4457_v51, %v4458_v18  ;;  %v4466_v21 = vmax.f32 %v4464_v20, %v4465_v44 }
 0x4e2   : > { %v4472_v19 = vrot.slane %v4471_v2, 4  ;;  %v4426_v47 = vmax.f32 %v4424_v23, %v4425_v39  ;;  %v11436_v17 = vmax.f32 %v4431_v24, %v4432_v9  ;;  %v4453_v29 = vrot.slane %v4452_v61, 2 }
 0x4e3   : > { %v4440_v16 = vmax.f32 %v4438_v12, %v4439_v36  ;;  %v11438_v35 = vmax.f32 %v4445_v33, %v4446_v34  ;;  %v4460_v46 = vrot.slane %v4459_v57, 2  ;;  %v4467_v28 = vrot.slane %v4466_v21, 2 }
 0x4e4   : > { %v4473_v15 = vmax.f32 %v4471_v2, %v4472_v19  ;;  %v4107_v3 = vcombine.high %v11419_v53, %v11419_v53  ;;  %v4427_v0 = vrot.slane %v4426_v47, 1  ;;  %v4454_v6 = vmax.f32 %v4452_v61, %v4453_v29 }
 0x4e5   : > { %v4441_v30 = vrot.slane %v4440_v16, 1  ;;  %v4108_v7 = vcombine.high %v11424_v59, %v11424_v59  ;;  %v4434_v51 = vrot.slane %v11436_v17, 1  ;;  %v4468_v20 = vmax.f32 %v4466_v21, %v4467_v28 }
 0x4e6   : > { %v4474_v23 = vrot.slane %v4473_v15, 2  ;;  %v4428_v24 = vmax.f32 %v4426_v47, %v4427_v0  ;;  %v11446_v54 = vmax.f32 %v4459_v57, %v4460_v46  ;;  %v4478_v19 = vsel %vm4309_vm10, %v11406_v43, -inf }
 0x4e7   : > { %v11450_v33 = vmax.f32 %v4440_v16, %v4441_v30  ;;  %v4455_v18 = vrot.slane %v4454_v6, 1  ;;  %v4479_v44 = vrot.slane %v4478_v19, 4  ;;  %v4485_v2 = vsel %vm4309_vm10, %v4090_v37, -inf }
 0x4e8   : > { %v4469_v39 = vrot.slane %v4468_v20, 1  ;;  %v4486_v9 = vrot.slane %v4485_v2, 4  ;;  %v4492_v36 = vsel %vm4309_vm10, %v11411_v58, -inf  ;;  %v4499_v61 = vsel %vm4309_vm10, %v4091_v50, -inf }
 0x4e9   : > { %12759 = vst [vmem:[#allocation22_spill] sm:$0xff] %v11450_v33  ;;  %v11456_v34 = vmax.f32 %v4473_v15, %v4474_v23  ;;  %v4480_v57 = vmax.f32 %v4478_v19, %v4479_v44  ;;  %v4493_v21 = vrot.slane %v4492_v36, 4  ;;  %v4500_v47 = vrot.slane %v4499_v61, 4 }
 0x4ea   : > { %v11458_v29 = vmax.f32 %v4485_v2, %v4486_v9  ;;  %v4506_v43 = vsel %vm4309_vm10, %v11419_v53, -inf  ;;  %v4513_v16 = vsel %vm4309_vm10, %v4107_v3, -inf  ;;  %v4520_v37 = vsel %vm4309_vm10, %v11424_v59, -inf }
 0x4eb   : > { %v4481_v46 = vrot.slane %v4480_v57, 2  ;;  %v4494_v28 = vmax.f32 %v4492_v36, %v4493_v21  ;;  %v11465_v58 = vmax.f32 %v4499_v61, %v4500_v47  ;;  %v4507_v50 = vrot.slane %v4506_v43, 4 }
 0x4ec   : > { %v11467_v15 = vmax.f32 %v4454_v6, %v4455_v18  ;;  %v4514_v0 = vrot.slane %v4513_v16, 4  ;;  %v4521_v30 = vrot.slane %v4520_v37, 4  ;;  %v4527_v23 = vsel %vm4309_vm10, %v4108_v7, -inf }
 0x4ed   : > { %v11470_v19 = vmax.f32 %v4468_v20, %v4469_v39  ;;  %v4482_v44 = vmax.f32 %v4480_v57, %v4481_v46  ;;  %v4495_v53 = vrot.slane %v4494_v28, 2  ;;  %v4508_v2 = vmax.f32 %v4506_v43, %v4507_v50 }
 0x4ee   : > { %v4522_v9 = vmax.f32 %v4520_v37, %v4521_v30  ;;  %v4528_v59 = vrot.slane %v4527_v23, 4  ;;  %v11475_v36 = vsel %vm4864_vm14, %v4428_v24, %v11393_v1  ;;  %v11478_v21 = vmax.f32 %v4513_v16, %v4514_v0 }
 0x4ef   : > { %12760 = vst [vmem:[#allocation23_spill] sm:$0xff] %v11470_v19  ;;  %v4496_v61 = vmax.f32 %v4494_v28, %v4495_v53  ;;  %v4509_v18 = vrot.slane %v4508_v2, 2  ;;  %v4483_v7 = vrot.slane %v4482_v44, 1  ;;  %v8121_v39 = vadd.f32 %v11203_v25, %v11175_v45 }
 0x4f0   : > { %v4523_v20 = vrot.slane %v4522_v9, 2  ;;  %v8129_v57 = vadd.f32 %v11210_v41, %v11177_v60  ;;  %v3807_v1 = vmax.f32 %v11255_v27, %v11414_v63  ;;  %v8122_v24 = vadd.f32 %v11212_v38, %v11170_v5 }
 0x4f1   : > { %v4497_v47 = vrot.slane %v4496_v61, 1  ;;  %v4510_v43 = vmax.f32 %v4508_v2, %v4509_v18  ;;  %v11488_v37 = vmax.f32 %v4527_v23, %v4528_v59  ;;  %v3790_v16 = vmul.f32 0.1, %v8121_v39 }
 0x4f2   : > { %v3792_v46 = vmul.f32 0.1, %v8129_v57  ;;  %v8130_v28 = vadd.f32 %v11220_v4, %v11172_v14  ;;  %v11492_v25 = vmax.f32 %v4522_v9, %v4523_v20  ;;  %v3793_v0 = vmul.f32 0.1, %v8122_v24 }
 0x4f3   : > { %12761 = vst [vmem:[#allocation24_spill] sm:$0xff] %v11488_v37  ;;  %v4511_v50 = vrot.slane %v4510_v43, 1  ;;  %v8123_v41 = vadd.f32 %v11222_v42, %v11175_v45  ;;  %v11496_v30 = vmax.f32 %v4482_v44, %v4483_v7  ;;  %v3806_v27 = vmax.f32 %v8121_v39, %v3790_v16 }
 0x4f4   : > { %12762 = vst [vmem:[#allocation25_spill] sm:$0xff] %v11492_v25  ;;  %v3808_v63 = vmax.f32 %v8129_v57, %v3792_v46  ;;  %v3795_v53 = vmul.f32 0.1, %v8130_v28  ;;  %v11498_v5 = vmax.f32 %v4496_v61, %v4497_v47  ;;  %v11500_v38 = vmax.f32 %v8122_v24, %v3793_v0 }
 0x4f5   : > { %v3794_v23 = vmul.f32 0.1, %v8123_v41  ;;  %v8131_v14 = vadd.f32 %v11233_v49, %v11177_v60  ;;  %v3901_v4 = vcombine.low %v11401_v56, %v3806_v27  ;;  %v3902_v2 = vcombine.high %v11401_v56, %v3806_v27 }
 0x4f6   : > { %12763 = vst [vmem:[#allocation26_spill] sm:$0xff] %v11498_v5  ;;  %v3903_v9 = vcombine.low %v3807_v1, %v3808_v63  ;;  %v3904_v59 = vcombine.high %v3807_v1, %v3808_v63  ;;  %v11506_v45 = vmax.f32 %v4510_v43, %v4511_v50  ;;  %v11509_v44 = vmax.f32 %v8130_v28, %v3795_v53 }
 0x4f7   : > { %v11511_v61 = vmax.f32 %v8123_v41, %v3794_v23  ;;  %v3911_v18 = vrot.slane %v3901_v4, %v11183_v26  ;;  %v3918_v7 = vrot.slane %v3902_v2, %v11183_v26  ;;  %v3796_v39 = vmul.f32 0.1, %v8131_v14 }
 0x4f8   : > { %v3925_v60 = vrot.slane %v3903_v9, %v11183_v26  ;;  %v3932_v49 = vrot.slane %v3904_v59, %v11183_v26  ;;  %v11524_v57 = vmax.f32 %v11436_v17, %v4434_v51 }
 0x4f9   : > { %v11536_v53 = vmax.f32 %v8131_v14, %v3796_v39 }
 0x4fa   : > { %v3933_v47 = vcombine.low %v3911_v18, %v3925_v60  ;;  %v3934_v43 = vcombine.high %v3911_v18, %v3925_v60  ;;  %v3935_v1 = vcombine.low %v3918_v7, %v3932_v49  ;;  %v3936_v24 = vcombine.high %v3918_v7, %v3932_v49 }
 0x4fb   : > { %v7732_v16 = vcombine.low %v3925_v60, %v3925_v60  ;;  %v7733_v46 = vcombine.high %v3925_v60, %v3925_v60  ;;  %v7734_v28 = vcombine.low %v3932_v49, %v3932_v49  ;;  %v7735_v50 = vcombine.high %v3932_v49, %v3932_v49 }
 0x4fc   : > { %v4116_v0 = vrot.slane %v3933_v47, %v11183_v26  ;;  %v4133_v41 = vrot.slane %v3934_v43, %v11183_v26  ;;  %v11529_v27 = vrot.slane %v3935_v1, %v11183_v26  ;;  %v11532_v63 = vrot.slane %v3936_v24, %v11183_v26 }
 0x4fd   : > { %v4123_v17 = vrot.slane %v7732_v16, %v11183_v26  ;;  %v4140_v51 = vrot.slane %v7733_v46, %v11183_v26  ;;  %v11540_v9 = vrot.slane %v7734_v28, %v11183_v26  ;;  %v11543_v59 = vrot.slane %v7735_v50, %v11183_v26 }
 0x4fe   : > { %v4124_v4 = vcombine.high %v4116_v0, %v4116_v0  ;;  %v4141_v2 = vcombine.high %v4133_v41, %v4133_v41  ;;  %v4158_v60 = vcombine.high %v11529_v27, %v11529_v27  ;;  %v4534_v14 = vsel %vm4309_vm10, %v4116_v0, -inf }
 0x4ff   : > { %v4125_v18 = vcombine.high %v4123_v17, %v4123_v17  ;;  %v4142_v7 = vcombine.high %v4140_v51, %v4140_v51  ;;  %v4548_v47 = vsel %vm4309_vm10, %v4123_v17, -inf  ;;  %v4562_v43 = vsel %vm4309_vm10, %v4133_v41, -inf }
 0x500   : > { %v4541_v39 = vsel %vm4309_vm10, %v4124_v4, -inf  ;;  %v4535_v1 = vrot.slane %v4534_v14, 4  ;;  %v4549_v16 = vrot.slane %v4548_v47, 4  ;;  %v4563_v50 = vrot.slane %v4562_v43, 4 }
 0x501   : > { %v4542_v24 = vrot.slane %v4541_v39, 4  ;;  %v4555_v46 = vsel %vm4309_vm10, %v4125_v18, -inf  ;;  %v4569_v42 = vsel %vm4309_vm10, %v4141_v2, -inf  ;;  %v4576_v6 = vsel %vm4309_vm10, %v4140_v51, -inf }
 0x502   : > { %v4556_v28 = vrot.slane %v4555_v46, 4  ;;  %v4536_v12 = vmax.f32 %v4534_v14, %v4535_v1  ;;  %v4550_v0 = vmax.f32 %v4548_v47, %v4549_v16  ;;  %v4570_v3 = vrot.slane %v4569_v42, 4 }
 0x503   : > { %v4543_v23 = vmax.f32 %v4541_v39, %v4542_v24  ;;  %v4564_v20 = vmax.f32 %v4562_v43, %v4563_v50  ;;  %v4577_v17 = vrot.slane %v4576_v6, 4  ;;  %v4583_v41 = vsel %vm4309_vm10, %v4142_v7, -inf }
 0x504   : > { %v4557_v4 = vmax.f32 %v4555_v46, %v4556_v28  ;;  %v4537_v56 = vrot.slane %v4536_v12, 2  ;;  %v4551_v5 = vrot.slane %v4550_v0, 2  ;;  %v4571_v19 = vmax.f32 %v4569_v42, %v4570_v3 }
 0x505   : > { %v4544_v49 = vrot.slane %v4543_v23, 2  ;;  %v4565_v33 = vrot.slane %v4564_v20, 2  ;;  %v4578_v52 = vmax.f32 %v4576_v6, %v4577_v17  ;;  %v4584_v22 = vrot.slane %v4583_v41, 4 }
 0x506   : > { %v4558_v18 = vrot.slane %v4557_v4, 2  ;;  %v4538_v2 = vmax.f32 %v4536_v12, %v4537_v56  ;;  %v4552_v51 = vmax.f32 %v4550_v0, %v4551_v5  ;;  %v4572_v14 = vrot.slane %v4571_v19, 2 }
 0x507   : > { %v4545_v32 = vmax.f32 %v4543_v23, %v4544_v49  ;;  %v4566_v47 = vmax.f32 %v4564_v20, %v4565_v33  ;;  %v4579_v1 = vrot.slane %v4578_v52, 2  ;;  %v4585_v24 = vmax.f32 %v4583_v41, %v4584_v22 }
 0x508   : > { %v4559_v39 = vmax.f32 %v4557_v4, %v4558_v18  ;;  %v4539_v43 = vrot.slane %v4538_v2, 1  ;;  %v4553_v46 = vrot.slane %v4552_v51, 1  ;;  %v4573_v7 = vmax.f32 %v4571_v19, %v4572_v14 }
 0x509   : > { %v4546_v16 = vrot.slane %v4545_v32, 1  ;;  %v4567_v50 = vrot.slane %v4566_v47, 1  ;;  %v4580_v10 = vmax.f32 %v4578_v52, %v4579_v1  ;;  %v4586_v3 = vrot.slane %v4585_v24, 2 }
 0x50a   : > { %v4560_v28 = vrot.slane %v4559_v39, 1  ;;  %v4159_v6 = vcombine.high %v11540_v9, %v11540_v9  ;;  %v4176_v12 = vcombine.high %v11543_v59, %v11543_v59  ;;  %v4540_v5 = vmax.f32 %v4538_v2, %v4539_v43 }
 0x50b   : > { %v11561_v42 = vmax.f32 %v4545_v32, %v4546_v16  ;;  %v4554_v33 = vmax.f32 %v4552_v51, %v4553_v46  ;;  %v4574_v56 = vrot.slane %v4573_v7, 1  ;;  %v4581_v22 = vrot.slane %v4580_v10, 1 }
 0x50c   : > { %v4587_v20 = vmax.f32 %v4585_v24, %v4586_v3  ;;  %v11563_v23 = vmax.f32 %v4559_v39, %v4560_v28  ;;  %v4590_v19 = vsel %vm4309_vm10, %v11529_v27, -inf  ;;  %v4597_v52 = vsel %vm4309_vm10, %v4158_v60, -inf }
 0x50d   : > { %v4604_v49 = vsel %vm4309_vm10, %v11540_v9, -inf  ;;  %v4568_v0 = vmax.f32 %v4566_v47, %v4567_v50  ;;  %v4582_v4 = vmax.f32 %v4580_v10, %v4581_v22  ;;  %v4591_v17 = vrot.slane %v4590_v19, 4 }
 0x50e   : > { %12764 = vst [vmem:[#allocation27_spill] sm:$0xff] %v11563_v23  ;;  %v4598_v41 = vrot.slane %v4597_v52, 4  ;;  %v4605_v32 = vrot.slane %v4604_v49, 4  ;;  %v4611_v18 = vsel %vm4309_vm10, %v4159_v6, -inf  ;;  %v4618_v2 = vsel %vm4309_vm10, %v11532_v63, -inf }
 0x50f   : > { %v12765_v51 = vcombine.high %v11532_v63, %v11532_v63  ;;  %v4588_v14 = vrot.slane %v4587_v20, 1  ;;  %v4592_v60 = vmax.f32 %v4590_v19, %v4591_v17  ;;  %v4612_v1 = vrot.slane %v4611_v18, 4 }
 0x510   : > { %v4599_v39 = vmax.f32 %v4597_v52, %v4598_v41  ;;  %v4606_v9 = vmax.f32 %v4604_v49, %v4605_v32  ;;  %v4619_v47 = vrot.slane %v4618_v2, 4  ;;  %v4632_v24 = vsel %vm4309_vm10, %v11543_v59, -inf }
 0x511   : > { %v4625_v27 = vsel %vm4309_vm10, %v12765_v51, -inf  ;;  %v4593_v43 = vrot.slane %v4592_v60, 2  ;;  %v4613_v46 = vmax.f32 %v4611_v18, %v4612_v1  ;;  %v4633_v28 = vrot.slane %v4632_v24, 4 }
 0x512   : > { %v4626_v10 = vrot.slane %v4625_v27, 4  ;;  %v4600_v16 = vrot.slane %v4599_v39, 2  ;;  %v4607_v50 = vrot.slane %v4606_v9, 2  ;;  %v4620_v3 = vmax.f32 %v4618_v2, %v4619_v47 }
 0x513   : > { %v4639_v63 = vsel %vm4309_vm10, %v4176_v12, -inf  ;;  %v4594_v22 = vmax.f32 %v4592_v60, %v4593_v43  ;;  %v4614_v19 = vrot.slane %v4613_v46, 2  ;;  %v4634_v52 = vmax.f32 %v4632_v24, %v4633_v28 }
 0x514   : > { %v4627_v6 = vmax.f32 %v4625_v27, %v4626_v10  ;;  %v4601_v51 = vmax.f32 %v4599_v39, %v4600_v16  ;;  %v4608_v17 = vmax.f32 %v4606_v9, %v4607_v50  ;;  %v4621_v49 = vrot.slane %v4620_v3, 2 }
 0x515   : > { %v4640_v32 = vrot.slane %v4639_v63, 4  ;;  %v4595_v25 = vrot.slane %v4594_v22, 1  ;;  %v4615_v59 = vmax.f32 %v4613_v46, %v4614_v19  ;;  %v4635_v31 = vrot.slane %v4634_v52, 2 }
 0x516   : > { %v4628_v41 = vrot.slane %v4627_v6, 2  ;;  %v4602_v23 = vrot.slane %v4601_v51, 1  ;;  %v4609_v13 = vrot.slane %v4608_v17, 1  ;;  %v4622_v18 = vmax.f32 %v4620_v3, %v4621_v49 }
 0x517   : > { %v4641_v37 = vmax.f32 %v4639_v63, %v4640_v32  ;;  %v11580_v2 = vmax.f32 %v4573_v7, %v4574_v56  ;;  %v4596_v27 = vmax.f32 %v4594_v22, %v4595_v25  ;;  %v4616_v12 = vrot.slane %v4615_v59, 1 }
 0x518   : > { %v4629_v1 = vmax.f32 %v4627_v6, %v4628_v41  ;;  %v4636_v60 = vmax.f32 %v4634_v52, %v4635_v31  ;;  %v11582_v39 = vmax.f32 %v4587_v20, %v4588_v14  ;;  %v4610_v47 = vmax.f32 %v4608_v17, %v4609_v13 }
 0x519   : > { %v4623_v9 = vrot.slane %v4622_v18, 1  ;;  %v4642_v10 = vrot.slane %v4641_v37, 2  ;;  %v4893_v16 = vsel %vm4858_vm11, %v4568_v0, %v4540_v5  ;;  %v4907_v46 = vsel %vm4858_vm11, %v4582_v4, %v4554_v33 }
 0x51a   : > { %v4630_v24 = vrot.slane %v4629_v1, 1  ;;  %v4637_v43 = vrot.slane %v4636_v60, 1  ;;  %v11586_v28 = vmax.f32 %v4601_v51, %v4602_v23  ;;  %v4894_v7 = vsel %vm4860_vm12, %v4596_v27, %v4893_v16 }
 0x51b   : > { %v4624_v50 = vmax.f32 %v4622_v18, %v4623_v9  ;;  %v4643_v3 = vmax.f32 %v4641_v37, %v4642_v10  ;;  %v11589_v25 = vmax.f32 %v4615_v59, %v4616_v12  ;;  %v11592_v31 = vsel %vm4860_vm12, %v4610_v47, %v4907_v46 }
 0x51c   : > { %v12766_v13 = vcombine.low %v11500_v38, %v11511_v61  ;;  %v12767_v5 = vcombine.high %v11500_v38, %v11511_v61  ;;  %v3939_v23 = vcombine.low %v11509_v44, %v11536_v53  ;;  %v3940_v0 = vcombine.high %v11509_v44, %v11536_v53 }
 0x51d   : > { %v4644_v20 = vrot.slane %v4643_v3, 1  ;;  %v11603_v37 = vsel %vm4862_vm13, %v4624_v50, %v4894_v7  ;;  %v11609_v4 = vmax.f32 %v4629_v1, %v4630_v24  ;;  %v11611_v14 = vmax.f32 %v4636_v60, %v4637_v43 }
 0x51e   : > { %v3947_v56 = vrot.slane %v12766_v13, %v11183_v26  ;;  %v3954_v33 = vrot.slane %v12767_v5, %v11183_v26  ;;  %v12769_v6 = vrot.slane %v11458_v29, 2  ;;  %v4516_v38 = vrot.slane %v11478_v21, 2 }
 0x51f   : > { %12768 = vst [vmem:[#allocation28_spill] sm:$0xff] %v11611_v14  ;;  %v3961_v61 = vrot.slane %v3939_v23, %v11183_v26  ;;  %v3968_v22 = vrot.slane %v3940_v0, %v11183_v26  ;;  %v12770_v51 = vrot.slane %v11446_v54, 1  ;;  %v11627_v53 = vmax.f32 %v4643_v3, %v4644_v20 }
 0x520   : > { %v11616_v63 = vmax.f32 %v11458_v29, %v12769_v6  ;;  %v11631_v29 = vmax.f32 %v11478_v21, %v4516_v38 }
 0x521   : > { %v11624_v19 = vmax.f32 %v11446_v54, %v12770_v51  ;;  %v3969_v49 = vcombine.low %v3947_v56, %v3961_v61  ;;  %v3970_v41 = vcombine.high %v3947_v56, %v3961_v61  ;;  %v3971_v32 = vcombine.low %v3954_v33, %v3968_v22 }
 0x522   : > { %v3972_v59 = vcombine.high %v3954_v33, %v3968_v22  ;;  %v7736_v18 = vcombine.low %v3961_v61, %v3961_v61  ;;  %v7737_v1 = vcombine.high %v3961_v61, %v3961_v61  ;;  %v7738_v27 = vcombine.low %v3968_v22, %v3968_v22 }
 0x523   : > { %v7739_v54 = vcombine.high %v3968_v22, %v3968_v22  ;;  %v4184_v12 = vrot.slane %v3969_v49, %v11183_v26  ;;  %v4201_v60 = vrot.slane %v3970_v41, %v11183_v26  ;;  %v4218_v47 = vrot.slane %v3971_v32, %v11183_v26 }
 0x524   : > { %v11638_v9 = vrot.slane %v3972_v59, %v11183_v26  ;;  %v4191_v21 = vrot.slane %v7736_v18, %v11183_v26  ;;  %v4208_v10 = vrot.slane %v7737_v1, %v11183_v26  ;;  %v11643_v24 = vrot.slane %v7738_v27, %v11183_v26 }
 0x525   : > { %v11646_v43 = vrot.slane %v7739_v54, %v11183_v26  ;;  %v4192_v16 = vcombine.high %v4184_v12, %v4184_v12  ;;  %v4209_v46 = vcombine.high %v4201_v60, %v4201_v60  ;;  %v4226_v50 = vcombine.high %v4218_v47, %v4218_v47 }
 0x526   : > { %v4193_v7 = vcombine.high %v4191_v21, %v4191_v21  ;;  %v4210_v13 = vcombine.high %v4208_v10, %v4208_v10  ;;  %v4227_v56 = vcombine.high %v11643_v24, %v11643_v24  ;;  %v4646_v33 = vsel %vm4309_vm10, %v4184_v12, -inf }
 0x527   : > { %v4653_v20 = vsel %vm4309_vm10, %v4192_v16, -inf  ;;  %v4660_v23 = vsel %vm4309_vm10, %v4191_v21, -inf  ;;  %v4674_v0 = vsel %vm4309_vm10, %v4201_v60, -inf  ;;  %v4647_v6 = vrot.slane %v4646_v33, 4 }
 0x528   : > { %v4654_v38 = vrot.slane %v4653_v20, 4  ;;  %v4661_v61 = vrot.slane %v4660_v23, 4  ;;  %v4667_v22 = vsel %vm4309_vm10, %v4193_v7, -inf  ;;  %v4675_v49 = vrot.slane %v4674_v0, 4 }
 0x529   : > { %v4668_v51 = vrot.slane %v4667_v22, 4  ;;  %v4681_v41 = vsel %vm4309_vm10, %v4209_v46, -inf  ;;  %v4688_v32 = vsel %vm4309_vm10, %v4208_v10, -inf  ;;  %v4648_v59 = vmax.f32 %v4646_v33, %v4647_v6 }
 0x52a   : > { %v4655_v18 = vmax.f32 %v4653_v20, %v4654_v38  ;;  %v4662_v1 = vmax.f32 %v4660_v23, %v4661_v61  ;;  %v4682_v27 = vrot.slane %v4681_v41, 4  ;;  %v4676_v12 = vmax.f32 %v4674_v0, %v4675_v49 }
 0x52b   : > { %v4669_v54 = vmax.f32 %v4667_v22, %v4668_v51  ;;  %v4689_v21 = vrot.slane %v4688_v32, 4  ;;  %v4695_v60 = vsel %vm4309_vm10, %v4210_v13, -inf  ;;  %v4649_v16 = vrot.slane %v4648_v59, 2 }
 0x52c   : > { %v4656_v17 = vrot.slane %v4655_v18, 2  ;;  %v4663_v52 = vrot.slane %v4662_v1, 2  ;;  %v4683_v5 = vmax.f32 %v4681_v41, %v4682_v27  ;;  %v4677_v3 = vrot.slane %v4676_v12, 2 }
 0x52d   : > { %v4670_v7 = vrot.slane %v4669_v54, 2  ;;  %v4690_v44 = vmax.f32 %v4688_v32, %v4689_v21  ;;  %v4696_v26 = vrot.slane %v4695_v60, 4  ;;  %v4650_v46 = vmax.f32 %v4648_v59, %v4649_v16 }
 0x52e   : > { %v4657_v14 = vmax.f32 %v4655_v18, %v4656_v17  ;;  %v4664_v10 = vmax.f32 %v4662_v1, %v4663_v52  ;;  %v4684_v33 = vrot.slane %v4683_v5, 2  ;;  %v4678_v23 = vmax.f32 %v4676_v12, %v4677_v3 }
 0x52f   : > { %v11662_v20 = vmax.f32 %v4669_v54, %v4670_v7  ;;  %v4691_v6 = vrot.slane %v4690_v44, 2  ;;  %v4697_v0 = vmax.f32 %v4695_v60, %v4696_v26  ;;  %v4651_v38 = vrot.slane %v4650_v46, 1 }
 0x530   : > { %v4658_v61 = vrot.slane %v4657_v14, 1  ;;  %v4665_v13 = vrot.slane %v4664_v10, 1  ;;  %v4685_v22 = vmax.f32 %v4683_v5, %v4684_v33  ;;  %v4679_v49 = vrot.slane %v4678_v23, 1 }
 0x531   : > { %v4672_v51 = vrot.slane %v11662_v20, 1  ;;  %v4692_v41 = vmax.f32 %v4690_v44, %v4691_v6  ;;  %v4698_v27 = vrot.slane %v4697_v0, 2  ;;  %v4652_v32 = vmax.f32 %v4650_v46, %v4651_v38 }
 0x532   : > { %v11665_v21 = vmax.f32 %v4664_v10, %v4665_v13  ;;  %v4702_v52 = vsel %vm4309_vm10, %v4218_v47, -inf  ;;  %v4709_v17 = vsel %vm4309_vm10, %v4226_v50, -inf  ;;  %v11669_v59 = vmax.f32 %v4678_v23, %v4679_v49 }
 0x533   : > { %v4693_v3 = vrot.slane %v4692_v41, 1  ;;  %v11671_v26 = vmax.f32 %v4697_v0, %v4698_v27  ;;  %v4703_v18 = vrot.slane %v4702_v52, 4  ;;  %v4710_v1 = vrot.slane %v4709_v17, 4 }
 0x534   : > { %v4716_v5 = vsel %vm4309_vm10, %v11643_v24, -inf  ;;  %v4723_v44 = vsel %vm4309_vm10, %v4227_v56, -inf  ;;  %v4730_v54 = vsel %vm4309_vm10, %v11638_v9, -inf  ;;  %v12771_v12 = vand.u32 1, %v9552_v8 }
 0x535   : > { %v11684_v50 = vmax.f32 %v4692_v41, %v4693_v3  ;;  %v4704_v60 = vmax.f32 %v4702_v52, %v4703_v18  ;;  %v4717_v16 = vrot.slane %v4716_v5, 4  ;;  %v4724_v7 = vrot.slane %v4723_v44, 4 }
 0x536   : > { %vm11680_vm15 = vcmp.ne.s32.totalorder %v12771_v12, 0  ;;  %v4711_v46 = vmax.f32 %v4709_v17, %v4710_v1  ;;  %v4731_v10 = vrot.slane %v4730_v54, 4  ;;  %v12774_v24 = vcombine.high %v11638_v9, %v11638_v9 }
 0x537   : > { %v4744_v33 = vsel %vm4309_vm10, %v11646_v43, -inf  ;;  %v4705_v23 = vrot.slane %v4704_v60, 2  ;;  %v4718_v6 = vmax.f32 %v4716_v5, %v4717_v16  ;;  %v11692_v0 = vmax.f32 %v4723_v44, %v4724_v7 }
 0x538   : > { %v4737_v56 = vsel %vm4309_vm10, %v12774_v24, -inf  ;;  %v4712_v13 = vrot.slane %v4711_v46, 2  ;;  %v4732_v49 = vmax.f32 %v4730_v54, %v4731_v10  ;;  %v4745_v41 = vrot.slane %v4744_v33, 4 }
 0x539   : > { %v4738_v38 = vrot.slane %v4737_v56, 4  ;;  %v12775_v27 = vcombine.high %v11646_v43, %v11646_v43  ;;  %v4706_v9 = vmax.f32 %v4704_v60, %v4705_v23  ;;  %v4719_v17 = vrot.slane %v4718_v6, 2 }
 0x53a   : > { %v4733_v1 = vrot.slane %v4732_v49, 2  ;;  %v4746_v12 = vmax.f32 %v4744_v33, %v4745_v41  ;;  %v4896_v44 = vsel %vm4864_vm14, %v4652_v32, %v11603_v37  ;;  %v12776_v7 = vrot.slane %v11616_v63, 1 }
 0x53b   : > { %v4751_v52 = vsel %vm4309_vm10, %v12775_v27, -inf  ;;  %v4739_v18 = vmax.f32 %v4737_v56, %v4738_v38  ;;  %v4707_v16 = vrot.slane %v4706_v9, 1  ;;  %v4720_v54 = vmax.f32 %v4718_v6, %v4719_v17 }
 0x53c   : > { %v4752_v5 = vrot.slane %v4751_v52, 4  ;;  %v4491_v43 = vmax.f32 %v11616_v63, %v12776_v7  ;;  %v4518_v10 = vrot.slane %v11631_v29, 1  ;;  %v4734_v24 = vmax.f32 %v4732_v49, %v4733_v1 }
 0x53d   : > { %v4747_v60 = vrot.slane %v4746_v12, 2  ;;  %v4659_v27 = vmax.f32 %v4657_v14, %v4658_v61  ;;  %v4708_v56 = vmax.f32 %v4706_v9, %v4707_v16  ;;  %v4721_v38 = vrot.slane %v4720_v54, 1 }
 0x53e   : > { %v11705_v23 = vmax.f32 %v4751_v52, %v4752_v5  ;;  %v4519_v33 = vmax.f32 %v11631_v29, %v4518_v10  ;;  %v4686_v41 = vrot.slane %v4685_v22, 1  ;;  %v4735_v3 = vrot.slane %v4734_v24, 1 }
 0x53f   : > { %v11708_v37 = vmax.f32 %v4746_v12, %v4747_v60  ;;  %v4713_v32 = vmax.f32 %v4711_v46, %v4712_v13  ;;  %v4740_v6 = vrot.slane %v4739_v18, 2  ;;  %v11710_v17 = vmax.f32 %v4720_v54, %v4721_v38 }
 0x540   : > { %v4687_v63 = vmax.f32 %v4685_v22, %v4686_v41  ;;  %v12777_v7 = vand.u32 1, %v9561_v11  ;;  %v12778_v49 = vmov 0.0   ;;  %v4736_v61 = vmax.f32 %v4734_v24, %v4735_v3 }
 0x541   : > { %v11717_v14 = vsel %vm11680_vm15, 1.0, %v12778_v49  ;;  %v4749_v29 = vrot.slane %v11708_v37, 1  ;;  %v4714_v52 = vrot.slane %v4713_v32, 1  ;;  %v4741_v9 = vmax.f32 %v4739_v18, %v4740_v6 }
 0x542   : > { %vm4783_vm1 = vcmp.ne.s32.totalorder %v12777_v7, 0  ;;  %v4872_v22 = vsel %vm4858_vm11, %v11358_v40, %v11307_v55  ;;  %v4900_v3 = vsel %vm4858_vm11, %v11580_v2, %v11561_v42  ;;  %v4867_v5 = vsel %vm4866_vm0, %v11467_v15, %v11475_v36 }
 0x543   : > { %v11721_v1 = vsel %vm4783_vm1, 1.0, %v12778_v49  ;;  %v4715_v46 = vmax.f32 %v4713_v32, %v4714_v52  ;;  %v4742_v13 = vrot.slane %v4741_v9, 1  ;;  %v4873_v47 = vsel %vm4860_vm12, %v11372_v48, %v4872_v22 }
 0x544   : > { %v4874_v18 = vsel %vm4862_vm13, %v11388_v62, %v4873_v47  ;;  %v4901_v12 = vsel %vm4860_vm12, %v11586_v28, %v4900_v3  ;;  %v4897_v55 = vsel %vm4866_vm0, %v11669_v59, %v4896_v44  ;;  %v4869_v62 = vsel %vm4868_vm4, %v11496_v30, %v4867_v5 }
 0x545   : > { %v4743_v40 = vmax.f32 %v4741_v9, %v4742_v13  ;;  %v4875_v48 = vsel %vm4864_vm14, %v11524_v57, %v4874_v18  ;;  %v4902_v42 = vsel %vm4862_vm13, %v11609_v4, %v4901_v12  ;;  %v11751_v15 = vsel %vm4870_vm5, %v11506_v45, %v4869_v62 }
 0x546   : > { %v4876_v2 = vsel %vm4866_vm0, %v11624_v19, %v4875_v48  ;;  %v4903_v28 = vsel %vm4864_vm14, %v4659_v27, %v4902_v42  ;;  %v4898_v36 = vsel %vm4868_vm4, %v4708_v56, %v4897_v55  ;;  %v4929_v30 = vrot.slane %v11751_v15, 7  ;;  %v12785_v42 = vld [vmem:[#allocation27_spill] sm:$0xff] }
 0x547   : > { %v4877_v59 = vsel %vm4868_vm4, %v4491_v43, %v4876_v2  ;;  %v4904_v57 = vsel %vm4866_vm0, %v4687_v63, %v4903_v28  ;;  %v11757_v4 = vsel %vm4870_vm5, %v4736_v61, %v4898_v36  ;;  %v12779_v45 = vrot.slane %v11438_v35, 1  ;;  %v12786_v2 = vld [vmem:[#allocation25_spill] sm:$0xff] }
 0x548   : > { %v11761_v44 = vsel %vm4870_vm5, %v4519_v33, %v4877_v59  ;;  %v4905_v19 = vsel %vm4868_vm4, %v4715_v46, %v4904_v57  ;;  %v4933_v16 = vrot.slane %v11757_v4, 7  ;;  %v4476_v24 = vrot.slane %v11456_v34, 1 }
 0x549   : > { %v4449_v54 = vmax.f32 %v11438_v35, %v12779_v45  ;;  %v11769_v43 = vsel %vm4870_vm5, %v4743_v40, %v4905_v19  ;;  %v4930_v10 = vrot.slane %v11761_v44, 7  ;;  %v12780_v60 = vrot.slane %v11465_v58, 2  ;;  %v12781_v35 = vld [vmem:[#allocation24_spill] sm:$0xff]  ;;  %v12784_v40 = vld [vmem:[#allocation17_spill] sm:$0xff]  ;;  %v8893_v19 = vld [vmem:[%s12717_s7 + $0x114] ss:$8 sps:$4 sm:$0xff]  }
 0x54a   : > { %v4934_v56 = vrot.slane %v11769_v43, 7  ;;  %v4937_v38 = vsel %vm589_vm2, %v4929_v30, %v4933_v16  ;;  %v4941_v33 = vsel %vm589_vm2, %v4933_v16, %v4929_v30  ;;  %v4530_v41 = vrot.slane %v12781_v35, 2  ;;  %v12788_v16 = vld [vmem:[#allocation18_spill] sm:$0xff] }
 0x54b   : > { %v4503_v27 = vmax.f32 %v11465_v58, %v12780_v60  ;;  %v4945_v32 = vmul.f32 %v11717_v14, %v4941_v33  ;;  %v4949_v6 = vmul.f32 %v11721_v1, %v4937_v38  ;;  %v4477_v63 = vmax.f32 %v11456_v34, %v4476_v24  ;;  %v12789_v24 = vld [vmem:[#allocation19_spill] sm:$0xff] }
 0x54c   : > { %v4938_v58 = vsel %vm589_vm2, %v4930_v10, %v4934_v56  ;;  %v4942_v61 = vsel %vm589_vm2, %v4934_v56, %v4930_v10  ;;  %v4531_v52 = vmax.f32 %v12781_v35, %v4530_v41  ;;  %v4673_v9 = vmax.f32 %v11662_v20, %v4672_v51  ;;  %v8888_v20 = vld [vmem:[%s12717_s7 + $0x100] ss:$8 sps:$4 sm:$0xff]  }
 0x54d   : > { %v4504_v7 = vrot.slane %v4503_v27, 1  ;;  %v4946_v22 = vmul.f32 %v11717_v14, %v4942_v61  ;;  %v4950_v46 = vmul.f32 %v11721_v1, %v4938_v58  ;;  %v4977_v13 = vpack.c.bf16 %v4949_v6, %v4945_v32  ;;  %v12783_v51 = vld [vmem:[#allocation16_spill] sm:$0xff]  ;;  %v12791_v56 = vld [vmem:[#allocation21_spill] sm:$0xff]  ;;  %v12794_v61 = vld [vmem:[#allocation23_spill] sm:$0xff] }
 0x54e   : > { %v4532_v34 = vrot.slane %v4531_v52, 1  ;;  %v4700_v3 = vrot.slane %v11671_v26, 1  ;;  %v12782_v18 = vrot.slane %v11692_v0, 2  ;;  %v4754_v5 = vrot.slane %v11705_v23, 2  ;;  %v12793_v32 = vld [vmem:[#allocation28_spill] sm:$0xff] }
 0x54f   : > { %v4505_v47 = vmax.f32 %v4503_v27, %v4504_v7  ;;  %v4978_v55 = vpack.c.bf16 %v4950_v46, %v4946_v22  ;;  %v4886_v48 = vsel %vm4858_vm11, %v12784_v40, %v12783_v51  ;;  %v4914_v62 = vsel %vm4858_vm11, %v11582_v39, %v12785_v42  ;;  %v12795_v46 = vld [vmem:[#allocation26_spill] sm:$0xff] }
 0x550   : > { %v4727_v12 = vmax.f32 %v11692_v0, %v12782_v18  ;;  %v12787_v28 = vrot.slane %v12786_v2, 1  ;;  %v4533_v0 = vmax.f32 %v4531_v52, %v4532_v34  ;;  %v4701_v59 = vmax.f32 %v11671_v26, %v4700_v3  ;;  %v12790_v26 = vld [vmem:[#allocation20_spill] sm:$0xff] }
 0x551   : > { %v4755_v30 = vmax.f32 %v11705_v23, %v4754_v5  ;;  %6185 = vmatprep.mubr.bf16.mxu0 %v4978_v55  ;;  %v4887_v45 = vsel %vm4860_vm12, %v12788_v16, %v4886_v48  ;;  %v4915_v39 = vsel %vm4860_vm12, %v11589_v25, %v4914_v62  ;;  %v4750_v10 = vmax.f32 %v11708_v37, %v4749_v29  ;;  %v8891_v37 = vld [vmem:[%s12717_s7 + $0x110] ss:$8 sps:$4 sm:$0xff]  }
 0x552   : > { %v4526_v36 = vmax.f32 %v12786_v2, %v12787_v28  ;;  %v4728_v57 = vrot.slane %v4727_v12, 1  ;;  %v4881_v60 = vsel %vm4862_vm13, %v12790_v26, %v12789_v24  ;;  %6186 = vmatmul.mubr.bf16.vlgmr.msra.gmra.mrb[16].mxu0 %v4977_v13  ;;  %v4888_v38 = vsel %vm4862_vm13, %v12791_v56, %v4887_v45  ;;  %v12792_v29 = vld [vmem:[#allocation22_spill] sm:$0xff] }
 0x553   : > { %v4756_v27 = vrot.slane %v4755_v30, 1  ;;  %v4916_v33 = vsel %vm4862_vm13, %v11627_v53, %v4915_v39  ;;  %6197 = vmatpush1.bf16.msra.mxu0 %v8888_v20  ;;  %v4889_v25 = vsel %vm4864_vm14, %v4449_v54, %v4888_v38  ;;  %v4882_v41 = vsel %vm4864_vm14, %v12792_v29, %v4881_v60  ;;  %v8896_v54 = vld [vmem:[%s12717_s7 + $0x124] ss:$8 sps:$4 sm:$0xff]   ;;  %v8899_v20 = vld [vmem:[%s12717_s7 + $0x134] ss:$8 sps:$4 sm:$0xff]  }
 0x554   : > { %v4729_v23 = vmax.f32 %v4727_v12, %v4728_v57  ;;  %v4917_v35 = vsel %vm4864_vm14, %v4673_v9, %v4916_v33  ;;  %v4909_v6 = vsel %vm4862_vm13, %v12793_v32, %v11592_v31  ;;  %v4890_v58 = vsel %vm4866_vm0, %v4477_v63, %v4889_v25  ;;  %6198 = vmatprep.subr.bf16.mxu0 %v8893_v19  ;;  %v8897_v57 = vld [vmem:[%s12717_s7 + $0x130] ss:$8 sps:$4 sm:$0xff]  }
 0x555   : > { %v4757_v7 = vmax.f32 %v4755_v30, %v4756_v27  ;;  %v4918_v53 = vsel %vm4866_vm0, %v4701_v59, %v4917_v35  ;;  %v4883_v52 = vsel %vm4866_vm0, %v12794_v61, %v4882_v41  ;;  %v4891_v9 = vsel %vm4868_vm4, %v4505_v47, %v4890_v58 }
 0x556   : > { %v4919_v22 = vsel %vm4868_vm4, %v4729_v23, %v4918_v53  ;;  %v4884_v31 = vsel %vm4868_vm4, %v12795_v46, %v4883_v52  ;;  %v4910_v63 = vsel %vm4864_vm14, %v11665_v21, %v4909_v6  ;;  %v11855_v13 = vsel %vm4870_vm5, %v4533_v0, %v4891_v9  ;;  %v8894_v21 = vld [vmem:[%s12717_s7 + $0x120] ss:$8 sps:$4 sm:$0xff]  }
 0x557   : > { %v11858_v34 = vsel %vm4870_vm5, %v4757_v7, %v4919_v22  ;;  %v11861_v3 = vsel %vm4870_vm5, %v4526_v36, %v4884_v31  ;;  %v4911_v47 = vsel %vm4866_vm0, %v11684_v50, %v4910_v63  ;;  %v4932_v18 = vrot.slane %v11855_v13, 7  ;;  %6199 = vmatpush1.bf16.msra.mxu0 %v8891_v37  ;;  %v8900_v37 = vld [vmem:[%s12717_s7 + $0x140] ss:$8 sps:$4 sm:$0xff]   ;;  %v8905_v7 = vld [vmem:[%s12717_s7 + $0x154] ss:$8 sps:$4 sm:$0xff]  }
 0x558   : > { %v4936_v12 = vrot.slane %v11858_v34, 7  ;;  %v4912_v5 = vsel %vm4868_vm4, %v11710_v17, %v4911_v47  ;;  %v4931_v55 = vrot.slane %v11861_v3, 7  ;;  %6200 = vmatprep.subr.bf16.mxu0 %v8896_v54  ;;  %v4982_v51 = vpack.c.bf16 %v11769_v43, %v11761_v44 }
 0x559   : > { %v11877_v50 = vsel %vm4870_vm5, %v4750_v10, %v4912_v5  ;;  %v4981_v40 = vpack.c.bf16 %v11757_v4, %v11751_v15  ;;  %v4984_v48 = vpack.c.bf16 %v11858_v34, %v11855_v13  ;;  %v12796_v0 = vand.u32 1, %v9552_v8  ;;  %v9146_v8 = vld [vmem:[%s12719_s9 + $0xc8] sm:$0xff]  }
 0x55a   : > { %v4940_v17 = vsel %vm589_vm2, %v4932_v18, %v4936_v12  ;;  %v4944_v42 = vsel %vm589_vm2, %v4936_v12, %v4932_v18  ;;  %v4935_v62 = vrot.slane %v11877_v50, 7  ;;  %v4983_v2 = vpack.c.bf16 %v11877_v50, %v11861_v3  ;;  %v8903_v12 = vld [vmem:[%s12717_s7 + $0x150] ss:$8 sps:$4 sm:$0xff]  }
 0x55b   : > { %v4948_v28 = vmul.f32 %v11717_v14, %v4944_v42  ;;  %v4952_v36 = vmul.f32 %v11721_v1, %v4940_v17  ;;  %vm4788_vm6 = vcmp.ne.s32.totalorder %v12796_v0, 1  ;;  %v12797_v59 = vand.u32 1, %v9561_v11  ;;  %6201 = vmatpush1.bf16.msra.mxu0 %v8894_v21  ;;  %v8902_v11 = vld [vmem:[%s12717_s7 + $0x144] ss:$8 sps:$4 sm:$0xff]   ;;  %v8906_v42 = vld [vmem:[%s12717_s7 + $0x160] ss:$8 sps:$4 sm:$0xff]  }
 0x55c   : > { %v4939_v30 = vsel %vm589_vm2, %v4931_v55, %v4935_v62  ;;  %v4943_v19 = vsel %vm589_vm2, %v4935_v62, %v4931_v55  ;;  %v11906_v16 = vsel %vm4788_vm6, 1.0, %v12778_v49  ;;  %6202 = vmatprep.subr.bf16.mxu0 %v8899_v20  ;;  %v4954_v26 = vrot.slane %v11761_v44, 1  ;;  %v8908_v55 = vld [vmem:[%s12717_s7 + $0x164] ss:$8 sps:$4 sm:$0xff]   ;;  %v8911_v62 = vld [vmem:[%s12717_s7 + $0x174] ss:$8 sps:$4 sm:$0xff]  }
 0x55d   : > { %vm4789_vm7 = vcmp.ne.s32.totalorder %v12797_v59, 1  ;;  %v4980_v39 = vpack.c.bf16 %v4952_v36, %v4948_v28  ;;  %v11915_v10 = vmul.f32 %v11717_v14, %v4943_v19  ;;  %v11918_v24 = vmul.f32 %v11721_v1, %v4939_v30  ;;  %v8909_v28 = vld [vmem:[%s12717_s7 + $0x170] ss:$8 sps:$4 sm:$0xff]   ;;  %v8914_v36 = vld [vmem:[%s12717_s7 + $0x184] ss:$8 sps:$4 sm:$0xff]  }
 0x55e   : > { %v11909_v45 = vsel %vm4789_vm7, 1.0, %v12778_v49  ;;  %v4958_v60 = vrot.slane %v11769_v43, 1  ;;  %v4953_v23 = vrot.slane %v11751_v15, 1  ;;  %v4957_v27 = vrot.slane %v11757_v4, 1  ;;  %v8912_v0 = vld [vmem:[%s12717_s7 + $0x180] ss:$8 sps:$4 sm:$0xff]  }
 0x55f   : > { %v4956_v56 = vrot.slane %v11855_v13, 1  ;;  %6228 = vmatprep.mubr.bf16.mxu0 %v4980_v39  ;;  %v4979_v38 = vpack.c.bf16 %v11918_v24, %v11915_v10  ;;  %v4960_v33 = vrot.slane %v11858_v34, 1  ;;  %v4955_v25 = vrot.slane %v11861_v3, 1  ;;  %6203 = vmatpush1.bf16.msra.mxu0 %v8897_v57  ;;  %v8917_v59 = vld [vmem:[%s12717_s7 + $0x194] ss:$8 sps:$4 sm:$0xff]  }
 0x560   : > { %v4959_v35 = vrot.slane %v11877_v50, 1  ;;  %v4962_v29 = vsel %vm614_vm3, %v4954_v26, %v4958_v60  ;;  %v4966_v41 = vsel %vm614_vm3, %v4958_v60, %v4954_v26  ;;  %v4961_v32 = vsel %vm614_vm3, %v4953_v23, %v4957_v27  ;;  %6204 = vmatprep.subr.bf16.mxu0 %v8902_v11  ;;  %v8915_v57 = vld [vmem:[%s12717_s7 + $0x190] ss:$8 sps:$4 sm:$0xff]   ;;  %v8920_v30 = vld [vmem:[%s12717_s7 + $0x1a4] ss:$8 sps:$4 sm:$0xff]  }
 0x561   : > { %v4965_v6 = vsel %vm614_vm3, %v4957_v27, %v4953_v23  ;;  %v11945_v58 = vmul.f32 %v11906_v16, %v4962_v29  ;;  %v11948_v53 = vmul.f32 %v11909_v45, %v4966_v41  ;;  %v11951_v54 = vmul.f32 %v11906_v16, %v4961_v32  ;;  %v8918_v19 = vld [vmem:[%s12717_s7 + $0x1a0] ss:$8 sps:$4 sm:$0xff]   ;;  %v8923_v39 = vld [vmem:[%s12717_s7 + $0x1b4] ss:$8 sps:$4 sm:$0xff]   ;;  %v8921_v11 = vld [vmem:[%s12717_s7 + $0x1b0] ss:$8 sps:$4 sm:$0xff]  }
 0x562   : > { %v11954_v61 = vmul.f32 %v11909_v45, %v4965_v6  ;;  %v4964_v52 = vsel %vm614_vm3, %v4956_v56, %v4960_v33  ;;  %v4968_v9 = vsel %vm614_vm3, %v4960_v33, %v4956_v56  ;;  %v4963_v22 = vsel %vm614_vm3, %v4955_v25, %v4959_v35  ;;  %v8926_v26 = vld [vmem:[%s12717_s7 + $0x1c4] ss:$8 sps:$4 sm:$0xff]   ;;  %v8924_v60 = vld [vmem:[%s12717_s7 + $0x1c0] ss:$8 sps:$4 sm:$0xff]   ;;  %v8929_v23 = vld [vmem:[%s12717_s7 + $0x1d4] ss:$8 sps:$4 sm:$0xff]  }
 0x563   : > { %v4967_v46 = vsel %vm614_vm3, %v4959_v35, %v4955_v25  ;;  %v4986_v31 = vpack.c.bf16 %v11948_v53, %v11945_v58  ;;  %v11969_v47 = vmul.f32 %v11906_v16, %v4964_v52  ;;  %v11972_v18 = vmul.f32 %v11909_v45, %v4968_v9  ;;  %6205 = vmatpush1.bf16.msra.mxu0 %v8900_v37  ;;  %v8927_v27 = vld [vmem:[%s12717_s7 + $0x1d0] ss:$8 sps:$4 sm:$0xff]   ;;  %v8932_v56 = vld [vmem:[%s12717_s7 + $0x1e4] ss:$8 sps:$4 sm:$0xff]   ;;  %v8930_v33 = vld [vmem:[%s12717_s7 + $0x1e0] ss:$8 sps:$4 sm:$0xff]  }
 0x564   : > { %v4985_v63 = vpack.c.bf16 %v11954_v61, %v11951_v54  ;;  %v11978_v21 = vmul.f32 %v11906_v16, %v4963_v22  ;;  %v11981_v5 = vmul.f32 %v11909_v45, %v4967_v46  ;;  %6206 = vmatprep.subr.bf16.mxu0 %v8905_v7  ;;  %v8935_v25 = vld [vmem:[%s12717_s7 + $0x1f4] ss:$8 sps:$4 sm:$0xff]   ;;  %v8933_v35 = vld [vmem:[%s12717_s7 + $0x1f0] ss:$8 sps:$4 sm:$0xff]   ;;  %v8938_v37 = vld [vmem:[%s12717_s7 + $0x204] ss:$8 sps:$4 sm:$0xff]  }
 0x565   : > { %v4988_v20 = vpack.c.bf16 %v11972_v18, %v11969_v47  ;;  %v8936_v29 = vld [vmem:[%s12717_s7 + $0x200] ss:$8 sps:$4 sm:$0xff]   ;;  %v8941_v41 = vld [vmem:[%s12717_s7 + $0x214] ss:$8 sps:$4 sm:$0xff]   ;;  %v8939_v32 = vld [vmem:[%s12717_s7 + $0x210] ss:$8 sps:$4 sm:$0xff]  }
 0x566   : > { %v4987_v17 = vpack.c.bf16 %v11981_v5, %v11978_v21  ;;  %v8944_v6 = vld [vmem:[%s12717_s7 + $0x224] ss:$8 sps:$4 sm:$0xff]   ;;  %v8942_v10 = vld [vmem:[%s12717_s7 + $0x220] ss:$8 sps:$4 sm:$0xff]   ;;  %v8947_v44 = vld [vmem:[%s12717_s7 + $0x234] ss:$8 sps:$4 sm:$0xff]  }
 0x567   : > { %6207 = vmatpush1.bf16.msra.mxu0 %v8903_v12  ;;  %v8945_v43 = vld [vmem:[%s12717_s7 + $0x230] ss:$8 sps:$4 sm:$0xff]   ;;  %v8948_v24 = vld [vmem:[%s12717_s7 + $0x240] ss:$8 sps:$4 sm:$0xff]   ;;  %v8956_v52 = vld [vmem:[%s12717_s7 + $0x264] ss:$8 sps:$4 sm:$0xff]  }
 0x568   : > { %6208 = vmatprep.subr.bf16.mxu0 %v8908_v55  ;;  %v8951_v7 = vld [vmem:[%s12717_s7 + $0x250] ss:$8 sps:$4 sm:$0xff]   ;;  %v8954_v9 = vld [vmem:[%s12717_s7 + $0x260] ss:$8 sps:$4 sm:$0xff]   ;;  %v8959_v22 = vld [vmem:[%s12717_s7 + $0x274] ss:$8 sps:$4 sm:$0xff]  }
 0x569   : > { %v8957_v46 = vld [vmem:[%s12717_s7 + $0x270] ss:$8 sps:$4 sm:$0xff]   ;;  %v8962_v12 = vld [vmem:[%s12717_s7 + $0x284] ss:$8 sps:$4 sm:$0xff]   ;;  %v8960_v55 = vld [vmem:[%s12717_s7 + $0x280] ss:$8 sps:$4 sm:$0xff]  }
 0x56a   : > { %v8990_v15 = vld [vmem:[%s12717_s7 + $0x320] ss:$8 sps:$4 sm:$0xff]   ;;  %v8995_v4 = vld [vmem:[%s12717_s7 + $0x334] ss:$8 sps:$4 sm:$0xff]   ;;  %v8993_v13 = vld [vmem:[%s12717_s7 + $0x330] ss:$8 sps:$4 sm:$0xff]  }
 0x56b   : > { %6209 = vmatpush1.bf16.msra.mxu0 %v8906_v42  ;;  %v8965_v42 = vld [vmem:[%s12717_s7 + $0x294] ss:$8 sps:$4 sm:$0xff]   ;;  %v8998_v34 = vld [vmem:[%s12717_s7 + $0x344] ss:$8 sps:$4 sm:$0xff]   ;;  %v9035_v3 = vld [vmem:[%s12717_s7 + $0x410] ss:$8 sps:$4 sm:$0xff]  }
 0x56c   : > { %6210 = vmatprep.subr.bf16.mxu0 %v8911_v62  ;;  %v8963_v62 = vld [vmem:[%s12717_s7 + $0x290] ss:$8 sps:$4 sm:$0xff]   ;;  %v9040_v50 = vld [vmem:[%s12717_s7 + $0x424] ss:$8 sps:$4 sm:$0xff]   ;;  %v9038_v53 = vld [vmem:[%s12717_s7 + $0x420] ss:$8 sps:$4 sm:$0xff]  }
 0x56d   : > { %v9132_v58 = vld [vmem:[%s12719_s9 + $0x50] sm:$0xff]   ;;  %v9086_v54 = vld [vmem:[%s12717_s7 + $0x520] ss:$8 sps:$4 sm:$0xff]   ;;  %v9094_v47 = vld [vmem:[%s12717_s7 + $0x544] ss:$8 sps:$4 sm:$0xff]  }
 0x56e   : > { %v9091_v61 = vld [vmem:[%s12717_s7 + $0x534] ss:$8 sps:$4 sm:$0xff]   ;;  %v9092_v18 = vld [vmem:[%s12717_s7 + $0x540] ss:$8 sps:$4 sm:$0xff]  }
 0x56f   : > { %6211 = vmatpush1.bf16.msra.mxu0 %v8909_v28  ;;  %v8968_v28 = vld [vmem:[%s12717_s7 + $0x2a4] ss:$8 sps:$4 sm:$0xff]   ;;  %v9140_v21 = vld [vmem:[%s12719_s9 + $0x70] sm:$0xff]  }
 0x570   : > { %6212 = vmatprep.subr.bf16.mxu0 %v8914_v36  ;;  %v8966_v36 = vld [vmem:[%s12717_s7 + $0x2a0] ss:$8 sps:$4 sm:$0xff]   ;;  %v9141_v5 = vld [vmem:[%s12719_s9 + $0x30] sm:$0xff]  }
 0x573   : > { %6213 = vmatpush1.bf16.msra.mxu0 %v8912_v0  ;;  %v8971_v0 = vld [vmem:[%s12717_s7 + $0x2b4] ss:$8 sps:$4 sm:$0xff]  }
 0x574   : > { %6214 = vmatprep.subr.bf16.mxu0 %v8917_v59  ;;  %v8969_v59 = vld [vmem:[%s12717_s7 + $0x2b0] ss:$8 sps:$4 sm:$0xff]  }
 0x577   : > { %6215 = vmatpush1.bf16.msra.mxu0 %v8915_v57  ;;  %v8974_v57 = vld [vmem:[%s12717_s7 + $0x2c4] ss:$8 sps:$4 sm:$0xff]  }
 0x578   : > { %6216 = vmatprep.subr.bf16.mxu0 %v8920_v30  ;;  %v8972_v30 = vld [vmem:[%s12717_s7 + $0x2c0] ss:$8 sps:$4 sm:$0xff]  }
 0x57b   : > { %6217 = vmatpush1.bf16.msra.mxu0 %v8918_v19  ;;  %v8977_v19 = vld [vmem:[%s12717_s7 + $0x2d4] ss:$8 sps:$4 sm:$0xff]  }
 0x57c   : > { %6218 = vmatprep.subr.bf16.mxu0 %v8923_v39  ;;  %v8975_v39 = vld [vmem:[%s12717_s7 + $0x2d0] ss:$8 sps:$4 sm:$0xff]  }
 0x57f   : > { %6219 = vmatpush1.bf16.msra.mxu0 %v8921_v11  ;;  %v8980_v11 = vld [vmem:[%s12717_s7 + $0x2e4] ss:$8 sps:$4 sm:$0xff]  }
 0x580   : > { %6220 = vmatprep.subr.bf16.mxu0 %v8926_v26  ;;  %v8978_v26 = vld [vmem:[%s12717_s7 + $0x2e0] ss:$8 sps:$4 sm:$0xff]  }
 0x583   : > { %6221 = vmatpush1.bf16.msra.mxu0 %v8924_v60  ;;  %v8983_v60 = vld [vmem:[%s12717_s7 + $0x2f4] ss:$8 sps:$4 sm:$0xff]  }
 0x584   : > { %6222 = vmatprep.subr.bf16.mxu0 %v8929_v23  ;;  %v8981_v23 = vld [vmem:[%s12717_s7 + $0x2f0] ss:$8 sps:$4 sm:$0xff]  }
 0x587   : > { %6223 = vmatpush1.bf16.msra.mxu0 %v8927_v27  ;;  %v8986_v27 = vld [vmem:[%s12717_s7 + $0x304] ss:$8 sps:$4 sm:$0xff]  }
 0x588   : > { %6224 = vmatprep.subr.bf16.mxu0 %v8932_v56  ;;  %v8984_v56 = vld [vmem:[%s12717_s7 + $0x300] ss:$8 sps:$4 sm:$0xff]  }
 0x58b   : > { %6225 = vmatpush1.bf16.msra.mxu0 %v8930_v33  ;;  %v8989_v33 = vld [vmem:[%s12717_s7 + $0x314] ss:$8 sps:$4 sm:$0xff]  }
 0x58c   : > { %6226 = vmatprep.subr.bf16.mxu0 %v8935_v25  ;;  %v8987_v25 = vld [vmem:[%s12717_s7 + $0x310] ss:$8 sps:$4 sm:$0xff]  }
 0x58f   : > { %6227 = vmatpush1.bf16.msra.mxu0 %v8933_v35  ;;  %v8992_v35 = vld [vmem:[%s12717_s7 + $0x324] ss:$8 sps:$4 sm:$0xff]  }
 0x590   : > { %6239 = vmatprep.subr.bf16.mxu0 %v8938_v37  ;;  %v8999_v37 = vld [vmem:[%s12717_s7 + $0x350] ss:$8 sps:$4 sm:$0xff]  }
 0x592   : > { %6229 = vmatmul.mubr.bf16.vlgmr.msra.gmra.mrb[16].mxu0 %v4979_v38  ;;  %v8953_v38 = vld [vmem:[%s12717_s7 + $0x254] ss:$8 sps:$4 sm:$0xff]  }
 0x593   : > { %6240 = vmatpush1.bf16.msra.mxu0 %v8936_v29  ;;  %6271 = vmatprep.mubr.bf16.mxu0 %v4982_v51  ;;  %v8950_v51 = vld [vmem:[%s12717_s7 + $0x244] ss:$8 sps:$4 sm:$0xff]  }
 0x594   : > { %6241 = vmatprep.subr.bf16.mxu0 %v8941_v41  ;;  %v9004_v29 = vld [vmem:[%s12717_s7 + $0x364] ss:$8 sps:$4 sm:$0xff]   ;;  %v9002_v41 = vld [vmem:[%s12717_s7 + $0x360] ss:$8 sps:$4 sm:$0xff]  }
 0x597   : > { %6242 = vmatpush1.bf16.msra.mxu0 %v8939_v32  ;;  %v9007_v32 = vld [vmem:[%s12717_s7 + $0x374] ss:$8 sps:$4 sm:$0xff]  }
 0x598   : > { %6243 = vmatprep.subr.bf16.mxu0 %v8944_v6  ;;  %v9005_v6 = vld [vmem:[%s12717_s7 + $0x370] ss:$8 sps:$4 sm:$0xff]  }
 0x59b   : > { %6244 = vmatpush1.bf16.msra.mxu0 %v8942_v10  ;;  %v9010_v10 = vld [vmem:[%s12717_s7 + $0x384] ss:$8 sps:$4 sm:$0xff]  }
 0x59c   : > { %6245 = vmatprep.subr.bf16.mxu0 %v8947_v44  ;;  %v9008_v44 = vld [vmem:[%s12717_s7 + $0x380] ss:$8 sps:$4 sm:$0xff]  }
 0x59f   : > { %6246 = vmatpush1.bf16.msra.mxu0 %v8945_v43  ;;  %v9013_v43 = vld [vmem:[%s12717_s7 + $0x394] ss:$8 sps:$4 sm:$0xff]  }
 0x5a0   : > { %6247 = vmatprep.subr.bf16.mxu0 %v8950_v51  ;;  %v9011_v51 = vld [vmem:[%s12717_s7 + $0x390] ss:$8 sps:$4 sm:$0xff]  }
 0x5a3   : > { %6248 = vmatpush1.bf16.msra.mxu0 %v8948_v24  ;;  %v9016_v24 = vld [vmem:[%s12717_s7 + $0x3a4] ss:$8 sps:$4 sm:$0xff]  }
 0x5a4   : > { %6249 = vmatprep.subr.bf16.mxu0 %v8953_v38  ;;  %v9014_v38 = vld [vmem:[%s12717_s7 + $0x3a0] ss:$8 sps:$4 sm:$0xff]  }
 0x5a7   : > { %6250 = vmatpush1.bf16.msra.mxu0 %v8951_v7  ;;  %v9019_v7 = vld [vmem:[%s12717_s7 + $0x3b4] ss:$8 sps:$4 sm:$0xff]  }
 0x5a8   : > { %6251 = vmatprep.subr.bf16.mxu0 %v8956_v52  ;;  %v9017_v52 = vld [vmem:[%s12717_s7 + $0x3b0] ss:$8 sps:$4 sm:$0xff]  }
 0x5ab   : > { %6252 = vmatpush1.bf16.msra.mxu0 %v8954_v9  ;;  %v9022_v9 = vld [vmem:[%s12717_s7 + $0x3c4] ss:$8 sps:$4 sm:$0xff]  }
 0x5ac   : > { %6253 = vmatprep.subr.bf16.mxu0 %v8959_v22  ;;  %v9020_v22 = vld [vmem:[%s12717_s7 + $0x3c0] ss:$8 sps:$4 sm:$0xff]  }
 0x5af   : > { %6254 = vmatpush1.bf16.msra.mxu0 %v8957_v46  ;;  %v9025_v46 = vld [vmem:[%s12717_s7 + $0x3d4] ss:$8 sps:$4 sm:$0xff]  }
 0x5b0   : > { %6255 = vmatprep.subr.bf16.mxu0 %v8962_v12  ;;  %v9023_v12 = vld [vmem:[%s12717_s7 + $0x3d0] ss:$8 sps:$4 sm:$0xff]  }
 0x5b3   : > { %6256 = vmatpush1.bf16.msra.mxu0 %v8960_v55  ;;  %v9028_v55 = vld [vmem:[%s12717_s7 + $0x3e4] ss:$8 sps:$4 sm:$0xff]  }
 0x5b4   : > { %6257 = vmatprep.subr.bf16.mxu0 %v8965_v42  ;;  %v9026_v42 = vld [vmem:[%s12717_s7 + $0x3e0] ss:$8 sps:$4 sm:$0xff]  }
 0x5b7   : > { %6258 = vmatpush1.bf16.msra.mxu0 %v8963_v62  ;;  %v9031_v62 = vld [vmem:[%s12717_s7 + $0x3f4] ss:$8 sps:$4 sm:$0xff]  }
 0x5b8   : > { %6259 = vmatprep.subr.bf16.mxu0 %v8968_v28  ;;  %v9029_v28 = vld [vmem:[%s12717_s7 + $0x3f0] ss:$8 sps:$4 sm:$0xff]  }
 0x5bb   : > { %6260 = vmatpush1.bf16.msra.mxu0 %v8966_v36  ;;  %v9034_v36 = vld [vmem:[%s12717_s7 + $0x404] ss:$8 sps:$4 sm:$0xff]  }
 0x5bc   : > { %6261 = vmatprep.subr.bf16.mxu0 %v8971_v0  ;;  %v9032_v0 = vld [vmem:[%s12717_s7 + $0x400] ss:$8 sps:$4 sm:$0xff]  }
 0x5bf   : > { %6262 = vmatpush1.bf16.msra.mxu0 %v8969_v59  ;;  %v9037_v59 = vld [vmem:[%s12717_s7 + $0x414] ss:$8 sps:$4 sm:$0xff]  }
 0x5c0   : > { %6263 = vmatprep.subr.bf16.mxu0 %v8974_v57  ;;  %v9128_v57 = vld [vmem:[%s12719_s9 + $0x40] sm:$0xff]  }
 0x5c1   : > { %7997 = vmatprep.subr.bf16.mxu1 %v9128_v57  ;;  %v9109_v57 = vld [vmem:[%s12717_s7 + $0x594] ss:$8 sps:$4 sm:$0xff]  }
 0x5c3   : > { %6264 = vmatpush1.bf16.msra.mxu0 %v8972_v30  ;;  %v9129_v30 = vld [vmem:[%s12719_s9] sm:$0xff]  }
 0x5c4   : > { %6265 = vmatprep.subr.bf16.mxu0 %v8977_v19  ;;  %v9130_v19 = vld [vmem:[%s12719_s9 + $0x48] sm:$0xff]   ;;  %7998 = vmatpush3.bf16.msra.mxu1 %v9129_v30  ;;  %v9107_v30 = vld [vmem:[%s12717_s7 + $0x590] ss:$8 sps:$4 sm:$0xff]  }
 0x5c5   : > { %7999 = vmatprep.subr.bf16.mxu1 %v9130_v19  ;;  %v9112_v19 = vld [vmem:[%s12717_s7 + $0x5a4] ss:$8 sps:$4 sm:$0xff]  }
 0x5c7   : > { %6266 = vmatpush1.bf16.msra.mxu0 %v8975_v39  ;;  %v9133_v39 = vld [vmem:[%s12719_s9 + $0x10] sm:$0xff]  }
 0x5c8   : > { %6267 = vmatprep.subr.bf16.mxu0 %v8980_v11  ;;  %v9134_v11 = vld [vmem:[%s12719_s9 + $0x58] sm:$0xff]  }
 0x5cb   : > { %6268 = vmatpush1.bf16.msra.mxu0 %v8978_v26  ;;  %v9041_v26 = vld [vmem:[%s12717_s7 + $0x430] ss:$8 sps:$4 sm:$0xff]  }
 0x5cc   : > { %6269 = vmatprep.subr.bf16.mxu0 %v8983_v60  ;;  %v9046_v60 = vld [vmem:[%s12717_s7 + $0x444] ss:$8 sps:$4 sm:$0xff]  }
 0x5cf   : > { %6270 = vmatpush1.bf16.msra.mxu0 %v8981_v23  ;;  %v9135_v23 = vld [vmem:[%s12719_s9 + $0x18] sm:$0xff]  }
 0x5d0   : > { %6282 = vmatprep.subr.bf16.mxu0 %v8986_v27  ;;  %v9044_v27 = vld [vmem:[%s12717_s7 + $0x440] ss:$8 sps:$4 sm:$0xff]  }
 0x5d2   : > { %6272 = vmatmul.mubr.bf16.vlgmr.msra.gmra.mrb[16].mxu0 %v4981_v40  ;;  %v8996_v40 = vld [vmem:[%s12717_s7 + $0x340] ss:$8 sps:$4 sm:$0xff]  }
 0x5d3   : > { %6283 = vmatpush1.bf16.msra.mxu0 %v8984_v56  ;;  %6314 = vmatprep.mubr.bf16.mxu0 %v4984_v48  ;;  %v9001_v48 = vld [vmem:[%s12717_s7 + $0x354] ss:$8 sps:$4 sm:$0xff]  }
 0x5d4   : > { %6284 = vmatprep.subr.bf16.mxu0 %v8989_v33  ;;  %v9049_v56 = vld [vmem:[%s12717_s7 + $0x454] ss:$8 sps:$4 sm:$0xff]   ;;  %v9047_v33 = vld [vmem:[%s12717_s7 + $0x450] ss:$8 sps:$4 sm:$0xff]  }
 0x5d7   : > { %6285 = vmatpush1.bf16.msra.mxu0 %v8987_v25  ;;  %v9052_v25 = vld [vmem:[%s12717_s7 + $0x464] ss:$8 sps:$4 sm:$0xff]  }
 0x5d8   : > { %6286 = vmatprep.subr.bf16.mxu0 %v8992_v35  ;;  %v9050_v35 = vld [vmem:[%s12717_s7 + $0x460] ss:$8 sps:$4 sm:$0xff]  }
 0x5db   : > { %6287 = vmatpush1.bf16.msra.mxu0 %v8990_v15  ;;  %v9055_v15 = vld [vmem:[%s12717_s7 + $0x474] ss:$8 sps:$4 sm:$0xff]  }
 0x5dc   : > { %6288 = vmatprep.subr.bf16.mxu0 %v8995_v4  ;;  %v9053_v4 = vld [vmem:[%s12717_s7 + $0x470] ss:$8 sps:$4 sm:$0xff]  }
 0x5df   : > { %6289 = vmatpush1.bf16.msra.mxu0 %v8993_v13  ;;  %v9058_v13 = vld [vmem:[%s12717_s7 + $0x484] ss:$8 sps:$4 sm:$0xff]  }
 0x5e0   : > { %6290 = vmatprep.subr.bf16.mxu0 %v8998_v34  ;;  %v9056_v34 = vld [vmem:[%s12717_s7 + $0x480] ss:$8 sps:$4 sm:$0xff]  }
 0x5e3   : > { %6291 = vmatpush1.bf16.msra.mxu0 %v8996_v40  ;;  %v9061_v40 = vld [vmem:[%s12717_s7 + $0x494] ss:$8 sps:$4 sm:$0xff]  }
 0x5e4   : > { %6292 = vmatprep.subr.bf16.mxu0 %v9001_v48  ;;  %v9059_v48 = vld [vmem:[%s12717_s7 + $0x490] ss:$8 sps:$4 sm:$0xff]  }
 0x5e7   : > { %6293 = vmatpush1.bf16.msra.mxu0 %v8999_v37  ;;  %v9064_v37 = vld [vmem:[%s12717_s7 + $0x4a4] ss:$8 sps:$4 sm:$0xff]  }
 0x5e8   : > { %6294 = vmatprep.subr.bf16.mxu0 %v9004_v29  ;;  %v9062_v29 = vld [vmem:[%s12717_s7 + $0x4a0] ss:$8 sps:$4 sm:$0xff]  }
 0x5eb   : > { %6295 = vmatpush1.bf16.msra.mxu0 %v9002_v41  ;;  %v9067_v41 = vld [vmem:[%s12717_s7 + $0x4b4] ss:$8 sps:$4 sm:$0xff]  }
 0x5ec   : > { %6296 = vmatprep.subr.bf16.mxu0 %v9007_v32  ;;  %v9065_v32 = vld [vmem:[%s12717_s7 + $0x4b0] ss:$8 sps:$4 sm:$0xff]  }
 0x5ef   : > { %6297 = vmatpush1.bf16.msra.mxu0 %v9005_v6  ;;  %v9070_v6 = vld [vmem:[%s12717_s7 + $0x4c4] ss:$8 sps:$4 sm:$0xff]  }
 0x5f0   : > { %6298 = vmatprep.subr.bf16.mxu0 %v9010_v10  ;;  %v9068_v10 = vld [vmem:[%s12717_s7 + $0x4c0] ss:$8 sps:$4 sm:$0xff]  }
 0x5f3   : > { %6299 = vmatpush1.bf16.msra.mxu0 %v9008_v44  ;;  %v9073_v44 = vld [vmem:[%s12717_s7 + $0x4d4] ss:$8 sps:$4 sm:$0xff]  }
 0x5f4   : > { %6300 = vmatprep.subr.bf16.mxu0 %v9013_v43  ;;  %v9071_v43 = vld [vmem:[%s12717_s7 + $0x4d0] ss:$8 sps:$4 sm:$0xff]  }
 0x5f7   : > { %6301 = vmatpush1.bf16.msra.mxu0 %v9011_v51  ;;  %v9076_v51 = vld [vmem:[%s12717_s7 + $0x4e4] ss:$8 sps:$4 sm:$0xff]  }
 0x5f8   : > { %6302 = vmatprep.subr.bf16.mxu0 %v9016_v24  ;;  %v9074_v24 = vld [vmem:[%s12717_s7 + $0x4e0] ss:$8 sps:$4 sm:$0xff]  }
 0x5fb   : > { %6303 = vmatpush1.bf16.msra.mxu0 %v9014_v38  ;;  %v9079_v38 = vld [vmem:[%s12717_s7 + $0x4f4] ss:$8 sps:$4 sm:$0xff]  }
 0x5fc   : > { %6304 = vmatprep.subr.bf16.mxu0 %v9019_v7  ;;  %v9077_v7 = vld [vmem:[%s12717_s7 + $0x4f0] ss:$8 sps:$4 sm:$0xff]  }
 0x5ff   : > { %6305 = vmatpush1.bf16.msra.mxu0 %v9017_v52  ;;  %v9082_v52 = vld [vmem:[%s12717_s7 + $0x504] ss:$8 sps:$4 sm:$0xff]  }
 0x600   : > { %6306 = vmatprep.subr.bf16.mxu0 %v9022_v9  ;;  %v9080_v9 = vld [vmem:[%s12717_s7 + $0x500] ss:$8 sps:$4 sm:$0xff]  }
 0x603   : > { %6307 = vmatpush1.bf16.msra.mxu0 %v9020_v22  ;;  %v9085_v22 = vld [vmem:[%s12717_s7 + $0x514] ss:$8 sps:$4 sm:$0xff]  }
 0x604   : > { %6308 = vmatprep.subr.bf16.mxu0 %v9025_v46  ;;  %v9083_v46 = vld [vmem:[%s12717_s7 + $0x510] ss:$8 sps:$4 sm:$0xff]  }
 0x607   : > { %6309 = vmatpush1.bf16.msra.mxu0 %v9023_v12  ;;  %v9088_v12 = vld [vmem:[%s12717_s7 + $0x524] ss:$8 sps:$4 sm:$0xff]  }
 0x608   : > { %6310 = vmatprep.subr.bf16.mxu0 %v9028_v55  ;;  %v9095_v55 = vld [vmem:[%s12717_s7 + $0x550] ss:$8 sps:$4 sm:$0xff]  }
 0x60b   : > { %6311 = vmatpush1.bf16.msra.mxu0 %v9026_v42  ;;  %v9100_v42 = vld [vmem:[%s12717_s7 + $0x564] ss:$8 sps:$4 sm:$0xff]  }
 0x60c   : > { %6312 = vmatprep.subr.bf16.mxu0 %v9031_v62  ;;  %v9098_v62 = vld [vmem:[%s12717_s7 + $0x560] ss:$8 sps:$4 sm:$0xff]  }
 0x60f   : > { %6313 = vmatpush1.bf16.msra.mxu0 %v9029_v28  ;;  %v9103_v28 = vld [vmem:[%s12717_s7 + $0x574] ss:$8 sps:$4 sm:$0xff]  }
 0x610   : > { %6325 = vmatprep.subr.bf16.mxu0 %v9034_v36  ;;  %v9101_v36 = vld [vmem:[%s12717_s7 + $0x570] ss:$8 sps:$4 sm:$0xff]  }
 0x612   : > { %6315 = vmatmul.mubr.bf16.vlgmr.msra.gmra.mrb[16].mxu0 %v4983_v2  ;;  %v9131_v2 = vld [vmem:[%s12719_s9 + $0x8] sm:$0xff]  }
 0x613   : > { %6326 = vmatpush1.bf16.msra.mxu0 %v9032_v0  ;;  %6357 = vmatprep.mubr.bf16.mxu0 %v4986_v31  ;;  %v9043_v31 = vld [vmem:[%s12717_s7 + $0x434] ss:$8 sps:$4 sm:$0xff]   ;;  %v9106_v0 = vld [vmem:[%s12717_s7 + $0x584] ss:$8 sps:$4 sm:$0xff]  }
 0x614   : > { %6327 = vmatprep.subr.bf16.mxu0 %v9037_v59  ;;  %8000 = vmatpush3.bf16.msra.mxu1 %v9131_v2  ;;  %v9104_v59 = vld [vmem:[%s12717_s7 + $0x580] ss:$8 sps:$4 sm:$0xff]   ;;  %v9113_v2 = vld [vmem:[%s12717_s7 + $0x5b0] ss:$8 sps:$4 sm:$0xff]  }
 0x615   : > { %8001 = vmatprep.subr.bf16.mxu1 %v9132_v58  ;;  %v9118_v58 = vld [vmem:[%s12717_s7 + $0x5c4] ss:$8 sps:$4 sm:$0xff]  }
 0x617   : > { %6328 = vmatpush1.bf16.msra.mxu0 %v9035_v3  ;;  %v9110_v3 = vld [vmem:[%s12717_s7 + $0x5a0] ss:$8 sps:$4 sm:$0xff]  }
 0x618   : > { %6329 = vmatprep.subr.bf16.mxu0 %v9040_v50  ;;  %8002 = vmatpush3.bf16.msra.mxu1 %v9133_v39  ;;  %v9115_v50 = vld [vmem:[%s12717_s7 + $0x5b4] ss:$8 sps:$4 sm:$0xff]   ;;  %v9119_v39 = vld [vmem:[%s12717_s7 + $0x5d0] ss:$8 sps:$4 sm:$0xff]  }
 0x619   : > { %8003 = vmatprep.subr.bf16.mxu1 %v9134_v11  ;;  %v9124_v11 = vld [vmem:[%s12717_s7 + $0x5e4] ss:$8 sps:$4 sm:$0xff]  }
 0x61b   : > { %6330 = vmatpush1.bf16.msra.mxu0 %v9038_v53  ;;  %v9116_v53 = vld [vmem:[%s12717_s7 + $0x5c0] ss:$8 sps:$4 sm:$0xff]  }
 0x61c   : > { %6331 = vmatprep.subr.bf16.mxu0 %v9043_v31  ;;  %8004 = vmatpush3.bf16.msra.mxu1 %v9135_v23  ;;  %v9121_v31 = vld [vmem:[%s12717_s7 + $0x5d4] ss:$8 sps:$4 sm:$0xff]   ;;  %v9125_v23 = vld [vmem:[%s12717_s7 + $0x5f0] ss:$8 sps:$4 sm:$0xff]  }
 0x61f   : > { %6332 = vmatpush1.bf16.msra.mxu0 %v9041_v26  ;;  %v9122_v26 = vld [vmem:[%s12717_s7 + $0x5e0] ss:$8 sps:$4 sm:$0xff]  }
 0x620   : > { %6333 = vmatprep.subr.bf16.mxu0 %v9046_v60  ;;  %v9127_v60 = vld [vmem:[%s12717_s7 + $0x5f4] ss:$8 sps:$4 sm:$0xff]  }
 0x623   : > { %6334 = vmatpush1.bf16.msra.mxu0 %v9044_v27  ;;  %v9136_v27 = vld [vmem:[%s12719_s9 + $0x60] sm:$0xff]  }
 0x624   : > { %6335 = vmatprep.subr.bf16.mxu0 %v9049_v56  ;;  %8005 = vmatprep.subr.bf16.mxu1 %v9136_v27  ;;  %v9137_v56 = vld [vmem:[%s12719_s9 + $0x20] sm:$0xff]  }
 0x625   : > { %8006 = vmatpush3.bf16.msra.mxu1 %v9137_v56  ;;  %v9149_v56 = vld [vmem:[%s12719_s9 + $0x90] sm:$0xff]  }
 0x627   : > { %6336 = vmatpush1.bf16.msra.mxu0 %v9047_v33  ;;  %v9138_v33 = vld [vmem:[%s12719_s9 + $0x68] sm:$0xff]  }
 0x628   : > { %6337 = vmatprep.subr.bf16.mxu0 %v9052_v25  ;;  %v9139_v25 = vld [vmem:[%s12719_s9 + $0x28] sm:$0xff]   ;;  %8007 = vmatprep.subr.bf16.mxu1 %v9138_v33  ;;  %v9150_v33 = vld [vmem:[%s12719_s9 + $0xd8] sm:$0xff]  }
 0x629   : > { %8008 = vmatpush3.bf16.msra.mxu1 %v9139_v25  ;;  %v9151_v25 = vld [vmem:[%s12719_s9 + $0x98] sm:$0xff]  }
 0x62a   : > { %8009 = vmatprep.subr.bf16.mxu1 %v9140_v21  ;;  %v9152_v21 = vld [vmem:[%s12719_s9 + $0xe0] sm:$0xff]  }
 0x62b   : > { %6338 = vmatpush1.bf16.msra.mxu0 %v9050_v35  ;;  %v9143_v35 = vld [vmem:[%s12719_s9 + $0x38] sm:$0xff]  }
 0x62c   : > { %6339 = vmatprep.subr.bf16.mxu0 %v9055_v15  ;;  %v9144_v15 = vld [vmem:[%s12719_s9 + $0xc0] sm:$0xff]  }
 0x62d   : > { %8010 = vmatpush3.bf16.msra.mxu1 %v9141_v5  ;;  %v9153_v5 = vld [vmem:[%s12719_s9 + $0xa0] sm:$0xff]  }
 0x62f   : > { %6340 = vmatpush1.bf16.msra.mxu0 %v9053_v4  ;;  %v5181_v4 = vld [vmem:[#allocation6] sm:$0x3] }
 0x630   : > { %6341 = vmatprep.subr.bf16.mxu0 %v9058_v13  ;;  %v12798_v13 = vld [vmem:[#allocation13_spill] sm:$0xff] }
 0x633   : > { %6342 = vmatpush1.bf16.msra.mxu0 %v9056_v34  ;;  %v5186_v34 = vrot.slane %v5181_v4, %v12798_v13  ;;  %v9158_v13 = vld [vmem:[%s12719_s9 + $0xf8] sm:$0xff]  }
 0x634   : > { %6343 = vmatprep.subr.bf16.mxu0 %v9061_v40  ;;  %v12799_v40 = vld [vmem:[#allocation14_spill] sm:$0xff] }
 0x637   : > { %6344 = vmatpush1.bf16.msra.mxu0 %v9059_v48  ;;  %v5190_v48 = vrot.slane %v5181_v4, %v12799_v40  ;;  %v9157_v4 = vld [vmem:[%s12719_s9 + $0xb0] sm:$0xff]   ;;  %v9160_v40 = vld [vmem:[%s12719_s9 + $0x140] sm:$0xff]  }
 0x638   : > { %6345 = vmatprep.subr.bf16.mxu0 %v9064_v37 }
 0x63b   : > { %6346 = vmatpush1.bf16.msra.mxu0 %v9062_v29 }
 0x63c   : > { %6347 = vmatprep.subr.bf16.mxu0 %v9067_v41 }
 0x63f   : > { %6348 = vmatpush1.bf16.msra.mxu0 %v9065_v32 }
 0x640   : > { %6349 = vmatprep.subr.bf16.mxu0 %v9070_v6 }
 0x643   : > { %6350 = vmatpush1.bf16.msra.mxu0 %v9068_v10 }
 0x644   : > { %6351 = vmatprep.subr.bf16.mxu0 %v9073_v44 }
 0x647   : > { %6352 = vmatpush1.bf16.msra.mxu0 %v9071_v43 }
 0x648   : > { %6353 = vmatprep.subr.bf16.mxu0 %v9076_v51 }
 0x64b   : > { %6354 = vmatpush1.bf16.msra.mxu0 %v9074_v24 }
 0x64c   : > { %6355 = vmatprep.subr.bf16.mxu0 %v9079_v38 }
 0x64f   : > { %6356 = vmatpush1.bf16.msra.mxu0 %v9077_v7 }
 0x650   : > { %6368 = vmatprep.subr.bf16.mxu0 %v9082_v52 }
 0x652   : > { %6358 = vmatmul.mubr.bf16.vlgmr.msra.gmra.mrb[16].mxu0 %v4985_v63  ;;  %v9089_v63 = vld [vmem:[%s12717_s7 + $0x530] ss:$8 sps:$4 sm:$0xff]  }
 0x653   : > { %6369 = vmatpush1.bf16.msra.mxu0 %v9080_v9  ;;  %6400 = vmatprep.mubr.bf16.mxu0 %v4988_v20  ;;  %v9097_v20 = vld [vmem:[%s12717_s7 + $0x554] ss:$8 sps:$4 sm:$0xff]  }
 0x654   : > { %6370 = vmatprep.subr.bf16.mxu0 %v9085_v22 }
 0x657   : > { %6371 = vmatpush1.bf16.msra.mxu0 %v9083_v46 }
 0x658   : > { %6372 = vmatprep.subr.bf16.mxu0 %v9088_v12 }
 0x65b   : > { %6373 = vmatpush1.bf16.msra.mxu0 %v9086_v54 }
 0x65c   : > { %6374 = vmatprep.subr.bf16.mxu0 %v9091_v61 }
 0x65f   : > { %6375 = vmatpush1.bf16.msra.mxu0 %v9089_v63 }
 0x660   : > { %6376 = vmatprep.subr.bf16.mxu0 %v9094_v47 }
 0x663   : > { %6377 = vmatpush1.bf16.msra.mxu0 %v9092_v18 }
 0x664   : > { %6378 = vmatprep.subr.bf16.mxu0 %v9097_v20 }
 0x667   : > { %6379 = vmatpush1.bf16.msra.mxu0 %v9095_v55 }
 0x668   : > { %6380 = vmatprep.subr.bf16.mxu0 %v9100_v42 }
 0x66b   : > { %6381 = vmatpush1.bf16.msra.mxu0 %v9098_v62 }
 0x66c   : > { %6382 = vmatprep.subr.bf16.mxu0 %v9103_v28 }
 0x66f   : > { %6383 = vmatpush1.bf16.msra.mxu0 %v9101_v36 }
 0x670   : > { %6384 = vmatprep.subr.bf16.mxu0 %v9106_v0 }
 0x673   : > { %6385 = vmatpush1.bf16.msra.mxu0 %v9104_v59 }
 0x674   : > { %6386 = vmatprep.subr.bf16.mxu0 %v9109_v57 }
 0x677   : > { %6387 = vmatpush1.bf16.msra.mxu0 %v9107_v30 }
 0x678   : > { %6388 = vmatprep.subr.bf16.mxu0 %v9112_v19 }
 0x67b   : > { %6389 = vmatpush1.bf16.msra.mxu0 %v9110_v3 }
 0x67c   : > { %6390 = vmatprep.subr.bf16.mxu0 %v9115_v50 }
 0x67f   : > { %6391 = vmatpush1.bf16.msra.mxu0 %v9113_v2 }
 0x680   : > { %6392 = vmatprep.subr.bf16.mxu0 %v9118_v58 }
 0x683   : > { %6393 = vmatpush1.bf16.msra.mxu0 %v9116_v53 }
 0x684   : > { %6394 = vmatprep.subr.bf16.mxu0 %v9121_v31 }
 0x687   : > { %6395 = vmatpush1.bf16.msra.mxu0 %v9119_v39 }
 0x688   : > { %6396 = vmatprep.subr.bf16.mxu0 %v9124_v11 }
 0x68b   : > { %6397 = vmatpush1.bf16.msra.mxu0 %v9122_v26 }
 0x68c   : > { %6398 = vmatprep.subr.bf16.mxu0 %v9127_v60 }
 0x68f   : > { %6399 = vmatpush1.bf16.msra.mxu0 %v9125_v23 }
 0x692   : > { %6401 = vmatmul.mubr.bf16.vlgmr.msra.gmra.mrb[16].mxu0 %v4987_v17  ;;  %v9142_v17 = vld [vmem:[%s12719_s9 + $0x78] sm:$0xff]  }
 0x693   : > { %8011 = vmatprep.subr.bf16.mxu1 %v9142_v17  ;;  %v9154_v17 = vld [vmem:[%s12719_s9 + $0xe8] sm:$0xff]  }
 0x694   : > { %8012 = vmatpush3.bf16.msra.mxu1 %v9143_v35  ;;  %v9155_v35 = vld [vmem:[%s12719_s9 + $0xa8] sm:$0xff]  }
 0x695   : > { %8019 = vmatprep.subr.bf16.mxu1 %v9144_v15  ;;  %v9156_v15 = vld [vmem:[%s12719_s9 + $0xf0] sm:$0xff]  }
 0x765   : > { %v6402_v37 = vpop.f32.mrb[16].mxu0 }
 0x766   : > { %v8132_v29 = vadd.f32 %v6402_v37, %v5186_v34  ;;  %v6404_v41 = vpop.f32.mrb[17].mxu0  ;;  %v9162_v37 = vld [vmem:[%s12719_s9 + $0x148] sm:$0xff]  }
 0x767   : > { %v8133_v32 = vadd.f32 %v6404_v41, %v5190_v48  ;;  %v6406_v6 = vpop.f32.mrb[18].mxu0  ;;  %v9164_v41 = vld [vmem:[%s12719_s9 + $0x150] sm:$0xff]  }
 0x768   : > { %v6411_v10 = vmul.f32 0.1, %v8132_v29  ;;  %v8134_v44 = vadd.f32 %v6406_v6, %v5186_v34  ;;  %v6408_v43 = vpop.f32.mrb[19].mxu0  ;;  %v9159_v34 = vld [vmem:[%s12719_s9 + $0xb8] sm:$0xff]  }
 0x769   : > { %v6412_v51 = vmul.f32 0.1, %v8133_v32  ;;  %v8135_v24 = vadd.f32 %v6408_v43, %v5190_v48  ;;  %v9161_v48 = vld [vmem:[%s12719_s9 + $0x100] sm:$0xff]   ;;  %v9166_v6 = vld [vmem:[%s12719_s9 + $0x158] sm:$0xff]  }
 0x76a   : > { %v12511_v38 = vmax.f32 %v8132_v29, %v6411_v10  ;;  %v6413_v7 = vmul.f32 0.1, %v8134_v44  ;;  %v9163_v29 = vld [vmem:[%s12719_s9 + $0x108] sm:$0xff]   ;;  %v9167_v10 = vld [vmem:[%s12719_s9 + $0x118] sm:$0xff]   ;;  %v9169_v43 = vld [vmem:[%s12719_s9 + $0x120] sm:$0xff]  }
 0x76b   : > { %v6416_v52 = vmax.f32 %v8133_v32, %v6412_v51  ;;  %v6414_v9 = vmul.f32 0.1, %v8135_v24  ;;  %v9165_v32 = vld [vmem:[%s12719_s9 + $0x110] sm:$0xff]   ;;  %v9170_v51 = vld [vmem:[%s12719_s9 + $0x168] sm:$0xff]  }
 0x76c   : > { %v12513_v22 = vmax.f32 %v8134_v44, %v6413_v7  ;;  %v6419_v46 = vrot.slane %v12511_v38, 7  ;;  %v6431_v12 = vrot.slane %v12511_v38, 1  ;;  %v9168_v44 = vld [vmem:[%s12719_s9 + $0x160] sm:$0xff]   ;;  %v9173_v7 = vld [vmem:[%s12719_s9 + $0x130] sm:$0xff]  }
 0x76d   : > { %v6418_v54 = vmax.f32 %v8135_v24, %v6414_v9  ;;  %v6420_v61 = vrot.slane %v6416_v52, 7  ;;  %v6432_v20 = vrot.slane %v6416_v52, 1  ;;  %v9171_v24 = vld [vmem:[%s12719_s9 + $0x128] sm:$0xff]   ;;  %v9175_v9 = vld [vmem:[%s12719_s9 + $0x138] sm:$0xff]  }
 0x76e   : > { %v6421_v63 = vrot.slane %v12513_v22, 7  ;;  %v6433_v47 = vrot.slane %v12513_v22, 1  ;;  %v6445_v18 = vpack.c.bf16 %v12513_v22, %v12511_v38  ;;  %v9172_v38 = vld [vmem:[%s12719_s9 + $0x170] sm:$0xff]   ;;  %v9176_v22 = vld [vmem:[%s12721_s11] sm:$0xff]  }
 0x76f   : > { %v6422_v55 = vrot.slane %v6418_v54, 7  ;;  %v6434_v42 = vrot.slane %v6418_v54, 1  ;;  %v6446_v62 = vpack.c.bf16 %v6418_v54, %v6416_v52  ;;  %v9174_v52 = vld [vmem:[%s12719_s9 + $0x178] sm:$0xff]  }
 0x770   : > { %v6423_v28 = vsel %vm589_vm2, %v6419_v46, %v6421_v63  ;;  %v6425_v36 = vsel %vm589_vm2, %v6421_v63, %v6419_v46  ;;  %v6435_v0 = vsel %vm614_vm3, %v6431_v12, %v6433_v47  ;;  %v6437_v59 = vsel %vm614_vm3, %v6433_v47, %v6431_v12  ;;  %v9177_v46 = vld [vmem:[%s12721_s11 + $0x8] sm:$0xff]   ;;  %v9178_v12 = vld [vmem:[%s12721_s11 + $0x10] sm:$0xff]   ;;  %v9179_v54 = vld [vmem:[%s12721_s11 + $0x18] sm:$0xff]  }
 0x771   : > { %v6427_v57 = vmul.f32 %v11717_v14, %v6425_v36  ;;  %v6429_v30 = vmul.f32 %v11721_v1, %v6423_v28  ;;  %v6424_v19 = vsel %vm589_vm2, %v6420_v61, %v6422_v55  ;;  %v6426_v3 = vsel %vm589_vm2, %v6422_v55, %v6420_v61  ;;  %v9180_v61 = vld [vmem:[%s12721_s11 + $0x20] sm:$0xff]   ;;  %v9181_v63 = vld [vmem:[%s12721_s11 + $0x28] sm:$0xff]   ;;  %v9182_v47 = vld [vmem:[%s12721_s11 + $0x30] sm:$0xff]  }
 0x772   : > { %v6428_v50 = vmul.f32 %v11717_v14, %v6426_v3  ;;  %v6430_v2 = vmul.f32 %v11721_v1, %v6424_v19  ;;  %v6436_v58 = vsel %vm614_vm3, %v6432_v20, %v6434_v42  ;;  %v6438_v53 = vsel %vm614_vm3, %v6434_v42, %v6432_v20  ;;  %v9145_v14 = vld [vmem:[%s12719_s9 + $0x80] sm:$0xff]  }
 0x773   : > { %v6443_v31 = vpack.c.bf16 %v6429_v30, %v6427_v57  ;;  %v6440_v39 = vmul.f32 %v11906_v16, %v6436_v58  ;;  %v6442_v11 = vmul.f32 %v11909_v45, %v6438_v53  ;;  %v12544_v26 = vmul.f32 %v11906_v16, %v6435_v0  ;;  %v9147_v16 = vld [vmem:[%s12719_s9 + $0x88] sm:$0xff]   ;;  %v7936_v0 = vld [vmem:[%s12720_s10] ss:$0 sm:$0xff] }
 0x774   : > { %v6444_v60 = vpack.c.bf16 %v6430_v2, %v6428_v50  ;;  %v12550_v1 = vmul.f32 %v11909_v45, %v6437_v59  ;;  %v9148_v45 = vld [vmem:[%s12719_s9 + $0xd0] sm:$0xff]   ;;  %vm9322_vm2 = vmmov 0  }
 0x775   : > { %v6448_v23 = vpack.c.bf16 %v6442_v11, %v6440_v39 }
 0x776   : > { %6872 = vmatprep.mubr.bf16.mxu1 %v6444_v60  ;;  %v6447_v27 = vpack.c.bf16 %v12550_v1, %v12544_v26 }
 0x777   : > { %6873 = vmatmul.mubr.bf16.vlgmr.msra.gmra.mrb[24].mxu1 %v6443_v31 }
 0x778   : > { %8020 = vmatpush3.bf16.msra.mxu1 %v9145_v14  ;;  %6913 = vmatprep.mubr.bf16.mxu1 %v6446_v62 }
 0x779   : > { %8021 = vmatprep.subr.bf16.mxu1 %v9146_v8 }
 0x77c   : > { %8022 = vmatpush3.bf16.msra.mxu1 %v9147_v16 }
 0x77d   : > { %8023 = vmatprep.subr.bf16.mxu1 %v9148_v45 }
 0x780   : > { %8024 = vmatpush3.bf16.msra.mxu1 %v9149_v56  ;;  %v12800_v56 = vld [vmem:[#allocation15_spill] sm:$0xff] }
 0x781   : > { %8025 = vmatprep.subr.bf16.mxu1 %v9150_v33 }
 0x784   : > { %8026 = vmatpush3.bf16.msra.mxu1 %v9151_v25 }
 0x785   : > { %8027 = vmatprep.subr.bf16.mxu1 %v9152_v21 }
 0x788   : > { %8028 = vmatpush3.bf16.msra.mxu1 %v9153_v5 }
 0x789   : > { %8029 = vmatprep.subr.bf16.mxu1 %v9154_v17 }
 0x78c   : > { %8030 = vmatpush3.bf16.msra.mxu1 %v9155_v35 }
 0x78d   : > { %8031 = vmatprep.subr.bf16.mxu1 %v9156_v15 }
 0x790   : > { %8032 = vmatpush3.bf16.msra.mxu1 %v9157_v4 }
 0x791   : > { %8033 = vmatprep.subr.bf16.mxu1 %v9158_v13 }
 0x794   : > { %8034 = vmatpush3.bf16.msra.mxu1 %v9159_v34 }
 0x795   : > { %8041 = vmatprep.subr.bf16.mxu1 %v9160_v40 }
 0x797   : > { %6914 = vmatmul.mubr.bf16.vlgmr.msra.gmra.mrb[28].mxu1 %v6445_v18  ;;  %v9183_v18 = vld [vmem:[%s12721_s11 + $0x38] sm:$0xff]  }
 0x798   : > { %8042 = vmatpush3.bf16.msra.mxu1 %v9161_v48  ;;  %6954 = vmatprep.mubr.bf16.mxu1 %v6448_v23 }
 0x799   : > { %8043 = vmatprep.subr.bf16.mxu1 %v9162_v37 }
 0x79c   : > { %8044 = vmatpush3.bf16.msra.mxu1 %v9163_v29 }
 0x79d   : > { %8045 = vmatprep.subr.bf16.mxu1 %v9164_v41 }
 0x7a0   : > { %8046 = vmatpush3.bf16.msra.mxu1 %v9165_v32 }
 0x7a1   : > { %8047 = vmatprep.subr.bf16.mxu1 %v9166_v6 }
 0x7a4   : > { %8048 = vmatpush3.bf16.msra.mxu1 %v9167_v10 }
 0x7a5   : > { %8049 = vmatprep.subr.bf16.mxu1 %v9168_v44 }
 0x7a8   : > { %8050 = vmatpush3.bf16.msra.mxu1 %v9169_v43 }
 0x7a9   : > { %8051 = vmatprep.subr.bf16.mxu1 %v9170_v51 }
 0x7ac   : > { %8052 = vmatpush3.bf16.msra.mxu1 %v9171_v24 }
 0x7ad   : > { %8053 = vmatprep.subr.bf16.mxu1 %v9172_v38 }
 0x7b0   : > { %8054 = vmatpush3.bf16.msra.mxu1 %v9173_v7 }
 0x7b1   : > { %8055 = vmatprep.subr.bf16.mxu1 %v9174_v52 }
 0x7b4   : > { %8056 = vmatpush3.bf16.msra.mxu1 %v9175_v9 }
 0x7b5   : > { %8072 = vmatprep.subr.bf16.mxu1 %v12778_v49 }
 0x7b7   : > { %6955 = vmatmul.mubr.bf16.vlgmr.msra.gmra.mrb[32].mxu1 %v6447_v27 }
 0x7b8   : > { %8088 = vmatprep.mubr.msk.bf16.mxu1 %vm9322_vm2, %v12778_v49  ;;  %8073 = vmatpush3.bf16.msra.mxu1 %v9176_v22 }
 0x7b9   : > { %8074 = vmatprep.subr.bf16.mxu1 %v12778_v49 }
 0x7bc   : > { %8075 = vmatpush3.bf16.msra.mxu1 %v9177_v46 }
 0x7bd   : > { %8076 = vmatprep.subr.bf16.mxu1 %v12778_v49 }
 0x7c0   : > { %8077 = vmatpush3.bf16.msra.mxu1 %v9178_v12 }
 0x7c1   : > { %8078 = vmatprep.subr.bf16.mxu1 %v12778_v49 }
 0x7c4   : > { %8079 = vmatpush3.bf16.msra.mxu1 %v9179_v54 }
 0x7c5   : > { %8080 = vmatprep.subr.bf16.mxu1 %v12778_v49 }
 0x7c8   : > { %8081 = vmatpush3.bf16.msra.mxu1 %v9180_v61 }
 0x7c9   : > { %8082 = vmatprep.subr.bf16.mxu1 %v12778_v49 }
 0x7cc   : > { %8083 = vmatpush3.bf16.msra.mxu1 %v9181_v63 }
 0x7cd   : > { %8084 = vmatprep.subr.bf16.mxu1 %v12778_v49 }
 0x7d0   : > { %8085 = vmatpush3.bf16.msra.mxu1 %v9182_v47 }
 0x7d1   : > { %8086 = vmatprep.subr.bf16.mxu1 %v12778_v49 }
 0x7d4   : > { %8087 = vmatpush3.bf16.msra.mxu1 %v9183_v18 }
 0x84a   : > { %v8013_v20 = vpop.f32.mrb[24].mxu1 }
 0x84b   : > { %v8014_v55 = vpop.f32.mrb[25].mxu1 }
 0x84c   : > { %v8015_v42 = vadd.f32 %v8014_v55, %v8013_v20  ;;  %v8016_v62 = vpop.f32.mrb[26].mxu1 }
 0x84d   : > { %v8017_v28 = vpop.f32.mrb[27].mxu1 }
 0x84e   : > { %v8018_v36 = vadd.f32 %v8017_v28, %v8016_v62  ;;  %v6875_v30 = vadd.f32 %v8015_v42, %v7936_v0 }
 0x850   : > { %v6878_v2 = vadd.f32 %v8018_v36, %v7936_v0 }
 0x86a   : > { %v8035_v59 = vpop.f32.mrb[28].mxu1 }
 0x86b   : > { %v8036_v57 = vpop.f32.mrb[29].mxu1 }
 0x86c   : > { %v8037_v19 = vadd.f32 %v8036_v57, %v8035_v59  ;;  %v8038_v3 = vpop.f32.mrb[30].mxu1 }
 0x86d   : > { %v8039_v50 = vpop.f32.mrb[31].mxu1 }
 0x86e   : > { %v6916_v58 = vadd.f32 %v8037_v19, %v6875_v30  ;;  %v8040_v49 = vadd.f32 %v8039_v50, %v8038_v3 }
 0x870   : > { %v6919_v53 = vadd.f32 %v8040_v49, %v6878_v2 }
 0x88a   : > { %v8057_v31 = vpop.f32.mrb[32].mxu1 }
 0x88b   : > { %v8058_v39 = vpop.f32.mrb[33].mxu1 }
 0x88c   : > { %v8059_v11 = vadd.f32 %v8058_v39, %v8057_v31  ;;  %v8060_v26 = vpop.f32.mrb[34].mxu1 }
 0x88d   : > { %v8061_v60 = vpop.f32.mrb[35].mxu1 }
 0x88e   : > { %v6957_v14 = vadd.f32 %v8059_v11, %v6916_v58  ;;  %v8062_v1 = vadd.f32 %v8061_v60, %v8060_v26 }
 0x890   : > { %v6963_v8 = vmul.f32 0.1, %v6957_v14  ;;  %v6960_v23 = vadd.f32 %v8062_v1, %v6919_v53 }
 0x892   : > { %v6965_v27 = vmax.f32 %v6957_v14, %v6963_v8  ;;  %v6964_v16 = vmul.f32 0.1, %v6960_v23 }
 0x894   : > { %v6969_v45 = vcombine.high %v6965_v27, %v6965_v27  ;;  %v6976_v33 = vrot.slane %v6965_v27, %v12800_v56  ;;  %v6966_v25 = vmax.f32 %v6960_v23, %v6964_v16 }
 0x896   : > { %v6983_v21 = vrot.slane %v6969_v45, %v12800_v56  ;;  %v6984_v5 = vcombine.high %v6976_v33, %v6976_v33  ;;  %v7011_v17 = vsel %vm4309_vm10, %v6976_v33, 0.0  ;;  %v6986_v35 = vcombine.high %v6966_v25, %v6966_v25 }
 0x897   : > { %v7012_v15 = vrot.slane %v7011_v17, 4  ;;  %v6993_v4 = vrot.slane %v6966_v25, %v12800_v56 }
 0x898   : > { %v6985_v13 = vcombine.high %v6983_v21, %v6983_v21  ;;  %v7018_v34 = vsel %vm4309_vm10, %v6984_v5, 0.0  ;;  %v7025_v40 = vsel %vm4309_vm10, %v6983_v21, 0.0  ;;  %v7000_v48 = vrot.slane %v6986_v35, %v12800_v56 }
 0x899   : > { %v7013_v37 = vadd.f32 %v7012_v15, %v7011_v17  ;;  %v7019_v29 = vrot.slane %v7018_v34, 4  ;;  %v7026_v41 = vrot.slane %v7025_v40, 4  ;;  %v7001_v32 = vcombine.high %v6993_v4, %v6993_v4 }
 0x89a   : > { %v7032_v6 = vsel %vm4309_vm10, %v6985_v13, 0.0  ;;  %v7002_v10 = vcombine.high %v7000_v48, %v7000_v48  ;;  %v7039_v44 = vsel %vm4309_vm10, %v6993_v4, 0.0  ;;  %v7053_v43 = vsel %vm4309_vm10, %v7000_v48, 0.0 }
 0x89b   : > { %v7014_v51 = vrot.slane %v7013_v37, 2  ;;  %v7020_v24 = vadd.f32 %v7019_v29, %v7018_v34  ;;  %v7027_v38 = vadd.f32 %v7026_v41, %v7025_v40  ;;  %v7033_v7 = vrot.slane %v7032_v6, 4 }
 0x89c   : > { %v7040_v52 = vrot.slane %v7039_v44, 4  ;;  %v7046_v9 = vsel %vm4309_vm10, %v7001_v32, 0.0  ;;  %v7054_v22 = vrot.slane %v7053_v43, 4  ;;  %v7060_v46 = vsel %vm4309_vm10, %v7002_v10, 0.0 }
 0x89d   : > { %v7015_v12 = vadd.f32 %v7014_v51, %v7013_v37  ;;  %v7021_v54 = vrot.slane %v7020_v24, 2  ;;  %v7028_v61 = vrot.slane %v7027_v38, 2  ;;  %v7034_v63 = vadd.f32 %v7033_v7, %v7032_v6 }
 0x89e   : > { %v7041_v47 = vadd.f32 %v7040_v52, %v7039_v44  ;;  %v7047_v18 = vrot.slane %v7046_v9, 4  ;;  %v7055_v20 = vadd.f32 %v7054_v22, %v7053_v43  ;;  %v7061_v55 = vrot.slane %v7060_v46, 4 }
 0x89f   : > { %v7016_v42 = vrot.slane %v7015_v12, 1  ;;  %v7022_v62 = vadd.f32 %v7021_v54, %v7020_v24  ;;  %v7029_v28 = vadd.f32 %v7028_v61, %v7027_v38  ;;  %v7035_v36 = vrot.slane %v7034_v63, 2 }
 0x8a0   : > { %v7042_v0 = vrot.slane %v7041_v47, 2  ;;  %v7048_v59 = vadd.f32 %v7047_v18, %v7046_v9  ;;  %v7056_v57 = vrot.slane %v7055_v20, 2  ;;  %v7062_v30 = vadd.f32 %v7061_v55, %v7060_v46 }
 0x8a1   : > { %v7017_v19 = vadd.f32 %v7016_v42, %v7015_v12  ;;  %v7023_v3 = vrot.slane %v7022_v62, 1  ;;  %v7030_v50 = vrot.slane %v7029_v28, 1  ;;  %v7036_v2 = vadd.f32 %v7035_v36, %v7034_v63 }
 0x8a2   : > { %v7043_v58 = vadd.f32 %v7042_v0, %v7041_v47  ;;  %v7049_v49 = vrot.slane %v7048_v59, 2  ;;  %v7057_v53 = vadd.f32 %v7056_v57, %v7055_v20  ;;  %v7063_v31 = vrot.slane %v7062_v30, 2  ;;  %v7985_v20 = vld [vmem:[#allocation7] ss:$0 sm:$0xff] }
 0x8a3   : > { %v7024_v39 = vadd.f32 %v7023_v3, %v7022_v62  ;;  %v7031_v11 = vadd.f32 %v7030_v50, %v7029_v28  ;;  %v7037_v26 = vrot.slane %v7036_v2, 1  ;;  %v7068_v60 = vmul.f32 0.5, %v7017_v19 }
 0x8a4   : > { %v7044_v14 = vrot.slane %v7043_v58, 1  ;;  %v7050_v1 = vadd.f32 %v7049_v49, %v7048_v59  ;;  %v7058_v8 = vrot.slane %v7057_v53, 1  ;;  %v7064_v23 = vadd.f32 %v7063_v31, %v7062_v30 }
 0x8a5   : > { %v7038_v27 = vadd.f32 %v7037_v26, %v7036_v2  ;;  %v7069_v16 = vmul.f32 0.5, %v7024_v39  ;;  %v7070_v45 = vmul.f32 0.5, %v7031_v11  ;;  %v7076_v56 = vpack.c.bf16 %v7068_v60, %v7068_v60 }
 0x8a6   : > { %v7045_v33 = vadd.f32 %v7044_v14, %v7043_v58  ;;  %v7051_v25 = vrot.slane %v7050_v1, 1  ;;  %v7059_v21 = vadd.f32 %v7058_v8, %v7057_v53  ;;  %v7065_v5 = vrot.slane %v7064_v23, 1 }
 0x8a7   : > { %v7071_v17 = vmul.f32 0.5, %v7038_v27  ;;  %v7077_v35 = vpack.c.bf16 %v7069_v16, %v7069_v16  ;;  %v7078_v15 = vpack.c.bf16 %v7070_v45, %v7070_v45  ;;  %v7115_v37 = vunpack.c.l.b16 %v7076_v56 }
 0x8a8   : > { %v7052_v4 = vadd.f32 %v7051_v25, %v7050_v1  ;;  %v7072_v13 = vmul.f32 0.5, %v7045_v33  ;;  %v7066_v34 = vadd.f32 %v7065_v5, %v7064_v23  ;;  %v7074_v40 = vmul.f32 0.5, %v7059_v21 }
 0x8a9   : > { %v7079_v48 = vpack.c.bf16 %v7071_v17, %v7071_v17  ;;  %v7116_v29 = vunpack.c.l.b16 %v7077_v35  ;;  %v7117_v41 = vunpack.c.l.b16 %v7078_v15 }
 0x8aa   : > { %v7073_v32 = vmul.f32 0.5, %v7052_v4  ;;  %v7080_v6 = vpack.c.bf16 %v7072_v13, %v7072_v13  ;;  %v7075_v10 = vmul.f32 0.5, %v7066_v34  ;;  %v7082_v51 = vpack.c.bf16 %v7074_v40, %v7074_v40 }
 0x8ab   : > { %v7118_v44 = vunpack.c.l.b16 %v7079_v48  ;;  %v7123_v43 = vsel %vm4858_vm11, %v7116_v29, %v7115_v37 }
 0x8ac   : > { %v7081_v24 = vpack.c.bf16 %v7073_v32, %v7073_v32  ;;  %v7083_v38 = vpack.c.bf16 %v7075_v10, %v7075_v10  ;;  %v7119_v7 = vunpack.c.l.b16 %v7080_v6  ;;  %v7124_v52 = vsel %vm4860_vm12, %v7117_v41, %v7123_v43 }
 0x8ad   : > { %v7125_v22 = vsel %vm4862_vm13, %v7118_v44, %v7124_v52  ;;  %v7121_v46 = vunpack.c.l.b16 %v7082_v51 }
 0x8ae   : > { %v7120_v9 = vunpack.c.l.b16 %v7081_v24  ;;  %v7126_v12 = vsel %vm4864_vm14, %v7119_v7, %v7125_v22  ;;  %v7122_v54 = vunpack.c.l.b16 %v7083_v38 }
 0x8b0   : > { %v7127_v61 = vsel %vm4866_vm0, %v7120_v9, %v7126_v12 }
 0x8b1   : > { %v7128_v63 = vsel %vm4868_vm4, %v7121_v46, %v7127_v61 }
 0x8b2   : > { %v7129_v47 = vsel %vm4870_vm5, %v7122_v54, %v7128_v63 }
 0x8b3   : > { %v7130_v18 = vpack.c.b16 %v7129_v47, %v7129_v47 }
 0x8b5   : > { %8089 = vmatmul.mubr.bf16.vlgmr.msra.gmra.mrb[36].mxu1 %v7130_v18 }
 0x988   : > { %v7214_v55 = vpop.f32.mrb[36].mxu1 }
 0x989   : > { %v7215_v42 = vadd.f32 %v7985_v20, %v7214_v55  ;;  %v8090_v62 = vpop.f32.mrb[37].mxu1 }
 0x98a   : > { %v7217_v28 = vpop.f32.mrb[38].mxu1 }
 0x98b   : > { %7220 = vst [vmem:[%s494_s17] sm:$0xff] %v7215_v42  ;;  %v8091_v36 = vpop.f32.mrb[39].mxu1 }
 0x98c PF: > { %s12801_s19 = sld [smem:[#allocation12_spill]] }
 0x992   : > { %s26_s25 = sadd.s32 1, %s12801_s19  }
 0x993   : > { %p23_p12 = scmp.ge.s32.totalorder %s26_s25, 4  }
 0x995   :  { %25 = sbr.rel (!%p23_p12) target bundleno = 3 (0x3), region = 119 }
 0x99c   :  { %7240 = vsyncpa [#allocation3], 1 }
 0x99d   :  { %7242 = vsyncpa [#allocation3 + $0x1], 1 }
 0x99e   :  { %7243 = vsyncpa [#allocation5], 1 }
 0x99f   :  { %7244 = vsyncpa [#allocation8], 1 }

</bundles_post_ra>
